<compile_context>
chip_gen: v5e
topology: v5e:2x2
jax: 0.10.0
libtpu: 0.0.40
codegen_flags: <defaults>
</compile_context>

<pallas_src>
import functools

import jax
import jax.numpy as jnp
from jax.experimental import pallas as pl
from jax.experimental.pallas import tpu as pltpu


HIDDEN = 256
SUB = 128            # rows per interleaved sub-tile (<= 32 f32 vregs live each)
PAIR = 2 * SUB       # rows processed per pair of interleaved streams


def _mlp_kernel(x_ref, w1_ref, b1_ref, wh_ref, bh_ref, w8_ref, b8_ref, o_ref):
    """Fully fused 8-layer MLP: activations never leave VMEM.

    x_ref : (block_b, n_inputs) f32   (cast to bf16 per sub-tile in-kernel)
    w1_ref: (n_inputs, 256) bf16      b1_ref: (1, 256) f32
    wh_ref: (6, 256, 256)  bf16       bh_ref: (6, 1, 256) f32   (layers 2..7)
    w8_ref: (1, 256) f32              b8_ref: (1,) f32 in SMEM  (layer 8)
    o_ref : (block_b, 1) f32
    """
    block_b = x_ref.shape[0]
    n_pairs = block_b // PAIR

    def dense_relu(h_bf16, w, b):
        # MXU matmul with f32 accumulation; bias + ReLU on the f32 accumulator.
        y = jnp.dot(h_bf16, w, preferred_element_type=jnp.float32)
        return jnp.maximum(y + b, 0.0)                      # f32

    def pair_body(p, carry):
        # Two independent 128-row streams: the scheduler can overlap one
        # stream's matmul with the other's VPU epilogue.
        r0 = pl.multiple_of(p * PAIR, PAIR)
        r1 = pl.multiple_of(p * PAIR + SUB, SUB)
        xa = x_ref[pl.ds(r0, SUB), :].astype(jnp.bfloat16)
        xb = x_ref[pl.ds(r1, SUB), :].astype(jnp.bfloat16)

        # Layer 1 (n_inputs -> 256).
        ha = dense_relu(xa, w1_ref[...], b1_ref[...])
        hb = dense_relu(xb, w1_ref[...], b1_ref[...])

        # Layers 2..7 (256 -> 256), statically unrolled; cast the f32
        # activation back to bf16 only for the next MXU pass.
        for j in range(6):
            w = wh_ref[j]
            b = bh_ref[j]
            ha = dense_relu(ha.astype(jnp.bfloat16), w, b)
            hb = dense_relu(hb.astype(jnp.bfloat16), w, b)

        # Layer 8 (256 -> 1): VPU multiply + lane reduction (avoids an N=1
        # MXU matmul that would waste 255/256 of the columns).  Done in f32.
        w8 = w8_ref[...]
        b8 = b8_ref[0]
        ya = jnp.sum(ha * w8, axis=-1, keepdims=True) + b8
        yb = jnp.sum(hb * w8, axis=-1, keepdims=True) + b8
        o_ref[pl.ds(r0, SUB), :] = jax.nn.sigmoid(ya).astype(o_ref.dtype)
        o_ref[pl.ds(r1, SUB), :] = jax.nn.sigmoid(yb).astype(o_ref.dtype)
        return carry

    jax.lax.fori_loop(0, n_pairs, pair_body, 0)


def _round_up(v, m):
    return ((v + m - 1) // m) * m


def _pick_block(B, target_block_b):
    """Adaptive batch tile: bounded padding for small B, even grid >= 2 for v7x."""
    b_r = _round_up(B, PAIR)
    if b_r <= PAIR:
        return PAIR                      # tiny batch: single minimal tile
    target = max(PAIR, _round_up(target_block_b, PAIR))
    half = _round_up((b_r + 1) // 2, PAIR)   # never let the grid collapse to (1,)
    return min(target, half)


@functools.partial(jax.jit, static_argnames=("target_block_b",))
def distilled_mlp_forward(x, params, target_block_b=1024):
    """x: (B, n_inputs) f32.  params: list of 8 (W_(in,out) f32, b_(1,out) f32)."""
    B, n_inputs = x.shape

    block_b = _pick_block(B, target_block_b)
    assert block_b % PAIR == 0
    B_pad = _round_up(B, block_b)
    grid = (B_pad // block_b,)

    # Pad only if needed; padded rows are computed and sliced off afterwards.
    x_p = x if B_pad == B else jnp.pad(x, ((0, B_pad - B), (0, 0)))

    # Kernel operands: bf16 weights for the MXU, f32 biases, scalar b8 -> SMEM.
    w1, b1 = params[0]
    w1 = w1.astype(jnp.bfloat16)                                        # (n_in, 256)
    wh = jnp.stack([w.astype(jnp.bfloat16) for (w, _) in params[1:7]])  # (6,256,256)
    bh = jnp.stack([b for (_, b) in params[1:7]])                       # (6, 1, 256)
    w8, b8 = params[7]
    w8_row = w8.reshape(1, HIDDEN).astype(jnp.float32)                  # (1, 256)
    b8_flat = b8.reshape((1,)).astype(jnp.float32)                      # (1,) scalar

    out = pl.pallas_call(
        _mlp_kernel,
        out_shape=jax.ShapeDtypeStruct((B_pad, 1), jnp.float32),
        grid_spec=pltpu.PrefetchScalarGridSpec(
            num_scalar_prefetch=0,
            grid=grid,
            in_specs=[
                pl.BlockSpec((block_b, n_inputs), lambda i: (i, 0)),
                # Weights/biases: full-extent blocks with constant index_maps
                # -> fetched once and resident in VMEM across the batch grid.
                pl.BlockSpec(w1.shape, lambda i: (0, 0)),
                pl.BlockSpec(b1.shape, lambda i: (0, 0)),
                pl.BlockSpec(wh.shape, lambda i: (0, 0, 0)),
                pl.BlockSpec(bh.shape, lambda i: (0, 0, 0)),
                pl.BlockSpec(w8_row.shape, lambda i: (0, 0)),
                # Final-layer scalar bias lives in SMEM (no lane-padded tile).
                pl.BlockSpec(memory_space=pltpu.MemorySpace.SMEM),
            ],
            out_specs=pl.BlockSpec((block_b, 1), lambda i: (i, 0)),
        ),
        compiler_params=pltpu.CompilerParams(
            dimension_semantics=("parallel",),
            vmem_limit_bytes=32 * 1024 * 1024,
        ),
    )(x_p, w1, b1, wh, bh, w8_row, b8_flat)

    return out[:B]


def init_params(key, n_inputs):
    """Deterministic init matching PyTorch Linear shapes (stored as (in, out))."""
    dims = [(n_inputs, HIDDEN)] + [(HIDDEN, HIDDEN)] * 6 + [(HIDDEN, 1)]
    params = []
    for (d_in, d_out) in dims:
        key, kw, kb = jax.random.split(key, 3)
        bound = 1.0 / jnp.sqrt(d_in)
        w = jax.random.uniform(kw, (d_in, d_out), jnp.float32, -bound, bound)
        b = jax.random.uniform(kb, (1, d_out), jnp.float32, -bound, bound)
        params.append((w, b))
    return params


def reference_forward(x, params):
    """Pure f32 reference (module semantics)."""
    h = x
    for i, (w, b) in enumerate(params):
        h = h @ w + b
        if i < len(params) - 1:
            h = jnp.maximum(h, 0.0)
    return jax.nn.sigmoid(h)


def reference_forward_bf16(x, params):
    """Reference mimicking the kernel's precision (bf16 MXU inputs, f32 accum)."""
    h = x.astype(jnp.bfloat16)
    a = None
    for (w, b) in params[:-1]:
        a = jnp.dot(h, w.astype(jnp.bfloat16),
                    preferred_element_type=jnp.float32) + b
        a = jnp.maximum(a, 0.0)
        h = a.astype(jnp.bfloat16)
    w8, b8 = params[-1]
    y = jnp.sum(a * w8.reshape(1, -1), axis=-1, keepdims=True) + b8
    return jax.nn.sigmoid(y)


# TODO(synk): integrated_positional_encoding is defined on the module but not
# used in forward(); it is intentionally not implemented in the kernel.


if __name__ == "__main__":
    key = jax.random.PRNGKey(0)
    key, kx = jax.random.split(key)

    # batch=512: the adaptive tile picks block_b=256 -> grid=(2,), an even
    # 'parallel' grid that keeps both v7x TensorCores busy.
    batch, n_inputs = 512, 32
    x = jax.random.normal(kx, (batch, n_inputs), jnp.float32)
    params = init_params(key, n_inputs)

    out = jax.block_until_ready(distilled_mlp_forward(x, params))

    ref_bf16 = reference_forward_bf16(x, params)
    ref_f32 = reference_forward(x, params)

    assert out.shape == (batch, 1)
    assert jnp.allclose(out, ref_bf16, atol=5e-3, rtol=5e-3), "mismatch vs bf16 reference"
    assert jnp.allclose(out, ref_f32, atol=5e-2, rtol=0.0), "mismatch vs f32 reference"

    print("KERNEL_OK")
</pallas_src>

<mosaic_0001>
module attributes {stable_mosaic.version = 11 : i64} {
  func.func @_mlp_kernel(%arg0: i32, %arg1: memref<256x32xf32, #tpu.memory_space<vmem>>, %arg2: memref<32x256xbf16, #tpu.memory_space<vmem>>, %arg3: memref<1x256xf32, #tpu.memory_space<vmem>>, %arg4: memref<6x256x256xbf16, #tpu.memory_space<vmem>>, %arg5: memref<6x1x256xf32, #tpu.memory_space<vmem>>, %arg6: memref<1x256xf32, #tpu.memory_space<vmem>>, %arg7: memref<1xf32, #tpu.memory_space<smem>>, %arg8: memref<256x1xf32, #tpu.memory_space<vmem>>) attributes {dimension_semantics = [#tpu.dimension_semantics<parallel>], iteration_bounds = array<i64: 2>, scalar_prefetch = 0 : i64, scratch_operands = 0 : i64, tpu.core_type = #tpu.core_type<tc>, window_params = [{transform_indices = @transform_0, window_bounds = array<i64: 256, 32>}, {pipeline_mode = #tpu.pipeline_mode<synchronous>, transform_indices = @transform_1, window_bounds = array<i64: 32, 256>}, {pipeline_mode = #tpu.pipeline_mode<synchronous>, transform_indices = @transform_2, window_bounds = array<i64: 1, 256>}, {pipeline_mode = #tpu.pipeline_mode<synchronous>, transform_indices = @transform_3, window_bounds = array<i64: 6, 256, 256>}, {pipeline_mode = #tpu.pipeline_mode<synchronous>, transform_indices = @transform_4, window_bounds = array<i64: 6, 1, 256>}, {pipeline_mode = #tpu.pipeline_mode<synchronous>, transform_indices = @transform_5, window_bounds = array<i64: 1, 256>}, {transform_indices = @transform_6, window_bounds = array<i64: 1>}, {transform_indices = @transform_7, window_bounds = array<i64: 256, 1>}]} {
    %c0_i32 = arith.constant 0 : i32
    %c256_i32 = arith.constant 256 : i32
    %0 = arith.muli %c0_i32, %c256_i32 : i32
    %1 = tpu.assume_multiple %0, 256 : i32
    %c256_i32_0 = arith.constant 256 : i32
    %2 = arith.muli %c0_i32, %c256_i32_0 : i32
    %c128_i32 = arith.constant 128 : i32
    %3 = arith.addi %2, %c128_i32 : i32
    %4 = tpu.assume_multiple %3, 128 : i32
    %5 = arith.index_cast %1 : i32 to index
    %c0 = arith.constant 0 : index
    %6 = vector.load %arg1[%5, %c0] : memref<256x32xf32, #tpu.memory_space<vmem>>, vector<128x32xf32>
    %7 = arith.truncf %6 : vector<128x32xf32> to vector<128x32xbf16>
    %8 = arith.index_cast %4 : i32 to index
    %c0_1 = arith.constant 0 : index
    %9 = vector.load %arg1[%8, %c0_1] : memref<256x32xf32, #tpu.memory_space<vmem>>, vector<128x32xf32>
    %10 = arith.truncf %9 : vector<128x32xf32> to vector<128x32xbf16>
    %c0_2 = arith.constant 0 : index
    %c0_3 = arith.constant 0 : index
    %11 = vector.load %arg2[%c0_2, %c0_3] : memref<32x256xbf16, #tpu.memory_space<vmem>>, vector<32x256xbf16>
    %c0_4 = arith.constant 0 : index
    %c0_5 = arith.constant 0 : index
    %12 = vector.load %arg3[%c0_4, %c0_5] : memref<1x256xf32, #tpu.memory_space<vmem>>, vector<1x256xf32>
    %cst = arith.constant dense<0.000000e+00> : vector<128x256xf32>
    %13 = tpu.matmul %7, %11, %cst {dimension_numbers = #tpu.dot_dimension_numbers<[1], [0], [0], [1], [0, 0, 1, 1], [], []>} : vector<128x32xbf16>, vector<32x256xbf16>, vector<128x256xf32> -> vector<128x256xf32>
    %14 = vector.broadcast %12 : vector<1x256xf32> to vector<128x256xf32>
    %15 = arith.addf %13, %14 : vector<128x256xf32>
    %cst_6 = arith.constant 0.000000e+00 : f32
    %16 = vector.broadcast %cst_6 : f32 to vector<128x256xf32>
    %17 = arith.maximumf %15, %16 : vector<128x256xf32>
    %c0_7 = arith.constant 0 : index
    %c0_8 = arith.constant 0 : index
    %18 = vector.load %arg2[%c0_7, %c0_8] : memref<32x256xbf16, #tpu.memory_space<vmem>>, vector<32x256xbf16>
    %c0_9 = arith.constant 0 : index
    %c0_10 = arith.constant 0 : index
    %19 = vector.load %arg3[%c0_9, %c0_10] : memref<1x256xf32, #tpu.memory_space<vmem>>, vector<1x256xf32>
    %cst_11 = arith.constant dense<0.000000e+00> : vector<128x256xf32>
    %20 = tpu.matmul %10, %18, %cst_11 {dimension_numbers = #tpu.dot_dimension_numbers<[1], [0], [0], [1], [0, 0, 1, 1], [], []>} : vector<128x32xbf16>, vector<32x256xbf16>, vector<128x256xf32> -> vector<128x256xf32>
    %21 = vector.broadcast %19 : vector<1x256xf32> to vector<128x256xf32>
    %22 = arith.addf %20, %21 : vector<128x256xf32>
    %cst_12 = arith.constant 0.000000e+00 : f32
    %23 = vector.broadcast %cst_12 : f32 to vector<128x256xf32>
    %24 = arith.maximumf %22, %23 : vector<128x256xf32>
    %c0_13 = arith.constant 0 : index
    %c0_14 = arith.constant 0 : index
    %c0_15 = arith.constant 0 : index
    %25 = vector.load %arg4[%c0_13, %c0_14, %c0_15] : memref<6x256x256xbf16, #tpu.memory_space<vmem>>, vector<1x256x256xbf16>
    %26 = vector.shape_cast %25 : vector<1x256x256xbf16> to vector<256x256xbf16>
    %c0_16 = arith.constant 0 : index
    %c0_17 = arith.constant 0 : index
    %c0_18 = arith.constant 0 : index
    %27 = vector.load %arg5[%c0_16, %c0_17, %c0_18] : memref<6x1x256xf32, #tpu.memory_space<vmem>>, vector<1x1x256xf32>
    %28 = vector.shape_cast %27 : vector<1x1x256xf32> to vector<1x256xf32>
    %29 = arith.truncf %17 : vector<128x256xf32> to vector<128x256xbf16>
    %cst_19 = arith.constant dense<0.000000e+00> : vector<128x256xf32>
    %30 = tpu.matmul %29, %26, %cst_19 {dimension_numbers = #tpu.dot_dimension_numbers<[1], [0], [0], [1], [0, 0, 1, 1], [], []>} : vector<128x256xbf16>, vector<256x256xbf16>, vector<128x256xf32> -> vector<128x256xf32>
    %31 = vector.broadcast %28 : vector<1x256xf32> to vector<128x256xf32>
    %32 = arith.addf %30, %31 : vector<128x256xf32>
    %cst_20 = arith.constant 0.000000e+00 : f32
    %33 = vector.broadcast %cst_20 : f32 to vector<128x256xf32>
    %34 = arith.maximumf %32, %33 : vector<128x256xf32>
    %35 = arith.truncf %24 : vector<128x256xf32> to vector<128x256xbf16>
    %cst_21 = arith.constant dense<0.000000e+00> : vector<128x256xf32>
    %36 = tpu.matmul %35, %26, %cst_21 {dimension_numbers = #tpu.dot_dimension_numbers<[1], [0], [0], [1], [0, 0, 1, 1], [], []>} : vector<128x256xbf16>, vector<256x256xbf16>, vector<128x256xf32> -> vector<128x256xf32>
    %37 = vector.broadcast %28 : vector<1x256xf32> to vector<128x256xf32>
    %38 = arith.addf %36, %37 : vector<128x256xf32>
    %cst_22 = arith.constant 0.000000e+00 : f32
    %39 = vector.broadcast %cst_22 : f32 to vector<128x256xf32>
    %40 = arith.maximumf %38, %39 : vector<128x256xf32>
    %c1 = arith.constant 1 : index
    %c0_23 = arith.constant 0 : index
    %c0_24 = arith.constant 0 : index
    %41 = vector.load %arg4[%c1, %c0_23, %c0_24] : memref<6x256x256xbf16, #tpu.memory_space<vmem>>, vector<1x256x256xbf16>
    %42 = vector.shape_cast %41 : vector<1x256x256xbf16> to vector<256x256xbf16>
    %c1_25 = arith.constant 1 : index
    %c0_26 = arith.constant 0 : index
    %c0_27 = arith.constant 0 : index
    %43 = vector.load %arg5[%c1_25, %c0_26, %c0_27] : memref<6x1x256xf32, #tpu.memory_space<vmem>>, vector<1x1x256xf32>
    %44 = vector.shape_cast %43 : vector<1x1x256xf32> to vector<1x256xf32>
    %45 = arith.truncf %34 : vector<128x256xf32> to vector<128x256xbf16>
    %cst_28 = arith.constant dense<0.000000e+00> : vector<128x256xf32>
    %46 = tpu.matmul %45, %42, %cst_28 {dimension_numbers = #tpu.dot_dimension_numbers<[1], [0], [0], [1], [0, 0, 1, 1], [], []>} : vector<128x256xbf16>, vector<256x256xbf16>, vector<128x256xf32> -> vector<128x256xf32>
    %47 = vector.broadcast %44 : vector<1x256xf32> to vector<128x256xf32>
    %48 = arith.addf %46, %47 : vector<128x256xf32>
    %cst_29 = arith.constant 0.000000e+00 : f32
    %49 = vector.broadcast %cst_29 : f32 to vector<128x256xf32>
    %50 = arith.maximumf %48, %49 : vector<128x256xf32>
    %51 = arith.truncf %40 : vector<128x256xf32> to vector<128x256xbf16>
    %cst_30 = arith.constant dense<0.000000e+00> : vector<128x256xf32>
    %52 = tpu.matmul %51, %42, %cst_30 {dimension_numbers = #tpu.dot_dimension_numbers<[1], [0], [0], [1], [0, 0, 1, 1], [], []>} : vector<128x256xbf16>, vector<256x256xbf16>, vector<128x256xf32> -> vector<128x256xf32>
    %53 = vector.broadcast %44 : vector<1x256xf32> to vector<128x256xf32>
    %54 = arith.addf %52, %53 : vector<128x256xf32>
    %cst_31 = arith.constant 0.000000e+00 : f32
    %55 = vector.broadcast %cst_31 : f32 to vector<128x256xf32>
    %56 = arith.maximumf %54, %55 : vector<128x256xf32>
    %c2 = arith.constant 2 : index
    %c0_32 = arith.constant 0 : index
    %c0_33 = arith.constant 0 : index
    %57 = vector.load %arg4[%c2, %c0_32, %c0_33] : memref<6x256x256xbf16, #tpu.memory_space<vmem>>, vector<1x256x256xbf16>
    %58 = vector.shape_cast %57 : vector<1x256x256xbf16> to vector<256x256xbf16>
    %c2_34 = arith.constant 2 : index
    %c0_35 = arith.constant 0 : index
    %c0_36 = arith.constant 0 : index
    %59 = vector.load %arg5[%c2_34, %c0_35, %c0_36] : memref<6x1x256xf32, #tpu.memory_space<vmem>>, vector<1x1x256xf32>
    %60 = vector.shape_cast %59 : vector<1x1x256xf32> to vector<1x256xf32>
    %61 = arith.truncf %50 : vector<128x256xf32> to vector<128x256xbf16>
    %cst_37 = arith.constant dense<0.000000e+00> : vector<128x256xf32>
    %62 = tpu.matmul %61, %58, %cst_37 {dimension_numbers = #tpu.dot_dimension_numbers<[1], [0], [0], [1], [0, 0, 1, 1], [], []>} : vector<128x256xbf16>, vector<256x256xbf16>, vector<128x256xf32> -> vector<128x256xf32>
    %63 = vector.broadcast %60 : vector<1x256xf32> to vector<128x256xf32>
    %64 = arith.addf %62, %63 : vector<128x256xf32>
    %cst_38 = arith.constant 0.000000e+00 : f32
    %65 = vector.broadcast %cst_38 : f32 to vector<128x256xf32>
    %66 = arith.maximumf %64, %65 : vector<128x256xf32>
    %67 = arith.truncf %56 : vector<128x256xf32> to vector<128x256xbf16>
    %cst_39 = arith.constant dense<0.000000e+00> : vector<128x256xf32>
    %68 = tpu.matmul %67, %58, %cst_39 {dimension_numbers = #tpu.dot_dimension_numbers<[1], [0], [0], [1], [0, 0, 1, 1], [], []>} : vector<128x256xbf16>, vector<256x256xbf16>, vector<128x256xf32> -> vector<128x256xf32>
    %69 = vector.broadcast %60 : vector<1x256xf32> to vector<128x256xf32>
    %70 = arith.addf %68, %69 : vector<128x256xf32>
    %cst_40 = arith.constant 0.000000e+00 : f32
    %71 = vector.broadcast %cst_40 : f32 to vector<128x256xf32>
    %72 = arith.maximumf %70, %71 : vector<128x256xf32>
    %c3 = arith.constant 3 : index
    %c0_41 = arith.constant 0 : index
    %c0_42 = arith.constant 0 : index
    %73 = vector.load %arg4[%c3, %c0_41, %c0_42] : memref<6x256x256xbf16, #tpu.memory_space<vmem>>, vector<1x256x256xbf16>
    %74 = vector.shape_cast %73 : vector<1x256x256xbf16> to vector<256x256xbf16>
    %c3_43 = arith.constant 3 : index
    %c0_44 = arith.constant 0 : index
    %c0_45 = arith.constant 0 : index
    %75 = vector.load %arg5[%c3_43, %c0_44, %c0_45] : memref<6x1x256xf32, #tpu.memory_space<vmem>>, vector<1x1x256xf32>
    %76 = vector.shape_cast %75 : vector<1x1x256xf32> to vector<1x256xf32>
    %77 = arith.truncf %66 : vector<128x256xf32> to vector<128x256xbf16>
    %cst_46 = arith.constant dense<0.000000e+00> : vector<128x256xf32>
    %78 = tpu.matmul %77, %74, %cst_46 {dimension_numbers = #tpu.dot_dimension_numbers<[1], [0], [0], [1], [0, 0, 1, 1], [], []>} : vector<128x256xbf16>, vector<256x256xbf16>, vector<128x256xf32> -> vector<128x256xf32>
    %79 = vector.broadcast %76 : vector<1x256xf32> to vector<128x256xf32>
    %80 = arith.addf %78, %79 : vector<128x256xf32>
    %cst_47 = arith.constant 0.000000e+00 : f32
    %81 = vector.broadcast %cst_47 : f32 to vector<128x256xf32>
    %82 = arith.maximumf %80, %81 : vector<128x256xf32>
    %83 = arith.truncf %72 : vector<128x256xf32> to vector<128x256xbf16>
    %cst_48 = arith.constant dense<0.000000e+00> : vector<128x256xf32>
    %84 = tpu.matmul %83, %74, %cst_48 {dimension_numbers = #tpu.dot_dimension_numbers<[1], [0], [0], [1], [0, 0, 1, 1], [], []>} : vector<128x256xbf16>, vector<256x256xbf16>, vector<128x256xf32> -> vector<128x256xf32>
    %85 = vector.broadcast %76 : vector<1x256xf32> to vector<128x256xf32>
    %86 = arith.addf %84, %85 : vector<128x256xf32>
    %cst_49 = arith.constant 0.000000e+00 : f32
    %87 = vector.broadcast %cst_49 : f32 to vector<128x256xf32>
    %88 = arith.maximumf %86, %87 : vector<128x256xf32>
    %c4 = arith.constant 4 : index
    %c0_50 = arith.constant 0 : index
    %c0_51 = arith.constant 0 : index
    %89 = vector.load %arg4[%c4, %c0_50, %c0_51] : memref<6x256x256xbf16, #tpu.memory_space<vmem>>, vector<1x256x256xbf16>
    %90 = vector.shape_cast %89 : vector<1x256x256xbf16> to vector<256x256xbf16>
    %c4_52 = arith.constant 4 : index
    %c0_53 = arith.constant 0 : index
    %c0_54 = arith.constant 0 : index
    %91 = vector.load %arg5[%c4_52, %c0_53, %c0_54] : memref<6x1x256xf32, #tpu.memory_space<vmem>>, vector<1x1x256xf32>
    %92 = vector.shape_cast %91 : vector<1x1x256xf32> to vector<1x256xf32>
    %93 = arith.truncf %82 : vector<128x256xf32> to vector<128x256xbf16>
    %cst_55 = arith.constant dense<0.000000e+00> : vector<128x256xf32>
    %94 = tpu.matmul %93, %90, %cst_55 {dimension_numbers = #tpu.dot_dimension_numbers<[1], [0], [0], [1], [0, 0, 1, 1], [], []>} : vector<128x256xbf16>, vector<256x256xbf16>, vector<128x256xf32> -> vector<128x256xf32>
    %95 = vector.broadcast %92 : vector<1x256xf32> to vector<128x256xf32>
    %96 = arith.addf %94, %95 : vector<128x256xf32>
    %cst_56 = arith.constant 0.000000e+00 : f32
    %97 = vector.broadcast %cst_56 : f32 to vector<128x256xf32>
    %98 = arith.maximumf %96, %97 : vector<128x256xf32>
    %99 = arith.truncf %88 : vector<128x256xf32> to vector<128x256xbf16>
    %cst_57 = arith.constant dense<0.000000e+00> : vector<128x256xf32>
    %100 = tpu.matmul %99, %90, %cst_57 {dimension_numbers = #tpu.dot_dimension_numbers<[1], [0], [0], [1], [0, 0, 1, 1], [], []>} : vector<128x256xbf16>, vector<256x256xbf16>, vector<128x256xf32> -> vector<128x256xf32>
    %101 = vector.broadcast %92 : vector<1x256xf32> to vector<128x256xf32>
    %102 = arith.addf %100, %101 : vector<128x256xf32>
    %cst_58 = arith.constant 0.000000e+00 : f32
    %103 = vector.broadcast %cst_58 : f32 to vector<128x256xf32>
    %104 = arith.maximumf %102, %103 : vector<128x256xf32>
    %c5 = arith.constant 5 : index
    %c0_59 = arith.constant 0 : index
    %c0_60 = arith.constant 0 : index
    %105 = vector.load %arg4[%c5, %c0_59, %c0_60] : memref<6x256x256xbf16, #tpu.memory_space<vmem>>, vector<1x256x256xbf16>
    %106 = vector.shape_cast %105 : vector<1x256x256xbf16> to vector<256x256xbf16>
    %c5_61 = arith.constant 5 : index
    %c0_62 = arith.constant 0 : index
    %c0_63 = arith.constant 0 : index
    %107 = vector.load %arg5[%c5_61, %c0_62, %c0_63] : memref<6x1x256xf32, #tpu.memory_space<vmem>>, vector<1x1x256xf32>
    %108 = vector.shape_cast %107 : vector<1x1x256xf32> to vector<1x256xf32>
    %109 = arith.truncf %98 : vector<128x256xf32> to vector<128x256xbf16>
    %cst_64 = arith.constant dense<0.000000e+00> : vector<128x256xf32>
    %110 = tpu.matmul %109, %106, %cst_64 {dimension_numbers = #tpu.dot_dimension_numbers<[1], [0], [0], [1], [0, 0, 1, 1], [], []>} : vector<128x256xbf16>, vector<256x256xbf16>, vector<128x256xf32> -> vector<128x256xf32>
    %111 = vector.broadcast %108 : vector<1x256xf32> to vector<128x256xf32>
    %112 = arith.addf %110, %111 : vector<128x256xf32>
    %cst_65 = arith.constant 0.000000e+00 : f32
    %113 = vector.broadcast %cst_65 : f32 to vector<128x256xf32>
    %114 = arith.maximumf %112, %113 : vector<128x256xf32>
    %115 = arith.truncf %104 : vector<128x256xf32> to vector<128x256xbf16>
    %cst_66 = arith.constant dense<0.000000e+00> : vector<128x256xf32>
    %116 = tpu.matmul %115, %106, %cst_66 {dimension_numbers = #tpu.dot_dimension_numbers<[1], [0], [0], [1], [0, 0, 1, 1], [], []>} : vector<128x256xbf16>, vector<256x256xbf16>, vector<128x256xf32> -> vector<128x256xf32>
    %117 = vector.broadcast %108 : vector<1x256xf32> to vector<128x256xf32>
    %118 = arith.addf %116, %117 : vector<128x256xf32>
    %cst_67 = arith.constant 0.000000e+00 : f32
    %119 = vector.broadcast %cst_67 : f32 to vector<128x256xf32>
    %120 = arith.maximumf %118, %119 : vector<128x256xf32>
    %c0_68 = arith.constant 0 : index
    %c0_69 = arith.constant 0 : index
    %121 = vector.load %arg6[%c0_68, %c0_69] : memref<1x256xf32, #tpu.memory_space<vmem>>, vector<1x256xf32>
    %c0_70 = arith.constant 0 : index
    %122 = memref.load %arg7[%c0_70] : memref<1xf32, #tpu.memory_space<smem>>
    %123 = vector.broadcast %121 : vector<1x256xf32> to vector<128x256xf32>
    %124 = arith.mulf %114, %123 : vector<128x256xf32>
    %cst_71 = arith.constant dense<0.000000e+00> : vector<128xf32>
    %125 = vector.multi_reduction <add>, %124, %cst_71 [1] : vector<128x256xf32> to vector<128xf32>
    %126 = vector.shape_cast %125 : vector<128xf32> to vector<128x1xf32>
    %127 = vector.broadcast %122 : f32 to vector<128x1xf32>
    %128 = arith.addf %126, %127 : vector<128x1xf32>
    %129 = vector.broadcast %121 : vector<1x256xf32> to vector<128x256xf32>
    %130 = arith.mulf %120, %129 : vector<128x256xf32>
    %cst_72 = arith.constant dense<0.000000e+00> : vector<128xf32>
    %131 = vector.multi_reduction <add>, %130, %cst_72 [1] : vector<128x256xf32> to vector<128xf32>
    %132 = vector.shape_cast %131 : vector<128xf32> to vector<128x1xf32>
    %133 = vector.broadcast %122 : f32 to vector<128x1xf32>
    %134 = arith.addf %132, %133 : vector<128x1xf32>
    %135 = arith.negf %128 : vector<128x1xf32>
    %136 = math.exp %135 : vector<128x1xf32>
    %cst_73 = arith.constant 1.000000e+00 : f32
    %137 = vector.broadcast %cst_73 : f32 to vector<128x1xf32>
    %138 = arith.addf %137, %136 : vector<128x1xf32>
    %139 = arith.divf %137, %138 : vector<128x1xf32>
    %140 = arith.index_cast %1 : i32 to index
    %c0_74 = arith.constant 0 : index
    %141 = vector.load %arg8[%140, %c0_74] : memref<256x1xf32, #tpu.memory_space<vmem>>, vector<128x1xf32>
    tpu.vector_store %arg8[%140, %c0_74], %139 {strides = array<i32>} : memref<256x1xf32, #tpu.memory_space<vmem>>, vector<128x1xf32>,
    %142 = arith.negf %134 : vector<128x1xf32>
    %143 = math.exp %142 : vector<128x1xf32>
    %cst_75 = arith.constant 1.000000e+00 : f32
    %144 = vector.broadcast %cst_75 : f32 to vector<128x1xf32>
    %145 = arith.addf %144, %143 : vector<128x1xf32>
    %146 = arith.divf %144, %145 : vector<128x1xf32>
    %147 = arith.index_cast %4 : i32 to index
    %c0_76 = arith.constant 0 : index
    %148 = vector.load %arg8[%147, %c0_76] : memref<256x1xf32, #tpu.memory_space<vmem>>, vector<128x1xf32>
    tpu.vector_store %arg8[%147, %c0_76], %146 {strides = array<i32>} : memref<256x1xf32, #tpu.memory_space<vmem>>, vector<128x1xf32>,
    %c1_i32 = arith.constant 1 : i32
    return
  }
  func.func @transform_0(%arg0: i32) -> (i32, i32) {
    %c0_i32 = arith.constant 0 : i32
    %c0_i32_0 = arith.constant 0 : i32
    return %arg0, %c0_i32 : i32, i32
  }
  func.func @transform_1(%arg0: i32) -> (i32, i32) {
    %c0_i32 = arith.constant 0 : i32
    %c0_i32_0 = arith.constant 0 : i32
    %c0_i32_1 = arith.constant 0 : i32
    return %c0_i32, %c0_i32_0 : i32, i32
  }
  func.func @transform_2(%arg0: i32) -> (i32, i32) {
    %c0_i32 = arith.constant 0 : i32
    %c0_i32_0 = arith.constant 0 : i32
    %c0_i32_1 = arith.constant 0 : i32
    return %c0_i32, %c0_i32_0 : i32, i32
  }
  func.func @transform_3(%arg0: i32) -> (i32, i32, i32) {
    %c0_i32 = arith.constant 0 : i32
    %c0_i32_0 = arith.constant 0 : i32
    %c0_i32_1 = arith.constant 0 : i32
    %c0_i32_2 = arith.constant 0 : i32
    return %c0_i32, %c0_i32_0, %c0_i32_1 : i32, i32, i32
  }
  func.func @transform_4(%arg0: i32) -> (i32, i32, i32) {
    %c0_i32 = arith.constant 0 : i32
    %c0_i32_0 = arith.constant 0 : i32
    %c0_i32_1 = arith.constant 0 : i32
    %c0_i32_2 = arith.constant 0 : i32
    return %c0_i32, %c0_i32_0, %c0_i32_1 : i32, i32, i32
  }
  func.func @transform_5(%arg0: i32) -> (i32, i32) {
    %c0_i32 = arith.constant 0 : i32
    %c0_i32_0 = arith.constant 0 : i32
    %c0_i32_1 = arith.constant 0 : i32
    return %c0_i32, %c0_i32_0 : i32, i32
  }
  func.func @transform_6(%arg0: i32) -> i32 {
    %c0_i32 = arith.constant 0 : i32
    %c0_i32_0 = arith.constant 0 : i32
    return %c0_i32 : i32
  }
  func.func @transform_7(%arg0: i32) -> (i32, i32) {
    %c0_i32 = arith.constant 0 : i32
    %c0_i32_0 = arith.constant 0 : i32
    return %arg0, %c0_i32 : i32, i32
  }
}

</mosaic_0001>

<bundles_post_ra>
// kernel: distilled_mlp_forward.1
= control target key start
LH: loop header
LB: loop body
LE: loop exit
PB: predicated region body
PF: predicated region fallthrough
CT: control target
= control target key end

     0   :  { %s7135_s26 = smov 0   ;;  %s10624_s0 = inlined_call_operand.vmem [shape: f32[512,32], index: 0, kind: input, shape index: {}]   ;;  %s10625_s1 = inlined_call_operand.vmem [shape: bf16[32,256], index: 1, kind: input, shape index: {}]   ;;  %s10626_s2 = inlined_call_operand.vmem [shape: f32[1,256], index: 2, kind: input, shape index: {}]   ;;  %s10627_s3 = inlined_call_operand.vmem [shape: bf16[6,256,256], index: 3, kind: input, shape index: {}]   ;;  %s10628_s4 = inlined_call_operand.vmem [shape: f32[6,1,256], index: 4, kind: input, shape index: {}]   ;;  %s10629_s5 = inlined_call_operand.vmem [shape: f32[1,256], index: 5, kind: input, shape index: {}]   ;;  %s10630_s6 = inlined_call_operand.<no memory space> [shape: f32[1], index: 6, kind: input, shape index: {}]   ;;  %s10631_s7 = inlined_call_operand.vmem [shape: f32[512,1], index: 7, kind: output, shape index: {}]  }
   0x1   :  { %12 = sst [smem:[#allocation2]] %s10630_s6 }
   0x2 LB: > { %s5696_s27 = sadd.s32 4294967295, %s7090_s26   ;;  %p5700_p0 = scmp.ge.s32.totalorder %s7090_s26, 1  ;;  %s7090_s26 = sphi %s7135_s26, %s18_s26  }
   0x3   : > { %p239_p1 = scmp.lt.s32.totalorder %s7090_s26, 3 }
   0x5   : > { %p240_p2 = pnand %p5700_p0, %p239_p1 }
   0x6   : > { %s5701_s20 = sshll.u32 (!%p240_p2), %s5696_s27, 5  ;;  %s4799_s12 = sld [smem:[#allocation2]] (!%p240_p2) }
   0x7   : > { %243 = sbr.rel (%p240_p2) target bundleno = 1985 (0x7c1), region = 48  ;;  %p272_p3 = scmp.lt.s32.totalorder (!%p240_p2), %s5701_s20, 63 }
   0xc   : > { %v5731_v0 = vld [vmem:[%s10625_s1 + $0x10] sm:$0xf]  ;;  %v6755_v1 = vld [vmem:[%s10625_s1 + $0x14] sm:$0xf0]  ;;  %v6754_v2 = vld [vmem:[%s10625_s1 + $0x14] sm:$0xf] }
   0xd   : > { %v5732_v3 = vor.u32 %v6755_v1, %v5731_v0  ;;  %v5733_v4 = vld [vmem:[%s10625_s1 + $0x18] sm:$0xf0]  ;;  %v5723_v5 = vld [vmem:[%s10625_s1] sm:$0xf]  ;;  %v6753_v6 = vld [vmem:[%s10625_s1 + $0x4] sm:$0xf0] }
   0xe   : > { %v5736_v7 = vor.u32 %v6754_v2, %v5733_v4  ;;  %v6752_v8 = vld [vmem:[%s10625_s1 + $0x4] sm:$0xf]  ;;  %v5725_v9 = vld [vmem:[%s10625_s1 + $0x8] sm:$0xf0]  ;;  %v5724_v10 = vor.u32 %v6753_v6, %v5723_v5  ;;  %v6770_v11 = vld [vmem:[%s10627_s3 + $0x74] sm:$0xf] }
   0xf   : > { %394 = vmatpush.bf16.msra.mxu0 %v5732_v3  ;;  %548 = vmatpush.bf16.msra.mxu2 %v5732_v3  ;;  %v5829_v12 = vld [vmem:[%s10627_s3 + $0x78] sm:$0xf0]  ;;  %v5728_v13 = vor.u32 %v6752_v8, %v5725_v9  ;;  %v6786_v14 = vld [vmem:[%s10627_s3 + $0xf4] sm:$0xf]  ;;  %v5827_v16 = vld [vmem:[%s10627_s3 + $0x70] sm:$0xf] }
  0x10   : > { %443 = vmatpush.bf16.msra.mxu1 %v5736_v7  ;;  %597 = vmatpush.bf16.msra.mxu3 %v5736_v7  ;;  %v5893_v15 = vld [vmem:[%s10627_s3 + $0xf8] sm:$0xf0]  ;;  %s10633_s20 = smov (!%p272_p3, %s5701_s20), 63  ;;  %v7184_v17 = vor.u32 %v6770_v11, %v5829_v12  ;;  %v6771_v19 = vld [vmem:[%s10627_s3 + $0x74] sm:$0xf0]  ;;  %vm363_vm0 = vcmask 261120  }
  0x11   : > { %v7186_v18 = vor.u32 %v6786_v14, %v5893_v15  ;;  %v5891_v20 = vld [vmem:[%s10627_s3 + $0xf0] sm:$0xf]  ;;  %v7194_v21 = vor.u32 %v6771_v19, %v5827_v16  ;;  %v6787_v22 = vld [vmem:[%s10627_s3 + $0xf4] sm:$0xf0]  ;;  %v6768_v23 = vld [vmem:[%s10627_s3 + $0x64] sm:$0xf] }
  0x12   : > { %v5821_v24 = vld [vmem:[%s10627_s3 + $0x68] sm:$0xf0]  ;;  %s5702_s18 = sshll.u32 %s10633_s20, 3  ;;  %v7206_v25 = vor.u32 %v6787_v22, %v5891_v20  ;;  %v6784_v26 = vld [vmem:[%s10627_s3 + $0xe4] sm:$0xf]  ;;  %vm5302_vm2 = vcmask 7168  }
  0x13   : > { %395 = vmatpush.bf16.msra.mxu0 %v5724_v10  ;;  %549 = vmatpush.bf16.msra.mxu2 %v5724_v10  ;;  %v5885_v27 = vld [vmem:[%s10627_s3 + $0xe8] sm:$0xf0]  ;;  %s7219_s28 = scalar_lea.vmem %s10624_s0, %s5702_s18  ;;  %v7229_v33 = vor.u32 %v6768_v23, %v5821_v24  ;;  %v5819_v36 = vld [vmem:[%s10627_s3 + $0x60] sm:$0xf]  ;;  %v6769_v37 = vld [vmem:[%s10627_s3 + $0x64] sm:$0xf0]  ;;  %s10381_s15 = scalar_lea.vmem %s10631_s7, %s5702_s18 }
  0x14   : > { %444 = vmatpush.bf16.msra.mxu1 %v5728_v13  ;;  %598 = vmatpush.bf16.msra.mxu3 %v5728_v13  ;;  %v284_v28 = vld [vmem:[%s7219_s28] sm:$0xff]  ;;  %v285_v29 = vld [vmem:[%s7219_s28 + $0x8] sm:$0xff]  ;;  %v7231_v34 = vor.u32 %v6784_v26, %v5885_v27  ;;  %v7243_v38 = vor.u32 %v6769_v37, %v5819_v36  ;;  %v6766_v41 = vld [vmem:[%s10627_s3 + $0x54] sm:$0xf] }
  0x15   : > { %v5705_v30 = vld [vmem:[%s7219_s28 + $0x80] sm:$0xff]  ;;  %v300_v31 = vpack.c.bf16 %v285_v29, %v284_v28  ;;  %v5706_v32 = vld [vmem:[%s7219_s28 + $0x88] sm:$0xff]  ;;  %v5813_v42 = vld [vmem:[%s10627_s3 + $0x58] sm:$0xf0] }
  0x16   : > { %v325_v35 = vpack.c.bf16 %v5706_v32, %v5705_v30  ;;  %v5883_v39 = vld [vmem:[%s10627_s3 + $0xe0] sm:$0xf]  ;;  %v6785_v40 = vld [vmem:[%s10627_s3 + $0xe4] sm:$0xf0]  ;;  %v7262_v44 = vor.u32 %v6766_v41, %v5813_v42  ;;  %v6782_v45 = vld [vmem:[%s10627_s3 + $0xd4] sm:$0xf] }
  0x17   : > { %984 = vmatpush.bf16.msrb.mxu2 %v7184_v17  ;;  %886 = vmatpush.bf16.msrb.mxu0 %v7194_v21  ;;  %v7260_v43 = vor.u32 %v6785_v40, %v5883_v39  ;;  %v5877_v46 = vld [vmem:[%s10627_s3 + $0xd8] sm:$0xf0]  ;;  %v286_v48 = vld [vmem:[%s7219_s28 + $0x10] sm:$0xff]  ;;  %v6767_v55 = vld [vmem:[%s10627_s3 + $0x54] sm:$0xf0] }
  0x18   : > { %1033 = vmatpush.bf16.msrb.mxu3 %v7186_v18  ;;  %935 = vmatpush.bf16.msrb.mxu1 %v7206_v25  ;;  %v7270_v47 = vor.u32 %v6782_v45, %v5877_v46  ;;  %v287_v49 = vld [vmem:[%s7219_s28 + $0x18] sm:$0xff]  ;;  %v5707_v50 = vld [vmem:[%s7219_s28 + $0x90] sm:$0xff]  ;;  %v6764_v60 = vld [vmem:[%s10627_s3 + $0x44] sm:$0xf] }
  0x19   : > { %5737 = vmatmul.msk.bf16.vlgmr.msra.gmra.mxu0 %vm363_vm0, %v300_v31  ;;  %5745 = vmatmul.msk.bf16.vlgmr.msra.gmra.mxu1 %vm363_vm0, %v300_v31  ;;  %v5708_v51 = vld [vmem:[%s7219_s28 + $0x98] sm:$0xff]  ;;  %v301_v52 = vpack.c.bf16 %v287_v49, %v286_v48  ;;  %v5811_v54 = vld [vmem:[%s10627_s3 + $0x50] sm:$0xf]  ;;  %v5805_v61 = vld [vmem:[%s10627_s3 + $0x48] sm:$0xf0] }
  0x1a   : > { %5753 = vmatmul.msk.bf16.vlgmr.msra.gmra.mxu2 %vm363_vm0, %v325_v35  ;;  %5761 = vmatmul.msk.bf16.vlgmr.msra.gmra.mxu3 %vm363_vm0, %v325_v35  ;;  %v326_v53 = vpack.c.bf16 %v5708_v51, %v5707_v50  ;;  %v7289_v56 = vor.u32 %v6767_v55, %v5811_v54  ;;  %v5875_v57 = vld [vmem:[%s10627_s3 + $0xd0] sm:$0xf]  ;;  %v6783_v58 = vld [vmem:[%s10627_s3 + $0xd4] sm:$0xf0]  ;;  %v6780_v62 = vld [vmem:[%s10627_s3 + $0xc4] sm:$0xf]  ;;  %v7309_v63 = vor.u32 %v6764_v60, %v5805_v61 }
  0x1b   : > { %985 = vmatpush.bf16.msrb.mxu2 %v7229_v33  ;;  %887 = vmatpush.bf16.msrb.mxu0 %v7243_v38  ;;  %v7297_v59 = vor.u32 %v6783_v58, %v5875_v57  ;;  %v5869_v0 = vld [vmem:[%s10627_s3 + $0xc8] sm:$0xf0]  ;;  %v288_v2 = vld [vmem:[%s7219_s28 + $0x20] sm:$0xff]  ;;  %v6765_v9 = vld [vmem:[%s10627_s3 + $0x44] sm:$0xf0] }
  0x1c   : > { %1034 = vmatpush.bf16.msrb.mxu3 %v7231_v34  ;;  %936 = vmatpush.bf16.msrb.mxu1 %v7260_v43  ;;  %v7315_v1 = vor.u32 %v6780_v62, %v5869_v0  ;;  %v289_v3 = vld [vmem:[%s7219_s28 + $0x28] sm:$0xff]  ;;  %v5709_v4 = vld [vmem:[%s7219_s28 + $0xa0] sm:$0xff]  ;;  %v6762_v14 = vld [vmem:[%s10627_s3 + $0x34] sm:$0xf] }
  0x1d   : > { %v5710_v5 = vld [vmem:[%s7219_s28 + $0xa8] sm:$0xff]  ;;  %v302_v6 = vpack.c.bf16 %v289_v3, %v288_v2  ;;  %v5803_v8 = vld [vmem:[%s10627_s3 + $0x40] sm:$0xf]  ;;  %v5797_v15 = vld [vmem:[%s10627_s3 + $0x38] sm:$0xf0] }
  0x1e   : > { %v327_v7 = vpack.c.bf16 %v5710_v5, %v5709_v4  ;;  %v7333_v10 = vor.u32 %v6765_v9, %v5803_v8  ;;  %v5867_v11 = vld [vmem:[%s10627_s3 + $0xc0] sm:$0xf]  ;;  %v6781_v12 = vld [vmem:[%s10627_s3 + $0xc4] sm:$0xf0]  ;;  %v6778_v16 = vld [vmem:[%s10627_s3 + $0xb4] sm:$0xf]  ;;  %v7353_v19 = vor.u32 %v6762_v14, %v5797_v15 }
  0x1f   : > { %986 = vmatpush.bf16.msrb.mxu2 %v7262_v44  ;;  %888 = vmatpush.bf16.msrb.mxu0 %v7289_v56  ;;  %v7341_v13 = vor.u32 %v6781_v12, %v5867_v11  ;;  %v5861_v20 = vld [vmem:[%s10627_s3 + $0xb8] sm:$0xf0]  ;;  %v290_v23 = vld [vmem:[%s7219_s28 + $0x30] sm:$0xff]  ;;  %v6763_v31 = vld [vmem:[%s10627_s3 + $0x34] sm:$0xf0] }
  0x20   : > { %1035 = vmatpush.bf16.msrb.mxu3 %v7270_v47  ;;  %937 = vmatpush.bf16.msrb.mxu1 %v7297_v59  ;;  %v7359_v22 = vor.u32 %v6778_v16, %v5861_v20  ;;  %v291_v24 = vld [vmem:[%s7219_s28 + $0x38] sm:$0xff]  ;;  %v5711_v26 = vld [vmem:[%s7219_s28 + $0xb0] sm:$0xff]  ;;  %v6760_v39 = vld [vmem:[%s10627_s3 + $0x24] sm:$0xf] }
  0x21   : > { %v5712_v27 = vld [vmem:[%s7219_s28 + $0xb8] sm:$0xff]  ;;  %v303_v28 = vpack.c.bf16 %v291_v24, %v290_v23  ;;  %v5795_v30 = vld [vmem:[%s10627_s3 + $0x30] sm:$0xf]  ;;  %v5789_v40 = vld [vmem:[%s10627_s3 + $0x28] sm:$0xf0] }
  0x22   : > { %v328_v29 = vpack.c.bf16 %v5712_v27, %v5711_v26  ;;  %v7377_v32 = vor.u32 %v6763_v31, %v5795_v30  ;;  %v5859_v35 = vld [vmem:[%s10627_s3 + $0xb0] sm:$0xf]  ;;  %v6779_v36 = vld [vmem:[%s10627_s3 + $0xb4] sm:$0xf0]  ;;  %v6776_v41 = vld [vmem:[%s10627_s3 + $0xa4] sm:$0xf]  ;;  %v7397_v42 = vor.u32 %v6760_v39, %v5789_v40 }
  0x23   : > { %987 = vmatpush.bf16.msrb.mxu2 %v7309_v63  ;;  %889 = vmatpush.bf16.msrb.mxu0 %v7333_v10  ;;  %v7385_v37 = vor.u32 %v6779_v36, %v5859_v35  ;;  %v5853_v45 = vld [vmem:[%s10627_s3 + $0xa8] sm:$0xf0]  ;;  %v292_v48 = vld [vmem:[%s7219_s28 + $0x40] sm:$0xff]  ;;  %v6761_v55 = vld [vmem:[%s10627_s3 + $0x24] sm:$0xf0] }
  0x24   : > { %1036 = vmatpush.bf16.msrb.mxu3 %v7315_v1  ;;  %938 = vmatpush.bf16.msrb.mxu1 %v7341_v13  ;;  %v7403_v46 = vor.u32 %v6776_v41, %v5853_v45  ;;  %v293_v49 = vld [vmem:[%s7219_s28 + $0x48] sm:$0xff]  ;;  %v5713_v50 = vld [vmem:[%s7219_s28 + $0xc0] sm:$0xff]  ;;  %v6758_v62 = vld [vmem:[%s10627_s3 + $0x14] sm:$0xf] }
  0x25   : > { %v5714_v51 = vld [vmem:[%s7219_s28 + $0xc8] sm:$0xff]  ;;  %v5787_v54 = vld [vmem:[%s10627_s3 + $0x20] sm:$0xf]  ;;  %v5781_v0 = vld [vmem:[%s10627_s3 + $0x18] sm:$0xf0] }
  0x26   : > { %v7421_v57 = vor.u32 %v6761_v55, %v5787_v54  ;;  %v5851_v58 = vld [vmem:[%s10627_s3 + $0xa0] sm:$0xf]  ;;  %v6777_v60 = vld [vmem:[%s10627_s3 + $0xa4] sm:$0xf0]  ;;  %v6774_v2 = vld [vmem:[%s10627_s3 + $0x94] sm:$0xf]  ;;  %v7441_v3 = vor.u32 %v6758_v62, %v5781_v0 }
  0x27   : > { %988 = vmatpush.bf16.msrb.mxu2 %v7353_v19  ;;  %890 = vmatpush.bf16.msrb.mxu0 %v7377_v32  ;;  %v7429_v61 = vor.u32 %v6777_v60, %v5851_v58  ;;  %v5845_v4 = vld [vmem:[%s10627_s3 + $0x98] sm:$0xf0]  ;;  %v5715_v8 = vld [vmem:[%s7219_s28 + $0xd0] sm:$0xff]  ;;  %v6759_v15 = vld [vmem:[%s10627_s3 + $0x14] sm:$0xf0] }
  0x28   : > { %1037 = vmatpush.bf16.msrb.mxu3 %v7359_v22  ;;  %939 = vmatpush.bf16.msrb.mxu1 %v7385_v37  ;;  %v7447_v5 = vor.u32 %v6774_v2, %v5845_v4  ;;  %v5716_v9 = vld [vmem:[%s7219_s28 + $0xd8] sm:$0xff]  ;;  %v5779_v14 = vld [vmem:[%s10627_s3 + $0x10] sm:$0xf]  ;;  %v6756_v26 = vld [vmem:[%s10627_s3 + $0x4] sm:$0xf] }
  0x29   : > { %5738 = vmatmul.msk.bf16.gmra.mxu0 %vm363_vm0, %v301_v52  ;;  %5746 = vmatmul.msk.bf16.gmra.mxu1 %vm363_vm0, %v301_v52  ;;  %v304_v52 = vpack.c.bf16 %v293_v49, %v292_v48  ;;  %v330_v12 = vpack.c.bf16 %v5716_v9, %v5715_v8  ;;  %v7465_v16 = vor.u32 %v6759_v15, %v5779_v14  ;;  %v5843_v20 = vld [vmem:[%s10627_s3 + $0x90] sm:$0xf]  ;;  %v6775_v23 = vld [vmem:[%s10627_s3 + $0x94] sm:$0xf0]  ;;  %v5773_v27 = vld [vmem:[%s10627_s3 + $0x8] sm:$0xf0] }
  0x2a   : > { %5754 = vmatmul.msk.bf16.gmra.mxu2 %vm363_vm0, %v326_v53  ;;  %5762 = vmatmul.msk.bf16.gmra.mxu3 %vm363_vm0, %v326_v53  ;;  %v329_v53 = vpack.c.bf16 %v5714_v51, %v5713_v50  ;;  %v7473_v24 = vor.u32 %v6775_v23, %v5843_v20  ;;  %v297_v30 = vld [vmem:[%s7219_s28 + $0x68] sm:$0xff]  ;;  %v5717_v31 = vld [vmem:[%s7219_s28 + $0xe0] sm:$0xff]  ;;  %v298_v51 = vld [vmem:[%s7219_s28 + $0x70] sm:$0xff] }
  0x2b   : > { %989 = vmatpush.bf16.msrb.mxu2 %v7397_v42  ;;  %891 = vmatpush.bf16.msrb.mxu0 %v7421_v57  ;;  %v5718_v35 = vld [vmem:[%s7219_s28 + $0xe8] sm:$0xff]  ;;  %v6772_v40 = vld [vmem:[%s10627_s3 + $0x84] sm:$0xf]  ;;  %v5835_v45 = vld [vmem:[%s10627_s3 + $0x80] sm:$0xf] }
  0x2c   : > { %1038 = vmatpush.bf16.msrb.mxu3 %v7403_v46  ;;  %940 = vmatpush.bf16.msrb.mxu1 %v7429_v61  ;;  %v331_v39 = vpack.c.bf16 %v5718_v35, %v5717_v31  ;;  %v6757_v41 = vld [vmem:[%s10627_s3 + $0x4] sm:$0xf0]  ;;  %v5720_v54 = vld [vmem:[%s7219_s28 + $0xf8] sm:$0xff] }
  0x2d   : > { %v6773_v48 = vld [vmem:[%s10627_s3 + $0x84] sm:$0xf0] }
  0x2e   : > { %v5836_v50 = vor.u32 %v6773_v48, %v5835_v45 }
  0x2f   : > { %990 = vmatpush.bf16.msrb.mxu2 %v7441_v3  ;;  %892 = vmatpush.bf16.msrb.mxu0 %v7465_v16 }
  0x30   : > { %1039 = vmatpush.bf16.msrb.mxu3 %v7447_v5  ;;  %941 = vmatpush.bf16.msrb.mxu1 %v7473_v24 }
  0x34   : > { %942 = vmatpush.bf16.msrb.mxu1 %v5836_v50 }
  0x38   : > { %1179 = vmatpush.bf16.msra.mxu1 %v7206_v25 }
  0x39   : > { %5739 = vmatmul.msk.bf16.gmra.mxu0 %vm363_vm0, %v302_v6  ;;  %5747 = vmatmul.msk.bf16.gmra.mxu1 %vm363_vm0, %v302_v6  ;;  %v294_v6 = vld [vmem:[%s7219_s28 + $0x50] sm:$0xff] }
  0x3a   : > { %5755 = vmatmul.msk.bf16.gmra.mxu2 %vm363_vm0, %v327_v7  ;;  %5763 = vmatmul.msk.bf16.gmra.mxu3 %vm363_vm0, %v327_v7  ;;  %v295_v7 = vld [vmem:[%s7219_s28 + $0x58] sm:$0xff] }
  0x3b   : > { %v305_v11 = vpack.c.bf16 %v295_v7, %v294_v6 }
  0x3c   : > { %1180 = vmatpush.bf16.msra.mxu1 %v7260_v43 }
  0x40   : > { %1181 = vmatpush.bf16.msra.mxu1 %v7297_v59 }
  0x44   : > { %1182 = vmatpush.bf16.msra.mxu1 %v7341_v13 }
  0x48   : > { %1183 = vmatpush.bf16.msra.mxu1 %v7385_v37 }
  0x49   : > { %5740 = vmatmul.msk.bf16.gmra.mxu0 %vm363_vm0, %v303_v28  ;;  %5748 = vmatmul.msk.bf16.gmra.mxu1 %vm363_vm0, %v303_v28  ;;  %v5776_v28 = vor.u32 %v6756_v26, %v5773_v27 }
  0x4a   : > { %5756 = vmatmul.msk.bf16.gmra.mxu2 %vm363_vm0, %v328_v29  ;;  %5764 = vmatmul.msk.bf16.gmra.mxu3 %vm363_vm0, %v328_v29  ;;  %v296_v29 = vld [vmem:[%s7219_s28 + $0x60] sm:$0xff] }
  0x4b   : > { %991 = vmatpush.bf16.msrb.mxu2 %v5776_v28  ;;  %v306_v36 = vpack.c.bf16 %v297_v30, %v296_v29 }
  0x4c   : > { %1184 = vmatpush.bf16.msra.mxu1 %v7429_v61 }
  0x4f   : > { %1228 = vmatpush.bf16.msra.mxu2 %v7184_v17  ;;  %v5837_v17 = vld [vmem:[%s10627_s3 + $0x88] sm:$0xf0] }
  0x50   : > { %1185 = vmatpush.bf16.msra.mxu1 %v7473_v24 }
  0x53   : > { %1229 = vmatpush.bf16.msra.mxu2 %v7229_v33  ;;  %v5771_v33 = vld [vmem:[%s10627_s3] sm:$0xf] }
  0x54   : > { %v5772_v49 = vor.u32 %v6757_v41, %v5771_v33  ;;  %1186 = vmatpush.bf16.msra.mxu1 %v5836_v50 }
  0x56   : > { %893 = vmatpush.bf16.msrb.mxu0 %v5772_v49 }
  0x57   : > { %1230 = vmatpush.bf16.msra.mxu2 %v7262_v44  ;;  %v5840_v44 = vor.u32 %v6772_v40, %v5837_v17 }
  0x59   : > { %5741 = vmatmul.msk.bf16.gmra.mxu0 %vm363_vm0, %v304_v52  ;;  %5749 = vmatmul.msk.bf16.gmra.mxu1 %vm363_vm0, %v304_v52  ;;  %v299_v52 = vld [vmem:[%s7219_s28 + $0x78] sm:$0xff] }
  0x5a   : > { %5757 = vmatmul.msk.bf16.gmra.mxu2 %vm363_vm0, %v329_v53  ;;  %5765 = vmatmul.msk.bf16.gmra.mxu3 %vm363_vm0, %v329_v53  ;;  %v5719_v53 = vld [vmem:[%s7219_s28 + $0xf0] sm:$0xff] }
  0x5b   : > { %1231 = vmatpush.bf16.msra.mxu2 %v7309_v63  ;;  %1040 = vmatpush.bf16.msrb.mxu3 %v5840_v44  ;;  %v307_v63 = vpack.c.bf16 %v299_v52, %v298_v51 }
  0x5c   : > { %1130 = vmatpush.bf16.msra.mxu0 %v7194_v21  ;;  %v337_v21 = vld [vmem:[%s10626_s2] sm:$0x3] }
  0x5d   : > { %v7550_v43 = vperm.slane %v337_v21, 1 }
  0x5f   : > { %1277 = vmatpush.bf16.msra.mxu3 %v7186_v18  ;;  %1232 = vmatpush.bf16.msra.mxu2 %v7353_v19  ;;  %v332_v18 = vpack.c.bf16 %v5720_v54, %v5719_v53 }
  0x60   : > { %1131 = vmatpush.bf16.msra.mxu0 %v7243_v38  ;;  %v7548_v38 = vperm.slane %v337_v21, 0 }
  0x63   : > { %1278 = vmatpush.bf16.msra.mxu3 %v7231_v34  ;;  %1233 = vmatpush.bf16.msra.mxu2 %v7397_v42 }
  0x64   : > { %1132 = vmatpush.bf16.msra.mxu0 %v7289_v56 }
  0x67   : > { %1279 = vmatpush.bf16.msra.mxu3 %v7270_v47  ;;  %1234 = vmatpush.bf16.msra.mxu2 %v7441_v3 }
  0x68   : > { %1133 = vmatpush.bf16.msra.mxu0 %v7333_v10 }
  0x69   : > { %5742 = vmatmul.msk.bf16.gmra.mxu0 %vm363_vm0, %v305_v11  ;;  %5750 = vmatmul.msk.bf16.gmra.mxu1 %vm363_vm0, %v305_v11 }
  0x6a   : > { %5758 = vmatmul.msk.bf16.gmra.mxu2 %vm363_vm0, %v330_v12  ;;  %5766 = vmatmul.msk.bf16.gmra.mxu3 %vm363_vm0, %v330_v12 }
  0x6b   : > { %1280 = vmatpush.bf16.msra.mxu3 %v7315_v1  ;;  %1235 = vmatpush.bf16.msra.mxu2 %v5776_v28 }
  0x6c   : > { %1134 = vmatpush.bf16.msra.mxu0 %v7377_v32 }
  0x6f   : > { %1281 = vmatpush.bf16.msra.mxu3 %v7359_v22 }
  0x70   : > { %1135 = vmatpush.bf16.msra.mxu0 %v7421_v57 }
  0x73   : > { %1282 = vmatpush.bf16.msra.mxu3 %v7403_v46 }
  0x74   : > { %1136 = vmatpush.bf16.msra.mxu0 %v7465_v16 }
  0x77   : > { %1283 = vmatpush.bf16.msra.mxu3 %v7447_v5 }
  0x78   : > { %1137 = vmatpush.bf16.msra.mxu0 %v5772_v49 }
  0x79   : > { %5743 = vmatmul.msk.bf16.gmra.mxu0 %vm363_vm0, %v306_v36  ;;  %5751 = vmatmul.msk.bf16.gmra.mxu1 %vm363_vm0, %v306_v36 }
  0x7a   : > { %5759 = vmatmul.msk.bf16.gmra.mxu2 %vm363_vm0, %v331_v39  ;;  %5767 = vmatmul.msk.bf16.gmra.mxu3 %vm363_vm0, %v331_v39 }
  0x7b   : > { %1284 = vmatpush.bf16.msra.mxu3 %v5840_v44 }
  0x89   : > { %5744 = vmatmul.msk.bf16.gmra.mxu0 %vm363_vm0, %v307_v63  ;;  %5752 = vmatmul.msk.bf16.gmra.mxu1 %vm363_vm0, %v307_v63 }
  0x8a   : > { %5760 = vmatmul.msk.bf16.gmra.mxu2 %vm363_vm0, %v332_v18  ;;  %5768 = vmatmul.msk.bf16.gmra.mxu3 %vm363_vm0, %v332_v18 }
  0x96   : > { %v397_v25 = vpop.f32.mrf.mxu0  ;;  %v446_v34 = vpop.f32.mrf.mxu1 }
  0x97   : > { %v398_v47 = vadd.f32 %v397_v25, %v7548_v38  ;;  %v447_v56 = vadd.f32 %v446_v34, %v7550_v43 }
  0x99   : > { %v486_v32 = vmax.f32 %v398_v47, 0.0  ;;  %v487_v37 = vmax.f32 %v447_v56, 0.0 }
  0x9d   : > { %v551_v59 = vpop.f32.mrf.mxu2  ;;  %v600_v1 = vpop.f32.mrf.mxu3 }
  0x9e   : > { %v399_v10 = vpop.f32.mrf.mxu0  ;;  %v448_v13 = vpop.f32.mrf.mxu1  ;;  %v552_v55 = vadd.f32 %v551_v59, %v7548_v38  ;;  %v601_v57 = vadd.f32 %v600_v1, %v7550_v43 }
  0x9f   : > { %v400_v19 = vadd.f32 %v399_v10, %v7548_v38  ;;  %v449_v22 = vadd.f32 %v448_v13, %v7550_v43 }
  0xa0   : > { %v640_v0 = vmax.f32 %v552_v55, 0.0  ;;  %v641_v2 = vmax.f32 %v601_v57, 0.0 }
  0xa1   : > { %v488_v42 = vmax.f32 %v400_v19, 0.0  ;;  %v489_v46 = vmax.f32 %v449_v22, 0.0 }
  0xa3   : > { %v705_v58 = vpack.c.bf16 %v488_v42, %v486_v32  ;;  %v706_v60 = vpack.c.bf16 %v489_v46, %v487_v37 }
  0xa5   : > { %894 = vmatmul.bf16.vlgmr.msrb.gmra.mxu0 %v705_v58  ;;  %943 = vmatmul.bf16.vlgmr.msrb.gmra.mxu1 %v706_v60  ;;  %v553_v61 = vpop.f32.mrf.mxu2  ;;  %v602_v62 = vpop.f32.mrf.mxu3 }
  0xa6   : > { %992 = vmatmul.bf16.vlgmr.msrb.gmra.mxu2 %v705_v58  ;;  %1041 = vmatmul.bf16.vlgmr.msrb.gmra.mxu3 %v706_v60  ;;  %v402_v3 = vpop.f32.mrf.mxu0  ;;  %v451_v4 = vpop.f32.mrf.mxu1  ;;  %v554_v5 = vadd.f32 %v553_v61, %v7548_v38  ;;  %v603_v6 = vadd.f32 %v602_v62, %v7550_v43 }
  0xa7   : > { %v403_v12 = vadd.f32 %v402_v3, %v7548_v38  ;;  %v452_v14 = vadd.f32 %v451_v4, %v7550_v43 }
  0xa8   : > { %v642_v7 = vmax.f32 %v554_v5, 0.0  ;;  %v643_v8 = vmax.f32 %v603_v6, 0.0 }
  0xa9   : > { %v490_v27 = vmax.f32 %v403_v12, 0.0  ;;  %v491_v28 = vmax.f32 %v452_v14, 0.0 }
  0xaa   : > { %v7560_v9 = vpack.c.bf16 %v642_v7, %v640_v0  ;;  %v7562_v11 = vpack.c.bf16 %v643_v8, %v641_v2 }
  0xad   : > { %v556_v15 = vpop.f32.mrf.mxu2  ;;  %v605_v16 = vpop.f32.mrf.mxu3 }
  0xae   : > { %v404_v20 = vpop.f32.mrf.mxu0  ;;  %v453_v23 = vpop.f32.mrf.mxu1  ;;  %v557_v31 = vadd.f32 %v556_v15, %v7548_v38  ;;  %v606_v35 = vadd.f32 %v605_v16, %v7550_v43 }
  0xaf   : > { %v405_v24 = vadd.f32 %v404_v20, %v7548_v38  ;;  %v454_v26 = vadd.f32 %v453_v23, %v7550_v43 }
  0xb0   : > { %v644_v33 = vmax.f32 %v557_v31, 0.0  ;;  %v645_v44 = vmax.f32 %v606_v35, 0.0 }
  0xb1   : > { %v492_v29 = vmax.f32 %v405_v24, 0.0  ;;  %v493_v30 = vmax.f32 %v454_v26, 0.0 }
  0xb3   : > { %v707_v36 = vpack.c.bf16 %v492_v29, %v490_v27  ;;  %v708_v39 = vpack.c.bf16 %v493_v30, %v491_v28 }
  0xb5   : > { %899 = vmatmul.bf16.gmra.mxu0 %v707_v36  ;;  %948 = vmatmul.bf16.gmra.mxu1 %v708_v39  ;;  %v558_v40 = vpop.f32.mrf.mxu2  ;;  %v607_v17 = vpop.f32.mrf.mxu3 }
  0xb6   : > { %997 = vmatmul.bf16.gmra.mxu2 %v707_v36  ;;  %1046 = vmatmul.bf16.gmra.mxu3 %v708_v39  ;;  %v407_v41 = vpop.f32.mrf.mxu0  ;;  %v456_v45 = vpop.f32.mrf.mxu1  ;;  %v559_v48 = vadd.f32 %v558_v40, %v7548_v38  ;;  %v608_v49 = vadd.f32 %v607_v17, %v7550_v43 }
  0xb7   : > { %v408_v54 = vadd.f32 %v407_v41, %v7548_v38  ;;  %v457_v63 = vadd.f32 %v456_v45, %v7550_v43 }
  0xb8   : > { %v646_v50 = vmax.f32 %v559_v48, 0.0  ;;  %v647_v51 = vmax.f32 %v608_v49, 0.0 }
  0xb9   : > { %v494_v59 = vmax.f32 %v408_v54, 0.0  ;;  %v495_v1 = vmax.f32 %v457_v63, 0.0 }
  0xba   : > { %v7572_v52 = vpack.c.bf16 %v646_v50, %v644_v33  ;;  %v7574_v53 = vpack.c.bf16 %v647_v51, %v645_v44 }
  0xbd   : > { %v561_v18 = vpop.f32.mrf.mxu2  ;;  %v610_v21 = vpop.f32.mrf.mxu3 }
  0xbe   : > { %v409_v25 = vpop.f32.mrf.mxu0  ;;  %v458_v34 = vpop.f32.mrf.mxu1  ;;  %v562_v19 = vadd.f32 %v561_v18, %v7548_v38  ;;  %v611_v22 = vadd.f32 %v610_v21, %v7550_v43 }
  0xbf   : > { %v410_v47 = vadd.f32 %v409_v25, %v7548_v38  ;;  %v459_v56 = vadd.f32 %v458_v34, %v7550_v43 }
  0xc0   : > { %v648_v55 = vmax.f32 %v562_v19, 0.0  ;;  %v649_v57 = vmax.f32 %v611_v22, 0.0 }
  0xc1   : > { %v496_v10 = vmax.f32 %v410_v47, 0.0  ;;  %v497_v13 = vmax.f32 %v459_v56, 0.0 }
  0xc3   : > { %v709_v32 = vpack.c.bf16 %v496_v10, %v494_v59  ;;  %v710_v37 = vpack.c.bf16 %v497_v13, %v495_v1 }
  0xc5   : > { %904 = vmatmul.bf16.gmra.mxu0 %v709_v32  ;;  %953 = vmatmul.bf16.gmra.mxu1 %v710_v37  ;;  %v563_v42 = vpop.f32.mrf.mxu2  ;;  %v612_v46 = vpop.f32.mrf.mxu3 }
  0xc6   : > { %1002 = vmatmul.bf16.gmra.mxu2 %v709_v32  ;;  %1051 = vmatmul.bf16.gmra.mxu3 %v710_v37  ;;  %v412_v58 = vpop.f32.mrf.mxu0  ;;  %v461_v60 = vpop.f32.mrf.mxu1  ;;  %v564_v61 = vadd.f32 %v563_v42, %v7548_v38  ;;  %v613_v62 = vadd.f32 %v612_v46, %v7550_v43 }
  0xc7   : > { %v413_v5 = vadd.f32 %v412_v58, %v7548_v38  ;;  %v462_v6 = vadd.f32 %v461_v60, %v7550_v43 }
  0xc8   : > { %v650_v0 = vmax.f32 %v564_v61, 0.0  ;;  %v651_v2 = vmax.f32 %v613_v62, 0.0 }
  0xc9   : > { %v498_v20 = vmax.f32 %v413_v5, 0.0  ;;  %v499_v23 = vmax.f32 %v462_v6, 0.0 }
  0xca   : > { %v7584_v3 = vpack.c.bf16 %v650_v0, %v648_v55  ;;  %v7586_v4 = vpack.c.bf16 %v651_v2, %v649_v57 }
  0xcd   : > { %v566_v7 = vpop.f32.mrf.mxu2  ;;  %v615_v8 = vpop.f32.mrf.mxu3 }
  0xce   : > { %v414_v12 = vpop.f32.mrf.mxu0  ;;  %v463_v14 = vpop.f32.mrf.mxu1  ;;  %v567_v27 = vadd.f32 %v566_v7, %v7548_v38  ;;  %v616_v28 = vadd.f32 %v615_v8, %v7550_v43 }
  0xcf   : > { %v415_v15 = vadd.f32 %v414_v12, %v7548_v38  ;;  %v464_v16 = vadd.f32 %v463_v14, %v7550_v43 }
  0xd0   : > { %v652_v36 = vmax.f32 %v567_v27, 0.0  ;;  %v653_v39 = vmax.f32 %v616_v28, 0.0 }
  0xd1   : > { %v500_v24 = vmax.f32 %v415_v15, 0.0  ;;  %v501_v26 = vmax.f32 %v464_v16, 0.0 }
  0xd3   : > { %v711_v29 = vpack.c.bf16 %v500_v24, %v498_v20  ;;  %v712_v30 = vpack.c.bf16 %v501_v26, %v499_v23 }
  0xd5   : > { %909 = vmatmul.bf16.gmra.mxu0 %v711_v29  ;;  %958 = vmatmul.bf16.gmra.mxu1 %v712_v30  ;;  %v568_v31 = vpop.f32.mrf.mxu2  ;;  %v617_v35 = vpop.f32.mrf.mxu3 }
  0xd6   : > { %1007 = vmatmul.bf16.gmra.mxu2 %v711_v29  ;;  %1056 = vmatmul.bf16.gmra.mxu3 %v712_v30  ;;  %v417_v40 = vpop.f32.mrf.mxu0  ;;  %v466_v17 = vpop.f32.mrf.mxu1  ;;  %v569_v33 = vadd.f32 %v568_v31, %v7548_v38  ;;  %v618_v44 = vadd.f32 %v617_v35, %v7550_v43 }
  0xd7   : > { %v418_v50 = vadd.f32 %v417_v40, %v7548_v38  ;;  %v467_v51 = vadd.f32 %v466_v17, %v7550_v43 }
  0xd8   : > { %v654_v41 = vmax.f32 %v569_v33, 0.0  ;;  %v655_v45 = vmax.f32 %v618_v44, 0.0 }
  0xd9   : > { %v502_v47 = vmax.f32 %v418_v50, 0.0  ;;  %v503_v56 = vmax.f32 %v467_v51, 0.0 }
  0xda   : > { %v7596_v48 = vpack.c.bf16 %v654_v41, %v652_v36  ;;  %v7598_v49 = vpack.c.bf16 %v655_v45, %v653_v39 }
  0xdd   : > { %v571_v54 = vpop.f32.mrf.mxu2  ;;  %v620_v63 = vpop.f32.mrf.mxu3 }
  0xde   : > { %v419_v18 = vpop.f32.mrf.mxu0  ;;  %v468_v21 = vpop.f32.mrf.mxu1  ;;  %v572_v10 = vadd.f32 %v571_v54, %v7548_v38  ;;  %v621_v13 = vadd.f32 %v620_v63, %v7550_v43 }
  0xdf   : > { %v420_v25 = vadd.f32 %v419_v18, %v7548_v38  ;;  %v469_v34 = vadd.f32 %v468_v21, %v7550_v43 }
  0xe0   : > { %v656_v42 = vmax.f32 %v572_v10, 0.0  ;;  %v657_v46 = vmax.f32 %v621_v13, 0.0 }
  0xe1   : > { %v504_v59 = vmax.f32 %v420_v25, 0.0  ;;  %v505_v1 = vmax.f32 %v469_v34, 0.0 }
  0xe3   : > { %v713_v19 = vpack.c.bf16 %v504_v59, %v502_v47  ;;  %v714_v22 = vpack.c.bf16 %v505_v1, %v503_v56 }
  0xe5   : > { %914 = vmatmul.bf16.gmra.mxu0 %v713_v19  ;;  %963 = vmatmul.bf16.gmra.mxu1 %v714_v22  ;;  %v573_v32 = vpop.f32.mrf.mxu2  ;;  %v622_v37 = vpop.f32.mrf.mxu3 }
  0xe6   : > { %1012 = vmatmul.bf16.gmra.mxu2 %v713_v19  ;;  %1061 = vmatmul.bf16.gmra.mxu3 %v714_v22  ;;  %v422_v55 = vpop.f32.mrf.mxu0  ;;  %v471_v57 = vpop.f32.mrf.mxu1  ;;  %v574_v58 = vadd.f32 %v573_v32, %v7548_v38  ;;  %v623_v60 = vadd.f32 %v622_v37, %v7550_v43 }
  0xe7   : > { %v423_v5 = vadd.f32 %v422_v55, %v7548_v38  ;;  %v472_v6 = vadd.f32 %v471_v57, %v7550_v43 }
  0xe8   : > { %v658_v61 = vmax.f32 %v574_v58, 0.0  ;;  %v659_v62 = vmax.f32 %v623_v60, 0.0 }
  0xe9   : > { %v506_v20 = vmax.f32 %v423_v5, 0.0  ;;  %v507_v23 = vmax.f32 %v472_v6, 0.0  ;;  %v6802_v5 = vld [vmem:[%s10627_s3 + $0x174] sm:$0xf]  ;;  %v5990_v6 = vld [vmem:[%s10627_s3 + $0x178] sm:$0xf0] }
  0xea   : > { %v7608_v0 = vpack.c.bf16 %v658_v61, %v656_v42  ;;  %v7610_v2 = vpack.c.bf16 %v659_v62, %v657_v46 }
  0xed   : > { %v576_v7 = vpop.f32.mrf.mxu2  ;;  %v625_v8 = vpop.f32.mrf.mxu3 }
  0xee   : > { %v424_v12 = vpop.f32.mrf.mxu0  ;;  %v473_v14 = vpop.f32.mrf.mxu1  ;;  %v577_v27 = vadd.f32 %v576_v7, %v7548_v38  ;;  %v626_v28 = vadd.f32 %v625_v8, %v7550_v43  ;;  %v6818_v7 = vld [vmem:[%s10627_s3 + $0x1f4] sm:$0xf] }
  0xef   : > { %v425_v15 = vadd.f32 %v424_v12, %v7548_v38  ;;  %v474_v16 = vadd.f32 %v473_v14, %v7550_v43  ;;  %v7641_v14 = vor.u32 %v6802_v5, %v5990_v6  ;;  %v6044_v5 = vld [vmem:[%s10627_s3 + $0x1e0] sm:$0xf] }
  0xf0   : > { %v660_v36 = vmax.f32 %v577_v27, 0.0  ;;  %v661_v39 = vmax.f32 %v626_v28, 0.0 }
  0xf1   : > { %v508_v24 = vmax.f32 %v425_v15, 0.0  ;;  %v509_v26 = vmax.f32 %v474_v16, 0.0  ;;  %v6054_v15 = vld [vmem:[%s10627_s3 + $0x1f8] sm:$0xf0]  ;;  %1672 = vmatpush.bf16.msrb.mxu2 %v7641_v14 }
  0xf2   : > { %v7646_v16 = vor.u32 %v6818_v7, %v6054_v15  ;;  %v6817_v7 = vld [vmem:[%s10627_s3 + $0x1e4] sm:$0xf0] }
  0xf3   : > { %v715_v29 = vpack.c.bf16 %v508_v24, %v506_v20  ;;  %v716_v30 = vpack.c.bf16 %v509_v26, %v507_v23 }
  0xf4   : > { %1721 = vmatpush.bf16.msrb.mxu3 %v7646_v16 }
  0xf5   : > { %919 = vmatmul.bf16.gmra.mxu0 %v715_v29  ;;  %968 = vmatmul.bf16.gmra.mxu1 %v716_v30  ;;  %v578_v31 = vpop.f32.mrf.mxu2  ;;  %v627_v35 = vpop.f32.mrf.mxu3 }
  0xf6   : > { %1017 = vmatmul.bf16.gmra.mxu2 %v715_v29  ;;  %1066 = vmatmul.bf16.gmra.mxu3 %v716_v30  ;;  %v427_v40 = vpop.f32.mrf.mxu0  ;;  %v476_v17 = vpop.f32.mrf.mxu1  ;;  %v579_v33 = vadd.f32 %v578_v31, %v7548_v38  ;;  %v628_v44 = vadd.f32 %v627_v35, %v7550_v43 }
  0xf7   : > { %v428_v54 = vadd.f32 %v427_v40, %v7548_v38  ;;  %v477_v63 = vadd.f32 %v476_v17, %v7550_v43 }
  0xf8   : > { %v662_v41 = vmax.f32 %v579_v33, 0.0  ;;  %v663_v45 = vmax.f32 %v628_v44, 0.0  ;;  %v5988_v33 = vld [vmem:[%s10627_s3 + $0x170] sm:$0xf]  ;;  %v6803_v44 = vld [vmem:[%s10627_s3 + $0x174] sm:$0xf0] }
  0xf9   : > { %v510_v59 = vmax.f32 %v428_v54, 0.0  ;;  %v511_v1 = vmax.f32 %v477_v63, 0.0  ;;  %v7666_v54 = vor.u32 %v6803_v44, %v5988_v33  ;;  %v6052_v63 = vld [vmem:[%s10627_s3 + $0x1f0] sm:$0xf] }
  0xfa   : > { %v7620_v50 = vpack.c.bf16 %v662_v41, %v660_v36  ;;  %v7622_v51 = vpack.c.bf16 %v663_v45, %v661_v39 }
  0xfb   : > { %1574 = vmatpush.bf16.msrb.mxu0 %v7666_v54 }
  0xfd   : > { %v581_v18 = vpop.f32.mrf.mxu2  ;;  %v630_v21 = vpop.f32.mrf.mxu3 }
  0xfe   : > { %v429_v25 = vpop.f32.mrf.mxu0  ;;  %v478_v34 = vpop.f32.mrf.mxu1  ;;  %v582_v19 = vadd.f32 %v581_v18, %v7548_v38  ;;  %v631_v22 = vadd.f32 %v630_v21, %v7550_v43  ;;  %v6819_v18 = vld [vmem:[%s10627_s3 + $0x1f4] sm:$0xf0] }
  0xff   : > { %v430_v47 = vadd.f32 %v429_v25, %v7548_v38  ;;  %v479_v56 = vadd.f32 %v478_v34, %v7550_v43  ;;  %v7674_v34 = vor.u32 %v6819_v18, %v6052_v63  ;;  %v5972_v18 = vld [vmem:[%s10627_s3 + $0x150] sm:$0xf] }
 0x100   : > { %v664_v55 = vmax.f32 %v582_v19, 0.0  ;;  %v665_v57 = vmax.f32 %v631_v22, 0.0 }
 0x101   : > { %v512_v10 = vmax.f32 %v430_v47, 0.0  ;;  %v513_v13 = vmax.f32 %v479_v56, 0.0  ;;  %1623 = vmatpush.bf16.msrb.mxu1 %v7674_v34 }
 0x103   : > { %v717_v32 = vpack.c.bf16 %v512_v10, %v510_v59  ;;  %v718_v37 = vpack.c.bf16 %v513_v13, %v511_v1 }
 0x105   : > { %924 = vmatmul.bf16.gmra.mxu0 %v717_v32  ;;  %973 = vmatmul.bf16.gmra.mxu1 %v718_v37  ;;  %v583_v42 = vpop.f32.mrf.mxu2  ;;  %v632_v46 = vpop.f32.mrf.mxu3 }
 0x106   : > { %1022 = vmatmul.bf16.gmra.mxu2 %v717_v32  ;;  %1071 = vmatmul.bf16.gmra.mxu3 %v718_v37  ;;  %v432_v58 = vpop.f32.mrf.mxu0  ;;  %v481_v60 = vpop.f32.mrf.mxu1  ;;  %v584_v61 = vadd.f32 %v583_v42, %v7548_v38  ;;  %v633_v62 = vadd.f32 %v632_v46, %v7550_v43  ;;  %v6800_v32 = vld [vmem:[%s10627_s3 + $0x164] sm:$0xf]  ;;  %v5982_v37 = vld [vmem:[%s10627_s3 + $0x168] sm:$0xf0] }
 0x107   : > { %v433_v24 = vadd.f32 %v432_v58, %v7548_v38  ;;  %v482_v26 = vadd.f32 %v481_v60, %v7550_v43  ;;  %v7686_v42 = vor.u32 %v6800_v32, %v5982_v37  ;;  %v704_v58 = vld [vmem:[%s10628_s4] sm:$0x3] }
 0x108   : > { %v666_v8 = vmax.f32 %v584_v61, 0.0  ;;  %v667_v12 = vmax.f32 %v633_v62, 0.0  ;;  %v7705_v60 = vperm.slane %v704_v58, 0  ;;  %v5980_v61 = vld [vmem:[%s10627_s3 + $0x160] sm:$0xf] }
 0x109   : > { %v514_v36 = vmax.f32 %v433_v24, 0.0  ;;  %v515_v39 = vmax.f32 %v482_v26, 0.0  ;;  %1673 = vmatpush.bf16.msrb.mxu2 %v7686_v42  ;;  %v6801_v62 = vld [vmem:[%s10627_s3 + $0x164] sm:$0xf0] }
 0x10a   : > { %v7649_v20 = vpack.c.bf16 %v666_v8, %v664_v55  ;;  %v7651_v23 = vpack.c.bf16 %v667_v12, %v665_v57  ;;  %v7716_v6 = vor.u32 %v6801_v62, %v5980_v61  ;;  %v7721_v8 = vor.u32 %v6817_v7, %v6044_v5  ;;  %v6796_v62 = vld [vmem:[%s10627_s3 + $0x144] sm:$0xf]  ;;  %v5966_v5 = vld [vmem:[%s10627_s3 + $0x148] sm:$0xf0] }
 0x10c   : > { %1575 = vmatpush.bf16.msrb.mxu0 %v7716_v6  ;;  %1624 = vmatpush.bf16.msrb.mxu1 %v7721_v8 }
 0x10d   : > { %v586_v27 = vpop.f32.mrf.mxu2  ;;  %v635_v28 = vpop.f32.mrf.mxu3 }
 0x10e   : > { %v434_v29 = vpop.f32.mrf.mxu0  ;;  %v483_v30 = vpop.f32.mrf.mxu1  ;;  %v587_v41 = vadd.f32 %v586_v27, %v7548_v38  ;;  %v636_v45 = vadd.f32 %v635_v28, %v7550_v43  ;;  %v7730_v27 = vperm.slane %v704_v58, 1  ;;  %v6798_v28 = vld [vmem:[%s10627_s3 + $0x154] sm:$0xf] }
 0x10f   : > { %v435_v31 = vadd.f32 %v434_v29, %v7548_v38  ;;  %v484_v35 = vadd.f32 %v483_v30, %v7550_v43  ;;  %v5974_v29 = vld [vmem:[%s10627_s3 + $0x158] sm:$0xf0] }
 0x110   : > { %v668_v59 = vmax.f32 %v587_v41, 0.0  ;;  %v669_v1 = vmax.f32 %v636_v45, 0.0  ;;  %v7738_v30 = vor.u32 %v6798_v28, %v5974_v29 }
 0x111   : > { %v516_v40 = vmax.f32 %v435_v31, 0.0  ;;  %v517_v17 = vmax.f32 %v484_v35, 0.0  ;;  %v6814_v31 = vld [vmem:[%s10627_s3 + $0x1d4] sm:$0xf] }
 0x112   : > { %1674 = vmatpush.bf16.msrb.mxu2 %v7738_v30 }
 0x113   : > { %v719_v21 = vpack.c.bf16 %v516_v40, %v514_v36  ;;  %v720_v25 = vpack.c.bf16 %v517_v17, %v515_v39 }
 0x115   : > { %929 = vmatmul.bf16.gmra.mxu0 %v719_v21  ;;  %978 = vmatmul.bf16.gmra.mxu1 %v720_v25  ;;  %v588_v47 = vpop.f32.mrf.mxu2  ;;  %v637_v56 = vpop.f32.mrf.mxu3 }
 0x116   : > { %1027 = vmatmul.bf16.gmra.mxu2 %v719_v21  ;;  %1076 = vmatmul.bf16.gmra.mxu3 %v720_v25  ;;  %v589_v10 = vadd.f32 %v588_v47, %v7548_v38  ;;  %v638_v13 = vadd.f32 %v637_v56, %v7550_v43  ;;  %v6816_v38 = vld [vmem:[%s10627_s3 + $0x1e4] sm:$0xf]  ;;  %v6046_v43 = vld [vmem:[%s10627_s3 + $0x1e8] sm:$0xf0]  ;;  %v6799_v21 = vld [vmem:[%s10627_s3 + $0x154] sm:$0xf0] }
 0x117   : > { %v7694_v46 = vor.u32 %v6816_v38, %v6046_v43  ;;  %v7758_v25 = vor.u32 %v6799_v21, %v5972_v18  ;;  %v6036_v47 = vld [vmem:[%s10627_s3 + $0x1d0] sm:$0xf]  ;;  %v6815_v56 = vld [vmem:[%s10627_s3 + $0x1d4] sm:$0xf0] }
 0x118   : > { %v670_v19 = vmax.f32 %v589_v10, 0.0  ;;  %v671_v22 = vmax.f32 %v638_v13, 0.0  ;;  %v7768_v13 = vor.u32 %v6815_v56, %v6036_v47 }
 0x119   : > { %1722 = vmatpush.bf16.msrb.mxu3 %v7694_v46  ;;  %1576 = vmatpush.bf16.msrb.mxu0 %v7758_v25 }
 0x11a   : > { %v7696_v55 = vpack.c.bf16 %v670_v19, %v668_v59  ;;  %v7698_v57 = vpack.c.bf16 %v671_v22, %v669_v1  ;;  %1625 = vmatpush.bf16.msrb.mxu1 %v7768_v13 }
 0x122   : > { %v895_v12 = vpop.f32.mrf.mxu0  ;;  %v944_v15 = vpop.f32.mrf.mxu1 }
 0x123   : > { %v896_v24 = vadd.f32 %v895_v12, %v7705_v60  ;;  %v7786_v12 = vor.u32 %v6796_v62, %v5966_v5  ;;  %v6810_v62 = vld [vmem:[%s10627_s3 + $0x1b4] sm:$0xf] }
 0x125   : > { %v945_v26 = vadd.f32 %v944_v15, %v896_v24  ;;  %1138 = vmatmul.bf16.vlgmr.msra.gmra.mxu0 %v7560_v9  ;;  %1187 = vmatmul.bf16.vlgmr.msra.gmra.mxu1 %v7562_v11  ;;  %v6812_v15 = vld [vmem:[%s10627_s3 + $0x1c4] sm:$0xf] }
 0x126   : > { %1236 = vmatmul.bf16.vlgmr.msra.gmra.mxu2 %v7560_v9  ;;  %1285 = vmatmul.bf16.vlgmr.msra.gmra.mxu3 %v7562_v11  ;;  %v6038_v9 = vld [vmem:[%s10627_s3 + $0x1d8] sm:$0xf0] }
 0x127   : > { %v7746_v36 = vor.u32 %v6814_v31, %v6038_v9  ;;  %v1082_v45 = vmax.f32 %v945_v26, 0.0  ;;  %1675 = vmatpush.bf16.msrb.mxu2 %v7786_v12 }
 0x129   : > { %v993_v11 = vpop.f32.mrf.mxu2  ;;  %v1042_v35 = vpop.f32.mrf.mxu3  ;;  %1723 = vmatpush.bf16.msrb.mxu3 %v7746_v36 }
 0x12a   : > { %v994_v39 = vadd.f32 %v993_v11, %v7730_v27  ;;  %v897_v40 = vpop.f32.mrf.mxu0  ;;  %v946_v17 = vpop.f32.mrf.mxu1 }
 0x12b   : > { %v898_v33 = vadd.f32 %v897_v40, %v7705_v60 }
 0x12c   : > { %v1043_v44 = vadd.f32 %v1042_v35, %v994_v39 }
 0x12d   : > { %v947_v41 = vadd.f32 %v946_v17, %v898_v33  ;;  %v5964_v17 = vld [vmem:[%s10627_s3 + $0x140] sm:$0xf]  ;;  %v6797_v33 = vld [vmem:[%s10627_s3 + $0x144] sm:$0xf0] }
 0x12e   : > { %v1083_v58 = vmax.f32 %v1043_v44, 0.0  ;;  %v7806_v44 = vor.u32 %v6797_v33, %v5964_v17  ;;  %v6020_v33 = vld [vmem:[%s10627_s3 + $0x1b0] sm:$0xf] }
 0x12f   : > { %v1084_v63 = vmax.f32 %v947_v41, 0.0  ;;  %v6028_v41 = vld [vmem:[%s10627_s3 + $0x1c0] sm:$0xf] }
 0x130   : > { %1577 = vmatpush.bf16.msrb.mxu0 %v7806_v44 }
 0x131   : > { %v7766_v59 = vpack.c.bf16 %v1084_v63, %v1082_v45  ;;  %v995_v1 = vpop.f32.mrf.mxu2  ;;  %v1044_v10 = vpop.f32.mrf.mxu3  ;;  %v6813_v45 = vld [vmem:[%s10627_s3 + $0x1c4] sm:$0xf0] }
 0x132   : > { %v996_v19 = vadd.f32 %v995_v1, %v7730_v27  ;;  %v900_v22 = vpop.f32.mrf.mxu0  ;;  %v949_v32 = vpop.f32.mrf.mxu1  ;;  %v7814_v21 = vor.u32 %v6813_v45, %v6028_v41  ;;  %v6811_v41 = vld [vmem:[%s10627_s3 + $0x1b4] sm:$0xf0] }
 0x133   : > { %v901_v37 = vadd.f32 %v900_v22, %v7705_v60 }
 0x134   : > { %v1045_v38 = vadd.f32 %v1044_v10, %v996_v19  ;;  %1626 = vmatpush.bf16.msrb.mxu1 %v7814_v21 }
 0x135   : > { %v950_v43 = vadd.f32 %v949_v32, %v901_v37  ;;  %1143 = vmatmul.bf16.gmra.mxu0 %v7572_v52  ;;  %1192 = vmatmul.bf16.gmra.mxu1 %v7574_v53 }
 0x136   : > { %v1085_v61 = vmax.f32 %v1045_v38, 0.0  ;;  %1241 = vmatmul.bf16.gmra.mxu2 %v7572_v52  ;;  %1290 = vmatmul.bf16.gmra.mxu3 %v7574_v53  ;;  %v6030_v52 = vld [vmem:[%s10627_s3 + $0x1c8] sm:$0xf0] }
 0x137   : > { %v7794_v26 = vor.u32 %v6812_v15, %v6030_v52  ;;  %v1086_v39 = vmax.f32 %v950_v43, 0.0  ;;  %v6794_v43 = vld [vmem:[%s10627_s3 + $0x134] sm:$0xf] }
 0x138   : > { %v7784_v7 = vpack.c.bf16 %v1085_v61, %v1083_v58  ;;  %v5958_v58 = vld [vmem:[%s10627_s3 + $0x138] sm:$0xf0] }
 0x139   : > { %v998_v53 = vpop.f32.mrf.mxu2  ;;  %v1047_v24 = vpop.f32.mrf.mxu3  ;;  %1724 = vmatpush.bf16.msrb.mxu3 %v7794_v26  ;;  %v7832_v61 = vor.u32 %v6794_v43, %v5958_v58  ;;  %v6792_v58 = vld [vmem:[%s10627_s3 + $0x124] sm:$0xf] }
 0x13a   : > { %v999_v28 = vadd.f32 %v998_v53, %v7730_v27  ;;  %v902_v29 = vpop.f32.mrf.mxu0  ;;  %v951_v31 = vpop.f32.mrf.mxu1 }
 0x13b   : > { %v903_v9 = vadd.f32 %v902_v29, %v7705_v60  ;;  %1676 = vmatpush.bf16.msrb.mxu2 %v7832_v61 }
 0x13c   : > { %v1048_v11 = vadd.f32 %v1047_v24, %v999_v28 }
 0x13d   : > { %v952_v35 = vadd.f32 %v951_v31, %v903_v9 }
 0x13e   : > { %v1087_v37 = vmax.f32 %v1048_v11, 0.0 }
 0x13f   : > { %v1088_v40 = vmax.f32 %v952_v35, 0.0 }
 0x141   : > { %v1000_v63 = vpop.f32.mrf.mxu2  ;;  %v1049_v18 = vpop.f32.mrf.mxu3  ;;  %v7816_v47 = vpack.c.bf16 %v1088_v40, %v1086_v39  ;;  %v5956_v39 = vld [vmem:[%s10627_s3 + $0x130] sm:$0xf]  ;;  %v6795_v40 = vld [vmem:[%s10627_s3 + $0x134] sm:$0xf0] }
 0x142   : > { %v1001_v56 = vadd.f32 %v1000_v63, %v7730_v27  ;;  %v905_v1 = vpop.f32.mrf.mxu0  ;;  %v954_v10 = vpop.f32.mrf.mxu1  ;;  %v7854_v17 = vor.u32 %v6795_v40, %v5956_v39 }
 0x143   : > { %v906_v19 = vadd.f32 %v905_v1, %v7705_v60 }
 0x144   : > { %v1050_v22 = vadd.f32 %v1049_v18, %v1001_v56  ;;  %v7862_v18 = vor.u32 %v6811_v41, %v6020_v33  ;;  %1578 = vmatpush.bf16.msrb.mxu0 %v7854_v17  ;;  %v5948_v33 = vld [vmem:[%s10627_s3 + $0x120] sm:$0xf]  ;;  %v6793_v41 = vld [vmem:[%s10627_s3 + $0x124] sm:$0xf0] }
 0x145   : > { %v955_v32 = vadd.f32 %v954_v10, %v906_v19  ;;  %1148 = vmatmul.bf16.gmra.mxu0 %v7584_v3  ;;  %1197 = vmatmul.bf16.gmra.mxu1 %v7586_v4 }
 0x146   : > { %v1089_v38 = vmax.f32 %v1050_v22, 0.0  ;;  %1246 = vmatmul.bf16.gmra.mxu2 %v7584_v3  ;;  %1295 = vmatmul.bf16.gmra.mxu3 %v7586_v4  ;;  %v6022_v3 = vld [vmem:[%s10627_s3 + $0x1b8] sm:$0xf0] }
 0x147   : > { %v7842_v52 = vor.u32 %v6810_v62, %v6022_v3  ;;  %v1090_v11 = vmax.f32 %v955_v32, 0.0  ;;  %1627 = vmatpush.bf16.msrb.mxu1 %v7862_v18  ;;  %v5950_v62 = vld [vmem:[%s10627_s3 + $0x128] sm:$0xf0] }
 0x148   : > { %v7840_v5 = vpack.c.bf16 %v1089_v38, %v1087_v37  ;;  %v7880_v3 = vor.u32 %v6792_v58, %v5950_v62 }
 0x149   : > { %v1003_v4 = vpop.f32.mrf.mxu2  ;;  %v1052_v15 = vpop.f32.mrf.mxu3  ;;  %1725 = vmatpush.bf16.msrb.mxu3 %v7842_v52 }
 0x14a   : > { %v1004_v53 = vadd.f32 %v1003_v4, %v7730_v27  ;;  %v907_v24 = vpop.f32.mrf.mxu0  ;;  %v956_v28 = vpop.f32.mrf.mxu1  ;;  %v6808_v4 = vld [vmem:[%s10627_s3 + $0x1a4] sm:$0xf]  ;;  %1677 = vmatpush.bf16.msrb.mxu2 %v7880_v3 }
 0x14b   : > { %v908_v29 = vadd.f32 %v907_v24, %v7705_v60 }
 0x14c   : > { %v1053_v31 = vadd.f32 %v1052_v15, %v1004_v53 }
 0x14d   : > { %v957_v9 = vadd.f32 %v956_v28, %v908_v29 }
 0x14e   : > { %v1091_v38 = vmax.f32 %v1053_v31, 0.0 }
 0x14f   : > { %v1092_v35 = vmax.f32 %v957_v9, 0.0 }
 0x151   : > { %v1005_v45 = vpop.f32.mrf.mxu2  ;;  %v1054_v63 = vpop.f32.mrf.mxu3  ;;  %v7864_v56 = vpack.c.bf16 %v1092_v35, %v1090_v11 }
 0x152   : > { %v1006_v1 = vadd.f32 %v1005_v45, %v7730_v27  ;;  %v910_v10 = vpop.f32.mrf.mxu0  ;;  %v959_v19 = vpop.f32.mrf.mxu1  ;;  %v7902_v45 = vor.u32 %v6793_v41, %v5948_v33 }
 0x153   : > { %v911_v22 = vadd.f32 %v910_v10, %v7705_v60 }
 0x154   : > { %v1055_v32 = vadd.f32 %v1054_v63, %v1006_v1  ;;  %v6012_v63 = vld [vmem:[%s10627_s3 + $0x1a0] sm:$0xf]  ;;  %v6809_v1 = vld [vmem:[%s10627_s3 + $0x1a4] sm:$0xf0]  ;;  %1579 = vmatpush.bf16.msrb.mxu0 %v7902_v45 }
 0x155   : > { %v960_v37 = vadd.f32 %v959_v19, %v911_v22  ;;  %1153 = vmatmul.bf16.gmra.mxu0 %v7596_v48  ;;  %1202 = vmatmul.bf16.gmra.mxu1 %v7598_v49  ;;  %v7910_v22 = vor.u32 %v6809_v1, %v6012_v63 }
 0x156   : > { %v1093_v43 = vmax.f32 %v1055_v32, 0.0  ;;  %1251 = vmatmul.bf16.gmra.mxu2 %v7596_v48  ;;  %1300 = vmatmul.bf16.gmra.mxu3 %v7598_v49  ;;  %v6014_v48 = vld [vmem:[%s10627_s3 + $0x1a8] sm:$0xf0] }
 0x157   : > { %v7890_v24 = vor.u32 %v6808_v4, %v6014_v48  ;;  %v1094_v39 = vmax.f32 %v960_v37, 0.0  ;;  %1628 = vmatpush.bf16.msrb.mxu1 %v7910_v22 }
 0x158   : > { %v7888_v15 = vpack.c.bf16 %v1093_v43, %v1091_v38 }
 0x159   : > { %v1008_v49 = vpop.f32.mrf.mxu2  ;;  %v1057_v53 = vpop.f32.mrf.mxu3  ;;  %1726 = vmatpush.bf16.msrb.mxu3 %v7890_v24 }
 0x15a   : > { %v1009_v28 = vadd.f32 %v1008_v49, %v7730_v27  ;;  %v912_v29 = vpop.f32.mrf.mxu0  ;;  %v961_v31 = vpop.f32.mrf.mxu1 }
 0x15b   : > { %v913_v9 = vadd.f32 %v912_v29, %v7705_v60 }
 0x15c   : > { %v1058_v11 = vadd.f32 %v1057_v53, %v1009_v28  ;;  %v6790_v53 = vld [vmem:[%s10627_s3 + $0x114] sm:$0xf]  ;;  %v5942_v28 = vld [vmem:[%s10627_s3 + $0x118] sm:$0xf0] }
 0x15d   : > { %v962_v35 = vadd.f32 %v961_v31, %v913_v9  ;;  %v7928_v29 = vor.u32 %v6790_v53, %v5942_v28  ;;  %v6806_v31 = vld [vmem:[%s10627_s3 + $0x194] sm:$0xf] }
 0x15e   : > { %v1095_v48 = vmax.f32 %v1058_v11, 0.0 }
 0x15f   : > { %v1096_v40 = vmax.f32 %v962_v35, 0.0  ;;  %1678 = vmatpush.bf16.msrb.mxu2 %v7928_v29 }
 0x161   : > { %v1010_v10 = vpop.f32.mrf.mxu2  ;;  %v1059_v19 = vpop.f32.mrf.mxu3  ;;  %v7912_v32 = vpack.c.bf16 %v1096_v40, %v1094_v39 }
 0x162   : > { %v1011_v37 = vadd.f32 %v1010_v10, %v7730_v27  ;;  %v915_v38 = vpop.f32.mrf.mxu0  ;;  %v964_v43 = vpop.f32.mrf.mxu1 }
 0x163   : > { %v916_v58 = vadd.f32 %v915_v38, %v7705_v60  ;;  %v6791_v38 = vld [vmem:[%s10627_s3 + $0x114] sm:$0xf0] }
 0x164   : > { %v1060_v62 = vadd.f32 %v1059_v19, %v1011_v37  ;;  %v5940_v37 = vld [vmem:[%s10627_s3 + $0x110] sm:$0xf] }
 0x165   : > { %v965_v4 = vadd.f32 %v964_v43, %v916_v58  ;;  %1158 = vmatmul.bf16.gmra.mxu0 %v7608_v0  ;;  %1207 = vmatmul.bf16.gmra.mxu1 %v7610_v2  ;;  %v7950_v43 = vor.u32 %v6791_v38, %v5940_v37  ;;  %v6004_v58 = vld [vmem:[%s10627_s3 + $0x190] sm:$0xf] }
 0x166   : > { %v1097_v49 = vmax.f32 %v1060_v62, 0.0  ;;  %1256 = vmatmul.bf16.gmra.mxu2 %v7608_v0  ;;  %1305 = vmatmul.bf16.gmra.mxu3 %v7610_v2  ;;  %v6006_v0 = vld [vmem:[%s10627_s3 + $0x198] sm:$0xf0]  ;;  %v6807_v62 = vld [vmem:[%s10627_s3 + $0x194] sm:$0xf0] }
 0x167   : > { %v7938_v35 = vor.u32 %v6806_v31, %v6006_v0  ;;  %v1098_v10 = vmax.f32 %v965_v4, 0.0  ;;  %1580 = vmatpush.bf16.msrb.mxu0 %v7950_v43 }
 0x168   : > { %v7936_v9 = vpack.c.bf16 %v1097_v49, %v1095_v48  ;;  %v7958_v49 = vor.u32 %v6807_v62, %v6004_v58 }
 0x169   : > { %v1013_v2 = vpop.f32.mrf.mxu2  ;;  %v1062_v11 = vpop.f32.mrf.mxu3  ;;  %1727 = vmatpush.bf16.msrb.mxu3 %v7938_v35 }
 0x16a   : > { %v1014_v39 = vadd.f32 %v1013_v2, %v7730_v27  ;;  %v917_v40 = vpop.f32.mrf.mxu0  ;;  %v966_v33 = vpop.f32.mrf.mxu1  ;;  %1629 = vmatpush.bf16.msrb.mxu1 %v7958_v49 }
 0x16b   : > { %v918_v41 = vadd.f32 %v917_v40, %v7705_v60 }
 0x16c   : > { %v1063_v63 = vadd.f32 %v1062_v11, %v1014_v39 }
 0x16d   : > { %v967_v1 = vadd.f32 %v966_v33, %v918_v41  ;;  %v6788_v41 = vld [vmem:[%s10627_s3 + $0x104] sm:$0xf] }
 0x16e   : > { %v1099_v40 = vmax.f32 %v1063_v63, 0.0 }
 0x16f   : > { %v1100_v19 = vmax.f32 %v967_v1, 0.0  ;;  %v5934_v1 = vld [vmem:[%s10627_s3 + $0x108] sm:$0xf0] }
 0x171   : > { %v1015_v4 = vpop.f32.mrf.mxu2  ;;  %v1064_v48 = vpop.f32.mrf.mxu3  ;;  %v7960_v53 = vpack.c.bf16 %v1100_v19, %v1098_v10  ;;  %v7976_v10 = vor.u32 %v6788_v41, %v5934_v1  ;;  %v6804_v19 = vld [vmem:[%s10627_s3 + $0x184] sm:$0xf] }
 0x172   : > { %v1016_v28 = vadd.f32 %v1015_v4, %v7730_v27  ;;  %v920_v31 = vpop.f32.mrf.mxu0  ;;  %v969_v0 = vpop.f32.mrf.mxu1 }
 0x173   : > { %v921_v2 = vadd.f32 %v920_v31, %v7705_v60  ;;  %1679 = vmatpush.bf16.msrb.mxu2 %v7976_v10 }
 0x174   : > { %v1065_v11 = vadd.f32 %v1064_v48, %v1016_v28 }
 0x175   : > { %v970_v39 = vadd.f32 %v969_v0, %v921_v2  ;;  %1163 = vmatmul.bf16.gmra.mxu0 %v7620_v50  ;;  %1212 = vmatmul.bf16.gmra.mxu1 %v7622_v51 }
 0x176   : > { %v1101_v33 = vmax.f32 %v1065_v11, 0.0  ;;  %1261 = vmatmul.bf16.gmra.mxu2 %v7620_v50  ;;  %1310 = vmatmul.bf16.gmra.mxu3 %v7622_v51  ;;  %v5998_v50 = vld [vmem:[%s10627_s3 + $0x188] sm:$0xf0]  ;;  %v5932_v11 = vld [vmem:[%s10627_s3 + $0x100] sm:$0xf] }
 0x177   : > { %v7986_v38 = vor.u32 %v6804_v19, %v5998_v50  ;;  %1916 = vmatpush.bf16.msra.mxu2 %v7641_v14  ;;  %v1102_v0 = vmax.f32 %v970_v39, 0.0  ;;  %v5996_v14 = vld [vmem:[%s10627_s3 + $0x180] sm:$0xf] }
 0x178   : > { %v7984_v63 = vpack.c.bf16 %v1101_v33, %v1099_v40  ;;  %v6789_v40 = vld [vmem:[%s10627_s3 + $0x104] sm:$0xf0] }
 0x179   : > { %v1018_v51 = vpop.f32.mrf.mxu2  ;;  %v1067_v37 = vpop.f32.mrf.mxu3  ;;  %1728 = vmatpush.bf16.msrb.mxu3 %v7986_v38  ;;  %v8001_v33 = vor.u32 %v6789_v40, %v5932_v11 }
 0x17a   : > { %v1019_v58 = vadd.f32 %v1018_v51, %v7730_v27  ;;  %v922_v62 = vpop.f32.mrf.mxu0  ;;  %v971_v4 = vpop.f32.mrf.mxu1 }
 0x17b   : > { %v923_v48 = vadd.f32 %v922_v62, %v7705_v60  ;;  %1917 = vmatpush.bf16.msra.mxu2 %v7686_v42  ;;  %1581 = vmatpush.bf16.msrb.mxu0 %v8001_v33 }
 0x17c   : > { %v1068_v28 = vadd.f32 %v1067_v37, %v1019_v58 }
 0x17d   : > { %1965 = vmatpush.bf16.msra.mxu3 %v7646_v16  ;;  %v972_v31 = vadd.f32 %v971_v4, %v923_v48  ;;  %v6805_v16 = vld [vmem:[%s10627_s3 + $0x184] sm:$0xf0] }
 0x17e   : > { %v8010_v1 = vor.u32 %v6805_v16, %v5996_v14  ;;  %v1103_v62 = vmax.f32 %v1068_v28, 0.0 }
 0x17f   : > { %v1104_v2 = vmax.f32 %v972_v31, 0.0  ;;  %1818 = vmatpush.bf16.msra.mxu0 %v7666_v54  ;;  %1918 = vmatpush.bf16.msra.mxu2 %v7738_v30 }
 0x180   : > { %1630 = vmatpush.bf16.msrb.mxu1 %v8010_v1 }
 0x181   : > { %1966 = vmatpush.bf16.msra.mxu3 %v7694_v46  ;;  %v1020_v39 = vpop.f32.mrf.mxu2  ;;  %v1069_v41 = vpop.f32.mrf.mxu3  ;;  %v8012_v19 = vpack.c.bf16 %v1104_v2, %v1102_v0 }
 0x182   : > { %v1021_v42 = vadd.f32 %v1020_v39, %v7730_v27  ;;  %v925_v50 = vpop.f32.mrf.mxu0  ;;  %v974_v51 = vpop.f32.mrf.mxu1 }
 0x183   : > { %v926_v37 = vadd.f32 %v925_v50, %v7705_v60  ;;  %1819 = vmatpush.bf16.msra.mxu0 %v7716_v6  ;;  %1919 = vmatpush.bf16.msra.mxu2 %v7786_v12 }
 0x184   : > { %v1070_v58 = vadd.f32 %v1069_v41, %v1021_v42  ;;  %1867 = vmatpush.bf16.msra.mxu1 %v7674_v34 }
 0x185   : > { %v975_v46 = vadd.f32 %v974_v51, %v926_v37  ;;  %1168 = vmatmul.bf16.gmra.mxu0 %v7649_v20  ;;  %1217 = vmatmul.bf16.gmra.mxu1 %v7651_v23 }
 0x186   : > { %v1105_v4 = vmax.f32 %v1070_v58, 0.0  ;;  %1266 = vmatmul.bf16.gmra.mxu2 %v7649_v20  ;;  %1315 = vmatmul.bf16.gmra.mxu3 %v7651_v23 }
 0x187   : > { %1967 = vmatpush.bf16.msra.mxu3 %v7746_v36  ;;  %1820 = vmatpush.bf16.msra.mxu0 %v7758_v25 }
 0x188   : > { %1868 = vmatpush.bf16.msra.mxu1 %v7721_v8  ;;  %v8029_v54 = vpack.c.bf16 %v1105_v4, %v1103_v62  ;;  %1920 = vmatpush.bf16.msra.mxu2 %v7832_v61  ;;  %v1106_v8 = vmax.f32 %v975_v46, 0.0 }
 0x189   : > { %v1023_v34 = vpop.f32.mrf.mxu2  ;;  %v1072_v30 = vpop.f32.mrf.mxu3 }
 0x18a   : > { %v1024_v48 = vadd.f32 %v1023_v34, %v7730_v27  ;;  %v927_v28 = vpop.f32.mrf.mxu0  ;;  %v976_v31 = vpop.f32.mrf.mxu1 }
 0x18b   : > { %v928_v20 = vadd.f32 %v927_v28, %v7705_v60  ;;  %1968 = vmatpush.bf16.msra.mxu3 %v7794_v26  ;;  %1821 = vmatpush.bf16.msra.mxu0 %v7806_v44 }
 0x18c   : > { %v1073_v23 = vadd.f32 %v1072_v30, %v1024_v48  ;;  %1869 = vmatpush.bf16.msra.mxu1 %v7768_v13  ;;  %1921 = vmatpush.bf16.msra.mxu2 %v7880_v3 }
 0x18d   : > { %v977_v6 = vadd.f32 %v976_v31, %v928_v20 }
 0x18f   : > { %v1108_v36 = vmax.f32 %v977_v6, 0.0  ;;  %1969 = vmatpush.bf16.msra.mxu3 %v7842_v52  ;;  %1822 = vmatpush.bf16.msra.mxu0 %v7854_v17  ;;  %v1107_v52 = vmax.f32 %v1073_v23, 0.0 }
 0x190   : > { %1870 = vmatpush.bf16.msra.mxu1 %v7814_v21  ;;  %1922 = vmatpush.bf16.msra.mxu2 %v7928_v29 }
 0x191   : > { %v1025_v12 = vpop.f32.mrf.mxu2  ;;  %v1074_v25 = vpop.f32.mrf.mxu3  ;;  %v8041_v0 = vpack.c.bf16 %v1108_v36, %v1106_v8 }
 0x192   : > { %v1026_v26 = vadd.f32 %v1025_v12, %v7730_v27  ;;  %v930_v13 = vpop.f32.mrf.mxu0  ;;  %v979_v2 = vpop.f32.mrf.mxu1 }
 0x193   : > { %v931_v61 = vadd.f32 %v930_v13, %v7705_v60  ;;  %1970 = vmatpush.bf16.msra.mxu3 %v7890_v24  ;;  %1823 = vmatpush.bf16.msra.mxu0 %v7902_v45 }
 0x194   : > { %v1075_v44 = vadd.f32 %v1074_v25, %v1026_v26  ;;  %1871 = vmatpush.bf16.msra.mxu1 %v7862_v18  ;;  %1923 = vmatpush.bf16.msra.mxu2 %v7976_v10 }
 0x195   : > { %v980_v21 = vadd.f32 %v979_v2, %v931_v61  ;;  %1173 = vmatmul.bf16.gmra.mxu0 %v7696_v55  ;;  %1222 = vmatmul.bf16.gmra.mxu1 %v7698_v57 }
 0x196   : > { %v1109_v3 = vmax.f32 %v1075_v44, 0.0  ;;  %1271 = vmatmul.bf16.gmra.mxu2 %v7696_v55  ;;  %1320 = vmatmul.bf16.gmra.mxu3 %v7698_v57 }
 0x197   : > { %1971 = vmatpush.bf16.msra.mxu3 %v7938_v35  ;;  %1824 = vmatpush.bf16.msra.mxu0 %v7950_v43 }
 0x198   : > { %1872 = vmatpush.bf16.msra.mxu1 %v7910_v22  ;;  %v8056_v17 = vpack.c.bf16 %v1109_v3, %v1107_v52  ;;  %v1110_v22 = vmax.f32 %v980_v21, 0.0 }
 0x199   : > { %v1028_v18 = vpop.f32.mrf.mxu2  ;;  %v1077_v24 = vpop.f32.mrf.mxu3 }
 0x19a   : > { %v1029_v29 = vadd.f32 %v1028_v18, %v7730_v27  ;;  %v932_v11 = vpop.f32.mrf.mxu0  ;;  %v981_v40 = vpop.f32.mrf.mxu1 }
 0x19b   : > { %v933_v55 = vadd.f32 %v932_v11, %v7705_v60  ;;  %1972 = vmatpush.bf16.msra.mxu3 %v7986_v38  ;;  %1825 = vmatpush.bf16.msra.mxu0 %v8001_v33 }
 0x19c   : > { %v1078_v57 = vadd.f32 %v1077_v24, %v1029_v29  ;;  %1873 = vmatpush.bf16.msra.mxu1 %v7958_v49 }
 0x19d   : > { %v982_v45 = vadd.f32 %v981_v40, %v933_v55 }
 0x19e   : > { %v1111_v49 = vmax.f32 %v1078_v57, 0.0 }
 0x19f   : > { %v1112_v35 = vmax.f32 %v982_v45, 0.0 }
 0x1a0   : > { %1874 = vmatpush.bf16.msra.mxu1 %v8010_v1 }
 0x1a1   : > { %v1030_v10 = vpop.f32.mrf.mxu2  ;;  %v1079_v14 = vpop.f32.mrf.mxu3  ;;  %v8066_v16 = vpack.c.bf16 %v1112_v35, %v1110_v22 }
 0x1a2   : > { %v1031_v39 = vadd.f32 %v1030_v10, %v7730_v27  ;;  %v1139_v41 = vpop.f32.mrf.mxu0  ;;  %v1188_v43 = vpop.f32.mrf.mxu1 }
 0x1a3   : > { %v1140_v38 = vadd.f32 %v1139_v41, %v7705_v60 }
 0x1a4   : > { %v1080_v42 = vadd.f32 %v1079_v14, %v1031_v39 }
 0x1a5   : > { %v1189_v50 = vadd.f32 %v1188_v43, %v1140_v38  ;;  %1582 = vmatmul.bf16.vlgmr.msrb.gmra.mxu0 %v7766_v59  ;;  %1631 = vmatmul.bf16.vlgmr.msrb.gmra.mxu1 %v7784_v7 }
 0x1a6   : > { %v1113_v33 = vmax.f32 %v1080_v42, 0.0  ;;  %1680 = vmatmul.bf16.vlgmr.msrb.gmra.mxu2 %v7766_v59  ;;  %1729 = vmatmul.bf16.vlgmr.msrb.gmra.mxu3 %v7784_v7 }
 0x1a7   : > { %v1326_v48 = vmax.f32 %v1189_v50, 0.0 }
 0x1a8   : > { %v8074_v1 = vpack.c.bf16 %v1113_v33, %v1111_v49 }
 0x1a9   : > { %v1237_v51 = vpop.f32.mrf.mxu2  ;;  %v1286_v37 = vpop.f32.mrf.mxu3 }
 0x1aa   : > { %v1238_v58 = vadd.f32 %v1237_v51, %v7730_v27  ;;  %v1141_v46 = vpop.f32.mrf.mxu0  ;;  %v1190_v62 = vpop.f32.mrf.mxu1 }
 0x1ab   : > { %v1142_v4 = vadd.f32 %v1141_v46, %v7705_v60 }
 0x1ac   : > { %v1287_v34 = vadd.f32 %v1286_v37, %v1238_v58 }
 0x1ad   : > { %v1191_v30 = vadd.f32 %v1190_v62, %v1142_v4 }
 0x1ae   : > { %v1327_v25 = vmax.f32 %v1287_v34, 0.0 }
 0x1af   : > { %v1328_v28 = vmax.f32 %v1191_v30, 0.0 }
 0x1b1   : > { %v8078_v31 = vpack.c.bf16 %v1328_v28, %v1326_v48  ;;  %v1239_v20 = vpop.f32.mrf.mxu2  ;;  %v1288_v59 = vpop.f32.mrf.mxu3 }
 0x1b2   : > { %v1240_v7 = vadd.f32 %v1239_v20, %v7730_v27  ;;  %v1144_v23 = vpop.f32.mrf.mxu0  ;;  %v1193_v6 = vpop.f32.mrf.mxu1 }
 0x1b3   : > { %v1145_v8 = vadd.f32 %v1144_v23, %v7705_v60 }
 0x1b4   : > { %v1289_v36 = vadd.f32 %v1288_v59, %v1240_v7 }
 0x1b5   : > { %v1194_v12 = vadd.f32 %v1193_v6, %v1145_v8  ;;  %1587 = vmatmul.bf16.gmra.mxu0 %v7816_v47  ;;  %1636 = vmatmul.bf16.gmra.mxu1 %v7840_v5 }
 0x1b6   : > { %v1329_v26 = vmax.f32 %v1289_v36, 0.0  ;;  %1685 = vmatmul.bf16.gmra.mxu2 %v7816_v47  ;;  %1734 = vmatmul.bf16.gmra.mxu3 %v7840_v5 }
 0x1b7   : > { %v1330_v29 = vmax.f32 %v1194_v12, 0.0 }
 0x1b8   : > { %v8086_v13 = vpack.c.bf16 %v1329_v26, %v1327_v25 }
 0x1b9   : > { %v1242_v2 = vpop.f32.mrf.mxu2  ;;  %v1291_v61 = vpop.f32.mrf.mxu3 }
 0x1ba   : > { %v1243_v44 = vadd.f32 %v1242_v2, %v7730_v27  ;;  %v1146_v21 = vpop.f32.mrf.mxu0  ;;  %v1195_v52 = vpop.f32.mrf.mxu1 }
 0x1bb   : > { %v1147_v3 = vadd.f32 %v1146_v21, %v7705_v60 }
 0x1bc   : > { %v1292_v18 = vadd.f32 %v1291_v61, %v1243_v44 }
 0x1bd   : > { %v1196_v24 = vadd.f32 %v1195_v52, %v1147_v3 }
 0x1be   : > { %v1331_v14 = vmax.f32 %v1292_v18, 0.0 }
 0x1bf   : > { %v1332_v11 = vmax.f32 %v1196_v24, 0.0 }
 0x1c1   : > { %v1244_v40 = vpop.f32.mrf.mxu2  ;;  %v1293_v55 = vpop.f32.mrf.mxu3  ;;  %v8090_v57 = vpack.c.bf16 %v1332_v11, %v1330_v29 }
 0x1c2   : > { %v1245_v47 = vadd.f32 %v1244_v40, %v7730_v27  ;;  %v1149_v5 = vpop.f32.mrf.mxu0  ;;  %v1198_v45 = vpop.f32.mrf.mxu1 }
 0x1c3   : > { %v1150_v22 = vadd.f32 %v1149_v5, %v7705_v60 }
 0x1c4   : > { %v1294_v35 = vadd.f32 %v1293_v55, %v1245_v47 }
 0x1c5   : > { %v1199_v10 = vadd.f32 %v1198_v45, %v1150_v22  ;;  %1592 = vmatmul.bf16.gmra.mxu0 %v7864_v56  ;;  %1641 = vmatmul.bf16.gmra.mxu1 %v7888_v15 }
 0x1c6   : > { %v1333_v39 = vmax.f32 %v1294_v35, 0.0  ;;  %1690 = vmatmul.bf16.gmra.mxu2 %v7864_v56  ;;  %1739 = vmatmul.bf16.gmra.mxu3 %v7888_v15 }
 0x1c7   : > { %v1334_v58 = vmax.f32 %v1199_v10, 0.0 }
 0x1c8   : > { %v8098_v41 = vpack.c.bf16 %v1333_v39, %v1331_v14 }
 0x1c9   : > { %v1247_v43 = vpop.f32.mrf.mxu2  ;;  %v1296_v38 = vpop.f32.mrf.mxu3 }
 0x1ca   : > { %v1248_v42 = vadd.f32 %v1247_v43, %v7730_v27  ;;  %v1151_v50 = vpop.f32.mrf.mxu0  ;;  %v1200_v49 = vpop.f32.mrf.mxu1 }
 0x1cb   : > { %v1152_v33 = vadd.f32 %v1151_v50, %v7705_v60 }
 0x1cc   : > { %v1297_v51 = vadd.f32 %v1296_v38, %v1248_v42 }
 0x1cd   : > { %v1201_v37 = vadd.f32 %v1200_v49, %v1152_v33 }
 0x1ce   : > { %v1335_v59 = vmax.f32 %v1297_v51, 0.0 }
 0x1cf   : > { %v1336_v46 = vmax.f32 %v1201_v37, 0.0 }
 0x1d1   : > { %v1249_v62 = vpop.f32.mrf.mxu2  ;;  %v1298_v4 = vpop.f32.mrf.mxu3  ;;  %v8102_v34 = vpack.c.bf16 %v1336_v46, %v1334_v58 }
 0x1d2   : > { %v1250_v56 = vadd.f32 %v1249_v62, %v7730_v27  ;;  %v1154_v15 = vpop.f32.mrf.mxu0  ;;  %v1203_v30 = vpop.f32.mrf.mxu1 }
 0x1d3   : > { %v1155_v48 = vadd.f32 %v1154_v15, %v7705_v60 }
 0x1d4   : > { %v1299_v28 = vadd.f32 %v1298_v4, %v1250_v56 }
 0x1d5   : > { %v1204_v20 = vadd.f32 %v1203_v30, %v1155_v48  ;;  %1597 = vmatmul.bf16.gmra.mxu0 %v7912_v32  ;;  %1646 = vmatmul.bf16.gmra.mxu1 %v7936_v9 }
 0x1d6   : > { %v1337_v7 = vmax.f32 %v1299_v28, 0.0  ;;  %1695 = vmatmul.bf16.gmra.mxu2 %v7912_v32  ;;  %1744 = vmatmul.bf16.gmra.mxu3 %v7936_v9 }
 0x1d7   : > { %v1338_v44 = vmax.f32 %v1204_v20, 0.0 }
 0x1d8   : > { %v8110_v23 = vpack.c.bf16 %v1337_v7, %v1335_v59 }
 0x1d9   : > { %v1252_v6 = vpop.f32.mrf.mxu2  ;;  %v1301_v8 = vpop.f32.mrf.mxu3 }
 0x1da   : > { %v1253_v36 = vadd.f32 %v1252_v6, %v7730_v27  ;;  %v1156_v12 = vpop.f32.mrf.mxu0  ;;  %v1205_v25 = vpop.f32.mrf.mxu1 }
 0x1db   : > { %v1157_v26 = vadd.f32 %v1156_v12, %v7705_v60 }
 0x1dc   : > { %v1302_v2 = vadd.f32 %v1301_v8, %v1253_v36 }
 0x1dd   : > { %v1206_v61 = vadd.f32 %v1205_v25, %v1157_v26 }
 0x1de   : > { %v1339_v55 = vmax.f32 %v1302_v2, 0.0 }
 0x1df   : > { %v1340_v21 = vmax.f32 %v1206_v61, 0.0 }
 0x1e1   : > { %v1254_v52 = vpop.f32.mrf.mxu2  ;;  %v1303_v3 = vpop.f32.mrf.mxu3  ;;  %v8114_v18 = vpack.c.bf16 %v1340_v21, %v1338_v44 }
 0x1e2   : > { %v1255_v32 = vadd.f32 %v1254_v52, %v7730_v27  ;;  %v1159_v9 = vpop.f32.mrf.mxu0  ;;  %v1208_v24 = vpop.f32.mrf.mxu1 }
 0x1e3   : > { %v1160_v29 = vadd.f32 %v1159_v9, %v7705_v60  ;;  %v6834_v9 = vld [vmem:[%s10627_s3 + $0x274] sm:$0xf] }
 0x1e4   : > { %v1304_v11 = vadd.f32 %v1303_v3, %v1255_v32 }
 0x1e5   : > { %v1209_v40 = vadd.f32 %v1208_v24, %v1160_v29  ;;  %1602 = vmatmul.bf16.gmra.mxu0 %v7960_v53  ;;  %1651 = vmatmul.bf16.gmra.mxu1 %v7984_v63  ;;  %v6151_v24 = vld [vmem:[%s10627_s3 + $0x278] sm:$0xf0] }
 0x1e6   : > { %v1341_v47 = vmax.f32 %v1304_v11, 0.0  ;;  %1700 = vmatmul.bf16.gmra.mxu2 %v7960_v53  ;;  %1749 = vmatmul.bf16.gmra.mxu3 %v7984_v63  ;;  %v8152_v29 = vor.u32 %v6834_v9, %v6151_v24  ;;  %v6850_v11 = vld [vmem:[%s10627_s3 + $0x2f4] sm:$0xf] }
 0x1e7   : > { %v1342_v42 = vmax.f32 %v1209_v40, 0.0 }
 0x1e8   : > { %v8122_v5 = vpack.c.bf16 %v1341_v47, %v1339_v55  ;;  %2360 = vmatpush.bf16.msrb.mxu2 %v8152_v29 }
 0x1e9   : > { %v1257_v45 = vpop.f32.mrf.mxu2  ;;  %v1306_v22 = vpop.f32.mrf.mxu3 }
 0x1ea   : > { %v1258_v35 = vadd.f32 %v1257_v45, %v7730_v27  ;;  %v1161_v10 = vpop.f32.mrf.mxu0  ;;  %v1210_v14 = vpop.f32.mrf.mxu1 }
 0x1eb   : > { %v1162_v39 = vadd.f32 %v1161_v10, %v7705_v60 }
 0x1ec   : > { %v1307_v43 = vadd.f32 %v1306_v22, %v1258_v35 }
 0x1ed   : > { %v1211_v38 = vadd.f32 %v1210_v14, %v1162_v39 }
 0x1ee   : > { %v1343_v4 = vmax.f32 %v1307_v43, 0.0 }
 0x1ef   : > { %v1344_v50 = vmax.f32 %v1211_v38, 0.0 }
 0x1f1   : > { %v1259_v49 = vpop.f32.mrf.mxu2  ;;  %v1308_v33 = vpop.f32.mrf.mxu3  ;;  %v8126_v51 = vpack.c.bf16 %v1344_v50, %v1342_v42 }
 0x1f2   : > { %v1260_v53 = vadd.f32 %v1259_v49, %v7730_v27  ;;  %v1164_v63 = vpop.f32.mrf.mxu0  ;;  %v1213_v37 = vpop.f32.mrf.mxu1  ;;  %v6149_v49 = vld [vmem:[%s10627_s3 + $0x270] sm:$0xf] }
 0x1f3   : > { %v1165_v58 = vadd.f32 %v1164_v63, %v7705_v60 }
 0x1f4   : > { %v1309_v46 = vadd.f32 %v1308_v33, %v1260_v53  ;;  %v6835_v33 = vld [vmem:[%s10627_s3 + $0x274] sm:$0xf0]  ;;  %v6213_v53 = vld [vmem:[%s10627_s3 + $0x2f0] sm:$0xf] }
 0x1f5   : > { %v1214_v62 = vadd.f32 %v1213_v37, %v1165_v58  ;;  %1607 = vmatmul.bf16.gmra.mxu0 %v8012_v19  ;;  %1656 = vmatmul.bf16.gmra.mxu1 %v8029_v54 }
 0x1f6   : > { %v1345_v56 = vmax.f32 %v1309_v46, 0.0  ;;  %1705 = vmatmul.bf16.gmra.mxu2 %v8012_v19  ;;  %1754 = vmatmul.bf16.gmra.mxu3 %v8029_v54 }
 0x1f7   : > { %v1346_v36 = vmax.f32 %v1214_v62, 0.0  ;;  %v8180_v62 = vor.u32 %v6835_v33, %v6149_v49 }
 0x1f8   : > { %v8134_v15 = vpack.c.bf16 %v1345_v56, %v1343_v4  ;;  %v6851_v4 = vld [vmem:[%s10627_s3 + $0x2f4] sm:$0xf0] }
 0x1f9   : > { %v1262_v30 = vpop.f32.mrf.mxu2  ;;  %v1311_v48 = vpop.f32.mrf.mxu3  ;;  %2262 = vmatpush.bf16.msrb.mxu0 %v8180_v62 }
 0x1fa   : > { %v1263_v28 = vadd.f32 %v1262_v30, %v7730_v27  ;;  %v1166_v20 = vpop.f32.mrf.mxu0  ;;  %v1215_v59 = vpop.f32.mrf.mxu1  ;;  %v8186_v30 = vor.u32 %v6851_v4, %v6213_v53  ;;  %v6830_v53 = vld [vmem:[%s10627_s3 + $0x254] sm:$0xf] }
 0x1fb   : > { %v1167_v7 = vadd.f32 %v1166_v20, %v7705_v60 }
 0x1fc   : > { %v1312_v6 = vadd.f32 %v1311_v48, %v1263_v28  ;;  %2311 = vmatpush.bf16.msrb.mxu1 %v8186_v30 }
 0x1fd   : > { %v1216_v8 = vadd.f32 %v1215_v59, %v1167_v7  ;;  %v6832_v7 = vld [vmem:[%s10627_s3 + $0x264] sm:$0xf] }
 0x1fe   : > { %v1347_v3 = vmax.f32 %v1312_v6, 0.0  ;;  %v6143_v6 = vld [vmem:[%s10627_s3 + $0x268] sm:$0xf0] }
 0x1ff   : > { %v1348_v12 = vmax.f32 %v1216_v8, 0.0  ;;  %v6848_v8 = vld [vmem:[%s10627_s3 + $0x2e4] sm:$0xf] }
 0x201   : > { %v1264_v25 = vpop.f32.mrf.mxu2  ;;  %v1313_v26 = vpop.f32.mrf.mxu3  ;;  %v8138_v2 = vpack.c.bf16 %v1348_v12, %v1346_v36 }
 0x202   : > { %v1265_v19 = vadd.f32 %v1264_v25, %v7730_v27  ;;  %v1169_v54 = vpop.f32.mrf.mxu0  ;;  %v1218_v61 = vpop.f32.mrf.mxu1  ;;  %v8205_v25 = vor.u32 %v6832_v7, %v6143_v6 }
 0x203   : > { %v1170_v44 = vadd.f32 %v1169_v54, %v7705_v60 }
 0x204   : > { %v1314_v21 = vadd.f32 %v1313_v26, %v1265_v19  ;;  %2361 = vmatpush.bf16.msrb.mxu2 %v8205_v25 }
 0x205   : > { %v1219_v52 = vadd.f32 %v1218_v61, %v1170_v44  ;;  %1612 = vmatmul.bf16.gmra.mxu0 %v8041_v0  ;;  %1661 = vmatmul.bf16.gmra.mxu1 %v8056_v17 }
 0x206   : > { %v1349_v32 = vmax.f32 %v1314_v21, 0.0  ;;  %1710 = vmatmul.bf16.gmra.mxu2 %v8041_v0  ;;  %1759 = vmatmul.bf16.gmra.mxu3 %v8056_v17  ;;  %v6215_v0 = vld [vmem:[%s10627_s3 + $0x2f8] sm:$0xf0]  ;;  %v5929_v21 = vld [vmem:[%s10628_s4 + $0x2] sm:$0x3] }
 0x207   : > { %v8162_v47 = vor.u32 %v6850_v11, %v6215_v0  ;;  %v1350_v43 = vmax.f32 %v1219_v52, 0.0  ;;  %v6141_v11 = vld [vmem:[%s10627_s3 + $0x260] sm:$0xf] }
 0x208   : > { %v8160_v40 = vpack.c.bf16 %v1349_v32, %v1347_v3  ;;  %v8219_v32 = vperm.slane %v5929_v21, 0 }
 0x209   : > { %v1267_v17 = vpop.f32.mrf.mxu2  ;;  %v1316_v55 = vpop.f32.mrf.mxu3  ;;  %2409 = vmatpush.bf16.msrb.mxu3 %v8162_v47 }
 0x20a   : > { %v1268_v45 = vadd.f32 %v1267_v17, %v7730_v27  ;;  %v1171_v22 = vpop.f32.mrf.mxu0  ;;  %v1220_v35 = vpop.f32.mrf.mxu1  ;;  %v6205_v17 = vld [vmem:[%s10627_s3 + $0x2e0] sm:$0xf] }
 0x20b   : > { %v1172_v10 = vadd.f32 %v1171_v22, %v7705_v60 }
 0x20c   : > { %v1317_v14 = vadd.f32 %v1316_v55, %v1268_v45  ;;  %v6849_v55 = vld [vmem:[%s10627_s3 + $0x2e4] sm:$0xf0] }
 0x20d   : > { %v1221_v39 = vadd.f32 %v1220_v35, %v1172_v10  ;;  %v8235_v35 = vor.u32 %v6849_v55, %v6205_v17 }
 0x20e   : > { %v1351_v20 = vmax.f32 %v1317_v14, 0.0 }
 0x20f   : > { %v1352_v38 = vmax.f32 %v1221_v39, 0.0  ;;  %2312 = vmatpush.bf16.msrb.mxu1 %v8235_v35 }
 0x211   : > { %v1269_v42 = vpop.f32.mrf.mxu2  ;;  %v1318_v50 = vpop.f32.mrf.mxu3  ;;  %v8177_v63 = vpack.c.bf16 %v1352_v38, %v1350_v43 }
 0x212   : > { %v1270_v37 = vadd.f32 %v1269_v42, %v7730_v27  ;;  %v1174_v58 = vpop.f32.mrf.mxu0  ;;  %v1223_v46 = vpop.f32.mrf.mxu1 }
 0x213   : > { %v1175_v56 = vadd.f32 %v1174_v58, %v7705_v60 }
 0x214   : > { %v1319_v48 = vadd.f32 %v1318_v50, %v1270_v37  ;;  %v6135_v37 = vld [vmem:[%s10627_s3 + $0x258] sm:$0xf0] }
 0x215   : > { %v1224_v28 = vadd.f32 %v1223_v46, %v1175_v56  ;;  %1617 = vmatmul.bf16.gmra.mxu0 %v8066_v16  ;;  %1666 = vmatmul.bf16.gmra.mxu1 %v8074_v1  ;;  %v8255_v58 = vor.u32 %v6830_v53, %v6135_v37  ;;  %v6846_v46 = vld [vmem:[%s10627_s3 + $0x2d4] sm:$0xf] }
 0x216   : > { %v1353_v59 = vmax.f32 %v1319_v48, 0.0  ;;  %1715 = vmatmul.bf16.gmra.mxu2 %v8066_v16  ;;  %1764 = vmatmul.bf16.gmra.mxu3 %v8074_v1  ;;  %v6207_v1 = vld [vmem:[%s10627_s3 + $0x2e8] sm:$0xf0] }
 0x217   : > { %v8211_v61 = vor.u32 %v6848_v8, %v6207_v1  ;;  %v1354_v9 = vmax.f32 %v1224_v28, 0.0  ;;  %2362 = vmatpush.bf16.msrb.mxu2 %v8255_v58  ;;  %v6133_v1 = vld [vmem:[%s10627_s3 + $0x250] sm:$0xf] }
 0x218   : > { %v8203_v36 = vpack.c.bf16 %v1353_v59, %v1351_v20 }
 0x219   : > { %v1272_v12 = vpop.f32.mrf.mxu2  ;;  %v1321_v16 = vpop.f32.mrf.mxu3  ;;  %2410 = vmatpush.bf16.msrb.mxu3 %v8211_v61 }
 0x21a   : > { %v1273_v26 = vadd.f32 %v1272_v12, %v7730_v27  ;;  %v1176_v19 = vpop.f32.mrf.mxu0  ;;  %v1225_v54 = vpop.f32.mrf.mxu1 }
 0x21b   : > { %v1177_v44 = vadd.f32 %v1176_v19, %v7705_v60  ;;  %v6833_v60 = vld [vmem:[%s10627_s3 + $0x264] sm:$0xf0] }
 0x21c   : > { %v1322_v52 = vadd.f32 %v1321_v16, %v1273_v26  ;;  %v8227_v0 = vor.u32 %v6833_v60, %v6141_v11  ;;  %v6831_v26 = vld [vmem:[%s10627_s3 + $0x254] sm:$0xf0] }
 0x21d   : > { %v1226_v3 = vadd.f32 %v1225_v54, %v1177_v44  ;;  %v8277_v19 = vor.u32 %v6831_v26, %v6133_v1  ;;  %v6197_v54 = vld [vmem:[%s10627_s3 + $0x2d0] sm:$0xf]  ;;  %v6847_v44 = vld [vmem:[%s10627_s3 + $0x2d4] sm:$0xf0] }
 0x21e   : > { %2263 = vmatpush.bf16.msrb.mxu0 %v8227_v0  ;;  %v1355_v49 = vmax.f32 %v1322_v52, 0.0 }
 0x21f   : > { %v1356_v24 = vmax.f32 %v1226_v3, 0.0 }
 0x221   : > { %v1274_v45 = vpop.f32.mrf.mxu2  ;;  %v1323_v22 = vpop.f32.mrf.mxu3  ;;  %v8237_v10 = vpack.c.bf16 %v1356_v24, %v1354_v9  ;;  %v8287_v9 = vor.u32 %v6847_v44, %v6197_v54 }
 0x222   : > { %v1275_v14 = vadd.f32 %v1274_v45, %v7730_v27  ;;  %v1583_v39 = vpop.f32.mrf.mxu0  ;;  %v1632_v43 = vpop.f32.mrf.mxu1  ;;  %v8247_v27 = vperm.slane %v5929_v21, 1  ;;  %2264 = vmatpush.bf16.msrb.mxu0 %v8277_v19 }
 0x223   : > { %v1584_v38 = vadd.f32 %v1583_v39, %v8219_v32  ;;  %2313 = vmatpush.bf16.msrb.mxu1 %v8287_v9  ;;  %v6828_v39 = vld [vmem:[%s10627_s3 + $0x244] sm:$0xf] }
 0x224   : > { %v1324_v42 = vadd.f32 %v1323_v22, %v1275_v14 }
 0x225   : > { %v1633_v50 = vadd.f32 %v1632_v43, %v1584_v38  ;;  %1826 = vmatmul.bf16.vlgmr.msra.gmra.mxu0 %v8078_v31  ;;  %1875 = vmatmul.bf16.vlgmr.msra.gmra.mxu1 %v8086_v13  ;;  %v6127_v43 = vld [vmem:[%s10627_s3 + $0x248] sm:$0xf0] }
 0x226   : > { %v1357_v33 = vmax.f32 %v1324_v42, 0.0  ;;  %1924 = vmatmul.bf16.vlgmr.msra.gmra.mxu2 %v8078_v31  ;;  %1973 = vmatmul.bf16.vlgmr.msra.gmra.mxu3 %v8086_v13  ;;  %v6199_v31 = vld [vmem:[%s10627_s3 + $0x2d8] sm:$0xf0]  ;;  %v8305_v42 = vor.u32 %v6828_v39, %v6127_v43  ;;  %v6842_v39 = vld [vmem:[%s10627_s3 + $0x2b4] sm:$0xf] }
 0x227   : > { %v8265_v48 = vor.u32 %v6846_v46, %v6199_v31  ;;  %v1770_v12 = vmax.f32 %v1633_v50, 0.0  ;;  %v6844_v50 = vld [vmem:[%s10627_s3 + $0x2c4] sm:$0xf] }
 0x228   : > { %v8263_v13 = vpack.c.bf16 %v1357_v33, %v1355_v49  ;;  %2363 = vmatpush.bf16.msrb.mxu2 %v8305_v42 }
 0x229   : > { %v1681_v4 = vpop.f32.mrf.mxu2  ;;  %v1730_v56 = vpop.f32.mrf.mxu3  ;;  %2411 = vmatpush.bf16.msrb.mxu3 %v8265_v48 }
 0x22a   : > { %v1682_v28 = vadd.f32 %v1681_v4, %v8247_v27  ;;  %v1585_v20 = vpop.f32.mrf.mxu0  ;;  %v1634_v59 = vpop.f32.mrf.mxu1 }
 0x22b   : > { %v1586_v7 = vadd.f32 %v1585_v20, %v8219_v32 }
 0x22c   : > { %v1731_v6 = vadd.f32 %v1730_v56, %v1682_v28 }
 0x22d   : > { %v1635_v8 = vadd.f32 %v1634_v59, %v1586_v7  ;;  %v6125_v59 = vld [vmem:[%s10627_s3 + $0x240] sm:$0xf]  ;;  %v6829_v7 = vld [vmem:[%s10627_s3 + $0x244] sm:$0xf0] }
 0x22e   : > { %v1771_v22 = vmax.f32 %v1731_v6, 0.0  ;;  %v8325_v6 = vor.u32 %v6829_v7, %v6125_v59  ;;  %v6181_v7 = vld [vmem:[%s10627_s3 + $0x2b0] sm:$0xf] }
 0x22f   : > { %v1772_v16 = vmax.f32 %v1635_v8, 0.0  ;;  %v6189_v8 = vld [vmem:[%s10627_s3 + $0x2c0] sm:$0xf] }
 0x230   : > { %2265 = vmatpush.bf16.msrb.mxu0 %v8325_v6 }
 0x231   : > { %v8285_v21 = vpack.c.bf16 %v1772_v16, %v1770_v12  ;;  %v1683_v52 = vpop.f32.mrf.mxu2  ;;  %v1732_v3 = vpop.f32.mrf.mxu3  ;;  %v6845_v12 = vld [vmem:[%s10627_s3 + $0x2c4] sm:$0xf0] }
 0x232   : > { %v1684_v24 = vadd.f32 %v1683_v52, %v8247_v27  ;;  %v1588_v11 = vpop.f32.mrf.mxu0  ;;  %v1637_v60 = vpop.f32.mrf.mxu1  ;;  %v8333_v26 = vor.u32 %v6845_v12, %v6189_v8  ;;  %v6843_v8 = vld [vmem:[%s10627_s3 + $0x2b4] sm:$0xf0] }
 0x233   : > { %v1589_v17 = vadd.f32 %v1588_v11, %v8219_v32 }
 0x234   : > { %v1733_v55 = vadd.f32 %v1732_v3, %v1684_v24  ;;  %2314 = vmatpush.bf16.msrb.mxu1 %v8333_v26 }
 0x235   : > { %v1638_v45 = vadd.f32 %v1637_v60, %v1589_v17  ;;  %1831 = vmatmul.bf16.gmra.mxu0 %v8090_v57  ;;  %1880 = vmatmul.bf16.gmra.mxu1 %v8098_v41 }
 0x236   : > { %v1773_v14 = vmax.f32 %v1733_v55, 0.0  ;;  %1929 = vmatmul.bf16.gmra.mxu2 %v8090_v57  ;;  %1978 = vmatmul.bf16.gmra.mxu3 %v8098_v41  ;;  %v6191_v57 = vld [vmem:[%s10627_s3 + $0x2c8] sm:$0xf0] }
 0x237   : > { %v8313_v33 = vor.u32 %v6844_v50, %v6191_v57  ;;  %v1774_v28 = vmax.f32 %v1638_v45, 0.0  ;;  %v6826_v45 = vld [vmem:[%s10627_s3 + $0x234] sm:$0xf] }
 0x238   : > { %v8303_v38 = vpack.c.bf16 %v1773_v14, %v1771_v22  ;;  %v6119_v22 = vld [vmem:[%s10627_s3 + $0x238] sm:$0xf0] }
 0x239   : > { %v1686_v41 = vpop.f32.mrf.mxu2  ;;  %v1735_v49 = vpop.f32.mrf.mxu3  ;;  %2412 = vmatpush.bf16.msrb.mxu3 %v8313_v33  ;;  %v8351_v14 = vor.u32 %v6826_v45, %v6119_v22  ;;  %v6824_v22 = vld [vmem:[%s10627_s3 + $0x224] sm:$0xf] }
 0x23a   : > { %v1687_v53 = vadd.f32 %v1686_v41, %v8247_v27  ;;  %v1590_v37 = vpop.f32.mrf.mxu0  ;;  %v1639_v46 = vpop.f32.mrf.mxu1 }
 0x23b   : > { %v1591_v31 = vadd.f32 %v1590_v37, %v8219_v32  ;;  %2364 = vmatpush.bf16.msrb.mxu2 %v8351_v14 }
 0x23c   : > { %v1736_v4 = vadd.f32 %v1735_v49, %v1687_v53 }
 0x23d   : > { %v1640_v56 = vadd.f32 %v1639_v46, %v1591_v31 }
 0x23e   : > { %v1775_v17 = vmax.f32 %v1736_v4, 0.0 }
 0x23f   : > { %v1776_v20 = vmax.f32 %v1640_v56, 0.0 }
 0x241   : > { %v1688_v16 = vpop.f32.mrf.mxu2  ;;  %v1737_v1 = vpop.f32.mrf.mxu3  ;;  %v8335_v54 = vpack.c.bf16 %v1776_v20, %v1774_v28  ;;  %v6117_v28 = vld [vmem:[%s10627_s3 + $0x230] sm:$0xf]  ;;  %v6827_v20 = vld [vmem:[%s10627_s3 + $0x234] sm:$0xf0] }
 0x242   : > { %v1689_v44 = vadd.f32 %v1688_v16, %v8247_v27  ;;  %v1593_v52 = vpop.f32.mrf.mxu0  ;;  %v1642_v3 = vpop.f32.mrf.mxu1  ;;  %v8373_v59 = vor.u32 %v6827_v20, %v6117_v28 }
 0x243   : > { %v1594_v24 = vadd.f32 %v1593_v52, %v8219_v32 }
 0x244   : > { %v1738_v11 = vadd.f32 %v1737_v1, %v1689_v44  ;;  %v8381_v1 = vor.u32 %v6843_v8, %v6181_v7  ;;  %2266 = vmatpush.bf16.msrb.mxu0 %v8373_v59  ;;  %v6109_v7 = vld [vmem:[%s10627_s3 + $0x220] sm:$0xf]  ;;  %v6825_v8 = vld [vmem:[%s10627_s3 + $0x224] sm:$0xf0] }
 0x245   : > { %v1643_v60 = vadd.f32 %v1642_v3, %v1594_v24  ;;  %1836 = vmatmul.bf16.gmra.mxu0 %v8102_v34  ;;  %1885 = vmatmul.bf16.gmra.mxu1 %v8110_v23 }
 0x246   : > { %v1777_v55 = vmax.f32 %v1738_v11, 0.0  ;;  %1934 = vmatmul.bf16.gmra.mxu2 %v8102_v34  ;;  %1983 = vmatmul.bf16.gmra.mxu3 %v8110_v23  ;;  %v6183_v34 = vld [vmem:[%s10627_s3 + $0x2b8] sm:$0xf0] }
 0x247   : > { %v8361_v57 = vor.u32 %v6842_v39, %v6183_v34  ;;  %v1778_v4 = vmax.f32 %v1643_v60, 0.0  ;;  %2315 = vmatpush.bf16.msrb.mxu1 %v8381_v1  ;;  %v6111_v39 = vld [vmem:[%s10627_s3 + $0x228] sm:$0xf0] }
 0x248   : > { %v8359_v43 = vpack.c.bf16 %v1777_v55, %v1775_v17  ;;  %v8399_v34 = vor.u32 %v6824_v22, %v6111_v39 }
 0x249   : > { %v1691_v23 = vpop.f32.mrf.mxu2  ;;  %v1740_v50 = vpop.f32.mrf.mxu3  ;;  %2413 = vmatpush.bf16.msrb.mxu3 %v8361_v57 }
 0x24a   : > { %v1692_v41 = vadd.f32 %v1691_v23, %v8247_v27  ;;  %v1595_v49 = vpop.f32.mrf.mxu0  ;;  %v1644_v53 = vpop.f32.mrf.mxu1  ;;  %v6840_v23 = vld [vmem:[%s10627_s3 + $0x2a4] sm:$0xf]  ;;  %2365 = vmatpush.bf16.msrb.mxu2 %v8399_v34 }
 0x24b   : > { %v1596_v37 = vadd.f32 %v1595_v49, %v8219_v32 }
 0x24c   : > { %v1741_v46 = vadd.f32 %v1740_v50, %v1692_v41 }
 0x24d   : > { %v1645_v31 = vadd.f32 %v1644_v53, %v1596_v37 }
 0x24e   : > { %v1779_v55 = vmax.f32 %v1741_v46, 0.0 }
 0x24f   : > { %v1780_v56 = vmax.f32 %v1645_v31, 0.0 }
 0x251   : > { %v1693_v12 = vpop.f32.mrf.mxu2  ;;  %v1742_v16 = vpop.f32.mrf.mxu3  ;;  %v8383_v44 = vpack.c.bf16 %v1780_v56, %v1778_v4 }
 0x252   : > { %v1694_v52 = vadd.f32 %v1693_v12, %v8247_v27  ;;  %v1598_v3 = vpop.f32.mrf.mxu0  ;;  %v1647_v24 = vpop.f32.mrf.mxu1  ;;  %v8421_v12 = vor.u32 %v6825_v8, %v6109_v7 }
 0x253   : > { %v1599_v11 = vadd.f32 %v1598_v3, %v8219_v32 }
 0x254   : > { %v1743_v60 = vadd.f32 %v1742_v16, %v1694_v52  ;;  %v6173_v16 = vld [vmem:[%s10627_s3 + $0x2a0] sm:$0xf]  ;;  %v6841_v52 = vld [vmem:[%s10627_s3 + $0x2a4] sm:$0xf0]  ;;  %2267 = vmatpush.bf16.msrb.mxu0 %v8421_v12 }
 0x255   : > { %v1648_v17 = vadd.f32 %v1647_v24, %v1599_v11  ;;  %1841 = vmatmul.bf16.gmra.mxu0 %v8114_v18  ;;  %1890 = vmatmul.bf16.gmra.mxu1 %v8122_v5  ;;  %v8429_v11 = vor.u32 %v6841_v52, %v6173_v16 }
 0x256   : > { %v1781_v45 = vmax.f32 %v1743_v60, 0.0  ;;  %1939 = vmatmul.bf16.gmra.mxu2 %v8114_v18  ;;  %1988 = vmatmul.bf16.gmra.mxu3 %v8122_v5  ;;  %v6175_v18 = vld [vmem:[%s10627_s3 + $0x2a8] sm:$0xf0] }
 0x257   : > { %v8409_v49 = vor.u32 %v6840_v23, %v6175_v18  ;;  %v1782_v28 = vmax.f32 %v1648_v17, 0.0  ;;  %2316 = vmatpush.bf16.msrb.mxu1 %v8429_v11 }
 0x258   : > { %v8407_v50 = vpack.c.bf16 %v1781_v45, %v1779_v55 }
 0x259   : > { %v1696_v5 = vpop.f32.mrf.mxu2  ;;  %v1745_v41 = vpop.f32.mrf.mxu3  ;;  %2414 = vmatpush.bf16.msrb.mxu3 %v8409_v49 }
 0x25a   : > { %v1697_v53 = vadd.f32 %v1696_v5, %v8247_v27  ;;  %v1600_v37 = vpop.f32.mrf.mxu0  ;;  %v1649_v46 = vpop.f32.mrf.mxu1 }
 0x25b   : > { %v1601_v31 = vadd.f32 %v1600_v37, %v8219_v32 }
 0x25c   : > { %v1746_v4 = vadd.f32 %v1745_v41, %v1697_v53  ;;  %v6822_v41 = vld [vmem:[%s10627_s3 + $0x214] sm:$0xf]  ;;  %v6103_v53 = vld [vmem:[%s10627_s3 + $0x218] sm:$0xf0] }
 0x25d   : > { %v1650_v56 = vadd.f32 %v1649_v46, %v1601_v31  ;;  %v8447_v37 = vor.u32 %v6822_v41, %v6103_v53  ;;  %v6838_v46 = vld [vmem:[%s10627_s3 + $0x294] sm:$0xf] }
 0x25e   : > { %v1783_v18 = vmax.f32 %v1746_v4, 0.0 }
 0x25f   : > { %v1784_v20 = vmax.f32 %v1650_v56, 0.0  ;;  %2366 = vmatpush.bf16.msrb.mxu2 %v8447_v37 }
 0x261   : > { %v1698_v3 = vpop.f32.mrf.mxu2  ;;  %v1747_v24 = vpop.f32.mrf.mxu3  ;;  %v8431_v60 = vpack.c.bf16 %v1784_v20, %v1782_v28 }
 0x262   : > { %v1699_v17 = vadd.f32 %v1698_v3, %v8247_v27  ;;  %v1603_v55 = vpop.f32.mrf.mxu0  ;;  %v1652_v45 = vpop.f32.mrf.mxu1 }
 0x263   : > { %v1604_v22 = vadd.f32 %v1603_v55, %v8219_v32  ;;  %v6823_v55 = vld [vmem:[%s10627_s3 + $0x214] sm:$0xf0] }
 0x264   : > { %v1748_v39 = vadd.f32 %v1747_v24, %v1699_v17  ;;  %v6101_v17 = vld [vmem:[%s10627_s3 + $0x210] sm:$0xf] }
 0x265   : > { %v1653_v23 = vadd.f32 %v1652_v45, %v1604_v22  ;;  %1846 = vmatmul.bf16.gmra.mxu0 %v8126_v51  ;;  %1895 = vmatmul.bf16.gmra.mxu1 %v8134_v15  ;;  %v8469_v45 = vor.u32 %v6823_v55, %v6101_v17  ;;  %v6165_v22 = vld [vmem:[%s10627_s3 + $0x290] sm:$0xf] }
 0x266   : > { %v1785_v5 = vmax.f32 %v1748_v39, 0.0  ;;  %1944 = vmatmul.bf16.gmra.mxu2 %v8126_v51  ;;  %1993 = vmatmul.bf16.gmra.mxu3 %v8134_v15  ;;  %v6167_v51 = vld [vmem:[%s10627_s3 + $0x298] sm:$0xf0]  ;;  %v6839_v39 = vld [vmem:[%s10627_s3 + $0x294] sm:$0xf0] }
 0x267   : > { %v8457_v56 = vor.u32 %v6838_v46, %v6167_v51  ;;  %v1786_v3 = vmax.f32 %v1653_v23, 0.0  ;;  %2268 = vmatpush.bf16.msrb.mxu0 %v8469_v45 }
 0x268   : > { %v8455_v31 = vpack.c.bf16 %v1785_v5, %v1783_v18  ;;  %v8477_v5 = vor.u32 %v6839_v39, %v6165_v22 }
 0x269   : > { %v1701_v15 = vpop.f32.mrf.mxu2  ;;  %v1750_v4 = vpop.f32.mrf.mxu3  ;;  %2415 = vmatpush.bf16.msrb.mxu3 %v8457_v56 }
 0x26a   : > { %v1702_v28 = vadd.f32 %v1701_v15, %v8247_v27  ;;  %v1605_v20 = vpop.f32.mrf.mxu0  ;;  %v1654_v7 = vpop.f32.mrf.mxu1  ;;  %2317 = vmatpush.bf16.msrb.mxu1 %v8477_v5 }
 0x26b   : > { %v1606_v8 = vadd.f32 %v1605_v20, %v8219_v32 }
 0x26c   : > { %v1751_v16 = vadd.f32 %v1750_v4, %v1702_v28 }
 0x26d   : > { %v1655_v52 = vadd.f32 %v1654_v7, %v1606_v8  ;;  %v6820_v8 = vld [vmem:[%s10627_s3 + $0x204] sm:$0xf] }
 0x26e   : > { %v1787_v20 = vmax.f32 %v1751_v16, 0.0 }
 0x26f   : > { %v1788_v24 = vmax.f32 %v1655_v52, 0.0  ;;  %v6095_v52 = vld [vmem:[%s10627_s3 + $0x208] sm:$0xf0] }
 0x271   : > { %v1703_v23 = vpop.f32.mrf.mxu2  ;;  %v1752_v18 = vpop.f32.mrf.mxu3  ;;  %v8479_v41 = vpack.c.bf16 %v1788_v24, %v1786_v3  ;;  %v8495_v3 = vor.u32 %v6820_v8, %v6095_v52  ;;  %v6836_v24 = vld [vmem:[%s10627_s3 + $0x284] sm:$0xf] }
 0x272   : > { %v1704_v53 = vadd.f32 %v1703_v23, %v8247_v27  ;;  %v1608_v46 = vpop.f32.mrf.mxu0  ;;  %v1657_v51 = vpop.f32.mrf.mxu1 }
 0x273   : > { %v1609_v15 = vadd.f32 %v1608_v46, %v8219_v32  ;;  %2367 = vmatpush.bf16.msrb.mxu2 %v8495_v3 }
 0x274   : > { %v1753_v4 = vadd.f32 %v1752_v18, %v1704_v53 }
 0x275   : > { %v1658_v28 = vadd.f32 %v1657_v51, %v1609_v15  ;;  %1851 = vmatmul.bf16.gmra.mxu0 %v8138_v2  ;;  %1900 = vmatmul.bf16.gmra.mxu1 %v8160_v40 }
 0x276   : > { %v1789_v7 = vmax.f32 %v1753_v4, 0.0  ;;  %1949 = vmatmul.bf16.gmra.mxu2 %v8138_v2  ;;  %1998 = vmatmul.bf16.gmra.mxu3 %v8160_v40  ;;  %v6159_v2 = vld [vmem:[%s10627_s3 + $0x288] sm:$0xf0]  ;;  %v6093_v4 = vld [vmem:[%s10627_s3 + $0x200] sm:$0xf] }
 0x277   : > { %v8505_v55 = vor.u32 %v6836_v24, %v6159_v2  ;;  %2604 = vmatpush.bf16.msra.mxu2 %v8152_v29  ;;  %v1790_v51 = vmax.f32 %v1658_v28, 0.0  ;;  %v6157_v29 = vld [vmem:[%s10627_s3 + $0x280] sm:$0xf] }
 0x278   : > { %v8503_v16 = vpack.c.bf16 %v1789_v7, %v1787_v20  ;;  %v6821_v20 = vld [vmem:[%s10627_s3 + $0x204] sm:$0xf0] }
 0x279   : > { %v1706_v40 = vpop.f32.mrf.mxu2  ;;  %v1755_v17 = vpop.f32.mrf.mxu3  ;;  %2416 = vmatpush.bf16.msrb.mxu3 %v8505_v55  ;;  %v8520_v7 = vor.u32 %v6821_v20, %v6093_v4 }
 0x27a   : > { %v1707_v22 = vadd.f32 %v1706_v40, %v8247_v27  ;;  %v1610_v39 = vpop.f32.mrf.mxu0  ;;  %v1659_v23 = vpop.f32.mrf.mxu1 }
 0x27b   : > { %v1611_v18 = vadd.f32 %v1610_v39, %v8219_v32  ;;  %2605 = vmatpush.bf16.msra.mxu2 %v8205_v25  ;;  %2269 = vmatpush.bf16.msrb.mxu0 %v8520_v7 }
 0x27c   : > { %v1756_v53 = vadd.f32 %v1755_v17, %v1707_v22 }
 0x27d   : > { %2653 = vmatpush.bf16.msra.mxu3 %v8162_v47  ;;  %v1660_v46 = vadd.f32 %v1659_v23, %v1611_v18  ;;  %v6837_v47 = vld [vmem:[%s10627_s3 + $0x284] sm:$0xf0] }
 0x27e   : > { %v8529_v52 = vor.u32 %v6837_v47, %v6157_v29  ;;  %v1791_v39 = vmax.f32 %v1756_v53, 0.0 }
 0x27f   : > { %v1792_v15 = vmax.f32 %v1660_v46, 0.0  ;;  %2506 = vmatpush.bf16.msra.mxu0 %v8180_v62  ;;  %2606 = vmatpush.bf16.msra.mxu2 %v8255_v58 }
 0x280   : > { %2318 = vmatpush.bf16.msrb.mxu1 %v8529_v52 }
 0x281   : > { %2654 = vmatpush.bf16.msra.mxu3 %v8211_v61  ;;  %v1708_v28 = vpop.f32.mrf.mxu2  ;;  %v1757_v8 = vpop.f32.mrf.mxu3  ;;  %v8531_v24 = vpack.c.bf16 %v1792_v15, %v1790_v51 }
 0x282   : > { %v1709_v25 = vadd.f32 %v1708_v28, %v8247_v27  ;;  %v1613_v2 = vpop.f32.mrf.mxu0  ;;  %v1662_v40 = vpop.f32.mrf.mxu1 }
 0x283   : > { %v1614_v17 = vadd.f32 %v1613_v2, %v8219_v32  ;;  %2507 = vmatpush.bf16.msra.mxu0 %v8227_v0  ;;  %2607 = vmatpush.bf16.msra.mxu2 %v8305_v42 }
 0x284   : > { %v1758_v22 = vadd.f32 %v1757_v8, %v1709_v25  ;;  %2555 = vmatpush.bf16.msra.mxu1 %v8186_v30 }
 0x285   : > { %v1663_v61 = vadd.f32 %v1662_v40, %v1614_v17  ;;  %1856 = vmatmul.bf16.gmra.mxu0 %v8177_v63  ;;  %1905 = vmatmul.bf16.gmra.mxu1 %v8203_v36 }
 0x286   : > { %v1793_v23 = vmax.f32 %v1758_v22, 0.0  ;;  %1954 = vmatmul.bf16.gmra.mxu2 %v8177_v63  ;;  %2003 = vmatmul.bf16.gmra.mxu3 %v8203_v36 }
 0x287   : > { %2655 = vmatpush.bf16.msra.mxu3 %v8265_v48  ;;  %2508 = vmatpush.bf16.msra.mxu0 %v8277_v19 }
 0x288   : > { %2556 = vmatpush.bf16.msra.mxu1 %v8235_v35  ;;  %v8548_v62 = vpack.c.bf16 %v1793_v23, %v1791_v39  ;;  %2608 = vmatpush.bf16.msra.mxu2 %v8351_v14  ;;  %v1794_v35 = vmax.f32 %v1663_v61, 0.0 }
 0x289   : > { %v1711_v30 = vpop.f32.mrf.mxu2  ;;  %v1760_v58 = vpop.f32.mrf.mxu3 }
 0x28a   : > { %v1712_v18 = vadd.f32 %v1711_v30, %v8247_v27  ;;  %v1615_v53 = vpop.f32.mrf.mxu0  ;;  %v1664_v46 = vpop.f32.mrf.mxu1 }
 0x28b   : > { %v1616_v63 = vadd.f32 %v1615_v53, %v8219_v32  ;;  %2656 = vmatpush.bf16.msra.mxu3 %v8313_v33  ;;  %2509 = vmatpush.bf16.msra.mxu0 %v8325_v6 }
 0x28c   : > { %v1761_v36 = vadd.f32 %v1760_v58, %v1712_v18  ;;  %2557 = vmatpush.bf16.msra.mxu1 %v8287_v9  ;;  %2609 = vmatpush.bf16.msra.mxu2 %v8399_v34 }
 0x28d   : > { %v1665_v0 = vadd.f32 %v1664_v46, %v1616_v63 }
 0x28f   : > { %v1796_v48 = vmax.f32 %v1665_v0, 0.0  ;;  %2657 = vmatpush.bf16.msra.mxu3 %v8361_v57  ;;  %2510 = vmatpush.bf16.msra.mxu0 %v8373_v59  ;;  %v1795_v57 = vmax.f32 %v1761_v36, 0.0 }
 0x290   : > { %2558 = vmatpush.bf16.msra.mxu1 %v8333_v26  ;;  %2610 = vmatpush.bf16.msra.mxu2 %v8447_v37 }
 0x291   : > { %v1713_v42 = vpop.f32.mrf.mxu2  ;;  %v1762_v19 = vpop.f32.mrf.mxu3  ;;  %v8560_v51 = vpack.c.bf16 %v1796_v48, %v1794_v35 }
 0x292   : > { %v1714_v33 = vadd.f32 %v1713_v42, %v8247_v27  ;;  %v1618_v9 = vpop.f32.mrf.mxu0  ;;  %v1667_v15 = vpop.f32.mrf.mxu1 }
 0x293   : > { %v1619_v14 = vadd.f32 %v1618_v9, %v8219_v32  ;;  %2658 = vmatpush.bf16.msra.mxu3 %v8409_v49  ;;  %2511 = vmatpush.bf16.msra.mxu0 %v8421_v12 }
 0x294   : > { %v1763_v6 = vadd.f32 %v1762_v19, %v1714_v33  ;;  %2559 = vmatpush.bf16.msra.mxu1 %v8381_v1  ;;  %2611 = vmatpush.bf16.msra.mxu2 %v8495_v3 }
 0x295   : > { %v1668_v26 = vadd.f32 %v1667_v15, %v1619_v14  ;;  %1861 = vmatmul.bf16.gmra.mxu0 %v8237_v10  ;;  %1910 = vmatmul.bf16.gmra.mxu1 %v8263_v13 }
 0x296   : > { %v1797_v34 = vmax.f32 %v1763_v6, 0.0  ;;  %1959 = vmatmul.bf16.gmra.mxu2 %v8237_v10  ;;  %2008 = vmatmul.bf16.gmra.mxu3 %v8263_v13 }
 0x297   : > { %2659 = vmatpush.bf16.msra.mxu3 %v8457_v56  ;;  %2512 = vmatpush.bf16.msra.mxu0 %v8469_v45 }
 0x298   : > { %2560 = vmatpush.bf16.msra.mxu1 %v8429_v11  ;;  %v8575_v59 = vpack.c.bf16 %v1797_v34, %v1795_v57  ;;  %v1798_v11 = vmax.f32 %v1668_v26, 0.0 }
 0x299   : > { %v1716_v1 = vpop.f32.mrf.mxu2  ;;  %v1765_v49 = vpop.f32.mrf.mxu3 }
 0x29a   : > { %v1717_v37 = vadd.f32 %v1716_v1, %v8247_v27  ;;  %v1620_v4 = vpop.f32.mrf.mxu0  ;;  %v1669_v20 = vpop.f32.mrf.mxu1 }
 0x29b   : > { %v1621_v10 = vadd.f32 %v1620_v4, %v8219_v32  ;;  %2660 = vmatpush.bf16.msra.mxu3 %v8505_v55  ;;  %2513 = vmatpush.bf16.msra.mxu0 %v8520_v7 }
 0x29c   : > { %v1766_v13 = vadd.f32 %v1765_v49, %v1717_v37  ;;  %2561 = vmatpush.bf16.msra.mxu1 %v8477_v5 }
 0x29d   : > { %v1670_v12 = vadd.f32 %v1669_v20, %v1621_v10 }
 0x29e   : > { %v1799_v5 = vmax.f32 %v1766_v13, 0.0 }
 0x29f   : > { %v1800_v56 = vmax.f32 %v1670_v12, 0.0 }
 0x2a0   : > { %2562 = vmatpush.bf16.msra.mxu1 %v8529_v52 }
 0x2a1   : > { %v1718_v3 = vpop.f32.mrf.mxu2  ;;  %v1767_v29 = vpop.f32.mrf.mxu3  ;;  %v8585_v47 = vpack.c.bf16 %v1800_v56, %v1798_v11 }
 0x2a2   : > { %v1719_v28 = vadd.f32 %v1718_v3, %v8247_v27  ;;  %v1827_v8 = vpop.f32.mrf.mxu0  ;;  %v1876_v45 = vpop.f32.mrf.mxu1 }
 0x2a3   : > { %v1828_v55 = vadd.f32 %v1827_v8, %v8219_v32 }
 0x2a4   : > { %v1768_v25 = vadd.f32 %v1767_v29, %v1719_v28 }
 0x2a5   : > { %v1877_v2 = vadd.f32 %v1876_v45, %v1828_v55  ;;  %2270 = vmatmul.bf16.vlgmr.msrb.gmra.mxu0 %v8285_v21  ;;  %2319 = vmatmul.bf16.vlgmr.msrb.gmra.mxu1 %v8303_v38 }
 0x2a6   : > { %v1801_v7 = vmax.f32 %v1768_v25, 0.0  ;;  %2368 = vmatmul.bf16.vlgmr.msrb.gmra.mxu2 %v8285_v21  ;;  %2417 = vmatmul.bf16.vlgmr.msrb.gmra.mxu3 %v8303_v38 }
 0x2a7   : > { %v2014_v18 = vmax.f32 %v1877_v2, 0.0 }
 0x2a8   : > { %v8593_v52 = vpack.c.bf16 %v1801_v7, %v1799_v5 }
 0x2a9   : > { %v1925_v40 = vpop.f32.mrf.mxu2  ;;  %v1974_v17 = vpop.f32.mrf.mxu3 }
 0x2aa   : > { %v1926_v22 = vadd.f32 %v1925_v40, %v8247_v27  ;;  %v1829_v61 = vpop.f32.mrf.mxu0  ;;  %v1878_v39 = vpop.f32.mrf.mxu1 }
 0x2ab   : > { %v1830_v23 = vadd.f32 %v1829_v61, %v8219_v32 }
 0x2ac   : > { %v1975_v30 = vadd.f32 %v1974_v17, %v1926_v22 }
 0x2ad   : > { %v1879_v58 = vadd.f32 %v1878_v39, %v1830_v23 }
 0x2ae   : > { %v2015_v19 = vmax.f32 %v1975_v30, 0.0 }
 0x2af   : > { %v2016_v53 = vmax.f32 %v1879_v58, 0.0 }
 0x2b1   : > { %v8597_v46 = vpack.c.bf16 %v2016_v53, %v2014_v18  ;;  %v1927_v63 = vpop.f32.mrf.mxu2  ;;  %v1976_v21 = vpop.f32.mrf.mxu3 }
 0x2b2   : > { %v1928_v38 = vadd.f32 %v1927_v63, %v8247_v27  ;;  %v1832_v36 = vpop.f32.mrf.mxu0  ;;  %v1881_v0 = vpop.f32.mrf.mxu1 }
 0x2b3   : > { %v1833_v35 = vadd.f32 %v1832_v36, %v8219_v32 }
 0x2b4   : > { %v1977_v48 = vadd.f32 %v1976_v21, %v1928_v38 }
 0x2b5   : > { %v1882_v42 = vadd.f32 %v1881_v0, %v1833_v35  ;;  %2275 = vmatmul.bf16.gmra.mxu0 %v8335_v54  ;;  %2324 = vmatmul.bf16.gmra.mxu1 %v8359_v43 }
 0x2b6   : > { %v2017_v33 = vmax.f32 %v1977_v48, 0.0  ;;  %2373 = vmatmul.bf16.gmra.mxu2 %v8335_v54  ;;  %2422 = vmatmul.bf16.gmra.mxu3 %v8359_v43 }
 0x2b7   : > { %v2018_v37 = vmax.f32 %v1882_v42, 0.0 }
 0x2b8   : > { %v8605_v9 = vpack.c.bf16 %v2017_v33, %v2015_v19 }
 0x2b9   : > { %v1930_v15 = vpop.f32.mrf.mxu2  ;;  %v1979_v14 = vpop.f32.mrf.mxu3 }
 0x2ba   : > { %v1931_v6 = vadd.f32 %v1930_v15, %v8247_v27  ;;  %v1834_v26 = vpop.f32.mrf.mxu0  ;;  %v1883_v57 = vpop.f32.mrf.mxu1 }
 0x2bb   : > { %v1835_v34 = vadd.f32 %v1834_v26, %v8219_v32 }
 0x2bc   : > { %v1980_v1 = vadd.f32 %v1979_v14, %v1931_v6 }
 0x2bd   : > { %v1884_v49 = vadd.f32 %v1883_v57, %v1835_v34 }
 0x2be   : > { %v2019_v29 = vmax.f32 %v1980_v1, 0.0 }
 0x2bf   : > { %v2020_v4 = vmax.f32 %v1884_v49, 0.0 }
 0x2c1   : > { %v1932_v20 = vpop.f32.mrf.mxu2  ;;  %v1981_v10 = vpop.f32.mrf.mxu3  ;;  %v8609_v13 = vpack.c.bf16 %v2020_v4, %v2018_v37 }
 0x2c2   : > { %v1933_v54 = vadd.f32 %v1932_v20, %v8247_v27  ;;  %v1837_v43 = vpop.f32.mrf.mxu0  ;;  %v1886_v12 = vpop.f32.mrf.mxu1 }
 0x2c3   : > { %v1838_v11 = vadd.f32 %v1837_v43, %v8219_v32 }
 0x2c4   : > { %v1982_v56 = vadd.f32 %v1981_v10, %v1933_v54 }
 0x2c5   : > { %v1887_v3 = vadd.f32 %v1886_v12, %v1838_v11  ;;  %2280 = vmatmul.bf16.gmra.mxu0 %v8383_v44  ;;  %2329 = vmatmul.bf16.gmra.mxu1 %v8407_v50 }
 0x2c6   : > { %v2021_v28 = vmax.f32 %v1982_v56, 0.0  ;;  %2378 = vmatmul.bf16.gmra.mxu2 %v8383_v44  ;;  %2427 = vmatmul.bf16.gmra.mxu3 %v8407_v50 }
 0x2c7   : > { %v2022_v22 = vmax.f32 %v1887_v3, 0.0 }
 0x2c8   : > { %v8617_v8 = vpack.c.bf16 %v2021_v28, %v2019_v29 }
 0x2c9   : > { %v1935_v45 = vpop.f32.mrf.mxu2  ;;  %v1984_v55 = vpop.f32.mrf.mxu3 }
 0x2ca   : > { %v1936_v25 = vadd.f32 %v1935_v45, %v8247_v27  ;;  %v1839_v2 = vpop.f32.mrf.mxu0  ;;  %v1888_v5 = vpop.f32.mrf.mxu1 }
 0x2cb   : > { %v1840_v7 = vadd.f32 %v1839_v2, %v8219_v32 }
 0x2cc   : > { %v1985_v40 = vadd.f32 %v1984_v55, %v1936_v25 }
 0x2cd   : > { %v1889_v17 = vadd.f32 %v1888_v5, %v1840_v7 }
 0x2ce   : > { %v2023_v21 = vmax.f32 %v1985_v40, 0.0 }
 0x2cf   : > { %v2024_v61 = vmax.f32 %v1889_v17, 0.0 }
 0x2d1   : > { %v1937_v39 = vpop.f32.mrf.mxu2  ;;  %v1986_v23 = vpop.f32.mrf.mxu3  ;;  %v8621_v30 = vpack.c.bf16 %v2024_v61, %v2022_v22 }
 0x2d2   : > { %v1938_v44 = vadd.f32 %v1937_v39, %v8247_v27  ;;  %v1842_v50 = vpop.f32.mrf.mxu0  ;;  %v1891_v58 = vpop.f32.mrf.mxu1 }
 0x2d3   : > { %v1843_v18 = vadd.f32 %v1842_v50, %v8219_v32 }
 0x2d4   : > { %v1987_v53 = vadd.f32 %v1986_v23, %v1938_v44 }
 0x2d5   : > { %v1892_v63 = vadd.f32 %v1891_v58, %v1843_v18  ;;  %2285 = vmatmul.bf16.gmra.mxu0 %v8431_v60  ;;  %2334 = vmatmul.bf16.gmra.mxu1 %v8455_v31 }
 0x2d6   : > { %v2025_v38 = vmax.f32 %v1987_v53, 0.0  ;;  %2383 = vmatmul.bf16.gmra.mxu2 %v8431_v60  ;;  %2432 = vmatmul.bf16.gmra.mxu3 %v8455_v31 }
 0x2d7   : > { %v2026_v6 = vmax.f32 %v1892_v63, 0.0 }
 0x2d8   : > { %v8629_v36 = vpack.c.bf16 %v2025_v38, %v2023_v21 }
 0x2d9   : > { %v1940_v0 = vpop.f32.mrf.mxu2  ;;  %v1989_v35 = vpop.f32.mrf.mxu3 }
 0x2da   : > { %v1941_v48 = vadd.f32 %v1940_v0, %v8247_v27  ;;  %v1844_v42 = vpop.f32.mrf.mxu0  ;;  %v1893_v19 = vpop.f32.mrf.mxu1 }
 0x2db   : > { %v1845_v33 = vadd.f32 %v1844_v42, %v8219_v32 }
 0x2dc   : > { %v1990_v15 = vadd.f32 %v1989_v35, %v1941_v48 }
 0x2dd   : > { %v1894_v14 = vadd.f32 %v1893_v19, %v1845_v33 }
 0x2de   : > { %v2027_v10 = vmax.f32 %v1990_v15, 0.0 }
 0x2df   : > { %v2028_v26 = vmax.f32 %v1894_v14, 0.0 }
 0x2e1   : > { %v1942_v57 = vpop.f32.mrf.mxu2  ;;  %v1991_v34 = vpop.f32.mrf.mxu3  ;;  %v8633_v1 = vpack.c.bf16 %v2028_v26, %v2026_v6 }
 0x2e2   : > { %v1943_v60 = vadd.f32 %v1942_v57, %v8247_v27  ;;  %v1847_v31 = vpop.f32.mrf.mxu0  ;;  %v1896_v49 = vpop.f32.mrf.mxu1 }
 0x2e3   : > { %v1848_v37 = vadd.f32 %v1847_v31, %v8219_v32  ;;  %v6866_v31 = vld [vmem:[%s10627_s3 + $0x374] sm:$0xf] }
 0x2e4   : > { %v1992_v4 = vadd.f32 %v1991_v34, %v1943_v60 }
 0x2e5   : > { %v1897_v20 = vadd.f32 %v1896_v49, %v1848_v37  ;;  %2290 = vmatmul.bf16.gmra.mxu0 %v8479_v41  ;;  %2339 = vmatmul.bf16.gmra.mxu1 %v8503_v16  ;;  %v6312_v49 = vld [vmem:[%s10627_s3 + $0x378] sm:$0xf0] }
 0x2e6   : > { %v2029_v54 = vmax.f32 %v1992_v4, 0.0  ;;  %2388 = vmatmul.bf16.gmra.mxu2 %v8479_v41  ;;  %2437 = vmatmul.bf16.gmra.mxu3 %v8503_v16  ;;  %v8671_v37 = vor.u32 %v6866_v31, %v6312_v49  ;;  %v6882_v4 = vld [vmem:[%s10627_s3 + $0x3f4] sm:$0xf] }
 0x2e7   : > { %v2030_v25 = vmax.f32 %v1897_v20, 0.0 }
 0x2e8   : > { %v8641_v43 = vpack.c.bf16 %v2029_v54, %v2027_v10  ;;  %3048 = vmatpush.bf16.msrb.mxu2 %v8671_v37 }
 0x2e9   : > { %v1945_v12 = vpop.f32.mrf.mxu2  ;;  %v1994_v11 = vpop.f32.mrf.mxu3 }
 0x2ea   : > { %v1946_v56 = vadd.f32 %v1945_v12, %v8247_v27  ;;  %v1849_v3 = vpop.f32.mrf.mxu0  ;;  %v1898_v29 = vpop.f32.mrf.mxu1 }
 0x2eb   : > { %v1850_v28 = vadd.f32 %v1849_v3, %v8219_v32 }
 0x2ec   : > { %v1995_v45 = vadd.f32 %v1994_v11, %v1946_v56 }
 0x2ed   : > { %v1899_v55 = vadd.f32 %v1898_v29, %v1850_v28 }
 0x2ee   : > { %v2031_v23 = vmax.f32 %v1995_v45, 0.0 }
 0x2ef   : > { %v2032_v2 = vmax.f32 %v1899_v55, 0.0 }
 0x2f1   : > { %v1947_v5 = vpop.f32.mrf.mxu2  ;;  %v1996_v7 = vpop.f32.mrf.mxu3  ;;  %v8645_v40 = vpack.c.bf16 %v2032_v2, %v2030_v25 }
 0x2f2   : > { %v1948_v41 = vadd.f32 %v1947_v5, %v8247_v27  ;;  %v1852_v16 = vpop.f32.mrf.mxu0  ;;  %v1901_v17 = vpop.f32.mrf.mxu1  ;;  %v6310_v5 = vld [vmem:[%s10627_s3 + $0x370] sm:$0xf] }
 0x2f3   : > { %v1853_v22 = vadd.f32 %v1852_v16, %v8219_v32 }
 0x2f4   : > { %v1997_v61 = vadd.f32 %v1996_v7, %v1948_v41  ;;  %v6867_v7 = vld [vmem:[%s10627_s3 + $0x374] sm:$0xf0]  ;;  %v6374_v41 = vld [vmem:[%s10627_s3 + $0x3f0] sm:$0xf] }
 0x2f5   : > { %v1902_v39 = vadd.f32 %v1901_v17, %v1853_v22  ;;  %2295 = vmatmul.bf16.gmra.mxu0 %v8531_v24  ;;  %2344 = vmatmul.bf16.gmra.mxu1 %v8548_v62 }
 0x2f6   : > { %v2033_v44 = vmax.f32 %v1997_v61, 0.0  ;;  %2393 = vmatmul.bf16.gmra.mxu2 %v8531_v24  ;;  %2442 = vmatmul.bf16.gmra.mxu3 %v8548_v62 }
 0x2f7   : > { %v2034_v48 = vmax.f32 %v1902_v39, 0.0  ;;  %v8699_v39 = vor.u32 %v6867_v7, %v6310_v5 }
 0x2f8   : > { %v8653_v50 = vpack.c.bf16 %v2033_v44, %v2031_v23  ;;  %v6883_v23 = vld [vmem:[%s10627_s3 + $0x3f4] sm:$0xf0] }
 0x2f9   : > { %v1950_v58 = vpop.f32.mrf.mxu2  ;;  %v1999_v18 = vpop.f32.mrf.mxu3  ;;  %2950 = vmatpush.bf16.msrb.mxu0 %v8699_v39 }
 0x2fa   : > { %v1951_v53 = vadd.f32 %v1950_v58, %v8247_v27  ;;  %v1854_v63 = vpop.f32.mrf.mxu0  ;;  %v1903_v21 = vpop.f32.mrf.mxu1  ;;  %v8705_v58 = vor.u32 %v6883_v23, %v6374_v41  ;;  %v6862_v41 = vld [vmem:[%s10627_s3 + $0x354] sm:$0xf] }
 0x2fb   : > { %v1855_v38 = vadd.f32 %v1854_v63, %v8219_v32 }
 0x2fc   : > { %v2000_v0 = vadd.f32 %v1999_v18, %v1951_v53  ;;  %2999 = vmatpush.bf16.msrb.mxu1 %v8705_v58 }
 0x2fd   : > { %v1904_v35 = vadd.f32 %v1903_v21, %v1855_v38  ;;  %v6864_v38 = vld [vmem:[%s10627_s3 + $0x364] sm:$0xf] }
 0x2fe   : > { %v2035_v34 = vmax.f32 %v2000_v0, 0.0  ;;  %v6304_v0 = vld [vmem:[%s10627_s3 + $0x368] sm:$0xf0] }
 0x2ff   : > { %v2036_v42 = vmax.f32 %v1904_v35, 0.0  ;;  %v6880_v35 = vld [vmem:[%s10627_s3 + $0x3e4] sm:$0xf] }
 0x301   : > { %v1952_v19 = vpop.f32.mrf.mxu2  ;;  %v2001_v33 = vpop.f32.mrf.mxu3  ;;  %v8657_v15 = vpack.c.bf16 %v2036_v42, %v2034_v48 }
 0x302   : > { %v1953_v24 = vadd.f32 %v1952_v19, %v8247_v27  ;;  %v1857_v62 = vpop.f32.mrf.mxu0  ;;  %v1906_v14 = vpop.f32.mrf.mxu1  ;;  %v8724_v19 = vor.u32 %v6864_v38, %v6304_v0 }
 0x303   : > { %v1858_v6 = vadd.f32 %v1857_v62, %v8219_v32 }
 0x304   : > { %v2002_v26 = vadd.f32 %v2001_v33, %v1953_v24  ;;  %3049 = vmatpush.bf16.msrb.mxu2 %v8724_v19 }
 0x305   : > { %v1907_v57 = vadd.f32 %v1906_v14, %v1858_v6  ;;  %2300 = vmatmul.bf16.gmra.mxu0 %v8560_v51  ;;  %2349 = vmatmul.bf16.gmra.mxu1 %v8575_v59 }
 0x306   : > { %v2037_v60 = vmax.f32 %v2002_v26, 0.0  ;;  %2398 = vmatmul.bf16.gmra.mxu2 %v8560_v51  ;;  %2447 = vmatmul.bf16.gmra.mxu3 %v8575_v59  ;;  %v6376_v51 = vld [vmem:[%s10627_s3 + $0x3f8] sm:$0xf0]  ;;  %v6090_v26 = vld [vmem:[%s10628_s4 + $0x4] sm:$0x3] }
 0x307   : > { %v8681_v54 = vor.u32 %v6882_v4, %v6376_v51  ;;  %v2038_v45 = vmax.f32 %v1907_v57, 0.0  ;;  %v6302_v4 = vld [vmem:[%s10627_s3 + $0x360] sm:$0xf] }
 0x308   : > { %v8679_v20 = vpack.c.bf16 %v2037_v60, %v2035_v34  ;;  %v8738_v60 = vperm.slane %v6090_v26, 0 }
 0x309   : > { %v1955_v59 = vpop.f32.mrf.mxu2  ;;  %v2004_v10 = vpop.f32.mrf.mxu3  ;;  %3097 = vmatpush.bf16.msrb.mxu3 %v8681_v54 }
 0x30a   : > { %v1956_v12 = vadd.f32 %v1955_v59, %v8247_v27  ;;  %v1859_v11 = vpop.f32.mrf.mxu0  ;;  %v1908_v56 = vpop.f32.mrf.mxu1  ;;  %v6366_v59 = vld [vmem:[%s10627_s3 + $0x3e0] sm:$0xf] }
 0x30b   : > { %v1860_v3 = vadd.f32 %v1859_v11, %v8219_v32 }
 0x30c   : > { %v2005_v29 = vadd.f32 %v2004_v10, %v1956_v12  ;;  %v6881_v10 = vld [vmem:[%s10627_s3 + $0x3e4] sm:$0xf0] }
 0x30d   : > { %v1909_v28 = vadd.f32 %v1908_v56, %v1860_v3  ;;  %v8754_v56 = vor.u32 %v6881_v10, %v6366_v59 }
 0x30e   : > { %v2039_v63 = vmax.f32 %v2005_v29, 0.0 }
 0x30f   : > { %v2040_v55 = vmax.f32 %v1909_v28, 0.0  ;;  %3000 = vmatpush.bf16.msrb.mxu1 %v8754_v56 }
 0x311   : > { %v1957_v25 = vpop.f32.mrf.mxu2  ;;  %v2006_v2 = vpop.f32.mrf.mxu3  ;;  %v8696_v16 = vpack.c.bf16 %v2040_v55, %v2038_v45 }
 0x312   : > { %v1958_v17 = vadd.f32 %v1957_v25, %v8247_v27  ;;  %v1862_v22 = vpop.f32.mrf.mxu0  ;;  %v1911_v61 = vpop.f32.mrf.mxu1 }
 0x313   : > { %v1863_v44 = vadd.f32 %v1862_v22, %v8219_v32 }
 0x314   : > { %v2007_v18 = vadd.f32 %v2006_v2, %v1958_v17  ;;  %v6296_v17 = vld [vmem:[%s10627_s3 + $0x358] sm:$0xf0] }
 0x315   : > { %v1912_v53 = vadd.f32 %v1911_v61, %v1863_v44  ;;  %2305 = vmatmul.bf16.gmra.mxu0 %v8585_v47  ;;  %2354 = vmatmul.bf16.gmra.mxu1 %v8593_v52  ;;  %v8774_v22 = vor.u32 %v6862_v41, %v6296_v17  ;;  %v6878_v61 = vld [vmem:[%s10627_s3 + $0x3d4] sm:$0xf] }
 0x316   : > { %v2041_v21 = vmax.f32 %v2007_v18, 0.0  ;;  %2403 = vmatmul.bf16.gmra.mxu2 %v8585_v47  ;;  %2452 = vmatmul.bf16.gmra.mxu3 %v8593_v52  ;;  %v6368_v52 = vld [vmem:[%s10627_s3 + $0x3e8] sm:$0xf0] }
 0x317   : > { %v8730_v14 = vor.u32 %v6880_v35, %v6368_v52  ;;  %v2042_v31 = vmax.f32 %v1912_v53, 0.0  ;;  %3050 = vmatpush.bf16.msrb.mxu2 %v8774_v22  ;;  %v6294_v52 = vld [vmem:[%s10627_s3 + $0x350] sm:$0xf] }
 0x318   : > { %v8722_v48 = vpack.c.bf16 %v2041_v21, %v2039_v63 }
 0x319   : > { %v1960_v42 = vpop.f32.mrf.mxu2  ;;  %v2009_v47 = vpop.f32.mrf.mxu3  ;;  %3098 = vmatpush.bf16.msrb.mxu3 %v8730_v14 }
 0x31a   : > { %v1961_v33 = vadd.f32 %v1960_v42, %v8247_v27  ;;  %v1864_v24 = vpop.f32.mrf.mxu0  ;;  %v1913_v62 = vpop.f32.mrf.mxu1 }
 0x31b   : > { %v1865_v6 = vadd.f32 %v1864_v24, %v8219_v32  ;;  %v6865_v32 = vld [vmem:[%s10627_s3 + $0x364] sm:$0xf0] }
 0x31c   : > { %v2010_v57 = vadd.f32 %v2009_v47, %v1961_v33  ;;  %v8746_v51 = vor.u32 %v6865_v32, %v6302_v4  ;;  %v6863_v33 = vld [vmem:[%s10627_s3 + $0x354] sm:$0xf0] }
 0x31d   : > { %v1914_v34 = vadd.f32 %v1913_v62, %v1865_v6  ;;  %v8796_v24 = vor.u32 %v6863_v33, %v6294_v52  ;;  %v6358_v62 = vld [vmem:[%s10627_s3 + $0x3d0] sm:$0xf]  ;;  %v6879_v6 = vld [vmem:[%s10627_s3 + $0x3d4] sm:$0xf0] }
 0x31e   : > { %2951 = vmatpush.bf16.msrb.mxu0 %v8746_v51  ;;  %v2043_v5 = vmax.f32 %v2010_v57, 0.0 }
 0x31f   : > { %v2044_v49 = vmax.f32 %v1914_v34, 0.0 }
 0x321   : > { %v1962_v12 = vpop.f32.mrf.mxu2  ;;  %v2011_v11 = vpop.f32.mrf.mxu3  ;;  %v8756_v3 = vpack.c.bf16 %v2044_v49, %v2042_v31  ;;  %v8806_v31 = vor.u32 %v6879_v6, %v6358_v62 }
 0x322   : > { %v1963_v29 = vadd.f32 %v1962_v12, %v8247_v27  ;;  %v2271_v28 = vpop.f32.mrf.mxu0  ;;  %v2320_v45 = vpop.f32.mrf.mxu1  ;;  %v8766_v27 = vperm.slane %v6090_v26, 1  ;;  %2952 = vmatpush.bf16.msrb.mxu0 %v8796_v24 }
 0x323   : > { %v2272_v55 = vadd.f32 %v2271_v28, %v8738_v60  ;;  %3001 = vmatpush.bf16.msrb.mxu1 %v8806_v31  ;;  %v6860_v28 = vld [vmem:[%s10627_s3 + $0x344] sm:$0xf] }
 0x324   : > { %v2012_v25 = vadd.f32 %v2011_v11, %v1963_v29 }
 0x325   : > { %v2321_v2 = vadd.f32 %v2320_v45, %v2272_v55  ;;  %2514 = vmatmul.bf16.vlgmr.msra.gmra.mxu0 %v8597_v46  ;;  %2563 = vmatmul.bf16.vlgmr.msra.gmra.mxu1 %v8605_v9  ;;  %v6288_v45 = vld [vmem:[%s10627_s3 + $0x348] sm:$0xf0] }
 0x326   : > { %v2045_v7 = vmax.f32 %v2012_v25, 0.0  ;;  %2612 = vmatmul.bf16.vlgmr.msra.gmra.mxu2 %v8597_v46  ;;  %2661 = vmatmul.bf16.vlgmr.msra.gmra.mxu3 %v8605_v9  ;;  %v6360_v46 = vld [vmem:[%s10627_s3 + $0x3d8] sm:$0xf0]  ;;  %v8824_v25 = vor.u32 %v6860_v28, %v6288_v45  ;;  %v6874_v28 = vld [vmem:[%s10627_s3 + $0x3b4] sm:$0xf] }
 0x327   : > { %v8784_v18 = vor.u32 %v6878_v61, %v6360_v46  ;;  %v2458_v42 = vmax.f32 %v2321_v2, 0.0  ;;  %v6876_v2 = vld [vmem:[%s10627_s3 + $0x3c4] sm:$0xf] }
 0x328   : > { %v8782_v9 = vpack.c.bf16 %v2045_v7, %v2043_v5  ;;  %3051 = vmatpush.bf16.msrb.mxu2 %v8824_v25 }
 0x329   : > { %v2369_v23 = vpop.f32.mrf.mxu2  ;;  %v2418_v44 = vpop.f32.mrf.mxu3  ;;  %3099 = vmatpush.bf16.msrb.mxu3 %v8784_v18 }
 0x32a   : > { %v2370_v53 = vadd.f32 %v2369_v23, %v8766_v27  ;;  %v2273_v63 = vpop.f32.mrf.mxu0  ;;  %v2322_v21 = vpop.f32.mrf.mxu1 }
 0x32b   : > { %v2274_v38 = vadd.f32 %v2273_v63, %v8738_v60 }
 0x32c   : > { %v2419_v0 = vadd.f32 %v2418_v44, %v2370_v53 }
 0x32d   : > { %v2323_v35 = vadd.f32 %v2322_v21, %v2274_v38  ;;  %v6286_v21 = vld [vmem:[%s10627_s3 + $0x340] sm:$0xf]  ;;  %v6861_v38 = vld [vmem:[%s10627_s3 + $0x344] sm:$0xf0] }
 0x32e   : > { %v2459_v11 = vmax.f32 %v2419_v0, 0.0  ;;  %v8844_v0 = vor.u32 %v6861_v38, %v6286_v21  ;;  %v6342_v38 = vld [vmem:[%s10627_s3 + $0x3b0] sm:$0xf] }
 0x32f   : > { %v2460_v47 = vmax.f32 %v2323_v35, 0.0  ;;  %v6350_v35 = vld [vmem:[%s10627_s3 + $0x3c0] sm:$0xf] }
 0x330   : > { %2953 = vmatpush.bf16.msrb.mxu0 %v8844_v0 }
 0x331   : > { %v8804_v26 = vpack.c.bf16 %v2460_v47, %v2458_v42  ;;  %v2371_v57 = vpop.f32.mrf.mxu2  ;;  %v2420_v34 = vpop.f32.mrf.mxu3  ;;  %v6877_v42 = vld [vmem:[%s10627_s3 + $0x3c4] sm:$0xf0] }
 0x332   : > { %v2372_v49 = vadd.f32 %v2371_v57, %v8766_v27  ;;  %v2276_v4 = vpop.f32.mrf.mxu0  ;;  %v2325_v32 = vpop.f32.mrf.mxu1  ;;  %v8852_v33 = vor.u32 %v6877_v42, %v6350_v35  ;;  %v6875_v35 = vld [vmem:[%s10627_s3 + $0x3b4] sm:$0xf0] }
 0x333   : > { %v2277_v59 = vadd.f32 %v2276_v4, %v8738_v60 }
 0x334   : > { %v2421_v10 = vadd.f32 %v2420_v34, %v2372_v49  ;;  %3002 = vmatpush.bf16.msrb.mxu1 %v8852_v33 }
 0x335   : > { %v2326_v12 = vadd.f32 %v2325_v32, %v2277_v59  ;;  %2519 = vmatmul.bf16.gmra.mxu0 %v8609_v13  ;;  %2568 = vmatmul.bf16.gmra.mxu1 %v8617_v8 }
 0x336   : > { %v2461_v29 = vmax.f32 %v2421_v10, 0.0  ;;  %2617 = vmatmul.bf16.gmra.mxu2 %v8609_v13  ;;  %2666 = vmatmul.bf16.gmra.mxu3 %v8617_v8  ;;  %v6352_v13 = vld [vmem:[%s10627_s3 + $0x3c8] sm:$0xf0] }
 0x337   : > { %v8832_v7 = vor.u32 %v6876_v2, %v6352_v13  ;;  %v2462_v53 = vmax.f32 %v2326_v12, 0.0  ;;  %v6858_v12 = vld [vmem:[%s10627_s3 + $0x334] sm:$0xf] }
 0x338   : > { %v8822_v55 = vpack.c.bf16 %v2461_v29, %v2459_v11  ;;  %v6280_v11 = vld [vmem:[%s10627_s3 + $0x338] sm:$0xf0] }
 0x339   : > { %v2374_v8 = vpop.f32.mrf.mxu2  ;;  %v2423_v5 = vpop.f32.mrf.mxu3  ;;  %3100 = vmatpush.bf16.msrb.mxu3 %v8832_v7  ;;  %v8870_v29 = vor.u32 %v6858_v12, %v6280_v11  ;;  %v6856_v11 = vld [vmem:[%s10627_s3 + $0x324] sm:$0xf] }
 0x33a   : > { %v2375_v41 = vadd.f32 %v2374_v8, %v8766_v27  ;;  %v2278_v17 = vpop.f32.mrf.mxu0  ;;  %v2327_v61 = vpop.f32.mrf.mxu1 }
 0x33b   : > { %v2279_v46 = vadd.f32 %v2278_v17, %v8738_v60  ;;  %3052 = vmatpush.bf16.msrb.mxu2 %v8870_v29 }
 0x33c   : > { %v2424_v23 = vadd.f32 %v2423_v5, %v2375_v41 }
 0x33d   : > { %v2328_v44 = vadd.f32 %v2327_v61, %v2279_v46 }
 0x33e   : > { %v2463_v59 = vmax.f32 %v2424_v23, 0.0 }
 0x33f   : > { %v2464_v63 = vmax.f32 %v2328_v44, 0.0 }
 0x341   : > { %v2376_v47 = vpop.f32.mrf.mxu2  ;;  %v2425_v52 = vpop.f32.mrf.mxu3  ;;  %v8854_v62 = vpack.c.bf16 %v2464_v63, %v2462_v53  ;;  %v6278_v53 = vld [vmem:[%s10627_s3 + $0x330] sm:$0xf]  ;;  %v6859_v63 = vld [vmem:[%s10627_s3 + $0x334] sm:$0xf0] }
 0x342   : > { %v2377_v6 = vadd.f32 %v2376_v47, %v8766_v27  ;;  %v2281_v57 = vpop.f32.mrf.mxu0  ;;  %v2330_v34 = vpop.f32.mrf.mxu1  ;;  %v8892_v21 = vor.u32 %v6859_v63, %v6278_v53 }
 0x343   : > { %v2282_v49 = vadd.f32 %v2281_v57, %v8738_v60 }
 0x344   : > { %v2426_v4 = vadd.f32 %v2425_v52, %v2377_v6  ;;  %v8900_v52 = vor.u32 %v6875_v35, %v6342_v38  ;;  %2954 = vmatpush.bf16.msrb.mxu0 %v8892_v21  ;;  %v6270_v38 = vld [vmem:[%s10627_s3 + $0x320] sm:$0xf]  ;;  %v6857_v35 = vld [vmem:[%s10627_s3 + $0x324] sm:$0xf0] }
 0x345   : > { %v2331_v32 = vadd.f32 %v2330_v34, %v2282_v49  ;;  %2524 = vmatmul.bf16.gmra.mxu0 %v8621_v30  ;;  %2573 = vmatmul.bf16.gmra.mxu1 %v8629_v36 }
 0x346   : > { %v2465_v10 = vmax.f32 %v2426_v4, 0.0  ;;  %2622 = vmatmul.bf16.gmra.mxu2 %v8621_v30  ;;  %2671 = vmatmul.bf16.gmra.mxu3 %v8629_v36  ;;  %v6344_v30 = vld [vmem:[%s10627_s3 + $0x3b8] sm:$0xf0] }
 0x347   : > { %v8880_v13 = vor.u32 %v6874_v28, %v6344_v30  ;;  %v2466_v23 = vmax.f32 %v2331_v32, 0.0  ;;  %3003 = vmatpush.bf16.msrb.mxu1 %v8900_v52  ;;  %v6272_v28 = vld [vmem:[%s10627_s3 + $0x328] sm:$0xf0] }
 0x348   : > { %v8878_v45 = vpack.c.bf16 %v2465_v10, %v2463_v59  ;;  %v8918_v30 = vor.u32 %v6856_v11, %v6272_v28 }
 0x349   : > { %v2379_v36 = vpop.f32.mrf.mxu2  ;;  %v2428_v2 = vpop.f32.mrf.mxu3  ;;  %3101 = vmatpush.bf16.msrb.mxu3 %v8880_v13 }
 0x34a   : > { %v2380_v8 = vadd.f32 %v2379_v36, %v8766_v27  ;;  %v2283_v5 = vpop.f32.mrf.mxu0  ;;  %v2332_v41 = vpop.f32.mrf.mxu1  ;;  %v6872_v36 = vld [vmem:[%s10627_s3 + $0x3a4] sm:$0xf]  ;;  %3053 = vmatpush.bf16.msrb.mxu2 %v8918_v30 }
 0x34b   : > { %v2284_v17 = vadd.f32 %v2283_v5, %v8738_v60 }
 0x34c   : > { %v2429_v61 = vadd.f32 %v2428_v2, %v2380_v8 }
 0x34d   : > { %v2333_v46 = vadd.f32 %v2332_v41, %v2284_v17 }
 0x34e   : > { %v2467_v10 = vmax.f32 %v2429_v61, 0.0 }
 0x34f   : > { %v2468_v44 = vmax.f32 %v2333_v46, 0.0 }
 0x351   : > { %v2381_v42 = vpop.f32.mrf.mxu2  ;;  %v2430_v47 = vpop.f32.mrf.mxu3  ;;  %v8902_v6 = vpack.c.bf16 %v2468_v44, %v2466_v23 }
 0x352   : > { %v2382_v57 = vadd.f32 %v2381_v42, %v8766_v27  ;;  %v2286_v34 = vpop.f32.mrf.mxu0  ;;  %v2335_v49 = vpop.f32.mrf.mxu1  ;;  %v8940_v42 = vor.u32 %v6857_v35, %v6270_v38 }
 0x353   : > { %v2287_v4 = vadd.f32 %v2286_v34, %v8738_v60 }
 0x354   : > { %v2431_v32 = vadd.f32 %v2430_v47, %v2382_v57  ;;  %v6334_v47 = vld [vmem:[%s10627_s3 + $0x3a0] sm:$0xf]  ;;  %v6873_v57 = vld [vmem:[%s10627_s3 + $0x3a4] sm:$0xf0]  ;;  %2955 = vmatpush.bf16.msrb.mxu0 %v8940_v42 }
 0x355   : > { %v2336_v59 = vadd.f32 %v2335_v49, %v2287_v4  ;;  %2529 = vmatmul.bf16.gmra.mxu0 %v8633_v1  ;;  %2578 = vmatmul.bf16.gmra.mxu1 %v8641_v43  ;;  %v8948_v4 = vor.u32 %v6873_v57, %v6334_v47 }
 0x356   : > { %v2469_v12 = vmax.f32 %v2431_v32, 0.0  ;;  %2627 = vmatmul.bf16.gmra.mxu2 %v8633_v1  ;;  %2676 = vmatmul.bf16.gmra.mxu3 %v8641_v43  ;;  %v6336_v1 = vld [vmem:[%s10627_s3 + $0x3a8] sm:$0xf0] }
 0x357   : > { %v8928_v5 = vor.u32 %v6872_v36, %v6336_v1  ;;  %v2470_v53 = vmax.f32 %v2336_v59, 0.0  ;;  %3004 = vmatpush.bf16.msrb.mxu1 %v8948_v4 }
 0x358   : > { %v8926_v2 = vpack.c.bf16 %v2469_v12, %v2467_v10 }
 0x359   : > { %v2384_v43 = vpop.f32.mrf.mxu2  ;;  %v2433_v8 = vpop.f32.mrf.mxu3  ;;  %3102 = vmatpush.bf16.msrb.mxu3 %v8928_v5 }
 0x35a   : > { %v2385_v41 = vadd.f32 %v2384_v43, %v8766_v27  ;;  %v2288_v17 = vpop.f32.mrf.mxu0  ;;  %v2337_v61 = vpop.f32.mrf.mxu1 }
 0x35b   : > { %v2289_v46 = vadd.f32 %v2288_v17, %v8738_v60 }
 0x35c   : > { %v2434_v23 = vadd.f32 %v2433_v8, %v2385_v41  ;;  %v6854_v8 = vld [vmem:[%s10627_s3 + $0x314] sm:$0xf]  ;;  %v6264_v41 = vld [vmem:[%s10627_s3 + $0x318] sm:$0xf0] }
 0x35d   : > { %v2338_v44 = vadd.f32 %v2337_v61, %v2289_v46  ;;  %v8966_v17 = vor.u32 %v6854_v8, %v6264_v41  ;;  %v6870_v61 = vld [vmem:[%s10627_s3 + $0x394] sm:$0xf] }
 0x35e   : > { %v2471_v1 = vmax.f32 %v2434_v23, 0.0 }
 0x35f   : > { %v2472_v63 = vmax.f32 %v2338_v44, 0.0  ;;  %3054 = vmatpush.bf16.msrb.mxu2 %v8966_v17 }
 0x361   : > { %v2386_v34 = vpop.f32.mrf.mxu2  ;;  %v2435_v49 = vpop.f32.mrf.mxu3  ;;  %v8950_v32 = vpack.c.bf16 %v2472_v63, %v2470_v53 }
 0x362   : > { %v2387_v59 = vadd.f32 %v2386_v34, %v8766_v27  ;;  %v2291_v10 = vpop.f32.mrf.mxu0  ;;  %v2340_v12 = vpop.f32.mrf.mxu1 }
 0x363   : > { %v2292_v11 = vadd.f32 %v2291_v10, %v8738_v60  ;;  %v6855_v10 = vld [vmem:[%s10627_s3 + $0x314] sm:$0xf0] }
 0x364   : > { %v2436_v28 = vadd.f32 %v2435_v49, %v2387_v59  ;;  %v6262_v59 = vld [vmem:[%s10627_s3 + $0x310] sm:$0xf] }
 0x365   : > { %v2341_v36 = vadd.f32 %v2340_v12, %v2292_v11  ;;  %2534 = vmatmul.bf16.gmra.mxu0 %v8645_v40  ;;  %2583 = vmatmul.bf16.gmra.mxu1 %v8653_v50  ;;  %v8988_v12 = vor.u32 %v6855_v10, %v6262_v59  ;;  %v6326_v11 = vld [vmem:[%s10627_s3 + $0x390] sm:$0xf] }
 0x366   : > { %v2473_v43 = vmax.f32 %v2436_v28, 0.0  ;;  %2632 = vmatmul.bf16.gmra.mxu2 %v8645_v40  ;;  %2681 = vmatmul.bf16.gmra.mxu3 %v8653_v50  ;;  %v6328_v40 = vld [vmem:[%s10627_s3 + $0x398] sm:$0xf0]  ;;  %v6871_v28 = vld [vmem:[%s10627_s3 + $0x394] sm:$0xf0] }
 0x367   : > { %v8976_v44 = vor.u32 %v6870_v61, %v6328_v40  ;;  %v2474_v34 = vmax.f32 %v2341_v36, 0.0  ;;  %2956 = vmatpush.bf16.msrb.mxu0 %v8988_v12 }
 0x368   : > { %v8974_v46 = vpack.c.bf16 %v2473_v43, %v2471_v1  ;;  %v8996_v43 = vor.u32 %v6871_v28, %v6326_v11 }
 0x369   : > { %v2389_v50 = vpop.f32.mrf.mxu2  ;;  %v2438_v23 = vpop.f32.mrf.mxu3  ;;  %3103 = vmatpush.bf16.msrb.mxu3 %v8976_v44 }
 0x36a   : > { %v2390_v53 = vadd.f32 %v2389_v50, %v8766_v27  ;;  %v2293_v63 = vpop.f32.mrf.mxu0  ;;  %v2342_v38 = vpop.f32.mrf.mxu1  ;;  %3005 = vmatpush.bf16.msrb.mxu1 %v8996_v43 }
 0x36b   : > { %v2294_v35 = vadd.f32 %v2293_v63, %v8738_v60 }
 0x36c   : > { %v2439_v47 = vadd.f32 %v2438_v23, %v2390_v53 }
 0x36d   : > { %v2343_v57 = vadd.f32 %v2342_v38, %v2294_v35  ;;  %v6852_v35 = vld [vmem:[%s10627_s3 + $0x304] sm:$0xf] }
 0x36e   : > { %v2475_v63 = vmax.f32 %v2439_v47, 0.0 }
 0x36f   : > { %v2476_v49 = vmax.f32 %v2343_v57, 0.0  ;;  %v6256_v57 = vld [vmem:[%s10627_s3 + $0x308] sm:$0xf0] }
 0x371   : > { %v2391_v36 = vpop.f32.mrf.mxu2  ;;  %v2440_v1 = vpop.f32.mrf.mxu3  ;;  %v8998_v8 = vpack.c.bf16 %v2476_v49, %v2474_v34  ;;  %v9014_v34 = vor.u32 %v6852_v35, %v6256_v57  ;;  %v6868_v49 = vld [vmem:[%s10627_s3 + $0x384] sm:$0xf] }
 0x372   : > { %v2392_v41 = vadd.f32 %v2391_v36, %v8766_v27  ;;  %v2296_v61 = vpop.f32.mrf.mxu0  ;;  %v2345_v40 = vpop.f32.mrf.mxu1 }
 0x373   : > { %v2297_v50 = vadd.f32 %v2296_v61, %v8738_v60  ;;  %3055 = vmatpush.bf16.msrb.mxu2 %v9014_v34 }
 0x374   : > { %v2441_v23 = vadd.f32 %v2440_v1, %v2392_v41 }
 0x375   : > { %v2346_v53 = vadd.f32 %v2345_v40, %v2297_v50  ;;  %2539 = vmatmul.bf16.gmra.mxu0 %v8657_v15  ;;  %2588 = vmatmul.bf16.gmra.mxu1 %v8679_v20 }
 0x376   : > { %v2477_v38 = vmax.f32 %v2441_v23, 0.0  ;;  %2637 = vmatmul.bf16.gmra.mxu2 %v8657_v15  ;;  %2686 = vmatmul.bf16.gmra.mxu3 %v8679_v20  ;;  %v6320_v15 = vld [vmem:[%s10627_s3 + $0x388] sm:$0xf0]  ;;  %v6254_v23 = vld [vmem:[%s10627_s3 + $0x300] sm:$0xf] }
 0x377   : > { %v9024_v10 = vor.u32 %v6868_v49, %v6320_v15  ;;  %3292 = vmatpush.bf16.msra.mxu2 %v8671_v37  ;;  %v2478_v40 = vmax.f32 %v2346_v53, 0.0  ;;  %v6318_v37 = vld [vmem:[%s10627_s3 + $0x380] sm:$0xf] }
 0x378   : > { %v9022_v47 = vpack.c.bf16 %v2477_v38, %v2475_v63  ;;  %v6853_v63 = vld [vmem:[%s10627_s3 + $0x304] sm:$0xf0] }
 0x379   : > { %v2394_v20 = vpop.f32.mrf.mxu2  ;;  %v2443_v59 = vpop.f32.mrf.mxu3  ;;  %3104 = vmatpush.bf16.msrb.mxu3 %v9024_v10  ;;  %v9039_v38 = vor.u32 %v6853_v63, %v6254_v23 }
 0x37a   : > { %v2395_v11 = vadd.f32 %v2394_v20, %v8766_v27  ;;  %v2298_v28 = vpop.f32.mrf.mxu0  ;;  %v2347_v36 = vpop.f32.mrf.mxu1 }
 0x37b   : > { %v2299_v1 = vadd.f32 %v2298_v28, %v8738_v60  ;;  %3293 = vmatpush.bf16.msra.mxu2 %v8724_v19  ;;  %2957 = vmatpush.bf16.msrb.mxu0 %v9039_v38 }
 0x37c   : > { %v2444_v41 = vadd.f32 %v2443_v59, %v2395_v11 }
 0x37d   : > { %3341 = vmatpush.bf16.msra.mxu3 %v8681_v54  ;;  %v2348_v61 = vadd.f32 %v2347_v36, %v2299_v1  ;;  %v6869_v54 = vld [vmem:[%s10627_s3 + $0x384] sm:$0xf0] }
 0x37e   : > { %v9048_v57 = vor.u32 %v6869_v54, %v6318_v37  ;;  %v2479_v28 = vmax.f32 %v2444_v41, 0.0 }
 0x37f   : > { %v2480_v50 = vmax.f32 %v2348_v61, 0.0  ;;  %3194 = vmatpush.bf16.msra.mxu0 %v8699_v39  ;;  %3294 = vmatpush.bf16.msra.mxu2 %v8774_v22 }
 0x380   : > { %3006 = vmatpush.bf16.msrb.mxu1 %v9048_v57 }
 0x381   : > { %3342 = vmatpush.bf16.msra.mxu3 %v8730_v14  ;;  %v2396_v53 = vpop.f32.mrf.mxu2  ;;  %v2445_v35 = vpop.f32.mrf.mxu3  ;;  %v9050_v49 = vpack.c.bf16 %v2480_v50, %v2478_v40 }
 0x382   : > { %v2397_v19 = vadd.f32 %v2396_v53, %v8766_v27  ;;  %v2301_v15 = vpop.f32.mrf.mxu0  ;;  %v2350_v20 = vpop.f32.mrf.mxu1 }
 0x383   : > { %v2302_v59 = vadd.f32 %v2301_v15, %v8738_v60  ;;  %3195 = vmatpush.bf16.msra.mxu0 %v8746_v51  ;;  %3295 = vmatpush.bf16.msra.mxu2 %v8824_v25 }
 0x384   : > { %v2446_v11 = vadd.f32 %v2445_v35, %v2397_v19  ;;  %3243 = vmatpush.bf16.msra.mxu1 %v8705_v58 }
 0x385   : > { %v2351_v14 = vadd.f32 %v2350_v20, %v2302_v59  ;;  %2544 = vmatmul.bf16.gmra.mxu0 %v8696_v16  ;;  %2593 = vmatmul.bf16.gmra.mxu1 %v8722_v48 }
 0x386   : > { %v2481_v36 = vmax.f32 %v2446_v11, 0.0  ;;  %2642 = vmatmul.bf16.gmra.mxu2 %v8696_v16  ;;  %2691 = vmatmul.bf16.gmra.mxu3 %v8722_v48 }
 0x387   : > { %3343 = vmatpush.bf16.msra.mxu3 %v8784_v18  ;;  %3196 = vmatpush.bf16.msra.mxu0 %v8796_v24 }
 0x388   : > { %3244 = vmatpush.bf16.msra.mxu1 %v8754_v56  ;;  %v9067_v39 = vpack.c.bf16 %v2481_v36, %v2479_v28  ;;  %3296 = vmatpush.bf16.msra.mxu2 %v8870_v29  ;;  %v2482_v56 = vmax.f32 %v2351_v14, 0.0 }
 0x389   : > { %v2399_v58 = vpop.f32.mrf.mxu2  ;;  %v2448_v22 = vpop.f32.mrf.mxu3 }
 0x38a   : > { %v2400_v1 = vadd.f32 %v2399_v58, %v8766_v27  ;;  %v2303_v41 = vpop.f32.mrf.mxu0  ;;  %v2352_v61 = vpop.f32.mrf.mxu1 }
 0x38b   : > { %v2304_v16 = vadd.f32 %v2303_v41, %v8738_v60  ;;  %3344 = vmatpush.bf16.msra.mxu3 %v8832_v7  ;;  %3197 = vmatpush.bf16.msra.mxu0 %v8844_v0 }
 0x38c   : > { %v2449_v48 = vadd.f32 %v2448_v22, %v2400_v1  ;;  %3245 = vmatpush.bf16.msra.mxu1 %v8806_v31  ;;  %3297 = vmatpush.bf16.msra.mxu2 %v8918_v30 }
 0x38d   : > { %v2353_v51 = vadd.f32 %v2352_v61, %v2304_v16 }
 0x38f   : > { %v2484_v18 = vmax.f32 %v2353_v51, 0.0  ;;  %3345 = vmatpush.bf16.msra.mxu3 %v8880_v13  ;;  %3198 = vmatpush.bf16.msra.mxu0 %v8892_v21  ;;  %v2483_v13 = vmax.f32 %v2449_v48, 0.0 }
 0x390   : > { %3246 = vmatpush.bf16.msra.mxu1 %v8852_v33  ;;  %3298 = vmatpush.bf16.msra.mxu2 %v8966_v17 }
 0x391   : > { %v2401_v25 = vpop.f32.mrf.mxu2  ;;  %v2450_v24 = vpop.f32.mrf.mxu3  ;;  %v9079_v40 = vpack.c.bf16 %v2484_v18, %v2482_v56 }
 0x392   : > { %v2402_v7 = vadd.f32 %v2401_v25, %v8766_v27  ;;  %v2306_v31 = vpop.f32.mrf.mxu0  ;;  %v2355_v50 = vpop.f32.mrf.mxu1 }
 0x393   : > { %v2307_v29 = vadd.f32 %v2306_v31, %v8738_v60  ;;  %3346 = vmatpush.bf16.msra.mxu3 %v8928_v5  ;;  %3199 = vmatpush.bf16.msra.mxu0 %v8940_v42 }
 0x394   : > { %v2451_v0 = vadd.f32 %v2450_v24, %v2402_v7  ;;  %3247 = vmatpush.bf16.msra.mxu1 %v8900_v52  ;;  %3299 = vmatpush.bf16.msra.mxu2 %v9014_v34 }
 0x395   : > { %v2356_v33 = vadd.f32 %v2355_v50, %v2307_v29  ;;  %2549 = vmatmul.bf16.gmra.mxu0 %v8756_v3  ;;  %2598 = vmatmul.bf16.gmra.mxu1 %v8782_v9 }
 0x396   : > { %v2485_v30 = vmax.f32 %v2451_v0, 0.0  ;;  %2647 = vmatmul.bf16.gmra.mxu2 %v8756_v3  ;;  %2696 = vmatmul.bf16.gmra.mxu3 %v8782_v9 }
 0x397   : > { %3347 = vmatpush.bf16.msra.mxu3 %v8976_v44  ;;  %3200 = vmatpush.bf16.msra.mxu0 %v8988_v12 }
 0x398   : > { %3248 = vmatpush.bf16.msra.mxu1 %v8948_v4  ;;  %v9094_v21 = vpack.c.bf16 %v2485_v30, %v2483_v13  ;;  %v2486_v4 = vmax.f32 %v2356_v33, 0.0 }
 0x399   : > { %v2404_v52 = vpop.f32.mrf.mxu2  ;;  %v2453_v5 = vpop.f32.mrf.mxu3 }
 0x39a   : > { %v2405_v17 = vadd.f32 %v2404_v52, %v8766_v27  ;;  %v2308_v23 = vpop.f32.mrf.mxu0  ;;  %v2357_v63 = vpop.f32.mrf.mxu1 }
 0x39b   : > { %v2309_v3 = vadd.f32 %v2308_v23, %v8738_v60  ;;  %3348 = vmatpush.bf16.msra.mxu3 %v9024_v10  ;;  %3201 = vmatpush.bf16.msra.mxu0 %v9039_v38 }
 0x39c   : > { %v2454_v9 = vadd.f32 %v2453_v5, %v2405_v17  ;;  %3249 = vmatpush.bf16.msra.mxu1 %v8996_v43 }
 0x39d   : > { %v2358_v42 = vadd.f32 %v2357_v63, %v2309_v3 }
 0x39e   : > { %v2487_v43 = vmax.f32 %v2454_v9, 0.0 }
 0x39f   : > { %v2488_v44 = vmax.f32 %v2358_v42, 0.0 }
 0x3a0   : > { %3250 = vmatpush.bf16.msra.mxu1 %v9048_v57 }
 0x3a1   : > { %v2406_v34 = vpop.f32.mrf.mxu2  ;;  %v2455_v37 = vpop.f32.mrf.mxu3  ;;  %v9104_v54 = vpack.c.bf16 %v2488_v44, %v2486_v4 }
 0x3a2   : > { %v2407_v53 = vadd.f32 %v2406_v34, %v8766_v27  ;;  %v2515_v35 = vpop.f32.mrf.mxu0  ;;  %v2564_v12 = vpop.f32.mrf.mxu1 }
 0x3a3   : > { %v2516_v10 = vadd.f32 %v2515_v35, %v8738_v60 }
 0x3a4   : > { %v2456_v19 = vadd.f32 %v2455_v37, %v2407_v53 }
 0x3a5   : > { %v2565_v15 = vadd.f32 %v2564_v12, %v2516_v10  ;;  %2958 = vmatmul.bf16.vlgmr.msrb.gmra.mxu0 %v8804_v26  ;;  %3007 = vmatmul.bf16.vlgmr.msrb.gmra.mxu1 %v8822_v55 }
 0x3a6   : > { %v2489_v38 = vmax.f32 %v2456_v19, 0.0  ;;  %3056 = vmatmul.bf16.vlgmr.msrb.gmra.mxu2 %v8804_v26  ;;  %3105 = vmatmul.bf16.vlgmr.msrb.gmra.mxu3 %v8822_v55 }
 0x3a7   : > { %v2702_v1 = vmax.f32 %v2565_v15, 0.0 }
 0x3a8   : > { %v9112_v57 = vpack.c.bf16 %v2489_v38, %v2487_v43 }
 0x3a9   : > { %v2613_v20 = vpop.f32.mrf.mxu2  ;;  %v2662_v59 = vpop.f32.mrf.mxu3 }
 0x3aa   : > { %v2614_v11 = vadd.f32 %v2613_v20, %v8766_v27  ;;  %v2517_v14 = vpop.f32.mrf.mxu0  ;;  %v2566_v28 = vpop.f32.mrf.mxu1 }
 0x3ab   : > { %v2518_v36 = vadd.f32 %v2517_v14, %v8738_v60 }
 0x3ac   : > { %v2663_v58 = vadd.f32 %v2662_v59, %v2614_v11 }
 0x3ad   : > { %v2567_v22 = vadd.f32 %v2566_v28, %v2518_v36 }
 0x3ae   : > { %v2703_v24 = vmax.f32 %v2663_v58, 0.0 }
 0x3af   : > { %v2704_v41 = vmax.f32 %v2567_v22, 0.0 }
 0x3b1   : > { %v9116_v61 = vpack.c.bf16 %v2704_v41, %v2702_v1  ;;  %v2615_v16 = vpop.f32.mrf.mxu2  ;;  %v2664_v26 = vpop.f32.mrf.mxu3 }
 0x3b2   : > { %v2616_v55 = vadd.f32 %v2615_v16, %v8766_v27  ;;  %v2520_v48 = vpop.f32.mrf.mxu0  ;;  %v2569_v51 = vpop.f32.mrf.mxu1 }
 0x3b3   : > { %v2521_v56 = vadd.f32 %v2520_v48, %v8738_v60 }
 0x3b4   : > { %v2665_v18 = vadd.f32 %v2664_v26, %v2616_v55 }
 0x3b5   : > { %v2570_v25 = vadd.f32 %v2569_v51, %v2521_v56  ;;  %2963 = vmatmul.bf16.gmra.mxu0 %v8854_v62  ;;  %3012 = vmatmul.bf16.gmra.mxu1 %v8878_v45 }
 0x3b6   : > { %v2705_v7 = vmax.f32 %v2665_v18, 0.0  ;;  %3061 = vmatmul.bf16.gmra.mxu2 %v8854_v62  ;;  %3110 = vmatmul.bf16.gmra.mxu3 %v8878_v45 }
 0x3b7   : > { %v2706_v17 = vmax.f32 %v2570_v25, 0.0 }
 0x3b8   : > { %v9124_v31 = vpack.c.bf16 %v2705_v7, %v2703_v24 }
 0x3b9   : > { %v2618_v50 = vpop.f32.mrf.mxu2  ;;  %v2667_v29 = vpop.f32.mrf.mxu3 }
 0x3ba   : > { %v2619_v0 = vadd.f32 %v2618_v50, %v8766_v27  ;;  %v2522_v33 = vpop.f32.mrf.mxu0  ;;  %v2571_v13 = vpop.f32.mrf.mxu1 }
 0x3bb   : > { %v2523_v30 = vadd.f32 %v2522_v33, %v8738_v60 }
 0x3bc   : > { %v2668_v52 = vadd.f32 %v2667_v29, %v2619_v0 }
 0x3bd   : > { %v2572_v5 = vadd.f32 %v2571_v13, %v2523_v30 }
 0x3be   : > { %v2707_v37 = vmax.f32 %v2668_v52, 0.0 }
 0x3bf   : > { %v2708_v23 = vmax.f32 %v2572_v5, 0.0 }
 0x3c1   : > { %v2620_v63 = vpop.f32.mrf.mxu2  ;;  %v2669_v3 = vpop.f32.mrf.mxu3  ;;  %v9128_v9 = vpack.c.bf16 %v2708_v23, %v2706_v17 }
 0x3c2   : > { %v2621_v62 = vadd.f32 %v2620_v63, %v8766_v27  ;;  %v2525_v45 = vpop.f32.mrf.mxu0  ;;  %v2574_v42 = vpop.f32.mrf.mxu1 }
 0x3c3   : > { %v2526_v4 = vadd.f32 %v2525_v45, %v8738_v60 }
 0x3c4   : > { %v2670_v44 = vadd.f32 %v2669_v3, %v2621_v62 }
 0x3c5   : > { %v2575_v34 = vadd.f32 %v2574_v42, %v2526_v4  ;;  %2968 = vmatmul.bf16.gmra.mxu0 %v8902_v6  ;;  %3017 = vmatmul.bf16.gmra.mxu1 %v8926_v2 }
 0x3c6   : > { %v2709_v53 = vmax.f32 %v2670_v44, 0.0  ;;  %3066 = vmatmul.bf16.gmra.mxu2 %v8902_v6  ;;  %3115 = vmatmul.bf16.gmra.mxu3 %v8926_v2 }
 0x3c7   : > { %v2710_v11 = vmax.f32 %v2575_v34, 0.0 }
 0x3c8   : > { %v9136_v35 = vpack.c.bf16 %v2709_v53, %v2707_v37 }
 0x3c9   : > { %v2623_v12 = vpop.f32.mrf.mxu2  ;;  %v2672_v10 = vpop.f32.mrf.mxu3 }
 0x3ca   : > { %v2624_v19 = vadd.f32 %v2623_v12, %v8766_v27  ;;  %v2527_v15 = vpop.f32.mrf.mxu0  ;;  %v2576_v43 = vpop.f32.mrf.mxu1 }
 0x3cb   : > { %v2528_v38 = vadd.f32 %v2527_v15, %v8738_v60 }
 0x3cc   : > { %v2673_v20 = vadd.f32 %v2672_v10, %v2624_v19 }
 0x3cd   : > { %v2577_v59 = vadd.f32 %v2576_v43, %v2528_v38 }
 0x3ce   : > { %v2711_v26 = vmax.f32 %v2673_v20, 0.0 }
 0x3cf   : > { %v2712_v14 = vmax.f32 %v2577_v59, 0.0 }
 0x3d1   : > { %v2625_v28 = vpop.f32.mrf.mxu2  ;;  %v2674_v36 = vpop.f32.mrf.mxu3  ;;  %v9140_v58 = vpack.c.bf16 %v2712_v14, %v2710_v11 }
 0x3d2   : > { %v2626_v6 = vadd.f32 %v2625_v28, %v8766_v27  ;;  %v2530_v2 = vpop.f32.mrf.mxu0  ;;  %v2579_v22 = vpop.f32.mrf.mxu1 }
 0x3d3   : > { %v2531_v1 = vadd.f32 %v2530_v2, %v8738_v60 }
 0x3d4   : > { %v2675_v41 = vadd.f32 %v2674_v36, %v2626_v6 }
 0x3d5   : > { %v2580_v16 = vadd.f32 %v2579_v22, %v2531_v1  ;;  %2973 = vmatmul.bf16.gmra.mxu0 %v8950_v32  ;;  %3022 = vmatmul.bf16.gmra.mxu1 %v8974_v46 }
 0x3d6   : > { %v2713_v55 = vmax.f32 %v2675_v41, 0.0  ;;  %3071 = vmatmul.bf16.gmra.mxu2 %v8950_v32  ;;  %3120 = vmatmul.bf16.gmra.mxu3 %v8974_v46 }
 0x3d7   : > { %v2714_v0 = vmax.f32 %v2580_v16, 0.0 }
 0x3d8   : > { %v9148_v48 = vpack.c.bf16 %v2713_v55, %v2711_v26 }
 0x3d9   : > { %v2628_v51 = vpop.f32.mrf.mxu2  ;;  %v2677_v56 = vpop.f32.mrf.mxu3 }
 0x3da   : > { %v2629_v18 = vadd.f32 %v2628_v51, %v8766_v27  ;;  %v2532_v25 = vpop.f32.mrf.mxu0  ;;  %v2581_v24 = vpop.f32.mrf.mxu1 }
 0x3db   : > { %v2533_v7 = vadd.f32 %v2532_v25, %v8738_v60 }
 0x3dc   : > { %v2678_v50 = vadd.f32 %v2677_v56, %v2629_v18 }
 0x3dd   : > { %v2582_v29 = vadd.f32 %v2581_v24, %v2533_v7 }
 0x3de   : > { %v2715_v3 = vmax.f32 %v2678_v50, 0.0 }
 0x3df   : > { %v2716_v33 = vmax.f32 %v2582_v29, 0.0 }
 0x3e1   : > { %v2630_v13 = vpop.f32.mrf.mxu2  ;;  %v2679_v30 = vpop.f32.mrf.mxu3  ;;  %v9152_v52 = vpack.c.bf16 %v2716_v33, %v2714_v0 }
 0x3e2   : > { %v2631_v32 = vadd.f32 %v2630_v13, %v8766_v27  ;;  %v2535_v46 = vpop.f32.mrf.mxu0  ;;  %v2584_v5 = vpop.f32.mrf.mxu1 }
 0x3e3   : > { %v2536_v17 = vadd.f32 %v2535_v46, %v8738_v60  ;;  %v6898_v46 = vld [vmem:[%s10627_s3 + $0x474] sm:$0xf] }
 0x3e4   : > { %v2680_v23 = vadd.f32 %v2679_v30, %v2631_v32 }
 0x3e5   : > { %v2585_v63 = vadd.f32 %v2584_v5, %v2536_v17  ;;  %2978 = vmatmul.bf16.gmra.mxu0 %v8998_v8  ;;  %3027 = vmatmul.bf16.gmra.mxu1 %v9022_v47  ;;  %v6473_v5 = vld [vmem:[%s10627_s3 + $0x478] sm:$0xf0] }
 0x3e6   : > { %v2717_v62 = vmax.f32 %v2680_v23, 0.0  ;;  %3076 = vmatmul.bf16.gmra.mxu2 %v8998_v8  ;;  %3125 = vmatmul.bf16.gmra.mxu3 %v9022_v47  ;;  %v9190_v17 = vor.u32 %v6898_v46, %v6473_v5  ;;  %v6914_v23 = vld [vmem:[%s10627_s3 + $0x4f4] sm:$0xf] }
 0x3e7   : > { %v2718_v19 = vmax.f32 %v2585_v63, 0.0 }
 0x3e8   : > { %v9160_v45 = vpack.c.bf16 %v2717_v62, %v2715_v3  ;;  %3736 = vmatpush.bf16.msrb.mxu2 %v9190_v17 }
 0x3e9   : > { %v2633_v42 = vpop.f32.mrf.mxu2  ;;  %v2682_v4 = vpop.f32.mrf.mxu3 }
 0x3ea   : > { %v2634_v44 = vadd.f32 %v2633_v42, %v8766_v27  ;;  %v2537_v34 = vpop.f32.mrf.mxu0  ;;  %v2586_v37 = vpop.f32.mrf.mxu1 }
 0x3eb   : > { %v2538_v53 = vadd.f32 %v2537_v34, %v8738_v60 }
 0x3ec   : > { %v2683_v12 = vadd.f32 %v2682_v4, %v2634_v44 }
 0x3ed   : > { %v2587_v10 = vadd.f32 %v2586_v37, %v2538_v53 }
 0x3ee   : > { %v2719_v36 = vmax.f32 %v2683_v12, 0.0 }
 0x3ef   : > { %v2720_v15 = vmax.f32 %v2587_v10, 0.0 }
 0x3f1   : > { %v2635_v43 = vpop.f32.mrf.mxu2  ;;  %v2684_v38 = vpop.f32.mrf.mxu3  ;;  %v9164_v20 = vpack.c.bf16 %v2720_v15, %v2718_v19 }
 0x3f2   : > { %v2636_v8 = vadd.f32 %v2635_v43, %v8766_v27  ;;  %v2540_v47 = vpop.f32.mrf.mxu0  ;;  %v2589_v59 = vpop.f32.mrf.mxu1  ;;  %v6471_v43 = vld [vmem:[%s10627_s3 + $0x470] sm:$0xf] }
 0x3f3   : > { %v2541_v11 = vadd.f32 %v2540_v47, %v8738_v60 }
 0x3f4   : > { %v2685_v14 = vadd.f32 %v2684_v38, %v2636_v8  ;;  %v6899_v38 = vld [vmem:[%s10627_s3 + $0x474] sm:$0xf0]  ;;  %v6535_v8 = vld [vmem:[%s10627_s3 + $0x4f0] sm:$0xf] }
 0x3f5   : > { %v2590_v28 = vadd.f32 %v2589_v59, %v2541_v11  ;;  %2983 = vmatmul.bf16.gmra.mxu0 %v9050_v49  ;;  %3032 = vmatmul.bf16.gmra.mxu1 %v9067_v39 }
 0x3f6   : > { %v2721_v6 = vmax.f32 %v2685_v14, 0.0  ;;  %3081 = vmatmul.bf16.gmra.mxu2 %v9050_v49  ;;  %3130 = vmatmul.bf16.gmra.mxu3 %v9067_v39 }
 0x3f7   : > { %v2722_v18 = vmax.f32 %v2590_v28, 0.0  ;;  %v9218_v28 = vor.u32 %v6899_v38, %v6471_v43 }
 0x3f8   : > { %v9172_v2 = vpack.c.bf16 %v2721_v6, %v2719_v36  ;;  %v6915_v36 = vld [vmem:[%s10627_s3 + $0x4f4] sm:$0xf0] }
 0x3f9   : > { %v2638_v22 = vpop.f32.mrf.mxu2  ;;  %v2687_v1 = vpop.f32.mrf.mxu3  ;;  %3638 = vmatpush.bf16.msrb.mxu0 %v9218_v28 }
 0x3fa   : > { %v2639_v41 = vadd.f32 %v2638_v22, %v8766_v27  ;;  %v2542_v16 = vpop.f32.mrf.mxu0  ;;  %v2591_v26 = vpop.f32.mrf.mxu1  ;;  %v9224_v22 = vor.u32 %v6915_v36, %v6535_v8  ;;  %v6894_v8 = vld [vmem:[%s10627_s3 + $0x454] sm:$0xf] }
 0x3fb   : > { %v2543_v55 = vadd.f32 %v2542_v16, %v8738_v60 }
 0x3fc   : > { %v2688_v51 = vadd.f32 %v2687_v1, %v2639_v41  ;;  %3687 = vmatpush.bf16.msrb.mxu1 %v9224_v22 }
 0x3fd   : > { %v2592_v56 = vadd.f32 %v2591_v26, %v2543_v55  ;;  %v6896_v55 = vld [vmem:[%s10627_s3 + $0x464] sm:$0xf] }
 0x3fe   : > { %v2723_v30 = vmax.f32 %v2688_v51, 0.0  ;;  %v6465_v51 = vld [vmem:[%s10627_s3 + $0x468] sm:$0xf0] }
 0x3ff   : > { %v2724_v25 = vmax.f32 %v2592_v56, 0.0  ;;  %v6912_v56 = vld [vmem:[%s10627_s3 + $0x4e4] sm:$0xf] }
 0x401   : > { %v2640_v24 = vpop.f32.mrf.mxu2  ;;  %v2689_v7 = vpop.f32.mrf.mxu3  ;;  %v9176_v50 = vpack.c.bf16 %v2724_v25, %v2722_v18 }
 0x402   : > { %v2641_v49 = vadd.f32 %v2640_v24, %v8766_v27  ;;  %v2545_v39 = vpop.f32.mrf.mxu0  ;;  %v2594_v29 = vpop.f32.mrf.mxu1  ;;  %v9243_v24 = vor.u32 %v6896_v55, %v6465_v51 }
 0x403   : > { %v2546_v0 = vadd.f32 %v2545_v39, %v8738_v60 }
 0x404   : > { %v2690_v33 = vadd.f32 %v2689_v7, %v2641_v49  ;;  %3737 = vmatpush.bf16.msrb.mxu2 %v9243_v24 }
 0x405   : > { %v2595_v13 = vadd.f32 %v2594_v29, %v2546_v0  ;;  %2988 = vmatmul.bf16.gmra.mxu0 %v9079_v40  ;;  %3037 = vmatmul.bf16.gmra.mxu1 %v9094_v21 }
 0x406   : > { %v2725_v32 = vmax.f32 %v2690_v33, 0.0  ;;  %3086 = vmatmul.bf16.gmra.mxu2 %v9079_v40  ;;  %3135 = vmatmul.bf16.gmra.mxu3 %v9094_v21  ;;  %v6537_v40 = vld [vmem:[%s10627_s3 + $0x4f8] sm:$0xf0]  ;;  %v6251_v33 = vld [vmem:[%s10628_s4 + $0x6] sm:$0x3] }
 0x407   : > { %v9200_v62 = vor.u32 %v6914_v23, %v6537_v40  ;;  %v2726_v12 = vmax.f32 %v2595_v13, 0.0  ;;  %v6463_v23 = vld [vmem:[%s10627_s3 + $0x460] sm:$0xf] }
 0x408   : > { %v9198_v63 = vpack.c.bf16 %v2725_v32, %v2723_v30  ;;  %v9257_v32 = vperm.slane %v6251_v33, 0 }
 0x409   : > { %v2643_v21 = vpop.f32.mrf.mxu2  ;;  %v2692_v3 = vpop.f32.mrf.mxu3  ;;  %3785 = vmatpush.bf16.msrb.mxu3 %v9200_v62 }
 0x40a   : > { %v2644_v42 = vadd.f32 %v2643_v21, %v8766_v27  ;;  %v2547_v4 = vpop.f32.mrf.mxu0  ;;  %v2596_v44 = vpop.f32.mrf.mxu1  ;;  %v6527_v21 = vld [vmem:[%s10627_s3 + $0x4e0] sm:$0xf] }
 0x40b   : > { %v2548_v34 = vadd.f32 %v2547_v4, %v8738_v60 }
 0x40c   : > { %v2693_v37 = vadd.f32 %v2692_v3, %v2644_v42  ;;  %v6913_v3 = vld [vmem:[%s10627_s3 + $0x4e4] sm:$0xf0] }
 0x40d   : > { %v2597_v53 = vadd.f32 %v2596_v44, %v2548_v34  ;;  %v9273_v44 = vor.u32 %v6913_v3, %v6527_v21 }
 0x40e   : > { %v2727_v16 = vmax.f32 %v2693_v37, 0.0 }
 0x40f   : > { %v2728_v10 = vmax.f32 %v2597_v53, 0.0  ;;  %3688 = vmatpush.bf16.msrb.mxu1 %v9273_v44 }
 0x411   : > { %v2645_v19 = vpop.f32.mrf.mxu2  ;;  %v2694_v15 = vpop.f32.mrf.mxu3  ;;  %v9215_v47 = vpack.c.bf16 %v2728_v10, %v2726_v12 }
 0x412   : > { %v2646_v59 = vadd.f32 %v2645_v19, %v8766_v27  ;;  %v2550_v11 = vpop.f32.mrf.mxu0  ;;  %v2599_v14 = vpop.f32.mrf.mxu1 }
 0x413   : > { %v2551_v6 = vadd.f32 %v2550_v11, %v8738_v60 }
 0x414   : > { %v2695_v1 = vadd.f32 %v2694_v15, %v2646_v59  ;;  %v6457_v59 = vld [vmem:[%s10627_s3 + $0x458] sm:$0xf0] }
 0x415   : > { %v2600_v41 = vadd.f32 %v2599_v14, %v2551_v6  ;;  %2993 = vmatmul.bf16.gmra.mxu0 %v9104_v54  ;;  %3042 = vmatmul.bf16.gmra.mxu1 %v9112_v57  ;;  %v9293_v11 = vor.u32 %v6894_v8, %v6457_v59  ;;  %v6910_v14 = vld [vmem:[%s10627_s3 + $0x4d4] sm:$0xf] }
 0x416   : > { %v2729_v26 = vmax.f32 %v2695_v1, 0.0  ;;  %3091 = vmatmul.bf16.gmra.mxu2 %v9104_v54  ;;  %3140 = vmatmul.bf16.gmra.mxu3 %v9112_v57  ;;  %v6529_v57 = vld [vmem:[%s10627_s3 + $0x4e8] sm:$0xf0] }
 0x417   : > { %v9249_v29 = vor.u32 %v6912_v56, %v6529_v57  ;;  %v2730_v46 = vmax.f32 %v2600_v41, 0.0  ;;  %3738 = vmatpush.bf16.msrb.mxu2 %v9293_v11  ;;  %v6455_v57 = vld [vmem:[%s10627_s3 + $0x450] sm:$0xf] }
 0x418   : > { %v9241_v18 = vpack.c.bf16 %v2729_v26, %v2727_v16 }
 0x419   : > { %v2648_v25 = vpop.f32.mrf.mxu2  ;;  %v2697_v54 = vpop.f32.mrf.mxu3  ;;  %3786 = vmatpush.bf16.msrb.mxu3 %v9249_v29 }
 0x41a   : > { %v2649_v7 = vadd.f32 %v2648_v25, %v8766_v27  ;;  %v2552_v49 = vpop.f32.mrf.mxu0  ;;  %v2601_v39 = vpop.f32.mrf.mxu1 }
 0x41b   : > { %v2553_v0 = vadd.f32 %v2552_v49, %v8738_v60  ;;  %v6897_v60 = vld [vmem:[%s10627_s3 + $0x464] sm:$0xf0] }
 0x41c   : > { %v2698_v13 = vadd.f32 %v2697_v54, %v2649_v7  ;;  %v9265_v40 = vor.u32 %v6897_v60, %v6463_v23  ;;  %v6895_v7 = vld [vmem:[%s10627_s3 + $0x454] sm:$0xf0] }
 0x41d   : > { %v2602_v30 = vadd.f32 %v2601_v39, %v2553_v0  ;;  %v9315_v49 = vor.u32 %v6895_v7, %v6455_v57  ;;  %v6519_v39 = vld [vmem:[%s10627_s3 + $0x4d0] sm:$0xf]  ;;  %v6911_v0 = vld [vmem:[%s10627_s3 + $0x4d4] sm:$0xf0] }
 0x41e   : > { %3639 = vmatpush.bf16.msrb.mxu0 %v9265_v40  ;;  %v2731_v43 = vmax.f32 %v2698_v13, 0.0 }
 0x41f   : > { %v2732_v5 = vmax.f32 %v2602_v30, 0.0 }
 0x421   : > { %v2650_v42 = vpop.f32.mrf.mxu2  ;;  %v2699_v4 = vpop.f32.mrf.mxu3  ;;  %v9275_v34 = vpack.c.bf16 %v2732_v5, %v2730_v46  ;;  %v9325_v46 = vor.u32 %v6911_v0, %v6519_v39 }
 0x422   : > { %v2651_v37 = vadd.f32 %v2650_v42, %v8766_v27  ;;  %v2959_v53 = vpop.f32.mrf.mxu0  ;;  %v3008_v12 = vpop.f32.mrf.mxu1  ;;  %v9285_v27 = vperm.slane %v6251_v33, 1  ;;  %3640 = vmatpush.bf16.msrb.mxu0 %v9315_v49 }
 0x423   : > { %v2960_v10 = vadd.f32 %v2959_v53, %v9257_v32  ;;  %3689 = vmatpush.bf16.msrb.mxu1 %v9325_v46  ;;  %v6892_v53 = vld [vmem:[%s10627_s3 + $0x444] sm:$0xf] }
 0x424   : > { %v2700_v19 = vadd.f32 %v2699_v4, %v2651_v37 }
 0x425   : > { %v3009_v15 = vadd.f32 %v3008_v12, %v2960_v10  ;;  %3202 = vmatmul.bf16.vlgmr.msra.gmra.mxu0 %v9116_v61  ;;  %3251 = vmatmul.bf16.vlgmr.msra.gmra.mxu1 %v9124_v31  ;;  %v6449_v12 = vld [vmem:[%s10627_s3 + $0x448] sm:$0xf0] }
 0x426   : > { %v2733_v38 = vmax.f32 %v2700_v19, 0.0  ;;  %3300 = vmatmul.bf16.vlgmr.msra.gmra.mxu2 %v9116_v61  ;;  %3349 = vmatmul.bf16.vlgmr.msra.gmra.mxu3 %v9124_v31  ;;  %v6521_v61 = vld [vmem:[%s10627_s3 + $0x4d8] sm:$0xf0]  ;;  %v9343_v19 = vor.u32 %v6892_v53, %v6449_v12  ;;  %v6906_v53 = vld [vmem:[%s10627_s3 + $0x4b4] sm:$0xf] }
 0x427   : > { %v9303_v1 = vor.u32 %v6910_v14, %v6521_v61  ;;  %v3146_v25 = vmax.f32 %v3009_v15, 0.0  ;;  %v6908_v15 = vld [vmem:[%s10627_s3 + $0x4c4] sm:$0xf] }
 0x428   : > { %v9301_v31 = vpack.c.bf16 %v2733_v38, %v2731_v43  ;;  %3739 = vmatpush.bf16.msrb.mxu2 %v9343_v19 }
 0x429   : > { %v3057_v36 = vpop.f32.mrf.mxu2  ;;  %v3106_v6 = vpop.f32.mrf.mxu3  ;;  %3787 = vmatpush.bf16.msrb.mxu3 %v9303_v1 }
 0x42a   : > { %v3058_v41 = vadd.f32 %v3057_v36, %v9285_v27  ;;  %v2961_v16 = vpop.f32.mrf.mxu0  ;;  %v3010_v26 = vpop.f32.mrf.mxu1 }
 0x42b   : > { %v2962_v55 = vadd.f32 %v2961_v16, %v9257_v32 }
 0x42c   : > { %v3107_v51 = vadd.f32 %v3106_v6, %v3058_v41 }
 0x42d   : > { %v3011_v56 = vadd.f32 %v3010_v26, %v2962_v55  ;;  %v6447_v26 = vld [vmem:[%s10627_s3 + $0x440] sm:$0xf]  ;;  %v6893_v55 = vld [vmem:[%s10627_s3 + $0x444] sm:$0xf0] }
 0x42e   : > { %v3147_v4 = vmax.f32 %v3107_v51, 0.0  ;;  %v9363_v51 = vor.u32 %v6893_v55, %v6447_v26  ;;  %v6503_v55 = vld [vmem:[%s10627_s3 + $0x4b0] sm:$0xf] }
 0x42f   : > { %v3148_v54 = vmax.f32 %v3011_v56, 0.0  ;;  %v6511_v56 = vld [vmem:[%s10627_s3 + $0x4c0] sm:$0xf] }
 0x430   : > { %3641 = vmatpush.bf16.msrb.mxu0 %v9363_v51 }
 0x431   : > { %v9323_v33 = vpack.c.bf16 %v3148_v54, %v3146_v25  ;;  %v3059_v13 = vpop.f32.mrf.mxu2  ;;  %v3108_v30 = vpop.f32.mrf.mxu3  ;;  %v6909_v25 = vld [vmem:[%s10627_s3 + $0x4c4] sm:$0xf0] }
 0x432   : > { %v3060_v5 = vadd.f32 %v3059_v13, %v9285_v27  ;;  %v2964_v23 = vpop.f32.mrf.mxu0  ;;  %v3013_v60 = vpop.f32.mrf.mxu1  ;;  %v9371_v7 = vor.u32 %v6909_v25, %v6511_v56  ;;  %v6907_v56 = vld [vmem:[%s10627_s3 + $0x4b4] sm:$0xf0] }
 0x433   : > { %v2965_v21 = vadd.f32 %v2964_v23, %v9257_v32 }
 0x434   : > { %v3109_v3 = vadd.f32 %v3108_v30, %v3060_v5  ;;  %3690 = vmatpush.bf16.msrb.mxu1 %v9371_v7 }
 0x435   : > { %v3014_v42 = vadd.f32 %v3013_v60, %v2965_v21  ;;  %3207 = vmatmul.bf16.gmra.mxu0 %v9128_v9  ;;  %3256 = vmatmul.bf16.gmra.mxu1 %v9136_v35 }
 0x436   : > { %v3149_v37 = vmax.f32 %v3109_v3, 0.0  ;;  %3305 = vmatmul.bf16.gmra.mxu2 %v9128_v9  ;;  %3354 = vmatmul.bf16.gmra.mxu3 %v9136_v35  ;;  %v6513_v9 = vld [vmem:[%s10627_s3 + $0x4c8] sm:$0xf0] }
 0x437   : > { %v9351_v38 = vor.u32 %v6908_v15, %v6513_v9  ;;  %v3150_v41 = vmax.f32 %v3014_v42, 0.0  ;;  %v6890_v42 = vld [vmem:[%s10627_s3 + $0x434] sm:$0xf] }
 0x438   : > { %v9341_v10 = vpack.c.bf16 %v3149_v37, %v3147_v4  ;;  %v6441_v4 = vld [vmem:[%s10627_s3 + $0x438] sm:$0xf0] }
 0x439   : > { %v3062_v35 = vpop.f32.mrf.mxu2  ;;  %v3111_v43 = vpop.f32.mrf.mxu3  ;;  %3788 = vmatpush.bf16.msrb.mxu3 %v9351_v38  ;;  %v9389_v37 = vor.u32 %v6890_v42, %v6441_v4  ;;  %v6888_v4 = vld [vmem:[%s10627_s3 + $0x424] sm:$0xf] }
 0x43a   : > { %v3063_v8 = vadd.f32 %v3062_v35, %v9285_v27  ;;  %v2966_v59 = vpop.f32.mrf.mxu0  ;;  %v3015_v14 = vpop.f32.mrf.mxu1 }
 0x43b   : > { %v2967_v61 = vadd.f32 %v2966_v59, %v9257_v32  ;;  %3740 = vmatpush.bf16.msrb.mxu2 %v9389_v37 }
 0x43c   : > { %v3112_v36 = vadd.f32 %v3111_v43, %v3063_v8 }
 0x43d   : > { %v3016_v6 = vadd.f32 %v3015_v14, %v2967_v61 }
 0x43e   : > { %v3151_v21 = vmax.f32 %v3112_v36, 0.0 }
 0x43f   : > { %v3152_v16 = vmax.f32 %v3016_v6, 0.0 }
 0x441   : > { %v3064_v54 = vpop.f32.mrf.mxu2  ;;  %v3113_v57 = vpop.f32.mrf.mxu3  ;;  %v9373_v39 = vpack.c.bf16 %v3152_v16, %v3150_v41  ;;  %v6439_v41 = vld [vmem:[%s10627_s3 + $0x430] sm:$0xf]  ;;  %v6891_v16 = vld [vmem:[%s10627_s3 + $0x434] sm:$0xf0] }
 0x442   : > { %v3065_v0 = vadd.f32 %v3064_v54, %v9285_v27  ;;  %v2969_v13 = vpop.f32.mrf.mxu0  ;;  %v3018_v30 = vpop.f32.mrf.mxu1  ;;  %v9411_v26 = vor.u32 %v6891_v16, %v6439_v41 }
 0x443   : > { %v2970_v5 = vadd.f32 %v2969_v13, %v9257_v32 }
 0x444   : > { %v3114_v23 = vadd.f32 %v3113_v57, %v3065_v0  ;;  %v9419_v57 = vor.u32 %v6907_v56, %v6503_v55  ;;  %3642 = vmatpush.bf16.msrb.mxu0 %v9411_v26  ;;  %v6431_v55 = vld [vmem:[%s10627_s3 + $0x420] sm:$0xf]  ;;  %v6889_v56 = vld [vmem:[%s10627_s3 + $0x424] sm:$0xf0] }
 0x445   : > { %v3019_v60 = vadd.f32 %v3018_v30, %v2970_v5  ;;  %3212 = vmatmul.bf16.gmra.mxu0 %v9140_v58  ;;  %3261 = vmatmul.bf16.gmra.mxu1 %v9148_v48 }
 0x446   : > { %v3153_v3 = vmax.f32 %v3114_v23, 0.0  ;;  %3310 = vmatmul.bf16.gmra.mxu2 %v9140_v58  ;;  %3359 = vmatmul.bf16.gmra.mxu3 %v9148_v48  ;;  %v6505_v58 = vld [vmem:[%s10627_s3 + $0x4b8] sm:$0xf0] }
 0x447   : > { %v9399_v9 = vor.u32 %v6906_v53, %v6505_v58  ;;  %v3154_v36 = vmax.f32 %v3019_v60, 0.0  ;;  %3691 = vmatpush.bf16.msrb.mxu1 %v9419_v57  ;;  %v6433_v53 = vld [vmem:[%s10627_s3 + $0x428] sm:$0xf0] }
 0x448   : > { %v9397_v12 = vpack.c.bf16 %v3153_v3, %v3151_v21  ;;  %v9437_v58 = vor.u32 %v6888_v4, %v6433_v53 }
 0x449   : > { %v3067_v48 = vpop.f32.mrf.mxu2  ;;  %v3116_v15 = vpop.f32.mrf.mxu3  ;;  %3789 = vmatpush.bf16.msrb.mxu3 %v9399_v9 }
 0x44a   : > { %v3068_v35 = vadd.f32 %v3067_v48, %v9285_v27  ;;  %v2971_v43 = vpop.f32.mrf.mxu0  ;;  %v3020_v8 = vpop.f32.mrf.mxu1  ;;  %v6904_v48 = vld [vmem:[%s10627_s3 + $0x4a4] sm:$0xf]  ;;  %3741 = vmatpush.bf16.msrb.mxu2 %v9437_v58 }
 0x44b   : > { %v2972_v59 = vadd.f32 %v2971_v43, %v9257_v32 }
 0x44c   : > { %v3117_v14 = vadd.f32 %v3116_v15, %v3068_v35 }
 0x44d   : > { %v3021_v61 = vadd.f32 %v3020_v8, %v2972_v59 }
 0x44e   : > { %v3155_v3 = vmax.f32 %v3117_v14, 0.0 }
 0x44f   : > { %v3156_v6 = vmax.f32 %v3021_v61, 0.0 }
 0x451   : > { %v3069_v25 = vpop.f32.mrf.mxu2  ;;  %v3118_v54 = vpop.f32.mrf.mxu3  ;;  %v9421_v0 = vpack.c.bf16 %v3156_v6, %v3154_v36 }
 0x452   : > { %v3070_v13 = vadd.f32 %v3069_v25, %v9285_v27  ;;  %v2974_v30 = vpop.f32.mrf.mxu0  ;;  %v3023_v5 = vpop.f32.mrf.mxu1  ;;  %v9459_v25 = vor.u32 %v6889_v56, %v6431_v55 }
 0x453   : > { %v2975_v23 = vadd.f32 %v2974_v30, %v9257_v32 }
 0x454   : > { %v3119_v60 = vadd.f32 %v3118_v54, %v3070_v13  ;;  %v6495_v54 = vld [vmem:[%s10627_s3 + $0x4a0] sm:$0xf]  ;;  %v6905_v13 = vld [vmem:[%s10627_s3 + $0x4a4] sm:$0xf0]  ;;  %3643 = vmatpush.bf16.msrb.mxu0 %v9459_v25 }
 0x455   : > { %v3024_v21 = vadd.f32 %v3023_v5, %v2975_v23  ;;  %3217 = vmatmul.bf16.gmra.mxu0 %v9152_v52  ;;  %3266 = vmatmul.bf16.gmra.mxu1 %v9160_v45  ;;  %v9467_v23 = vor.u32 %v6905_v13, %v6495_v54 }
 0x456   : > { %v3157_v42 = vmax.f32 %v3119_v60, 0.0  ;;  %3315 = vmatmul.bf16.gmra.mxu2 %v9152_v52  ;;  %3364 = vmatmul.bf16.gmra.mxu3 %v9160_v45  ;;  %v6497_v52 = vld [vmem:[%s10627_s3 + $0x4a8] sm:$0xf0] }
 0x457   : > { %v9447_v43 = vor.u32 %v6904_v48, %v6497_v52  ;;  %v3158_v41 = vmax.f32 %v3024_v21, 0.0  ;;  %3692 = vmatpush.bf16.msrb.mxu1 %v9467_v23 }
 0x458   : > { %v9445_v15 = vpack.c.bf16 %v3157_v42, %v3155_v3 }
 0x459   : > { %v3072_v45 = vpop.f32.mrf.mxu2  ;;  %v3121_v35 = vpop.f32.mrf.mxu3  ;;  %3790 = vmatpush.bf16.msrb.mxu3 %v9447_v43 }
 0x45a   : > { %v3073_v8 = vadd.f32 %v3072_v45, %v9285_v27  ;;  %v2976_v59 = vpop.f32.mrf.mxu0  ;;  %v3025_v14 = vpop.f32.mrf.mxu1 }
 0x45b   : > { %v2977_v61 = vadd.f32 %v2976_v59, %v9257_v32 }
 0x45c   : > { %v3122_v36 = vadd.f32 %v3121_v35, %v3073_v8  ;;  %v6886_v35 = vld [vmem:[%s10627_s3 + $0x414] sm:$0xf]  ;;  %v6425_v8 = vld [vmem:[%s10627_s3 + $0x418] sm:$0xf0] }
 0x45d   : > { %v3026_v6 = vadd.f32 %v3025_v14, %v2977_v61  ;;  %v9485_v59 = vor.u32 %v6886_v35, %v6425_v8  ;;  %v6902_v14 = vld [vmem:[%s10627_s3 + $0x494] sm:$0xf] }
 0x45e   : > { %v3159_v52 = vmax.f32 %v3122_v36, 0.0 }
 0x45f   : > { %v3160_v16 = vmax.f32 %v3026_v6, 0.0  ;;  %3742 = vmatpush.bf16.msrb.mxu2 %v9485_v59 }
 0x461   : > { %v3074_v30 = vpop.f32.mrf.mxu2  ;;  %v3123_v5 = vpop.f32.mrf.mxu3  ;;  %v9469_v60 = vpack.c.bf16 %v3160_v16, %v3158_v41 }
 0x462   : > { %v3075_v21 = vadd.f32 %v3074_v30, %v9285_v27  ;;  %v2979_v3 = vpop.f32.mrf.mxu0  ;;  %v3028_v42 = vpop.f32.mrf.mxu1 }
 0x463   : > { %v2980_v4 = vadd.f32 %v2979_v3, %v9257_v32  ;;  %v6887_v3 = vld [vmem:[%s10627_s3 + $0x414] sm:$0xf0] }
 0x464   : > { %v3124_v53 = vadd.f32 %v3123_v5, %v3075_v21  ;;  %v6423_v21 = vld [vmem:[%s10627_s3 + $0x410] sm:$0xf] }
 0x465   : > { %v3029_v48 = vadd.f32 %v3028_v42, %v2980_v4  ;;  %3222 = vmatmul.bf16.gmra.mxu0 %v9164_v20  ;;  %3271 = vmatmul.bf16.gmra.mxu1 %v9172_v2  ;;  %v9507_v42 = vor.u32 %v6887_v3, %v6423_v21  ;;  %v6487_v4 = vld [vmem:[%s10627_s3 + $0x490] sm:$0xf] }
 0x466   : > { %v3161_v45 = vmax.f32 %v3124_v53, 0.0  ;;  %3320 = vmatmul.bf16.gmra.mxu2 %v9164_v20  ;;  %3369 = vmatmul.bf16.gmra.mxu3 %v9172_v2  ;;  %v6489_v20 = vld [vmem:[%s10627_s3 + $0x498] sm:$0xf0]  ;;  %v6903_v53 = vld [vmem:[%s10627_s3 + $0x494] sm:$0xf0] }
 0x467   : > { %v9495_v6 = vor.u32 %v6902_v14, %v6489_v20  ;;  %v3162_v30 = vmax.f32 %v3029_v48, 0.0  ;;  %3644 = vmatpush.bf16.msrb.mxu0 %v9507_v42 }
 0x468   : > { %v9493_v61 = vpack.c.bf16 %v3161_v45, %v3159_v52  ;;  %v9515_v45 = vor.u32 %v6903_v53, %v6487_v4 }
 0x469   : > { %v3077_v2 = vpop.f32.mrf.mxu2  ;;  %v3126_v36 = vpop.f32.mrf.mxu3  ;;  %3791 = vmatpush.bf16.msrb.mxu3 %v9495_v6 }
 0x46a   : > { %v3078_v41 = vadd.f32 %v3077_v2, %v9285_v27  ;;  %v2981_v16 = vpop.f32.mrf.mxu0  ;;  %v3030_v55 = vpop.f32.mrf.mxu1  ;;  %3693 = vmatpush.bf16.msrb.mxu1 %v9515_v45 }
 0x46b   : > { %v2982_v56 = vadd.f32 %v2981_v16, %v9257_v32 }
 0x46c   : > { %v3127_v54 = vadd.f32 %v3126_v36, %v3078_v41 }
 0x46d   : > { %v3031_v13 = vadd.f32 %v3030_v55, %v2982_v56  ;;  %v6884_v56 = vld [vmem:[%s10627_s3 + $0x404] sm:$0xf] }
 0x46e   : > { %v3163_v16 = vmax.f32 %v3127_v54, 0.0 }
 0x46f   : > { %v3164_v5 = vmax.f32 %v3031_v13, 0.0  ;;  %v6417_v13 = vld [vmem:[%s10627_s3 + $0x408] sm:$0xf0] }
 0x471   : > { %v3079_v48 = vpop.f32.mrf.mxu2  ;;  %v3128_v52 = vpop.f32.mrf.mxu3  ;;  %v9517_v35 = vpack.c.bf16 %v3164_v5, %v3162_v30  ;;  %v9533_v30 = vor.u32 %v6884_v56, %v6417_v13  ;;  %v6900_v5 = vld [vmem:[%s10627_s3 + $0x484] sm:$0xf] }
 0x472   : > { %v3080_v8 = vadd.f32 %v3079_v48, %v9285_v27  ;;  %v2984_v14 = vpop.f32.mrf.mxu0  ;;  %v3033_v20 = vpop.f32.mrf.mxu1 }
 0x473   : > { %v2985_v2 = vadd.f32 %v2984_v14, %v9257_v32  ;;  %3743 = vmatpush.bf16.msrb.mxu2 %v9533_v30 }
 0x474   : > { %v3129_v36 = vadd.f32 %v3128_v52, %v3080_v8 }
 0x475   : > { %v3034_v41 = vadd.f32 %v3033_v20, %v2985_v2  ;;  %3227 = vmatmul.bf16.gmra.mxu0 %v9176_v50  ;;  %3276 = vmatmul.bf16.gmra.mxu1 %v9198_v63 }
 0x476   : > { %v3165_v55 = vmax.f32 %v3129_v36, 0.0  ;;  %3325 = vmatmul.bf16.gmra.mxu2 %v9176_v50  ;;  %3374 = vmatmul.bf16.gmra.mxu3 %v9198_v63  ;;  %v6481_v50 = vld [vmem:[%s10627_s3 + $0x488] sm:$0xf0]  ;;  %v6415_v36 = vld [vmem:[%s10627_s3 + $0x400] sm:$0xf] }
 0x477   : > { %v9543_v3 = vor.u32 %v6900_v5, %v6481_v50  ;;  %3980 = vmatpush.bf16.msra.mxu2 %v9190_v17  ;;  %v3166_v20 = vmax.f32 %v3034_v41, 0.0  ;;  %v6479_v17 = vld [vmem:[%s10627_s3 + $0x480] sm:$0xf] }
 0x478   : > { %v9541_v54 = vpack.c.bf16 %v3165_v55, %v3163_v16  ;;  %v6885_v16 = vld [vmem:[%s10627_s3 + $0x404] sm:$0xf0] }
 0x479   : > { %v3082_v63 = vpop.f32.mrf.mxu2  ;;  %v3131_v21 = vpop.f32.mrf.mxu3  ;;  %3792 = vmatpush.bf16.msrb.mxu3 %v9543_v3  ;;  %v9558_v55 = vor.u32 %v6885_v16, %v6415_v36 }
 0x47a   : > { %v3083_v4 = vadd.f32 %v3082_v63, %v9285_v27  ;;  %v2986_v53 = vpop.f32.mrf.mxu0  ;;  %v3035_v48 = vpop.f32.mrf.mxu1 }
 0x47b   : > { %v2987_v52 = vadd.f32 %v2986_v53, %v9257_v32  ;;  %3981 = vmatpush.bf16.msra.mxu2 %v9243_v24  ;;  %3645 = vmatpush.bf16.msrb.mxu0 %v9558_v55 }
 0x47c   : > { %v3132_v8 = vadd.f32 %v3131_v21, %v3083_v4 }
 0x47d   : > { %4029 = vmatpush.bf16.msra.mxu3 %v9200_v62  ;;  %v3036_v14 = vadd.f32 %v3035_v48, %v2987_v52  ;;  %v6901_v62 = vld [vmem:[%s10627_s3 + $0x484] sm:$0xf0] }
 0x47e   : > { %v9567_v13 = vor.u32 %v6901_v62, %v6479_v17  ;;  %v3167_v53 = vmax.f32 %v3132_v8, 0.0 }
 0x47f   : > { %v3168_v2 = vmax.f32 %v3036_v14, 0.0  ;;  %3882 = vmatpush.bf16.msra.mxu0 %v9218_v28  ;;  %3982 = vmatpush.bf16.msra.mxu2 %v9293_v11 }
 0x480   : > { %3694 = vmatpush.bf16.msrb.mxu1 %v9567_v13 }
 0x481   : > { %4030 = vmatpush.bf16.msra.mxu3 %v9249_v29  ;;  %v3084_v41 = vpop.f32.mrf.mxu2  ;;  %v3133_v56 = vpop.f32.mrf.mxu3  ;;  %v9569_v5 = vpack.c.bf16 %v3168_v2, %v3166_v20 }
 0x482   : > { %v3085_v24 = vadd.f32 %v3084_v41, %v9285_v27  ;;  %v2989_v50 = vpop.f32.mrf.mxu0  ;;  %v3038_v63 = vpop.f32.mrf.mxu1 }
 0x483   : > { %v2990_v21 = vadd.f32 %v2989_v50, %v9257_v32  ;;  %3883 = vmatpush.bf16.msra.mxu0 %v9265_v40  ;;  %3983 = vmatpush.bf16.msra.mxu2 %v9343_v19 }
 0x484   : > { %v3134_v4 = vadd.f32 %v3133_v56, %v3085_v24  ;;  %3931 = vmatpush.bf16.msra.mxu1 %v9224_v22 }
 0x485   : > { %v3039_v29 = vadd.f32 %v3038_v63, %v2990_v21  ;;  %3232 = vmatmul.bf16.gmra.mxu0 %v9215_v47  ;;  %3281 = vmatmul.bf16.gmra.mxu1 %v9241_v18 }
 0x486   : > { %v3169_v48 = vmax.f32 %v3134_v4, 0.0  ;;  %3330 = vmatmul.bf16.gmra.mxu2 %v9215_v47  ;;  %3379 = vmatmul.bf16.gmra.mxu3 %v9241_v18 }
 0x487   : > { %4031 = vmatpush.bf16.msra.mxu3 %v9303_v1  ;;  %3884 = vmatpush.bf16.msra.mxu0 %v9315_v49 }
 0x488   : > { %3932 = vmatpush.bf16.msra.mxu1 %v9273_v44  ;;  %v9586_v28 = vpack.c.bf16 %v3169_v48, %v3167_v53  ;;  %3984 = vmatpush.bf16.msra.mxu2 %v9389_v37  ;;  %v3170_v44 = vmax.f32 %v3039_v29, 0.0 }
 0x489   : > { %v3087_v22 = vpop.f32.mrf.mxu2  ;;  %v3136_v11 = vpop.f32.mrf.mxu3 }
 0x48a   : > { %v3088_v52 = vadd.f32 %v3087_v22, %v9285_v27  ;;  %v2991_v8 = vpop.f32.mrf.mxu0  ;;  %v3040_v14 = vpop.f32.mrf.mxu1 }
 0x48b   : > { %v2992_v47 = vadd.f32 %v2991_v8, %v9257_v32  ;;  %4032 = vmatpush.bf16.msra.mxu3 %v9351_v38  ;;  %3885 = vmatpush.bf16.msra.mxu0 %v9363_v51 }
 0x48c   : > { %v3137_v18 = vadd.f32 %v3136_v11, %v3088_v52  ;;  %3933 = vmatpush.bf16.msra.mxu1 %v9325_v46  ;;  %3985 = vmatpush.bf16.msra.mxu2 %v9437_v58 }
 0x48d   : > { %v3041_v40 = vadd.f32 %v3040_v14, %v2992_v47 }
 0x48f   : > { %v3172_v1 = vmax.f32 %v3041_v40, 0.0  ;;  %4033 = vmatpush.bf16.msra.mxu3 %v9399_v9  ;;  %3886 = vmatpush.bf16.msra.mxu0 %v9411_v26  ;;  %v3171_v9 = vmax.f32 %v3137_v18, 0.0 }
 0x490   : > { %3934 = vmatpush.bf16.msra.mxu1 %v9371_v7  ;;  %3986 = vmatpush.bf16.msra.mxu2 %v9485_v59 }
 0x491   : > { %v3089_v19 = vpop.f32.mrf.mxu2  ;;  %v3138_v49 = vpop.f32.mrf.mxu3  ;;  %v9598_v20 = vpack.c.bf16 %v3172_v1, %v3170_v44 }
 0x492   : > { %v3090_v38 = vadd.f32 %v3089_v19, %v9285_v27  ;;  %v2994_v46 = vpop.f32.mrf.mxu0  ;;  %v3043_v2 = vpop.f32.mrf.mxu1 }
 0x493   : > { %v2995_v37 = vadd.f32 %v2994_v46, %v9257_v32  ;;  %4034 = vmatpush.bf16.msra.mxu3 %v9447_v43  ;;  %3887 = vmatpush.bf16.msra.mxu0 %v9459_v25 }
 0x494   : > { %v3139_v51 = vadd.f32 %v3138_v49, %v3090_v38  ;;  %3935 = vmatpush.bf16.msra.mxu1 %v9419_v57  ;;  %3987 = vmatpush.bf16.msra.mxu2 %v9533_v30 }
 0x495   : > { %v3044_v7 = vadd.f32 %v3043_v2, %v2995_v37  ;;  %3237 = vmatmul.bf16.gmra.mxu0 %v9275_v34  ;;  %3286 = vmatmul.bf16.gmra.mxu1 %v9301_v31 }
 0x496   : > { %v3173_v58 = vmax.f32 %v3139_v51, 0.0  ;;  %3335 = vmatmul.bf16.gmra.mxu2 %v9275_v34  ;;  %3384 = vmatmul.bf16.gmra.mxu3 %v9301_v31 }
 0x497   : > { %4035 = vmatpush.bf16.msra.mxu3 %v9495_v6  ;;  %3888 = vmatpush.bf16.msra.mxu0 %v9507_v42 }
 0x498   : > { %3936 = vmatpush.bf16.msra.mxu1 %v9467_v23  ;;  %v9613_v26 = vpack.c.bf16 %v3173_v58, %v3171_v9  ;;  %v3174_v23 = vmax.f32 %v3044_v7, 0.0 }
 0x499   : > { %v3092_v57 = vpop.f32.mrf.mxu2  ;;  %v3141_v43 = vpop.f32.mrf.mxu3 }
 0x49a   : > { %v3093_v59 = vadd.f32 %v3092_v57, %v9285_v27  ;;  %v2996_v36 = vpop.f32.mrf.mxu0  ;;  %v3045_v16 = vpop.f32.mrf.mxu1 }
 0x49b   : > { %v2997_v34 = vadd.f32 %v2996_v36, %v9257_v32  ;;  %4036 = vmatpush.bf16.msra.mxu3 %v9543_v3  ;;  %3889 = vmatpush.bf16.msra.mxu0 %v9558_v55 }
 0x49c   : > { %v3142_v31 = vadd.f32 %v3141_v43, %v3093_v59  ;;  %3937 = vmatpush.bf16.msra.mxu1 %v9515_v45 }
 0x49d   : > { %v3046_v25 = vadd.f32 %v3045_v16, %v2997_v34 }
 0x49e   : > { %v3175_v45 = vmax.f32 %v3142_v31, 0.0 }
 0x49f   : > { %v3176_v6 = vmax.f32 %v3046_v25, 0.0 }
 0x4a0   : > { %3938 = vmatpush.bf16.msra.mxu1 %v9567_v13 }
 0x4a1   : > { %v3094_v30 = vpop.f32.mrf.mxu2  ;;  %v3143_v17 = vpop.f32.mrf.mxu3  ;;  %v9623_v62 = vpack.c.bf16 %v3176_v6, %v3174_v23 }
 0x4a2   : > { %v3095_v41 = vadd.f32 %v3094_v30, %v9285_v27  ;;  %v3203_v56 = vpop.f32.mrf.mxu0  ;;  %v3252_v42 = vpop.f32.mrf.mxu1 }
 0x4a3   : > { %v3204_v3 = vadd.f32 %v3203_v56, %v9257_v32 }
 0x4a4   : > { %v3144_v24 = vadd.f32 %v3143_v17, %v3095_v41 }
 0x4a5   : > { %v3253_v50 = vadd.f32 %v3252_v42, %v3204_v3  ;;  %3646 = vmatmul.bf16.vlgmr.msrb.gmra.mxu0 %v9323_v33  ;;  %3695 = vmatmul.bf16.vlgmr.msrb.gmra.mxu1 %v9341_v10 }
 0x4a6   : > { %v3177_v55 = vmax.f32 %v3144_v24, 0.0  ;;  %3744 = vmatmul.bf16.vlgmr.msrb.gmra.mxu2 %v9323_v33  ;;  %3793 = vmatmul.bf16.vlgmr.msrb.gmra.mxu3 %v9341_v10 }
 0x4a7   : > { %v3390_v52 = vmax.f32 %v3253_v50, 0.0 }
 0x4a8   : > { %v9631_v13 = vpack.c.bf16 %v3177_v55, %v3175_v45 }
 0x4a9   : > { %v3301_v63 = vpop.f32.mrf.mxu2  ;;  %v3350_v21 = vpop.f32.mrf.mxu3 }
 0x4aa   : > { %v3302_v4 = vadd.f32 %v3301_v63, %v9285_v27  ;;  %v3205_v29 = vpop.f32.mrf.mxu0  ;;  %v3254_v53 = vpop.f32.mrf.mxu1 }
 0x4ab   : > { %v3206_v48 = vadd.f32 %v3205_v29, %v9257_v32 }
 0x4ac   : > { %v3351_v22 = vadd.f32 %v3350_v21, %v3302_v4 }
 0x4ad   : > { %v3255_v11 = vadd.f32 %v3254_v53, %v3206_v48 }
 0x4ae   : > { %v3391_v49 = vmax.f32 %v3351_v22, 0.0 }
 0x4af   : > { %v3392_v8 = vmax.f32 %v3255_v11, 0.0 }
 0x4b1   : > { %v9635_v14 = vpack.c.bf16 %v3392_v8, %v3390_v52  ;;  %v3303_v47 = vpop.f32.mrf.mxu2  ;;  %v3352_v33 = vpop.f32.mrf.mxu3 }
 0x4b2   : > { %v3304_v10 = vadd.f32 %v3303_v47, %v9285_v27  ;;  %v3208_v18 = vpop.f32.mrf.mxu0  ;;  %v3257_v40 = vpop.f32.mrf.mxu1 }
 0x4b3   : > { %v3209_v44 = vadd.f32 %v3208_v18, %v9257_v32 }
 0x4b4   : > { %v3353_v1 = vadd.f32 %v3352_v33, %v3304_v10 }
 0x4b5   : > { %v3258_v19 = vadd.f32 %v3257_v40, %v3209_v44  ;;  %3651 = vmatmul.bf16.gmra.mxu0 %v9373_v39  ;;  %3700 = vmatmul.bf16.gmra.mxu1 %v9397_v12 }
 0x4b6   : > { %v3393_v38 = vmax.f32 %v3353_v1, 0.0  ;;  %3749 = vmatmul.bf16.gmra.mxu2 %v9373_v39  ;;  %3798 = vmatmul.bf16.gmra.mxu3 %v9397_v12 }
 0x4b7   : > { %v3394_v59 = vmax.f32 %v3258_v19, 0.0 }
 0x4b8   : > { %v9643_v46 = vpack.c.bf16 %v3393_v38, %v3391_v49 }
 0x4b9   : > { %v3306_v2 = vpop.f32.mrf.mxu2  ;;  %v3355_v37 = vpop.f32.mrf.mxu3 }
 0x4ba   : > { %v3307_v51 = vadd.f32 %v3306_v2, %v9285_v27  ;;  %v3210_v7 = vpop.f32.mrf.mxu0  ;;  %v3259_v9 = vpop.f32.mrf.mxu1 }
 0x4bb   : > { %v3211_v58 = vadd.f32 %v3210_v7, %v9257_v32 }
 0x4bc   : > { %v3356_v57 = vadd.f32 %v3355_v37, %v3307_v51 }
 0x4bd   : > { %v3260_v43 = vadd.f32 %v3259_v9, %v3211_v58 }
 0x4be   : > { %v3395_v17 = vmax.f32 %v3356_v57, 0.0 }
 0x4bf   : > { %v3396_v36 = vmax.f32 %v3260_v43, 0.0 }
 0x4c1   : > { %v3308_v16 = vpop.f32.mrf.mxu2  ;;  %v3357_v34 = vpop.f32.mrf.mxu3  ;;  %v9647_v31 = vpack.c.bf16 %v3396_v36, %v3394_v59 }
 0x4c2   : > { %v3309_v39 = vadd.f32 %v3308_v16, %v9285_v27  ;;  %v3213_v12 = vpop.f32.mrf.mxu0  ;;  %v3262_v25 = vpop.f32.mrf.mxu1 }
 0x4c3   : > { %v3214_v23 = vadd.f32 %v3213_v12, %v9257_v32 }
 0x4c4   : > { %v3358_v6 = vadd.f32 %v3357_v34, %v3309_v39 }
 0x4c5   : > { %v3263_v30 = vadd.f32 %v3262_v25, %v3214_v23  ;;  %3656 = vmatmul.bf16.gmra.mxu0 %v9421_v0  ;;  %3705 = vmatmul.bf16.gmra.mxu1 %v9445_v15 }
 0x4c6   : > { %v3397_v41 = vmax.f32 %v3358_v6, 0.0  ;;  %3754 = vmatmul.bf16.gmra.mxu2 %v9421_v0  ;;  %3803 = vmatmul.bf16.gmra.mxu3 %v9445_v15 }
 0x4c7   : > { %v3398_v4 = vmax.f32 %v3263_v30, 0.0 }
 0x4c8   : > { %v9655_v56 = vpack.c.bf16 %v3397_v41, %v3395_v17 }
 0x4c9   : > { %v3311_v42 = vpop.f32.mrf.mxu2  ;;  %v3360_v3 = vpop.f32.mrf.mxu3 }
 0x4ca   : > { %v3312_v24 = vadd.f32 %v3311_v42, %v9285_v27  ;;  %v3215_v50 = vpop.f32.mrf.mxu0  ;;  %v3264_v45 = vpop.f32.mrf.mxu1 }
 0x4cb   : > { %v3216_v55 = vadd.f32 %v3215_v50, %v9257_v32 }
 0x4cc   : > { %v3361_v63 = vadd.f32 %v3360_v3, %v3312_v24 }
 0x4cd   : > { %v3265_v21 = vadd.f32 %v3264_v45, %v3216_v55 }
 0x4ce   : > { %v3399_v33 = vmax.f32 %v3361_v63, 0.0 }
 0x4cf   : > { %v3400_v29 = vmax.f32 %v3265_v21, 0.0 }
 0x4d1   : > { %v3313_v53 = vpop.f32.mrf.mxu2  ;;  %v3362_v48 = vpop.f32.mrf.mxu3  ;;  %v9659_v22 = vpack.c.bf16 %v3400_v29, %v3398_v4 }
 0x4d2   : > { %v3314_v0 = vadd.f32 %v3313_v53, %v9285_v27  ;;  %v3218_v15 = vpop.f32.mrf.mxu0  ;;  %v3267_v11 = vpop.f32.mrf.mxu1 }
 0x4d3   : > { %v3219_v52 = vadd.f32 %v3218_v15, %v9257_v32 }
 0x4d4   : > { %v3363_v8 = vadd.f32 %v3362_v48, %v3314_v0 }
 0x4d5   : > { %v3268_v47 = vadd.f32 %v3267_v11, %v3219_v52  ;;  %3661 = vmatmul.bf16.gmra.mxu0 %v9469_v60  ;;  %3710 = vmatmul.bf16.gmra.mxu1 %v9493_v61 }
 0x4d6   : > { %v3401_v10 = vmax.f32 %v3363_v8, 0.0  ;;  %3759 = vmatmul.bf16.gmra.mxu2 %v9469_v60  ;;  %3808 = vmatmul.bf16.gmra.mxu3 %v9493_v61 }
 0x4d7   : > { %v3402_v51 = vmax.f32 %v3268_v47, 0.0 }
 0x4d8   : > { %v9667_v18 = vpack.c.bf16 %v3401_v10, %v3399_v33 }
 0x4d9   : > { %v3316_v40 = vpop.f32.mrf.mxu2  ;;  %v3365_v44 = vpop.f32.mrf.mxu3 }
 0x4da   : > { %v3317_v1 = vadd.f32 %v3316_v40, %v9285_v27  ;;  %v3220_v19 = vpop.f32.mrf.mxu0  ;;  %v3269_v49 = vpop.f32.mrf.mxu1 }
 0x4db   : > { %v3221_v38 = vadd.f32 %v3220_v19, %v9257_v32 }
 0x4dc   : > { %v3366_v2 = vadd.f32 %v3365_v44, %v3317_v1 }
 0x4dd   : > { %v3270_v37 = vadd.f32 %v3269_v49, %v3221_v38 }
 0x4de   : > { %v3403_v34 = vmax.f32 %v3366_v2, 0.0 }
 0x4df   : > { %v3404_v7 = vmax.f32 %v3270_v37, 0.0 }
 0x4e1   : > { %v3318_v9 = vpop.f32.mrf.mxu2  ;;  %v3367_v58 = vpop.f32.mrf.mxu3  ;;  %v9671_v57 = vpack.c.bf16 %v3404_v7, %v3402_v51 }
 0x4e2   : > { %v3319_v60 = vadd.f32 %v3318_v9, %v9285_v27  ;;  %v3223_v61 = vpop.f32.mrf.mxu0  ;;  %v3272_v43 = vpop.f32.mrf.mxu1 }
 0x4e3   : > { %v3224_v59 = vadd.f32 %v3223_v61, %v9257_v32  ;;  %v6930_v61 = vld [vmem:[%s10627_s3 + $0x574] sm:$0xf] }
 0x4e4   : > { %v3368_v36 = vadd.f32 %v3367_v58, %v3319_v60 }
 0x4e5   : > { %v3273_v16 = vadd.f32 %v3272_v43, %v3224_v59  ;;  %3666 = vmatmul.bf16.gmra.mxu0 %v9517_v35  ;;  %3715 = vmatmul.bf16.gmra.mxu1 %v9541_v54  ;;  %v6634_v43 = vld [vmem:[%s10627_s3 + $0x578] sm:$0xf0] }
 0x4e6   : > { %v3405_v39 = vmax.f32 %v3368_v36, 0.0  ;;  %3764 = vmatmul.bf16.gmra.mxu2 %v9517_v35  ;;  %3813 = vmatmul.bf16.gmra.mxu3 %v9541_v54  ;;  %v9709_v59 = vor.u32 %v6930_v61, %v6634_v43  ;;  %v6946_v36 = vld [vmem:[%s10627_s3 + $0x5f4] sm:$0xf] }
 0x4e7   : > { %v3406_v24 = vmax.f32 %v3273_v16, 0.0 }
 0x4e8   : > { %v9679_v12 = vpack.c.bf16 %v3405_v39, %v3403_v34  ;;  %4424 = vmatpush.bf16.msrb.mxu2 %v9709_v59 }
 0x4e9   : > { %v3321_v25 = vpop.f32.mrf.mxu2  ;;  %v3370_v23 = vpop.f32.mrf.mxu3 }
 0x4ea   : > { %v3322_v6 = vadd.f32 %v3321_v25, %v9285_v27  ;;  %v3225_v30 = vpop.f32.mrf.mxu0  ;;  %v3274_v17 = vpop.f32.mrf.mxu1 }
 0x4eb   : > { %v3226_v41 = vadd.f32 %v3225_v30, %v9257_v32 }
 0x4ec   : > { %v3371_v42 = vadd.f32 %v3370_v23, %v3322_v6 }
 0x4ed   : > { %v3275_v3 = vadd.f32 %v3274_v17, %v3226_v41 }
 0x4ee   : > { %v3407_v48 = vmax.f32 %v3371_v42, 0.0 }
 0x4ef   : > { %v3408_v50 = vmax.f32 %v3275_v3, 0.0 }
 0x4f1   : > { %v3323_v45 = vpop.f32.mrf.mxu2  ;;  %v3372_v55 = vpop.f32.mrf.mxu3  ;;  %v9683_v63 = vpack.c.bf16 %v3408_v50, %v3406_v24 }
 0x4f2   : > { %v3324_v35 = vadd.f32 %v3323_v45, %v9285_v27  ;;  %v3228_v54 = vpop.f32.mrf.mxu0  ;;  %v3277_v21 = vpop.f32.mrf.mxu1  ;;  %v6632_v45 = vld [vmem:[%s10627_s3 + $0x570] sm:$0xf] }
 0x4f3   : > { %v3229_v4 = vadd.f32 %v3228_v54, %v9257_v32 }
 0x4f4   : > { %v3373_v29 = vadd.f32 %v3372_v55, %v3324_v35  ;;  %v6931_v55 = vld [vmem:[%s10627_s3 + $0x574] sm:$0xf0]  ;;  %v6696_v35 = vld [vmem:[%s10627_s3 + $0x5f0] sm:$0xf] }
 0x4f5   : > { %v3278_v53 = vadd.f32 %v3277_v21, %v3229_v4  ;;  %3671 = vmatmul.bf16.gmra.mxu0 %v9569_v5  ;;  %3720 = vmatmul.bf16.gmra.mxu1 %v9586_v28 }
 0x4f6   : > { %v3409_v0 = vmax.f32 %v3373_v29, 0.0  ;;  %3769 = vmatmul.bf16.gmra.mxu2 %v9569_v5  ;;  %3818 = vmatmul.bf16.gmra.mxu3 %v9586_v28 }
 0x4f7   : > { %v3410_v1 = vmax.f32 %v3278_v53, 0.0  ;;  %v9737_v53 = vor.u32 %v6931_v55, %v6632_v45 }
 0x4f8   : > { %v9691_v15 = vpack.c.bf16 %v3409_v0, %v3407_v48  ;;  %v6947_v48 = vld [vmem:[%s10627_s3 + $0x5f4] sm:$0xf0] }
 0x4f9   : > { %v3326_v11 = vpop.f32.mrf.mxu2  ;;  %v3375_v52 = vpop.f32.mrf.mxu3  ;;  %4326 = vmatpush.bf16.msrb.mxu0 %v9737_v53 }
 0x4fa   : > { %v3327_v8 = vadd.f32 %v3326_v11, %v9285_v27  ;;  %v3230_v47 = vpop.f32.mrf.mxu0  ;;  %v3279_v33 = vpop.f32.mrf.mxu1  ;;  %v9743_v11 = vor.u32 %v6947_v48, %v6696_v35  ;;  %v6926_v35 = vld [vmem:[%s10627_s3 + $0x554] sm:$0xf] }
 0x4fb   : > { %v3231_v10 = vadd.f32 %v3230_v47, %v9257_v32 }
 0x4fc   : > { %v3376_v40 = vadd.f32 %v3375_v52, %v3327_v8  ;;  %4375 = vmatpush.bf16.msrb.mxu1 %v9743_v11 }
 0x4fd   : > { %v3280_v44 = vadd.f32 %v3279_v33, %v3231_v10  ;;  %v6928_v10 = vld [vmem:[%s10627_s3 + $0x564] sm:$0xf] }
 0x4fe   : > { %v3411_v58 = vmax.f32 %v3376_v40, 0.0  ;;  %v6626_v40 = vld [vmem:[%s10627_s3 + $0x568] sm:$0xf0] }
 0x4ff   : > { %v3412_v19 = vmax.f32 %v3280_v44, 0.0  ;;  %v6944_v44 = vld [vmem:[%s10627_s3 + $0x5e4] sm:$0xf] }
 0x501   : > { %v3328_v49 = vpop.f32.mrf.mxu2  ;;  %v3377_v38 = vpop.f32.mrf.mxu3  ;;  %v9695_v2 = vpack.c.bf16 %v3412_v19, %v3410_v1 }
 0x502   : > { %v3329_v5 = vadd.f32 %v3328_v49, %v9285_v27  ;;  %v3233_v28 = vpop.f32.mrf.mxu0  ;;  %v3282_v37 = vpop.f32.mrf.mxu1  ;;  %v9762_v49 = vor.u32 %v6928_v10, %v6626_v40 }
 0x503   : > { %v3234_v51 = vadd.f32 %v3233_v28, %v9257_v32 }
 0x504   : > { %v3378_v7 = vadd.f32 %v3377_v38, %v3329_v5  ;;  %4425 = vmatpush.bf16.msrb.mxu2 %v9762_v49 }
 0x505   : > { %v3283_v9 = vadd.f32 %v3282_v37, %v3234_v51  ;;  %3676 = vmatmul.bf16.gmra.mxu0 %v9598_v20  ;;  %3725 = vmatmul.bf16.gmra.mxu1 %v9613_v26 }
 0x506   : > { %v3413_v60 = vmax.f32 %v3378_v7, 0.0  ;;  %3774 = vmatmul.bf16.gmra.mxu2 %v9598_v20  ;;  %3823 = vmatmul.bf16.gmra.mxu3 %v9613_v26  ;;  %v6698_v20 = vld [vmem:[%s10627_s3 + $0x5f8] sm:$0xf0]  ;;  %v6412_v7 = vld [vmem:[%s10628_s4 + $0x8] sm:$0x3] }
 0x507   : > { %v9719_v39 = vor.u32 %v6946_v36, %v6698_v20  ;;  %v3414_v42 = vmax.f32 %v3283_v9, 0.0  ;;  %v6624_v36 = vld [vmem:[%s10627_s3 + $0x560] sm:$0xf] }
 0x508   : > { %v9717_v16 = vpack.c.bf16 %v3413_v60, %v3411_v58  ;;  %v9776_v60 = vperm.slane %v6412_v7, 0 }
 0x509   : > { %v3331_v26 = vpop.f32.mrf.mxu2  ;;  %v3380_v34 = vpop.f32.mrf.mxu3  ;;  %4473 = vmatpush.bf16.msrb.mxu3 %v9719_v39 }
 0x50a   : > { %v3332_v25 = vadd.f32 %v3331_v26, %v9285_v27  ;;  %v3235_v23 = vpop.f32.mrf.mxu0  ;;  %v3284_v6 = vpop.f32.mrf.mxu1  ;;  %v6688_v26 = vld [vmem:[%s10627_s3 + $0x5e0] sm:$0xf] }
 0x50b   : > { %v3236_v30 = vadd.f32 %v3235_v23, %v9257_v32 }
 0x50c   : > { %v3381_v17 = vadd.f32 %v3380_v34, %v3332_v25  ;;  %v6945_v34 = vld [vmem:[%s10627_s3 + $0x5e4] sm:$0xf0] }
 0x50d   : > { %v3285_v41 = vadd.f32 %v3284_v6, %v3236_v30  ;;  %v9792_v6 = vor.u32 %v6945_v34, %v6688_v26 }
 0x50e   : > { %v3415_v47 = vmax.f32 %v3381_v17, 0.0 }
 0x50f   : > { %v3416_v3 = vmax.f32 %v3285_v41, 0.0  ;;  %4376 = vmatpush.bf16.msrb.mxu1 %v9792_v6 }
 0x511   : > { %v3333_v24 = vpop.f32.mrf.mxu2  ;;  %v3382_v50 = vpop.f32.mrf.mxu3  ;;  %v9734_v54 = vpack.c.bf16 %v3416_v3, %v3414_v42 }
 0x512   : > { %v3334_v21 = vadd.f32 %v3333_v24, %v9285_v27  ;;  %v3238_v4 = vpop.f32.mrf.mxu0  ;;  %v3287_v29 = vpop.f32.mrf.mxu1 }
 0x513   : > { %v3239_v0 = vadd.f32 %v3238_v4, %v9257_v32 }
 0x514   : > { %v3383_v52 = vadd.f32 %v3382_v50, %v3334_v21  ;;  %v6618_v21 = vld [vmem:[%s10627_s3 + $0x558] sm:$0xf0] }
 0x515   : > { %v3288_v8 = vadd.f32 %v3287_v29, %v3239_v0  ;;  %3681 = vmatmul.bf16.gmra.mxu0 %v9623_v62  ;;  %3730 = vmatmul.bf16.gmra.mxu1 %v9631_v13  ;;  %v9812_v4 = vor.u32 %v6926_v35, %v6618_v21  ;;  %v6942_v29 = vld [vmem:[%s10627_s3 + $0x5d4] sm:$0xf] }
 0x516   : > { %v3417_v33 = vmax.f32 %v3383_v52, 0.0  ;;  %3779 = vmatmul.bf16.gmra.mxu2 %v9623_v62  ;;  %3828 = vmatmul.bf16.gmra.mxu3 %v9631_v13  ;;  %v6690_v13 = vld [vmem:[%s10627_s3 + $0x5e8] sm:$0xf0] }
 0x517   : > { %v9768_v37 = vor.u32 %v6944_v44, %v6690_v13  ;;  %v3418_v61 = vmax.f32 %v3288_v8, 0.0  ;;  %4426 = vmatpush.bf16.msrb.mxu2 %v9812_v4  ;;  %v6616_v13 = vld [vmem:[%s10627_s3 + $0x550] sm:$0xf] }
 0x518   : > { %v9760_v1 = vpack.c.bf16 %v3417_v33, %v3415_v47 }
 0x519   : > { %v3336_v19 = vpop.f32.mrf.mxu2  ;;  %v3385_v62 = vpop.f32.mrf.mxu3  ;;  %4474 = vmatpush.bf16.msrb.mxu3 %v9768_v37 }
 0x51a   : > { %v3337_v38 = vadd.f32 %v3336_v19, %v9285_v27  ;;  %v3240_v5 = vpop.f32.mrf.mxu0  ;;  %v3289_v28 = vpop.f32.mrf.mxu1 }
 0x51b   : > { %v3241_v51 = vadd.f32 %v3240_v5, %v9257_v32  ;;  %v6929_v32 = vld [vmem:[%s10627_s3 + $0x564] sm:$0xf0] }
 0x51c   : > { %v3386_v9 = vadd.f32 %v3385_v62, %v3337_v38  ;;  %v9784_v20 = vor.u32 %v6929_v32, %v6624_v36  ;;  %v6927_v38 = vld [vmem:[%s10627_s3 + $0x554] sm:$0xf0] }
 0x51d   : > { %v3290_v58 = vadd.f32 %v3289_v28, %v3241_v51  ;;  %v9834_v5 = vor.u32 %v6927_v38, %v6616_v13  ;;  %v6680_v28 = vld [vmem:[%s10627_s3 + $0x5d0] sm:$0xf]  ;;  %v6943_v51 = vld [vmem:[%s10627_s3 + $0x5d4] sm:$0xf0] }
 0x51e   : > { %4327 = vmatpush.bf16.msrb.mxu0 %v9784_v20  ;;  %v3419_v45 = vmax.f32 %v3386_v9, 0.0 }
 0x51f   : > { %v3420_v43 = vmax.f32 %v3290_v58, 0.0 }
 0x521   : > { %v3338_v25 = vpop.f32.mrf.mxu2  ;;  %v3387_v23 = vpop.f32.mrf.mxu3  ;;  %v9794_v30 = vpack.c.bf16 %v3420_v43, %v3418_v61  ;;  %v9844_v61 = vor.u32 %v6943_v51, %v6680_v28 }
 0x522   : > { %v3339_v17 = vadd.f32 %v3338_v25, %v9285_v27  ;;  %v3647_v41 = vpop.f32.mrf.mxu0  ;;  %v3696_v42 = vpop.f32.mrf.mxu1  ;;  %v9804_v27 = vperm.slane %v6412_v7, 1  ;;  %4328 = vmatpush.bf16.msrb.mxu0 %v9834_v5 }
 0x523   : > { %v3648_v3 = vadd.f32 %v3647_v41, %v9776_v60  ;;  %4377 = vmatpush.bf16.msrb.mxu1 %v9844_v61  ;;  %v6924_v41 = vld [vmem:[%s10627_s3 + $0x544] sm:$0xf] }
 0x524   : > { %v3388_v24 = vadd.f32 %v3387_v23, %v3339_v17 }
 0x525   : > { %v3697_v50 = vadd.f32 %v3696_v42, %v3648_v3  ;;  %3890 = vmatmul.bf16.vlgmr.msra.gmra.mxu0 %v9635_v14  ;;  %3939 = vmatmul.bf16.vlgmr.msra.gmra.mxu1 %v9643_v46  ;;  %v6610_v42 = vld [vmem:[%s10627_s3 + $0x548] sm:$0xf0] }
 0x526   : > { %v3421_v55 = vmax.f32 %v3388_v24, 0.0  ;;  %3988 = vmatmul.bf16.vlgmr.msra.gmra.mxu2 %v9635_v14  ;;  %4037 = vmatmul.bf16.vlgmr.msra.gmra.mxu3 %v9643_v46  ;;  %v6682_v14 = vld [vmem:[%s10627_s3 + $0x5d8] sm:$0xf0]  ;;  %v9862_v24 = vor.u32 %v6924_v41, %v6610_v42  ;;  %v6938_v41 = vld [vmem:[%s10627_s3 + $0x5b4] sm:$0xf] }
 0x527   : > { %v9822_v52 = vor.u32 %v6942_v29, %v6682_v14  ;;  %v3834_v19 = vmax.f32 %v3697_v50, 0.0  ;;  %v6940_v50 = vld [vmem:[%s10627_s3 + $0x5c4] sm:$0xf] }
 0x528   : > { %v9820_v46 = vpack.c.bf16 %v3421_v55, %v3419_v45  ;;  %4427 = vmatpush.bf16.msrb.mxu2 %v9862_v24 }
 0x529   : > { %v3745_v48 = vpop.f32.mrf.mxu2  ;;  %v3794_v0 = vpop.f32.mrf.mxu3  ;;  %4475 = vmatpush.bf16.msrb.mxu3 %v9822_v52 }
 0x52a   : > { %v3746_v8 = vadd.f32 %v3745_v48, %v9804_v27  ;;  %v3649_v47 = vpop.f32.mrf.mxu0  ;;  %v3698_v33 = vpop.f32.mrf.mxu1 }
 0x52b   : > { %v3650_v10 = vadd.f32 %v3649_v47, %v9776_v60 }
 0x52c   : > { %v3795_v40 = vadd.f32 %v3794_v0, %v3746_v8 }
 0x52d   : > { %v3699_v44 = vadd.f32 %v3698_v33, %v3650_v10  ;;  %v6608_v33 = vld [vmem:[%s10627_s3 + $0x540] sm:$0xf]  ;;  %v6925_v10 = vld [vmem:[%s10627_s3 + $0x544] sm:$0xf0] }
 0x52e   : > { %v3835_v23 = vmax.f32 %v3795_v40, 0.0  ;;  %v9882_v40 = vor.u32 %v6925_v10, %v6608_v33  ;;  %v6664_v10 = vld [vmem:[%s10627_s3 + $0x5b0] sm:$0xf] }
 0x52f   : > { %v3836_v62 = vmax.f32 %v3699_v44, 0.0  ;;  %v6672_v44 = vld [vmem:[%s10627_s3 + $0x5c0] sm:$0xf] }
 0x530   : > { %4329 = vmatpush.bf16.msrb.mxu0 %v9882_v40 }
 0x531   : > { %v9842_v7 = vpack.c.bf16 %v3836_v62, %v3834_v19  ;;  %v3747_v9 = vpop.f32.mrf.mxu2  ;;  %v3796_v58 = vpop.f32.mrf.mxu3  ;;  %v6941_v19 = vld [vmem:[%s10627_s3 + $0x5c4] sm:$0xf0] }
 0x532   : > { %v3748_v43 = vadd.f32 %v3747_v9, %v9804_v27  ;;  %v3652_v36 = vpop.f32.mrf.mxu0  ;;  %v3701_v32 = vpop.f32.mrf.mxu1  ;;  %v9890_v38 = vor.u32 %v6941_v19, %v6672_v44  ;;  %v6939_v44 = vld [vmem:[%s10627_s3 + $0x5b4] sm:$0xf0] }
 0x533   : > { %v3653_v26 = vadd.f32 %v3652_v36, %v9776_v60 }
 0x534   : > { %v3797_v34 = vadd.f32 %v3796_v58, %v3748_v43  ;;  %4378 = vmatpush.bf16.msrb.mxu1 %v9890_v38 }
 0x535   : > { %v3702_v25 = vadd.f32 %v3701_v32, %v3653_v26  ;;  %3895 = vmatmul.bf16.gmra.mxu0 %v9647_v31  ;;  %3944 = vmatmul.bf16.gmra.mxu1 %v9655_v56 }
 0x536   : > { %v3837_v17 = vmax.f32 %v3797_v34, 0.0  ;;  %3993 = vmatmul.bf16.gmra.mxu2 %v9647_v31  ;;  %4042 = vmatmul.bf16.gmra.mxu3 %v9655_v56  ;;  %v6674_v31 = vld [vmem:[%s10627_s3 + $0x5c8] sm:$0xf0] }
 0x537   : > { %v9870_v55 = vor.u32 %v6940_v50, %v6674_v31  ;;  %v3838_v8 = vmax.f32 %v3702_v25, 0.0  ;;  %v6922_v25 = vld [vmem:[%s10627_s3 + $0x534] sm:$0xf] }
 0x538   : > { %v9860_v3 = vpack.c.bf16 %v3837_v17, %v3835_v23  ;;  %v6602_v23 = vld [vmem:[%s10627_s3 + $0x538] sm:$0xf0] }
 0x539   : > { %v3750_v56 = vpop.f32.mrf.mxu2  ;;  %v3799_v45 = vpop.f32.mrf.mxu3  ;;  %4476 = vmatpush.bf16.msrb.mxu3 %v9870_v55  ;;  %v9908_v17 = vor.u32 %v6922_v25, %v6602_v23  ;;  %v6920_v23 = vld [vmem:[%s10627_s3 + $0x524] sm:$0xf] }
 0x53a   : > { %v3751_v35 = vadd.f32 %v3750_v56, %v9804_v27  ;;  %v3654_v21 = vpop.f32.mrf.mxu0  ;;  %v3703_v29 = vpop.f32.mrf.mxu1 }
 0x53b   : > { %v3655_v14 = vadd.f32 %v3654_v21, %v9776_v60  ;;  %4428 = vmatpush.bf16.msrb.mxu2 %v9908_v17 }
 0x53c   : > { %v3800_v48 = vadd.f32 %v3799_v45, %v3751_v35 }
 0x53d   : > { %v3704_v0 = vadd.f32 %v3703_v29, %v3655_v14 }
 0x53e   : > { %v3839_v26 = vmax.f32 %v3800_v48, 0.0 }
 0x53f   : > { %v3840_v47 = vmax.f32 %v3704_v0, 0.0 }
 0x541   : > { %v3752_v62 = vpop.f32.mrf.mxu2  ;;  %v3801_v13 = vpop.f32.mrf.mxu3  ;;  %v9892_v28 = vpack.c.bf16 %v3840_v47, %v3838_v8  ;;  %v6600_v8 = vld [vmem:[%s10627_s3 + $0x530] sm:$0xf]  ;;  %v6923_v47 = vld [vmem:[%s10627_s3 + $0x534] sm:$0xf0] }
 0x542   : > { %v3753_v51 = vadd.f32 %v3752_v62, %v9804_v27  ;;  %v3657_v9 = vpop.f32.mrf.mxu0  ;;  %v3706_v58 = vpop.f32.mrf.mxu1  ;;  %v9930_v33 = vor.u32 %v6923_v47, %v6600_v8 }
 0x543   : > { %v3658_v43 = vadd.f32 %v3657_v9, %v9776_v60 }
 0x544   : > { %v3802_v36 = vadd.f32 %v3801_v13, %v3753_v51  ;;  %v9938_v13 = vor.u32 %v6939_v44, %v6664_v10  ;;  %4330 = vmatpush.bf16.msrb.mxu0 %v9930_v33  ;;  %v6592_v10 = vld [vmem:[%s10627_s3 + $0x520] sm:$0xf]  ;;  %v6921_v44 = vld [vmem:[%s10627_s3 + $0x524] sm:$0xf0] }
 0x545   : > { %v3707_v32 = vadd.f32 %v3706_v58, %v3658_v43  ;;  %3900 = vmatmul.bf16.gmra.mxu0 %v9659_v22  ;;  %3949 = vmatmul.bf16.gmra.mxu1 %v9667_v18 }
 0x546   : > { %v3841_v34 = vmax.f32 %v3802_v36, 0.0  ;;  %3998 = vmatmul.bf16.gmra.mxu2 %v9659_v22  ;;  %4047 = vmatmul.bf16.gmra.mxu3 %v9667_v18  ;;  %v6666_v22 = vld [vmem:[%s10627_s3 + $0x5b8] sm:$0xf0] }
 0x547   : > { %v9918_v31 = vor.u32 %v6938_v41, %v6666_v22  ;;  %v3842_v48 = vmax.f32 %v3707_v32, 0.0  ;;  %4379 = vmatpush.bf16.msrb.mxu1 %v9938_v13  ;;  %v6594_v41 = vld [vmem:[%s10627_s3 + $0x528] sm:$0xf0] }
 0x548   : > { %v9916_v42 = vpack.c.bf16 %v3841_v34, %v3839_v26  ;;  %v9956_v22 = vor.u32 %v6920_v23, %v6594_v41 }
 0x549   : > { %v3755_v18 = vpop.f32.mrf.mxu2  ;;  %v3804_v50 = vpop.f32.mrf.mxu3  ;;  %4477 = vmatpush.bf16.msrb.mxu3 %v9918_v31 }
 0x54a   : > { %v3756_v56 = vadd.f32 %v3755_v18, %v9804_v27  ;;  %v3659_v45 = vpop.f32.mrf.mxu0  ;;  %v3708_v35 = vpop.f32.mrf.mxu1  ;;  %v6936_v18 = vld [vmem:[%s10627_s3 + $0x5a4] sm:$0xf]  ;;  %4429 = vmatpush.bf16.msrb.mxu2 %v9956_v22 }
 0x54b   : > { %v3660_v21 = vadd.f32 %v3659_v45, %v9776_v60 }
 0x54c   : > { %v3805_v29 = vadd.f32 %v3804_v50, %v3756_v56 }
 0x54d   : > { %v3709_v14 = vadd.f32 %v3708_v35, %v3660_v21 }
 0x54e   : > { %v3843_v34 = vmax.f32 %v3805_v29, 0.0 }
 0x54f   : > { %v3844_v0 = vmax.f32 %v3709_v14, 0.0 }
 0x551   : > { %v3757_v19 = vpop.f32.mrf.mxu2  ;;  %v3806_v62 = vpop.f32.mrf.mxu3  ;;  %v9940_v51 = vpack.c.bf16 %v3844_v0, %v3842_v48 }
 0x552   : > { %v3758_v9 = vadd.f32 %v3757_v19, %v9804_v27  ;;  %v3662_v58 = vpop.f32.mrf.mxu0  ;;  %v3711_v43 = vpop.f32.mrf.mxu1  ;;  %v9978_v19 = vor.u32 %v6921_v44, %v6592_v10 }
 0x553   : > { %v3663_v36 = vadd.f32 %v3662_v58, %v9776_v60 }
 0x554   : > { %v3807_v32 = vadd.f32 %v3806_v62, %v3758_v9  ;;  %v6656_v62 = vld [vmem:[%s10627_s3 + $0x5a0] sm:$0xf]  ;;  %v6937_v9 = vld [vmem:[%s10627_s3 + $0x5a4] sm:$0xf0]  ;;  %4331 = vmatpush.bf16.msrb.mxu0 %v9978_v19 }
 0x555   : > { %v3712_v26 = vadd.f32 %v3711_v43, %v3663_v36  ;;  %3905 = vmatmul.bf16.gmra.mxu0 %v9671_v57  ;;  %3954 = vmatmul.bf16.gmra.mxu1 %v9679_v12  ;;  %v9986_v36 = vor.u32 %v6937_v9, %v6656_v62 }
 0x556   : > { %v3845_v25 = vmax.f32 %v3807_v32, 0.0  ;;  %4003 = vmatmul.bf16.gmra.mxu2 %v9671_v57  ;;  %4052 = vmatmul.bf16.gmra.mxu3 %v9679_v12  ;;  %v6658_v57 = vld [vmem:[%s10627_s3 + $0x5a8] sm:$0xf0] }
 0x557   : > { %v9966_v45 = vor.u32 %v6936_v18, %v6658_v57  ;;  %v3846_v8 = vmax.f32 %v3712_v26, 0.0  ;;  %4380 = vmatpush.bf16.msrb.mxu1 %v9986_v36 }
 0x558   : > { %v9964_v50 = vpack.c.bf16 %v3845_v25, %v3843_v34 }
 0x559   : > { %v3760_v12 = vpop.f32.mrf.mxu2  ;;  %v3809_v56 = vpop.f32.mrf.mxu3  ;;  %4478 = vmatpush.bf16.msrb.mxu3 %v9966_v45 }
 0x55a   : > { %v3761_v35 = vadd.f32 %v3760_v12, %v9804_v27  ;;  %v3664_v21 = vpop.f32.mrf.mxu0  ;;  %v3713_v29 = vpop.f32.mrf.mxu1 }
 0x55b   : > { %v3665_v14 = vadd.f32 %v3664_v21, %v9776_v60 }
 0x55c   : > { %v3810_v48 = vadd.f32 %v3809_v56, %v3761_v35  ;;  %v6918_v56 = vld [vmem:[%s10627_s3 + $0x514] sm:$0xf]  ;;  %v6586_v35 = vld [vmem:[%s10627_s3 + $0x518] sm:$0xf0] }
 0x55d   : > { %v3714_v0 = vadd.f32 %v3713_v29, %v3665_v14  ;;  %v10004_v21 = vor.u32 %v6918_v56, %v6586_v35  ;;  %v6934_v29 = vld [vmem:[%s10627_s3 + $0x594] sm:$0xf] }
 0x55e   : > { %v3847_v57 = vmax.f32 %v3810_v48, 0.0 }
 0x55f   : > { %v3848_v47 = vmax.f32 %v3714_v0, 0.0  ;;  %4430 = vmatpush.bf16.msrb.mxu2 %v10004_v21 }
 0x561   : > { %v3762_v58 = vpop.f32.mrf.mxu2  ;;  %v3811_v43 = vpop.f32.mrf.mxu3  ;;  %v9988_v32 = vpack.c.bf16 %v3848_v47, %v3846_v8 }
 0x562   : > { %v3763_v26 = vadd.f32 %v3762_v58, %v9804_v27  ;;  %v3667_v34 = vpop.f32.mrf.mxu0  ;;  %v3716_v25 = vpop.f32.mrf.mxu1 }
 0x563   : > { %v3668_v23 = vadd.f32 %v3667_v34, %v9776_v60  ;;  %v6919_v34 = vld [vmem:[%s10627_s3 + $0x514] sm:$0xf0] }
 0x564   : > { %v3812_v41 = vadd.f32 %v3811_v43, %v3763_v26  ;;  %v6584_v26 = vld [vmem:[%s10627_s3 + $0x510] sm:$0xf] }
 0x565   : > { %v3717_v18 = vadd.f32 %v3716_v25, %v3668_v23  ;;  %3910 = vmatmul.bf16.gmra.mxu0 %v9683_v63  ;;  %3959 = vmatmul.bf16.gmra.mxu1 %v9691_v15  ;;  %v10026_v25 = vor.u32 %v6919_v34, %v6584_v26  ;;  %v6648_v23 = vld [vmem:[%s10627_s3 + $0x590] sm:$0xf] }
 0x566   : > { %v3849_v12 = vmax.f32 %v3812_v41, 0.0  ;;  %4008 = vmatmul.bf16.gmra.mxu2 %v9683_v63  ;;  %4057 = vmatmul.bf16.gmra.mxu3 %v9691_v15  ;;  %v6650_v63 = vld [vmem:[%s10627_s3 + $0x598] sm:$0xf0]  ;;  %v6935_v41 = vld [vmem:[%s10627_s3 + $0x594] sm:$0xf0] }
 0x567   : > { %v10014_v0 = vor.u32 %v6934_v29, %v6650_v63  ;;  %v3850_v58 = vmax.f32 %v3717_v18, 0.0  ;;  %4332 = vmatpush.bf16.msrb.mxu0 %v10026_v25 }
 0x568   : > { %v10012_v14 = vpack.c.bf16 %v3849_v12, %v3847_v57  ;;  %v10034_v12 = vor.u32 %v6935_v41, %v6648_v23 }
 0x569   : > { %v3765_v15 = vpop.f32.mrf.mxu2  ;;  %v3814_v48 = vpop.f32.mrf.mxu3  ;;  %4479 = vmatpush.bf16.msrb.mxu3 %v10014_v0 }
 0x56a   : > { %v3766_v8 = vadd.f32 %v3765_v15, %v9804_v27  ;;  %v3669_v47 = vpop.f32.mrf.mxu0  ;;  %v3718_v10 = vpop.f32.mrf.mxu1  ;;  %4381 = vmatpush.bf16.msrb.mxu1 %v10034_v12 }
 0x56b   : > { %v3670_v44 = vadd.f32 %v3669_v47, %v9776_v60 }
 0x56c   : > { %v3815_v62 = vadd.f32 %v3814_v48, %v3766_v8 }
 0x56d   : > { %v3719_v9 = vadd.f32 %v3718_v10, %v3670_v44  ;;  %v6916_v44 = vld [vmem:[%s10627_s3 + $0x504] sm:$0xf] }
 0x56e   : > { %v3851_v47 = vmax.f32 %v3815_v62, 0.0 }
 0x56f   : > { %v3852_v43 = vmax.f32 %v3719_v9, 0.0  ;;  %v6578_v9 = vld [vmem:[%s10627_s3 + $0x508] sm:$0xf0] }
 0x571   : > { %v3767_v18 = vpop.f32.mrf.mxu2  ;;  %v3816_v57 = vpop.f32.mrf.mxu3  ;;  %v10036_v56 = vpack.c.bf16 %v3852_v43, %v3850_v58  ;;  %v10052_v58 = vor.u32 %v6916_v44, %v6578_v9  ;;  %v6932_v43 = vld [vmem:[%s10627_s3 + $0x584] sm:$0xf] }
 0x572   : > { %v3768_v35 = vadd.f32 %v3767_v18, %v9804_v27  ;;  %v3672_v29 = vpop.f32.mrf.mxu0  ;;  %v3721_v63 = vpop.f32.mrf.mxu1 }
 0x573   : > { %v3673_v15 = vadd.f32 %v3672_v29, %v9776_v60  ;;  %4431 = vmatpush.bf16.msrb.mxu2 %v10052_v58 }
 0x574   : > { %v3817_v48 = vadd.f32 %v3816_v57, %v3768_v35 }
 0x575   : > { %v3722_v8 = vadd.f32 %v3721_v63, %v3673_v15  ;;  %3915 = vmatmul.bf16.gmra.mxu0 %v9695_v2  ;;  %3964 = vmatmul.bf16.gmra.mxu1 %v9717_v16 }
 0x576   : > { %v3853_v10 = vmax.f32 %v3817_v48, 0.0  ;;  %4013 = vmatmul.bf16.gmra.mxu2 %v9695_v2  ;;  %4062 = vmatmul.bf16.gmra.mxu3 %v9717_v16  ;;  %v6642_v2 = vld [vmem:[%s10627_s3 + $0x588] sm:$0xf0]  ;;  %v6576_v48 = vld [vmem:[%s10627_s3 + $0x500] sm:$0xf] }
 0x577   : > { %v10062_v34 = vor.u32 %v6932_v43, %v6642_v2  ;;  %4668 = vmatpush.bf16.msra.mxu2 %v9709_v59  ;;  %v3854_v63 = vmax.f32 %v3722_v8, 0.0  ;;  %v6640_v59 = vld [vmem:[%s10627_s3 + $0x580] sm:$0xf] }
 0x578   : > { %v10060_v62 = vpack.c.bf16 %v3853_v10, %v3851_v47  ;;  %v6917_v47 = vld [vmem:[%s10627_s3 + $0x504] sm:$0xf0] }
 0x579   : > { %v3770_v16 = vpop.f32.mrf.mxu2  ;;  %v3819_v26 = vpop.f32.mrf.mxu3  ;;  %4480 = vmatpush.bf16.msrb.mxu3 %v10062_v34  ;;  %v10077_v10 = vor.u32 %v6917_v47, %v6576_v48 }
 0x57a   : > { %v3771_v23 = vadd.f32 %v3770_v16, %v9804_v27  ;;  %v3674_v41 = vpop.f32.mrf.mxu0  ;;  %v3723_v18 = vpop.f32.mrf.mxu1 }
 0x57b   : > { %v3675_v57 = vadd.f32 %v3674_v41, %v9776_v60  ;;  %4669 = vmatpush.bf16.msra.mxu2 %v9762_v49  ;;  %4333 = vmatpush.bf16.msrb.mxu0 %v10077_v10 }
 0x57c   : > { %v3820_v35 = vadd.f32 %v3819_v26, %v3771_v23 }
 0x57d   : > { %4717 = vmatpush.bf16.msra.mxu3 %v9719_v39  ;;  %v3724_v29 = vadd.f32 %v3723_v18, %v3675_v57  ;;  %v6933_v39 = vld [vmem:[%s10627_s3 + $0x584] sm:$0xf0] }
 0x57e   : > { %v10086_v9 = vor.u32 %v6933_v39, %v6640_v59  ;;  %v3855_v41 = vmax.f32 %v3820_v35, 0.0 }
 0x57f   : > { %v3856_v15 = vmax.f32 %v3724_v29, 0.0  ;;  %4570 = vmatpush.bf16.msra.mxu0 %v9737_v53  ;;  %4670 = vmatpush.bf16.msra.mxu2 %v9812_v4 }
 0x580   : > { %4382 = vmatpush.bf16.msrb.mxu1 %v10086_v9 }
 0x581   : > { %4718 = vmatpush.bf16.msra.mxu3 %v9768_v37  ;;  %v3772_v8 = vpop.f32.mrf.mxu2  ;;  %v3821_v44 = vpop.f32.mrf.mxu3  ;;  %v10088_v43 = vpack.c.bf16 %v3856_v15, %v3854_v63 }
 0x582   : > { %v3773_v49 = vadd.f32 %v3772_v8, %v9804_v27  ;;  %v3677_v2 = vpop.f32.mrf.mxu0  ;;  %v3726_v16 = vpop.f32.mrf.mxu1 }
 0x583   : > { %v3678_v26 = vadd.f32 %v3677_v2, %v9776_v60  ;;  %4571 = vmatpush.bf16.msra.mxu0 %v9784_v20  ;;  %4671 = vmatpush.bf16.msra.mxu2 %v9862_v24 }
 0x584   : > { %v3822_v23 = vadd.f32 %v3821_v44, %v3773_v49  ;;  %4619 = vmatpush.bf16.msra.mxu1 %v9743_v11 }
 0x585   : > { %v3727_v37 = vadd.f32 %v3726_v16, %v3678_v26  ;;  %3920 = vmatmul.bf16.gmra.mxu0 %v9734_v54  ;;  %3969 = vmatmul.bf16.gmra.mxu1 %v9760_v1 }
 0x586   : > { %v3857_v18 = vmax.f32 %v3822_v23, 0.0  ;;  %4018 = vmatmul.bf16.gmra.mxu2 %v9734_v54  ;;  %4067 = vmatmul.bf16.gmra.mxu3 %v9760_v1 }
 0x587   : > { %4719 = vmatpush.bf16.msra.mxu3 %v9822_v52  ;;  %4572 = vmatpush.bf16.msra.mxu0 %v9834_v5 }
 0x588   : > { %4620 = vmatpush.bf16.msra.mxu1 %v9792_v6  ;;  %v10105_v53 = vpack.c.bf16 %v3857_v18, %v3855_v41  ;;  %4672 = vmatpush.bf16.msra.mxu2 %v9908_v17  ;;  %v3858_v6 = vmax.f32 %v3727_v37, 0.0 }
 0x589   : > { %v3775_v11 = vpop.f32.mrf.mxu2  ;;  %v3824_v4 = vpop.f32.mrf.mxu3 }
 0x58a   : > { %v3776_v57 = vadd.f32 %v3775_v11, %v9804_v27  ;;  %v3679_v35 = vpop.f32.mrf.mxu0  ;;  %v3728_v29 = vpop.f32.mrf.mxu1 }
 0x58b   : > { %v3680_v54 = vadd.f32 %v3679_v35, %v9776_v60  ;;  %4720 = vmatpush.bf16.msra.mxu3 %v9870_v55  ;;  %4573 = vmatpush.bf16.msra.mxu0 %v9882_v40 }
 0x58c   : > { %v3825_v1 = vadd.f32 %v3824_v4, %v3776_v57  ;;  %4621 = vmatpush.bf16.msra.mxu1 %v9844_v61  ;;  %4673 = vmatpush.bf16.msra.mxu2 %v9956_v22 }
 0x58d   : > { %v3729_v20 = vadd.f32 %v3728_v29, %v3680_v54 }
 0x58f   : > { %v3860_v52 = vmax.f32 %v3729_v20, 0.0  ;;  %4721 = vmatpush.bf16.msra.mxu3 %v9918_v31  ;;  %4574 = vmatpush.bf16.msra.mxu0 %v9930_v33  ;;  %v3859_v31 = vmax.f32 %v3825_v1, 0.0 }
 0x590   : > { %4622 = vmatpush.bf16.msra.mxu1 %v9890_v38  ;;  %4674 = vmatpush.bf16.msra.mxu2 %v10004_v21 }
 0x591   : > { %v3777_v24 = vpop.f32.mrf.mxu2  ;;  %v3826_v5 = vpop.f32.mrf.mxu3  ;;  %v10117_v63 = vpack.c.bf16 %v3860_v52, %v3858_v6 }
 0x592   : > { %v3778_v55 = vadd.f32 %v3777_v24, %v9804_v27  ;;  %v3682_v61 = vpop.f32.mrf.mxu0  ;;  %v3731_v15 = vpop.f32.mrf.mxu1 }
 0x593   : > { %v3683_v17 = vadd.f32 %v3682_v61, %v9776_v60  ;;  %4722 = vmatpush.bf16.msra.mxu3 %v9966_v45  ;;  %4575 = vmatpush.bf16.msra.mxu0 %v9978_v19 }
 0x594   : > { %v3827_v40 = vadd.f32 %v3826_v5, %v3778_v55  ;;  %4623 = vmatpush.bf16.msra.mxu1 %v9938_v13  ;;  %4675 = vmatpush.bf16.msra.mxu2 %v10052_v58 }
 0x595   : > { %v3732_v38 = vadd.f32 %v3731_v15, %v3683_v17  ;;  %3925 = vmatmul.bf16.gmra.mxu0 %v9794_v30  ;;  %3974 = vmatmul.bf16.gmra.mxu1 %v9820_v46 }
 0x596   : > { %v3861_v22 = vmax.f32 %v3827_v40, 0.0  ;;  %4023 = vmatmul.bf16.gmra.mxu2 %v9794_v30  ;;  %4072 = vmatmul.bf16.gmra.mxu3 %v9820_v46 }
 0x597   : > { %4723 = vmatpush.bf16.msra.mxu3 %v10014_v0  ;;  %4576 = vmatpush.bf16.msra.mxu0 %v10026_v25 }
 0x598   : > { %4624 = vmatpush.bf16.msra.mxu1 %v9986_v36  ;;  %v10132_v33 = vpack.c.bf16 %v3861_v22, %v3859_v31  ;;  %v3862_v36 = vmax.f32 %v3732_v38, 0.0 }
 0x599   : > { %v3780_v13 = vpop.f32.mrf.mxu2  ;;  %v3829_v45 = vpop.f32.mrf.mxu3 }
 0x59a   : > { %v3781_v21 = vadd.f32 %v3780_v13, %v9804_v27  ;;  %v3684_v48 = vpop.f32.mrf.mxu0  ;;  %v3733_v47 = vpop.f32.mrf.mxu1 }
 0x59b   : > { %v3685_v30 = vadd.f32 %v3684_v48, %v9776_v60  ;;  %4724 = vmatpush.bf16.msra.mxu3 %v10062_v34  ;;  %4577 = vmatpush.bf16.msra.mxu0 %v10077_v10 }
 0x59c   : > { %v3830_v46 = vadd.f32 %v3829_v45, %v3781_v21  ;;  %4625 = vmatpush.bf16.msra.mxu1 %v10034_v12 }
 0x59d   : > { %v3734_v19 = vadd.f32 %v3733_v47, %v3685_v30 }
 0x59e   : > { %v3863_v12 = vmax.f32 %v3830_v46, 0.0 }
 0x59f   : > { %v3864_v0 = vmax.f32 %v3734_v19, 0.0 }
 0x5a0   : > { %4626 = vmatpush.bf16.msra.mxu1 %v10086_v9 }
 0x5a1   : > { %v3782_v58 = vpop.f32.mrf.mxu2  ;;  %v3831_v59 = vpop.f32.mrf.mxu3  ;;  %v10142_v39 = vpack.c.bf16 %v3864_v0, %v3862_v36 }
 0x5a2   : > { %v3783_v8 = vadd.f32 %v3782_v58, %v9804_v27  ;;  %v3891_v44 = vpop.f32.mrf.mxu0  ;;  %v3940_v25 = vpop.f32.mrf.mxu1 }
 0x5a3   : > { %v3892_v34 = vadd.f32 %v3891_v44, %v9776_v60 }
 0x5a4   : > { %v3832_v49 = vadd.f32 %v3831_v59, %v3783_v8 }
 0x5a5   : > { %v3941_v2 = vadd.f32 %v3940_v25, %v3892_v34  ;;  %4334 = vmatmul.bf16.vlgmr.msrb.gmra.mxu0 %v9842_v7  ;;  %4383 = vmatmul.bf16.vlgmr.msrb.gmra.mxu1 %v9860_v3 }
 0x5a6   : > { %v3865_v10 = vmax.f32 %v3832_v49, 0.0  ;;  %4432 = vmatmul.bf16.vlgmr.msrb.gmra.mxu2 %v9842_v7  ;;  %4481 = vmatmul.bf16.vlgmr.msrb.gmra.mxu3 %v9860_v3 }
 0x5a7   : > { %v4078_v57 = vmax.f32 %v3941_v2, 0.0 }
 0x5a8   : > { %v10150_v9 = vpack.c.bf16 %v3865_v10, %v3863_v12 }
 0x5a9   : > { %v3989_v16 = vpop.f32.mrf.mxu2  ;;  %v4038_v26 = vpop.f32.mrf.mxu3 }
 0x5aa   : > { %v3990_v23 = vadd.f32 %v3989_v16, %v9804_v27  ;;  %v3893_v37 = vpop.f32.mrf.mxu0  ;;  %v3942_v41 = vpop.f32.mrf.mxu1 }
 0x5ab   : > { %v3894_v18 = vadd.f32 %v3893_v37, %v9776_v60 }
 0x5ac   : > { %v4039_v11 = vadd.f32 %v4038_v26, %v3990_v23 }
 0x5ad   : > { %v3943_v4 = vadd.f32 %v3942_v41, %v3894_v18 }
 0x5ae   : > { %v4079_v5 = vmax.f32 %v4039_v11, 0.0 }
 0x5af   : > { %v4080_v35 = vmax.f32 %v3943_v4, 0.0 }
 0x5b1   : > { %v10154_v29 = vpack.c.bf16 %v4080_v35, %v4078_v57  ;;  %v3991_v54 = vpop.f32.mrf.mxu2  ;;  %v4040_v7 = vpop.f32.mrf.mxu3 }
 0x5b2   : > { %v3992_v3 = vadd.f32 %v3991_v54, %v9804_v27  ;;  %v3896_v1 = vpop.f32.mrf.mxu0  ;;  %v3945_v20 = vpop.f32.mrf.mxu1 }
 0x5b3   : > { %v3897_v6 = vadd.f32 %v3896_v1, %v9776_v60 }
 0x5b4   : > { %v4041_v52 = vadd.f32 %v4040_v7, %v3992_v3 }
 0x5b5   : > { %v3946_v24 = vadd.f32 %v3945_v20, %v3897_v6  ;;  %4339 = vmatmul.bf16.gmra.mxu0 %v9892_v28  ;;  %4388 = vmatmul.bf16.gmra.mxu1 %v9916_v42 }
 0x5b6   : > { %v4081_v55 = vmax.f32 %v4041_v52, 0.0  ;;  %4437 = vmatmul.bf16.gmra.mxu2 %v9892_v28  ;;  %4486 = vmatmul.bf16.gmra.mxu3 %v9916_v42 }
 0x5b7   : > { %v4082_v21 = vmax.f32 %v3946_v24, 0.0 }
 0x5b8   : > { %v10162_v61 = vpack.c.bf16 %v4081_v55, %v4079_v5 }
 0x5b9   : > { %v3994_v15 = vpop.f32.mrf.mxu2  ;;  %v4043_v17 = vpop.f32.mrf.mxu3 }
 0x5ba   : > { %v3995_v40 = vadd.f32 %v3994_v15, %v9804_v27  ;;  %v3898_v38 = vpop.f32.mrf.mxu0  ;;  %v3947_v31 = vpop.f32.mrf.mxu1 }
 0x5bb   : > { %v3899_v22 = vadd.f32 %v3898_v38, %v9776_v60 }
 0x5bc   : > { %v4044_v13 = vadd.f32 %v4043_v17, %v3995_v40 }
 0x5bd   : > { %v3948_v45 = vadd.f32 %v3947_v31, %v3899_v22 }
 0x5be   : > { %v4083_v59 = vmax.f32 %v4044_v13, 0.0 }
 0x5bf   : > { %v4084_v48 = vmax.f32 %v3948_v45, 0.0 }
 0x5c1   : > { %v3996_v47 = vpop.f32.mrf.mxu2  ;;  %v4045_v30 = vpop.f32.mrf.mxu3  ;;  %v10166_v46 = vpack.c.bf16 %v4084_v48, %v4082_v21 }
 0x5c2   : > { %v3997_v28 = vadd.f32 %v3996_v47, %v9804_v27  ;;  %v3901_v42 = vpop.f32.mrf.mxu0  ;;  %v3950_v19 = vpop.f32.mrf.mxu1 }
 0x5c3   : > { %v3902_v36 = vadd.f32 %v3901_v42, %v9776_v60 }
 0x5c4   : > { %v4046_v0 = vadd.f32 %v4045_v30, %v3997_v28 }
 0x5c5   : > { %v3951_v58 = vadd.f32 %v3950_v19, %v3902_v36  ;;  %4344 = vmatmul.bf16.gmra.mxu0 %v9940_v51  ;;  %4393 = vmatmul.bf16.gmra.mxu1 %v9964_v50 }
 0x5c6   : > { %v4085_v8 = vmax.f32 %v4046_v0, 0.0  ;;  %4442 = vmatmul.bf16.gmra.mxu2 %v9940_v51  ;;  %4491 = vmatmul.bf16.gmra.mxu3 %v9964_v50 }
 0x5c7   : > { %v4086_v23 = vmax.f32 %v3951_v58, 0.0 }
 0x5c8   : > { %v10174_v44 = vpack.c.bf16 %v4085_v8, %v4083_v59 }
 0x5c9   : > { %v3999_v25 = vpop.f32.mrf.mxu2  ;;  %v4048_v34 = vpop.f32.mrf.mxu3 }
 0x5ca   : > { %v4000_v49 = vadd.f32 %v3999_v25, %v9804_v27  ;;  %v3903_v2 = vpop.f32.mrf.mxu0  ;;  %v3952_v12 = vpop.f32.mrf.mxu1 }
 0x5cb   : > { %v3904_v10 = vadd.f32 %v3903_v2, %v9776_v60 }
 0x5cc   : > { %v4049_v16 = vadd.f32 %v4048_v34, %v4000_v49 }
 0x5cd   : > { %v3953_v26 = vadd.f32 %v3952_v12, %v3904_v10 }
 0x5ce   : > { %v4087_v7 = vmax.f32 %v4049_v16, 0.0 }
 0x5cf   : > { %v4088_v37 = vmax.f32 %v3953_v26, 0.0 }
 0x5d1   : > { %v4001_v41 = vpop.f32.mrf.mxu2  ;;  %v4050_v18 = vpop.f32.mrf.mxu3  ;;  %v10178_v11 = vpack.c.bf16 %v4088_v37, %v4086_v23 }
 0x5d2   : > { %v4002_v51 = vadd.f32 %v4001_v41, %v9804_v27  ;;  %v3906_v50 = vpop.f32.mrf.mxu0  ;;  %v3955_v4 = vpop.f32.mrf.mxu1 }
 0x5d3   : > { %v3907_v57 = vadd.f32 %v3906_v50, %v9776_v60 }
 0x5d4   : > { %v4051_v35 = vadd.f32 %v4050_v18, %v4002_v51 }
 0x5d5   : > { %v3956_v54 = vadd.f32 %v3955_v4, %v3907_v57  ;;  %4349 = vmatmul.bf16.gmra.mxu0 %v9988_v32  ;;  %4398 = vmatmul.bf16.gmra.mxu1 %v10012_v14 }
 0x5d6   : > { %v4089_v3 = vmax.f32 %v4051_v35, 0.0  ;;  %4447 = vmatmul.bf16.gmra.mxu2 %v9988_v32  ;;  %4496 = vmatmul.bf16.gmra.mxu3 %v10012_v14 }
 0x5d7   : > { %v4090_v40 = vmax.f32 %v3956_v54, 0.0 }
 0x5d8   : > { %v10186_v1 = vpack.c.bf16 %v4089_v3, %v4087_v7 }
 0x5d9   : > { %v4004_v20 = vpop.f32.mrf.mxu2  ;;  %v4053_v6 = vpop.f32.mrf.mxu3 }
 0x5da   : > { %v4005_v52 = vadd.f32 %v4004_v20, %v9804_v27  ;;  %v3908_v24 = vpop.f32.mrf.mxu0  ;;  %v3957_v5 = vpop.f32.mrf.mxu1 }
 0x5db   : > { %v3909_v55 = vadd.f32 %v3908_v24, %v9776_v60 }
 0x5dc   : > { %v4054_v15 = vadd.f32 %v4053_v6, %v4005_v52 }
 0x5dd   : > { %v3958_v17 = vadd.f32 %v3957_v5, %v3909_v55 }
 0x5de   : > { %v4091_v30 = vmax.f32 %v4054_v15, 0.0 }
 0x5df   : > { %v4092_v38 = vmax.f32 %v3958_v17, 0.0 }
 0x5e1   : > { %v4006_v31 = vpop.f32.mrf.mxu2  ;;  %v4055_v22 = vpop.f32.mrf.mxu3  ;;  %v10190_v13 = vpack.c.bf16 %v4092_v38, %v4090_v40 }
 0x5e2   : > { %v4007_v32 = vadd.f32 %v4006_v31, %v9804_v27  ;;  %v3911_v14 = vpop.f32.mrf.mxu0  ;;  %v3960_v45 = vpop.f32.mrf.mxu1 }
 0x5e3   : > { %v3912_v21 = vadd.f32 %v3911_v14, %v9776_v60 }
 0x5e4   : > { %v4056_v48 = vadd.f32 %v4055_v22, %v4007_v32 }
 0x5e5   : > { %v3961_v47 = vadd.f32 %v3960_v45, %v3912_v21  ;;  %4354 = vmatmul.bf16.gmra.mxu0 %v10036_v56  ;;  %4403 = vmatmul.bf16.gmra.mxu1 %v10060_v62 }
 0x5e6   : > { %v4093_v28 = vmax.f32 %v4056_v48, 0.0  ;;  %4452 = vmatmul.bf16.gmra.mxu2 %v10036_v56  ;;  %4501 = vmatmul.bf16.gmra.mxu3 %v10060_v62 }
 0x5e7   : > { %v4094_v49 = vmax.f32 %v3961_v47, 0.0 }
 0x5e8   : > { %v10198_v42 = vpack.c.bf16 %v4093_v28, %v4091_v30 }
 0x5e9   : > { %v4009_v19 = vpop.f32.mrf.mxu2  ;;  %v4058_v36 = vpop.f32.mrf.mxu3 }
 0x5ea   : > { %v4010_v0 = vadd.f32 %v4009_v19, %v9804_v27  ;;  %v3913_v58 = vpop.f32.mrf.mxu0  ;;  %v3962_v59 = vpop.f32.mrf.mxu1 }
 0x5eb   : > { %v3914_v8 = vadd.f32 %v3913_v58, %v9776_v60 }
 0x5ec   : > { %v4059_v25 = vadd.f32 %v4058_v36, %v4010_v0 }
 0x5ed   : > { %v3963_v34 = vadd.f32 %v3962_v59, %v3914_v8 }
 0x5ee   : > { %v4095_v18 = vmax.f32 %v4059_v25, 0.0 }
 0x5ef   : > { %v4096_v2 = vmax.f32 %v3963_v34, 0.0 }
 0x5f1   : > { %v4011_v12 = vpop.f32.mrf.mxu2  ;;  %v4060_v10 = vpop.f32.mrf.mxu3  ;;  %v10202_v16 = vpack.c.bf16 %v4096_v2, %v4094_v49 }
 0x5f2   : > { %v4012_v56 = vadd.f32 %v4011_v12, %v9804_v27  ;;  %v3916_v62 = vpop.f32.mrf.mxu0  ;;  %v3965_v26 = vpop.f32.mrf.mxu1 }
 0x5f3   : > { %v3917_v23 = vadd.f32 %v3916_v62, %v9776_v60 }
 0x5f4   : > { %v4061_v37 = vadd.f32 %v4060_v10, %v4012_v56 }
 0x5f5   : > { %v3966_v41 = vadd.f32 %v3965_v26, %v3917_v23  ;;  %4359 = vmatmul.bf16.gmra.mxu0 %v10088_v43  ;;  %4408 = vmatmul.bf16.gmra.mxu1 %v10105_v53 }
 0x5f6   : > { %v4097_v51 = vmax.f32 %v4061_v37, 0.0  ;;  %4457 = vmatmul.bf16.gmra.mxu2 %v10088_v43  ;;  %4506 = vmatmul.bf16.gmra.mxu3 %v10105_v53 }
 0x5f7   : > { %v4098_v52 = vmax.f32 %v3966_v41, 0.0 }
 0x5f8   : > { %v10210_v50 = vpack.c.bf16 %v4097_v51, %v4095_v18 }
 0x5f9   : > { %v4014_v4 = vpop.f32.mrf.mxu2  ;;  %v4063_v57 = vpop.f32.mrf.mxu3 }
 0x5fa   : > { %v4015_v35 = vadd.f32 %v4014_v4, %v9804_v27  ;;  %v3918_v54 = vpop.f32.mrf.mxu0  ;;  %v3967_v7 = vpop.f32.mrf.mxu1 }
 0x5fb   : > { %v3919_v3 = vadd.f32 %v3918_v54, %v9776_v60 }
 0x5fc   : > { %v4064_v20 = vadd.f32 %v4063_v57, %v4015_v35  ;;  %v6573_v35 = vld [vmem:[%s10628_s4 + $0xa] sm:$0x3] }
 0x5fd   : > { %v3968_v6 = vadd.f32 %v3967_v7, %v3919_v3  ;;  %v10241_v7 = vperm.slane %v6573_v35, 0 }
 0x5fe   : > { %v4099_v22 = vmax.f32 %v4064_v20, 0.0 }
 0x5ff   : > { %v4100_v24 = vmax.f32 %v3968_v6, 0.0 }
 0x601   : > { %v4016_v5 = vpop.f32.mrf.mxu2  ;;  %v4065_v55 = vpop.f32.mrf.mxu3  ;;  %v10214_v15 = vpack.c.bf16 %v4100_v24, %v4098_v52 }
 0x602   : > { %v4017_v43 = vadd.f32 %v4016_v5, %v9804_v27  ;;  %v3921_v53 = vpop.f32.mrf.mxu0  ;;  %v3970_v17 = vpop.f32.mrf.mxu1 }
 0x603   : > { %v3922_v40 = vadd.f32 %v3921_v53, %v9776_v60  ;;  %v10251_v53 = vperm.slane %v6573_v35, 1 }
 0x604   : > { %v4066_v38 = vadd.f32 %v4065_v55, %v4017_v43 }
 0x605   : > { %v3971_v31 = vadd.f32 %v3970_v17, %v3922_v40  ;;  %4364 = vmatmul.bf16.gmra.mxu0 %v10117_v63  ;;  %4413 = vmatmul.bf16.gmra.mxu1 %v10132_v33 }
 0x606   : > { %v4101_v32 = vmax.f32 %v4066_v38, 0.0  ;;  %4462 = vmatmul.bf16.gmra.mxu2 %v10117_v63  ;;  %4511 = vmatmul.bf16.gmra.mxu3 %v10132_v33 }
 0x607   : > { %v4102_v0 = vmax.f32 %v3971_v31, 0.0 }
 0x608   : > { %v10222_v14 = vpack.c.bf16 %v4101_v32, %v4099_v22 }
 0x609   : > { %v4019_v45 = vpop.f32.mrf.mxu2  ;;  %v4068_v21 = vpop.f32.mrf.mxu3 }
 0x60a   : > { %v4020_v48 = vadd.f32 %v4019_v45, %v9804_v27  ;;  %v3923_v47 = vpop.f32.mrf.mxu0  ;;  %v3972_v30 = vpop.f32.mrf.mxu1 }
 0x60b   : > { %v3924_v28 = vadd.f32 %v3923_v47, %v9776_v60 }
 0x60c   : > { %v4069_v19 = vadd.f32 %v4068_v21, %v4020_v48 }
 0x60d   : > { %v3973_v36 = vadd.f32 %v3972_v30, %v3924_v28 }
 0x60e   : > { %v4103_v10 = vmax.f32 %v4069_v19, 0.0 }
 0x60f   : > { %v4104_v58 = vmax.f32 %v3973_v36, 0.0 }
 0x611   : > { %v4021_v59 = vpop.f32.mrf.mxu2  ;;  %v4070_v8 = vpop.f32.mrf.mxu3  ;;  %v10226_v25 = vpack.c.bf16 %v4104_v58, %v4102_v0 }
 0x612   : > { %v4022_v63 = vadd.f32 %v4021_v59, %v9804_v27  ;;  %v3926_v33 = vpop.f32.mrf.mxu0  ;;  %v3975_v34 = vpop.f32.mrf.mxu1 }
 0x613   : > { %v3927_v49 = vadd.f32 %v3926_v33, %v9776_v60 }
 0x614   : > { %v4071_v2 = vadd.f32 %v4070_v8, %v4022_v63 }
 0x615   : > { %v3976_v12 = vadd.f32 %v3975_v34, %v3927_v49  ;;  %4369 = vmatmul.bf16.gmra.mxu0 %v10142_v39  ;;  %4418 = vmatmul.bf16.gmra.mxu1 %v10150_v9 }
 0x616   : > { %v4105_v56 = vmax.f32 %v4071_v2, 0.0  ;;  %4467 = vmatmul.bf16.gmra.mxu2 %v10142_v39  ;;  %4516 = vmatmul.bf16.gmra.mxu3 %v10150_v9 }
 0x617   : > { %v4106_v54 = vmax.f32 %v3976_v12, 0.0 }
 0x618   : > { %v10234_v62 = vpack.c.bf16 %v4105_v56, %v4103_v10 }
 0x619   : > { %v4024_v26 = vpop.f32.mrf.mxu2  ;;  %v4073_v23 = vpop.f32.mrf.mxu3 }
 0x61a   : > { %v4025_v37 = vadd.f32 %v4024_v26, %v9804_v27  ;;  %v3928_v41 = vpop.f32.mrf.mxu0  ;;  %v3977_v18 = vpop.f32.mrf.mxu1 }
 0x61b   : > { %v3929_v51 = vadd.f32 %v3928_v41, %v9776_v60 }
 0x61c   : > { %v4074_v4 = vadd.f32 %v4073_v23, %v4025_v37 }
 0x61d   : > { %v3978_v57 = vadd.f32 %v3977_v18, %v3929_v51 }
 0x61e   : > { %v4107_v55 = vmax.f32 %v4074_v4, 0.0 }
 0x61f   : > { %v4108_v39 = vmax.f32 %v3978_v57, 0.0 }
 0x621   : > { %v4026_v9 = vpop.f32.mrf.mxu2  ;;  %v4075_v3 = vpop.f32.mrf.mxu3  ;;  %v10243_v20 = vpack.c.bf16 %v4108_v39, %v4106_v54 }
 0x622   : > { %v4027_v6 = vadd.f32 %v4026_v9, %v9804_v27  ;;  %v4335_v52 = vpop.f32.mrf.mxu0  ;;  %v4384_v24 = vpop.f32.mrf.mxu1  ;;  %v4798_v27 = vld [vmem:[%s10629_s5] sm:$0x3] }
 0x623   : > { %v4336_v60 = vadd.f32 %v4335_v52, %v10241_v7  ;;  %v10259_v21 = vperm.slane %v4798_v27, 0  ;;  %v10262_v47 = vperm.slane %v4798_v27, 1 }
 0x624   : > { %v4076_v5 = vadd.f32 %v4075_v3, %v4027_v6 }
 0x625   : > { %4578 = vmatmul.bf16.vlgmr.msra.gmra.mxu0 %v10154_v29  ;;  %4627 = vmatmul.bf16.vlgmr.msra.gmra.mxu1 %v10162_v61  ;;  %v4385_v17 = vadd.f32 %v4384_v24, %v4336_v60 }
 0x626   : > { %v4109_v43 = vmax.f32 %v4076_v5, 0.0  ;;  %4676 = vmatmul.bf16.vlgmr.msra.gmra.mxu2 %v10154_v29  ;;  %4725 = vmatmul.bf16.vlgmr.msra.gmra.mxu3 %v10162_v61 }
 0x627   : > { %v4522_v29 = vmax.f32 %v4385_v17, 0.0 }
 0x628   : > { %v10256_v40 = vpack.c.bf16 %v4109_v43, %v4107_v55 }
 0x629   : > { %v4433_v38 = vpop.f32.mrf.mxu2  ;;  %v4482_v31 = vpop.f32.mrf.mxu3  ;;  %v4805_v19 = vmul.f32 %v10259_v21, %v4522_v29 }
 0x62a   : > { %v4434_v22 = vadd.f32 %v4433_v38, %v10251_v53  ;;  %v4337_v32 = vpop.f32.mrf.mxu0  ;;  %v4386_v45 = vpop.f32.mrf.mxu1 }
 0x62b   : > { %v4338_v61 = vadd.f32 %v4337_v32, %v10241_v7 }
 0x62c   : > { %v4483_v48 = vadd.f32 %v4482_v31, %v4434_v22 }
 0x62d   : > { %v4387_v28 = vadd.f32 %v4386_v45, %v4338_v61 }
 0x62e   : > { %v4523_v30 = vmax.f32 %v4483_v48, 0.0 }
 0x62f   : > { %v4524_v34 = vmax.f32 %v4387_v28, 0.0 }
 0x630   : > { %v4806_v36 = vmul.f32 %v10262_v47, %v4523_v30 }
 0x631   : > { %v4435_v0 = vpop.f32.mrf.mxu2  ;;  %v4484_v58 = vpop.f32.mrf.mxu3  ;;  %v4807_v56 = vmul.f32 %v10259_v21, %v4524_v34 }
 0x632   : > { %v4436_v59 = vadd.f32 %v4435_v0, %v10251_v53  ;;  %v4340_v8 = vpop.f32.mrf.mxu0  ;;  %v4389_v63 = vpop.f32.mrf.mxu1  ;;  %v4837_v33 = vadd.f32 %v4806_v36, %v4805_v19 }
 0x633   : > { %v4341_v2 = vadd.f32 %v4340_v8, %v10241_v7 }
 0x634   : > { %v4485_v49 = vadd.f32 %v4484_v58, %v4436_v59  ;;  %4838 = vadd.xlane.f32.xlu0 %v4837_v33 }
 0x635   : > { %4583 = vmatmul.bf16.gmra.mxu0 %v10166_v46  ;;  %4632 = vmatmul.bf16.gmra.mxu1 %v10174_v44  ;;  %v4390_v10 = vadd.f32 %v4389_v63, %v4341_v2 }
 0x636   : > { %v4525_v12 = vmax.f32 %v4485_v49, 0.0  ;;  %4681 = vmatmul.bf16.gmra.mxu2 %v10166_v46  ;;  %4730 = vmatmul.bf16.gmra.mxu3 %v10174_v44 }
 0x637   : > { %v4526_v57 = vmax.f32 %v4390_v10, 0.0 }
 0x638   : > { %v4808_v26 = vmul.f32 %v10262_v47, %v4525_v12 }
 0x639   : > { %v4438_v23 = vpop.f32.mrf.mxu2  ;;  %v4487_v37 = vpop.f32.mrf.mxu3  ;;  %v4809_v44 = vmul.f32 %v10259_v21, %v4526_v57 }
 0x63a   : > { %v4439_v41 = vadd.f32 %v4438_v23, %v10251_v53  ;;  %v4342_v18 = vpop.f32.mrf.mxu0  ;;  %v4391_v51 = vpop.f32.mrf.mxu1  ;;  %v4840_v4 = vadd.f32 %v4808_v26, %v4807_v56 }
 0x63b   : > { %v4343_v54 = vadd.f32 %v4342_v18, %v10241_v7 }
 0x63c   : > { %v4488_v35 = vadd.f32 %v4487_v37, %v4439_v41  ;;  %4841 = vadd.xlane.f32.xlu0 %v4840_v4 }
 0x63d   : > { %v4392_v39 = vadd.f32 %v4391_v51, %v4343_v54 }
 0x63e   : > { %v4527_v46 = vmax.f32 %v4488_v35, 0.0 }
 0x63f   : > { %v4528_v55 = vmax.f32 %v4392_v39, 0.0 }
 0x640   : > { %v4810_v9 = vmul.f32 %v10262_v47, %v4527_v46 }
 0x641   : > { %v4440_v3 = vpop.f32.mrf.mxu2  ;;  %v4489_v6 = vpop.f32.mrf.mxu3  ;;  %v4811_v31 = vmul.f32 %v10259_v21, %v4528_v55 }
 0x642   : > { %v4441_v52 = vadd.f32 %v4440_v3, %v10251_v53  ;;  %v4345_v24 = vpop.f32.mrf.mxu0  ;;  %v4394_v5 = vpop.f32.mrf.mxu1  ;;  %v4843_v60 = vadd.f32 %v4810_v9, %v4809_v44 }
 0x643   : > { %v4346_v17 = vadd.f32 %v4345_v24, %v10241_v7 }
 0x644   : > { %v4490_v43 = vadd.f32 %v4489_v6, %v4441_v52  ;;  %4844 = vadd.xlane.f32.xlu1 %v4843_v60 }
 0x645   : > { %4588 = vmatmul.bf16.gmra.mxu0 %v10178_v11  ;;  %4637 = vmatmul.bf16.gmra.mxu1 %v10186_v1  ;;  %v4395_v38 = vadd.f32 %v4394_v5, %v4346_v17 }
 0x646   : > { %v4529_v27 = vmax.f32 %v4490_v43, 0.0  ;;  %4686 = vmatmul.bf16.gmra.mxu2 %v10178_v11  ;;  %4735 = vmatmul.bf16.gmra.mxu3 %v10186_v1 }
 0x647   : > { %v4530_v28 = vmax.f32 %v4395_v38, 0.0 }
 0x648   : > { %v4812_v22 = vmul.f32 %v10262_v47, %v4529_v27 }
 0x649   : > { %v4443_v32 = vpop.f32.mrf.mxu2  ;;  %v4492_v45 = vpop.f32.mrf.mxu3  ;;  %v4813_v1 = vmul.f32 %v10259_v21, %v4530_v28 }
 0x64a   : > { %v4444_v29 = vadd.f32 %v4443_v32, %v10251_v53  ;;  %v4347_v48 = vpop.f32.mrf.mxu0  ;;  %v4396_v61 = vpop.f32.mrf.mxu1  ;;  %v4846_v30 = vadd.f32 %v4812_v22, %v4811_v31 }
 0x64b   : > { %v4348_v36 = vadd.f32 %v4347_v48, %v10241_v7 }
 0x64c   : > { %v4493_v19 = vadd.f32 %v4492_v45, %v4444_v29  ;;  %4847 = vadd.xlane.f32.xlu1 %v4846_v30 }
 0x64d   : > { %v4397_v0 = vadd.f32 %v4396_v61, %v4348_v36 }
 0x64e   : > { %v4531_v11 = vmax.f32 %v4493_v19, 0.0 }
 0x64f   : > { %v4532_v2 = vmax.f32 %v4397_v0, 0.0 }
 0x650   : > { %v4814_v58 = vmul.f32 %v10262_v47, %v4531_v11 }
 0x651   : > { %v4445_v59 = vpop.f32.mrf.mxu2  ;;  %v4494_v8 = vpop.f32.mrf.mxu3  ;;  %v4815_v23 = vmul.f32 %v10259_v21, %v4532_v2 }
 0x652   : > { %v4446_v63 = vadd.f32 %v4445_v59, %v10251_v53  ;;  %v4350_v33 = vpop.f32.mrf.mxu0  ;;  %v4399_v34 = vpop.f32.mrf.mxu1  ;;  %v4849_v49 = vadd.f32 %v4814_v58, %v4813_v1 }
 0x653   : > { %v4351_v10 = vadd.f32 %v4350_v33, %v10241_v7 }
 0x654   : > { %v4495_v12 = vadd.f32 %v4494_v8, %v4446_v63  ;;  %4850 = vadd.xlane.f32.xlu2 %v4849_v49 }
 0x655   : > { %4593 = vmatmul.bf16.gmra.mxu0 %v10190_v13  ;;  %4642 = vmatmul.bf16.gmra.mxu1 %v10198_v42  ;;  %v4400_v26 = vadd.f32 %v4399_v34, %v4351_v10 }
 0x656   : > { %v4533_v56 = vmax.f32 %v4495_v12, 0.0  ;;  %4691 = vmatmul.bf16.gmra.mxu2 %v10190_v13  ;;  %4740 = vmatmul.bf16.gmra.mxu3 %v10198_v42 }
 0x657   : > { %v4534_v54 = vmax.f32 %v4400_v26, 0.0 }
 0x658   : > { %v4816_v37 = vmul.f32 %v10262_v47, %v4533_v56 }
 0x659   : > { %v4448_v41 = vpop.f32.mrf.mxu2  ;;  %v4497_v18 = vpop.f32.mrf.mxu3  ;;  %v4817_v42 = vmul.f32 %v10259_v21, %v4534_v54 }
 0x65a   : > { %v4449_v51 = vadd.f32 %v4448_v41, %v10251_v53  ;;  %v4352_v4 = vpop.f32.mrf.mxu0  ;;  %v4401_v57 = vpop.f32.mrf.mxu1  ;;  %v4852_v35 = vadd.f32 %v4816_v37, %v4815_v23 }
 0x65b   : > { %v4353_v39 = vadd.f32 %v4352_v4, %v10241_v7 }
 0x65c   : > { %v4498_v46 = vadd.f32 %v4497_v18, %v4449_v51  ;;  %4853 = vadd.xlane.f32.xlu2 %v4852_v35 }
 0x65d   : > { %v4402_v9 = vadd.f32 %v4401_v57, %v4353_v39 }
 0x65e   : > { %v4535_v13 = vmax.f32 %v4498_v46, 0.0 }
 0x65f   : > { %v4536_v55 = vmax.f32 %v4402_v9, 0.0 }
 0x660   : > { %v4818_v44 = vmul.f32 %v10262_v47, %v4535_v13 }
 0x661   : > { %v4450_v3 = vpop.f32.mrf.mxu2  ;;  %v4499_v6 = vpop.f32.mrf.mxu3  ;;  %v4819_v31 = vmul.f32 %v10259_v21, %v4536_v55 }
 0x662   : > { %v4451_v52 = vadd.f32 %v4450_v3, %v10251_v53  ;;  %v4355_v24 = vpop.f32.mrf.mxu0  ;;  %v4404_v5 = vpop.f32.mrf.mxu1  ;;  %v4855_v60 = vadd.f32 %v4818_v44, %v4817_v42 }
 0x663   : > { %v4356_v17 = vadd.f32 %v4355_v24, %v10241_v7 }
 0x664   : > { %v4500_v43 = vadd.f32 %v4499_v6, %v4451_v52  ;;  %4856 = vadd.xlane.f32.xlu0 %v4855_v60 }
 0x665   : > { %4598 = vmatmul.bf16.gmra.mxu0 %v10202_v16  ;;  %4647 = vmatmul.bf16.gmra.mxu1 %v10210_v50  ;;  %v4405_v38 = vadd.f32 %v4404_v5, %v4356_v17 }
 0x666   : > { %v4537_v27 = vmax.f32 %v4500_v43, 0.0  ;;  %4696 = vmatmul.bf16.gmra.mxu2 %v10202_v16  ;;  %4745 = vmatmul.bf16.gmra.mxu3 %v10210_v50 }
 0x667   : > { %v4538_v28 = vmax.f32 %v4405_v38, 0.0 }
 0x668   : > { %v4820_v22 = vmul.f32 %v10262_v47, %v4537_v27 }
 0x669   : > { %v4453_v32 = vpop.f32.mrf.mxu2  ;;  %v4502_v45 = vpop.f32.mrf.mxu3  ;;  %v4821_v50 = vmul.f32 %v10259_v21, %v4538_v28 }
 0x66a   : > { %v4454_v29 = vadd.f32 %v4453_v32, %v10251_v53  ;;  %v4357_v48 = vpop.f32.mrf.mxu0  ;;  %v4406_v61 = vpop.f32.mrf.mxu1  ;;  %v4858_v30 = vadd.f32 %v4820_v22, %v4819_v31 }
 0x66b   : > { %v4358_v36 = vadd.f32 %v4357_v48, %v10241_v7 }
 0x66c   : > { %v4503_v19 = vadd.f32 %v4502_v45, %v4454_v29  ;;  %4859 = vadd.xlane.f32.xlu1 %v4858_v30 }
 0x66d   : > { %v4407_v0 = vadd.f32 %v4406_v61, %v4358_v36 }
 0x66e   : > { %v4539_v16 = vmax.f32 %v4503_v19, 0.0 }
 0x66f   : > { %v4540_v34 = vmax.f32 %v4407_v0, 0.0 }
 0x670   : > { %v4822_v11 = vmul.f32 %v10262_v47, %v4539_v16 }
 0x671   : > { %v4455_v1 = vpop.f32.mrf.mxu2  ;;  %v4504_v58 = vpop.f32.mrf.mxu3  ;;  %v4823_v10 = vmul.f32 %v10259_v21, %v4540_v34 }
 0x672   : > { %v4456_v59 = vadd.f32 %v4455_v1, %v10251_v53  ;;  %v4360_v8 = vpop.f32.mrf.mxu0  ;;  %v4409_v63 = vpop.f32.mrf.mxu1  ;;  %v4861_v33 = vadd.f32 %v4822_v11, %v4821_v50 }
 0x673   : > { %v4361_v2 = vadd.f32 %v4360_v8, %v10241_v7 }
 0x674   : > { %v4505_v49 = vadd.f32 %v4504_v58, %v4456_v59  ;;  %4862 = vadd.xlane.f32.xlu2 %v4861_v33 }
 0x675   : > { %4603 = vmatmul.bf16.gmra.mxu0 %v10214_v15  ;;  %4652 = vmatmul.bf16.gmra.mxu1 %v10222_v14  ;;  %v4410_v26 = vadd.f32 %v4409_v63, %v4361_v2 }
 0x676   : > { %v4541_v12 = vmax.f32 %v4505_v49, 0.0  ;;  %4701 = vmatmul.bf16.gmra.mxu2 %v10214_v15  ;;  %4750 = vmatmul.bf16.gmra.mxu3 %v10222_v14 }
 0x677   : > { %v4542_v57 = vmax.f32 %v4410_v26, 0.0 }
 0x678   : > { %v4824_v56 = vmul.f32 %v10262_v47, %v4541_v12 }
 0x679   : > { %v4458_v23 = vpop.f32.mrf.mxu2  ;;  %v4507_v37 = vpop.f32.mrf.mxu3  ;;  %v4825_v14 = vmul.f32 %v10259_v21, %v4542_v57 }
 0x67a   : > { %v4459_v41 = vadd.f32 %v4458_v23, %v10251_v53  ;;  %v4362_v18 = vpop.f32.mrf.mxu0  ;;  %v4411_v51 = vpop.f32.mrf.mxu1  ;;  %v4864_v4 = vadd.f32 %v4824_v56, %v4823_v10 }
 0x67b   : > { %v4363_v54 = vadd.f32 %v4362_v18, %v10241_v7 }
 0x67c   : > { %v4508_v35 = vadd.f32 %v4507_v37, %v4459_v41  ;;  %4865 = vadd.xlane.f32.xlu0 %v4864_v4 }
 0x67d   : > { %v4412_v39 = vadd.f32 %v4411_v51, %v4363_v54 }
 0x67e   : > { %v4543_v15 = vmax.f32 %v4508_v35, 0.0 }
 0x67f   : > { %v4544_v52 = vmax.f32 %v4412_v39, 0.0 }
 0x680   : > { %v4826_v46 = vmul.f32 %v10262_v47, %v4543_v15 }
 0x681   : > { %v4460_v13 = vpop.f32.mrf.mxu2  ;;  %v4509_v42 = vpop.f32.mrf.mxu3  ;;  %v4827_v55 = vmul.f32 %v10259_v21, %v4544_v52 }
 0x682   : > { %v4461_v44 = vadd.f32 %v4460_v13, %v10251_v53  ;;  %v4365_v9 = vpop.f32.mrf.mxu0  ;;  %v4414_v3 = vpop.f32.mrf.mxu1  ;;  %v4867_v6 = vadd.f32 %v4826_v46, %v4825_v14 }
 0x683   : > { %v4366_v5 = vadd.f32 %v4365_v9, %v10241_v7 }
 0x684   : > { %v4510_v24 = vadd.f32 %v4509_v42, %v4461_v44  ;;  %4868 = vadd.xlane.f32.xlu1 %v4867_v6  ;;  %v10352_v42 = vstv %s4799_s12 }
 0x685   : > { %4608 = vmatmul.bf16.gmra.mxu0 %v10226_v25  ;;  %4657 = vmatmul.bf16.gmra.mxu1 %v10234_v62  ;;  %v4415_v17 = vadd.f32 %v4414_v3, %v4366_v5 }
 0x686   : > { %v4545_v60 = vmax.f32 %v4510_v24, 0.0  ;;  %4706 = vmatmul.bf16.gmra.mxu2 %v10226_v25  ;;  %4755 = vmatmul.bf16.gmra.mxu3 %v10234_v62 }
 0x687   : > { %v4546_v29 = vmax.f32 %v4415_v17, 0.0 }
 0x688   : > { %v4828_v43 = vmul.f32 %v10262_v47, %v4545_v60 }
 0x689   : > { %v4463_v27 = vpop.f32.mrf.mxu2  ;;  %v4512_v38 = vpop.f32.mrf.mxu3  ;;  %v4829_v62 = vmul.f32 %v10259_v21, %v4546_v29 }
 0x68a   : > { %v4464_v31 = vadd.f32 %v4463_v27, %v10251_v53  ;;  %v4367_v22 = vpop.f32.mrf.mxu0  ;;  %v4416_v32 = vpop.f32.mrf.mxu1  ;;  %v4870_v45 = vadd.f32 %v4828_v43, %v4827_v55 }
 0x68b   : > { %v4368_v61 = vadd.f32 %v4367_v22, %v10241_v7 }
 0x68c   : > { %v4513_v48 = vadd.f32 %v4512_v38, %v4464_v31  ;;  %4871 = vadd.xlane.f32.xlu2 %v4870_v45 }
 0x68d   : > { %v4417_v28 = vadd.f32 %v4416_v32, %v4368_v61 }
 0x68e   : > { %v4547_v25 = vmax.f32 %v4513_v48, 0.0 }
 0x68f   : > { %v4548_v1 = vmax.f32 %v4417_v28, 0.0 }
 0x690   : > { %v4830_v30 = vmul.f32 %v10262_v47, %v4547_v25 }
 0x691   : > { %v4465_v19 = vpop.f32.mrf.mxu2  ;;  %v4514_v36 = vpop.f32.mrf.mxu3  ;;  %v4831_v63 = vmul.f32 %v10259_v21, %v4548_v1 }
 0x692   : > { %v4466_v16 = vadd.f32 %v4465_v19, %v10251_v53  ;;  %v4370_v50 = vpop.f32.mrf.mxu0  ;;  %v4419_v11 = vpop.f32.mrf.mxu1  ;;  %v4873_v0 = vadd.f32 %v4830_v30, %v4829_v62 }
 0x693   : > { %v4371_v59 = vadd.f32 %v4370_v50, %v10241_v7 }
 0x694   : > { %v4515_v58 = vadd.f32 %v4514_v36, %v4466_v16  ;;  %4874 = vadd.xlane.f32.xlu0 %v4873_v0 }
 0x695   : > { %4613 = vmatmul.bf16.gmra.mxu0 %v10243_v20  ;;  %4662 = vmatmul.bf16.gmra.mxu1 %v10256_v40  ;;  %v4420_v34 = vadd.f32 %v4419_v11, %v4371_v59 }
 0x696   : > { %v4549_v8 = vmax.f32 %v4515_v58, 0.0  ;;  %4711 = vmatmul.bf16.gmra.mxu2 %v10243_v20  ;;  %4760 = vmatmul.bf16.gmra.mxu3 %v10256_v40 }
 0x697   : > { %v4550_v23 = vmax.f32 %v4420_v34, 0.0 }
 0x698   : > { %v4832_v33 = vmul.f32 %v10262_v47, %v4549_v8 }
 0x699   : > { %v4468_v49 = vpop.f32.mrf.mxu2  ;;  %v4517_v2 = vpop.f32.mrf.mxu3  ;;  %v4833_v40 = vmul.f32 %v10259_v21, %v4550_v23 }
 0x69a   : > { %v4469_v12 = vadd.f32 %v4468_v49, %v10251_v53  ;;  %v4372_v10 = vpop.f32.mrf.mxu0  ;;  %v4421_v56 = vpop.f32.mrf.mxu1  ;;  %v4876_v26 = vadd.f32 %v4832_v33, %v4831_v63 }
 0x69b   : > { %v4373_v41 = vadd.f32 %v4372_v10, %v10241_v7 }
 0x69c   : > { %v4518_v37 = vadd.f32 %v4517_v2, %v4469_v12  ;;  %4877 = vadd.xlane.f32.xlu1 %v4876_v26 }
 0x69d   : > { %v4422_v51 = vadd.f32 %v4421_v56, %v4373_v41 }
 0x69e   : > { %v4551_v20 = vmax.f32 %v4518_v37, 0.0 }
 0x69f   : > { %v4552_v46 = vmax.f32 %v4422_v51, 0.0 }
 0x6a0   : > { %v4834_v18 = vmul.f32 %v10262_v47, %v4551_v20 }
 0x6a1   : > { %v4470_v4 = vpop.f32.mrf.mxu2  ;;  %v4519_v57 = vpop.f32.mrf.mxu3  ;;  %v4835_v3 = vmul.f32 %v10259_v21, %v4552_v46 }
 0x6a2   : > { %v4471_v35 = vadd.f32 %v4470_v4, %v10251_v53  ;;  %v4579_v54 = vpop.f32.mrf.mxu0  ;;  %v4628_v15 = vpop.f32.mrf.mxu1  ;;  %v4879_v14 = vadd.f32 %v4834_v18, %v4833_v40 }
 0x6a3   : > { %v4580_v13 = vadd.f32 %v4579_v54, %v10241_v7 }
 0x6a4   : > { %v4520_v39 = vadd.f32 %v4519_v57, %v4471_v35  ;;  %4880 = vadd.xlane.f32.xlu2 %v4879_v14 }
 0x6a5   : > { %v4629_v52 = vadd.f32 %v4628_v15, %v4580_v13 }
 0x6a6   : > { %v4553_v44 = vmax.f32 %v4520_v39, 0.0 }
 0x6a7   : > { %v4839_v9 = vpop.xlane.xlu0 %4838  ;;  %v4766_v31 = vmax.f32 %v4629_v52, 0.0 }
 0x6a8   : > { %v4836_v6 = vmul.f32 %v10262_v47, %v4553_v44  ;;  %v4886_v24 = vadd.f32 %v10352_v42, %v4839_v9 }
 0x6a9   : > { %v4677_v5 = vpop.f32.mrf.mxu2  ;;  %v4726_v60 = vpop.f32.mrf.mxu3  ;;  %v4902_v48 = vmul.f32 %v10259_v21, %v4766_v31 }
 0x6aa   : > { %v6702_v55 = vmul.f32 -1.442695, %v4886_v24  ;;  %v4678_v43 = vadd.f32 %v4677_v5, %v10251_v53  ;;  %v4581_v17 = vpop.f32.mrf.mxu0  ;;  %v4630_v27 = vpop.f32.mrf.mxu1  ;;  %v4882_v38 = vadd.f32 %v4836_v6, %v4835_v3 }
 0x6ab   : > { %v4582_v32 = vadd.f32 %v4581_v17, %v10241_v7 }
 0x6ac   : > { %6956 = vpow2.f32 %v6702_v55  ;;  %v4727_v22 = vadd.f32 %v4726_v60, %v4678_v43  ;;  %4883 = vadd.xlane.f32.xlu0 %v4882_v38 }
 0x6ad   : > { %v4631_v25 = vadd.f32 %v4630_v27, %v4582_v32 }
 0x6ae   : > { %v4767_v45 = vmax.f32 %v4727_v22, 0.0 }
 0x6af   : > { %v4842_v29 = vpop.xlane.xlu0 %4841  ;;  %v4768_v58 = vmax.f32 %v4631_v25, 0.0 }
 0x6b0   : > { %v4903_v61 = vmul.f32 %v10262_v47, %v4767_v45  ;;  %v4887_v62 = vadd.f32 %v10352_v42, %v4842_v29 }
 0x6b1   : > { %v4679_v30 = vpop.f32.mrf.mxu2  ;;  %v4728_v28 = vpop.f32.mrf.mxu3  ;;  %v4904_v34 = vmul.f32 %v10259_v21, %v4768_v58 }
 0x6b2   : > { %v6957_v19 = vpop.eup %6956  ;;  %v6703_v36 = vmul.f32 -1.442695, %v4887_v62  ;;  %v4680_v16 = vadd.f32 %v4679_v30, %v10251_v53  ;;  %v4584_v50 = vpop.f32.mrf.mxu0  ;;  %v4934_v0 = vadd.f32 %v4903_v61, %v4902_v48 }
 0x6b3   : > { %v4633_v11 = vpop.f32.mrf.mxu1  ;;  %v5046_v1 = vadd.f32 1.0, %v6957_v19  ;;  %v4585_v8 = vadd.f32 %v4584_v50, %v10241_v7 }
 0x6b4   : > { %6958 = vpow2.f32 %v6703_v36  ;;  %v4729_v59 = vadd.f32 %v4728_v28, %v4680_v16  ;;  %4935 = vadd.xlane.f32.xlu1 %v4934_v0 }
 0x6b5   : > { %6960 = vrcp.f32 %v5046_v1  ;;  %v4634_v12 = vadd.f32 %v4633_v11, %v4585_v8  ;;  %v5071_v14 = vand.u32 2147483647, %v5046_v1  ;;  %v5073_v46 = vand.u32 2147483648, %v5046_v1 }
 0x6b6   : > { %v4769_v63 = vmax.f32 %v4729_v59, 0.0  ;;  %vm5067_vm3 = vweird.f32 %v5046_v1 }
 0x6b7   : > { %v4845_v33 = vpop.xlane.xlu1 %4844  ;;  %v4770_v35 = vmax.f32 %v4634_v12, 0.0  ;;  %v5074_v31 = vor.u32 1.1754944e-38, %v5073_v46  ;;  %vm5072_vm5 = vcmp.eq.f32.partialorder %v5071_v14, 8.507059e+37 }
 0x6b8   : > { %v4905_v49 = vmul.f32 %v10262_v47, %v4769_v63  ;;  %v4888_v2 = vadd.f32 %v10352_v42, %v4845_v33 }
 0x6b9   : > { %v4682_v10 = vpop.f32.mrf.mxu2  ;;  %v4731_v56 = vpop.f32.mrf.mxu3  ;;  %v4906_v3 = vmul.f32 %v10259_v21, %v4770_v35 }
 0x6ba   : > { %v6959_v26 = vpop.eup %6958  ;;  %v6704_v23 = vmul.f32 -1.442695, %v4888_v2  ;;  %v4683_v37 = vadd.f32 %v4682_v10, %v10251_v53  ;;  %v4586_v41 = vpop.f32.mrf.mxu0  ;;  %v4937_v40 = vadd.f32 %v4905_v49, %v4904_v34 }
 0x6bb   : > { %v4635_v20 = vpop.f32.mrf.mxu1  ;;  %v6961_v18 = vpop.eup %6960  ;;  %v10368_v51 = vadd.f32 1.0, %v6959_v26  ;;  %v4587_v6 = vadd.f32 %v4586_v41, %v10241_v7 }
 0x6bc   : > { %v5063_v4 = vmul.f32 %v6961_v18, %v5046_v1  ;;  %6962 = vpow2.f32 %v6704_v23  ;;  %v4732_v57 = vadd.f32 %v4731_v56, %v4683_v37  ;;  %4938 = vadd.xlane.f32.xlu2 %v4937_v40  ;;  %vm5068_vm1 = vweird.f32 %v6961_v18 }
 0x6bd   : > { %6964 = vrcp.f32 %v10368_v51  ;;  %vm5069_vm4 = vmor %vm5067_vm3, %vm5068_vm1  ;;  %v4636_v25 = vadd.f32 %v4635_v20, %v4587_v6  ;;  %v5088_v30 = vand.u32 2147483648, %v10368_v51  ;;  %v5086_v50 = vand.u32 2147483647, %v10368_v51 }
 0x6be   : > { %v5064_v54 = vsub.f32 1.0, %v5063_v4  ;;  %v4771_v15 = vmax.f32 %v4732_v57, 0.0  ;;  %vm5082_vm7 = vweird.f32 %v10368_v51 }
 0x6bf   : > { %v4848_v39 = vpop.xlane.xlu1 %4847  ;;  %v4772_v0 = vmax.f32 %v4636_v25, 0.0  ;;  %v5089_v33 = vor.u32 1.1754944e-38, %v5088_v30  ;;  %vm5087_vm9 = vcmp.eq.f32.partialorder %v5086_v50, 8.507059e+37 }
 0x6c0   : > { %v5065_v13 = vmul.f32 %v6961_v18, %v5064_v54  ;;  %v4907_v44 = vmul.f32 %v10262_v47, %v4771_v15  ;;  %v4889_v9 = vadd.f32 %v10352_v42, %v4848_v39 }
 0x6c1   : > { %v4684_v52 = vpop.f32.mrf.mxu2  ;;  %v4733_v24 = vpop.f32.mrf.mxu3 }
 0x6c2   : > { %v6963_v5 = vpop.eup %6962  ;;  %v5066_v60 = vadd.f32 %v6961_v18, %v5065_v13  ;;  %v6705_v55 = vmul.f32 -1.442695, %v4889_v9  ;;  %v4685_v43 = vadd.f32 %v4684_v52, %v10251_v53  ;;  %v4589_v17 = vpop.f32.mrf.mxu0  ;;  %v4940_v45 = vadd.f32 %v4907_v44, %v4906_v3 }
 0x6c3   : > { %v4638_v27 = vpop.f32.mrf.mxu1  ;;  %v6965_v38 = vpop.eup %6964  ;;  %v10384_v22 = vadd.f32 1.0, %v6963_v5  ;;  %v4590_v32 = vadd.f32 %v4589_v17, %v10241_v7 }
 0x6c4   : > { %v5070_v29 = vsel %vm5069_vm4, %v6961_v18, %v5066_v60  ;;  %v5078_v48 = vmul.f32 %v6965_v38, %v10368_v51  ;;  %6966 = vpow2.f32 %v6705_v55  ;;  %4941 = vadd.xlane.f32.xlu0 %v4940_v45  ;;  %v4734_v28 = vadd.f32 %v4733_v24, %v4685_v43 }
 0x6c5   : > { %v5075_v61 = vsel %vm5072_vm5, %v5074_v31, %v5070_v29  ;;  %6968 = vrcp.f32 %v10384_v22  ;;  %v4639_v19 = vadd.f32 %v4638_v27, %v4590_v32  ;;  %vm5083_vm6 = vweird.f32 %v6965_v38 }
 0x6c6   : > { %5303 = vst.msk [vmem:[%s10381_s15] sm:$0xff] %vm5302_vm2, %v5075_v61  ;;  %v5079_v62 = vsub.f32 1.0, %v5078_v48  ;;  %v4773_v11 = vmax.f32 %v4734_v28, 0.0  ;;  %vm5084_vm8 = vmor %vm5082_vm7, %vm5083_vm6  ;;  %v4908_v18 = vmul.f32 %v10259_v21, %v4772_v0  ;;  %v5101_v35 = vand.u32 2147483647, %v10384_v22 }
 0x6c7   : > { %v4851_v36 = vpop.xlane.xlu2 %4850  ;;  %v4774_v26 = vmax.f32 %v4639_v19, 0.0  ;;  %v5103_v54 = vand.u32 2147483648, %v10384_v22  ;;  %vm5097_vm11 = vweird.f32 %v10384_v22 }
 0x6c8   : > { %v5080_v16 = vmul.f32 %v6965_v38, %v5079_v62  ;;  %v4890_v1 = vadd.f32 %v10352_v42, %v4851_v36  ;;  %v4909_v56 = vmul.f32 %v10262_v47, %v4773_v11  ;;  %vm5102_vm13 = vcmp.eq.f32.partialorder %v5101_v35, 8.507059e+37 }
 0x6c9   : > { %v4687_v58 = vpop.f32.mrf.mxu2  ;;  %v4736_v59 = vpop.f32.mrf.mxu3  ;;  %v4910_v15 = vmul.f32 %v10259_v21, %v4774_v26  ;;  %v5104_v27 = vor.u32 1.1754944e-38, %v5103_v54 }
 0x6ca   : > { %v6967_v8 = vpop.eup %6966  ;;  %v5081_v63 = vadd.f32 %v6965_v38, %v5080_v16  ;;  %v4688_v34 = vadd.f32 %v4687_v58, %v10251_v53  ;;  %v4591_v49 = vpop.f32.mrf.mxu0  ;;  %v6706_v23 = vmul.f32 -1.442695, %v4890_v1  ;;  %v4943_v14 = vadd.f32 %v4909_v56, %v4908_v18 }
 0x6cb   : > { %v4640_v2 = vpop.f32.mrf.mxu1  ;;  %v6969_v12 = vpop.eup %6968  ;;  %v10397_v10 = vadd.f32 1.0, %v6967_v8  ;;  %v4592_v51 = vadd.f32 %v4591_v49, %v10241_v7 }
 0x6cc   : > { %v5085_v37 = vsel %vm5084_vm8, %v6965_v38, %v5081_v63  ;;  %v5093_v41 = vmul.f32 %v6969_v12, %v10384_v22  ;;  %v4737_v20 = vadd.f32 %v4736_v59, %v4688_v34  ;;  %vm5098_vm10 = vweird.f32 %v6969_v12  ;;  %4944 = vadd.xlane.f32.xlu1 %v4943_v14 }
 0x6cd   : > { %v5090_v40 = vsel %vm5087_vm9, %v5089_v33, %v5085_v37  ;;  %6970 = vrcp.f32 %v10397_v10  ;;  %v4641_v9 = vadd.f32 %v4640_v2, %v4592_v51  ;;  %vm5099_vm12 = vmor %vm5097_vm11, %vm5098_vm10  ;;  %v5116_v25 = vand.u32 2147483647, %v10397_v10 }
 0x6ce   : > { %5304 = vst.msk [vmem:[%s10381_s15 + $0x8] sm:$0xff] %vm5302_vm2, %v5090_v40  ;;  %v5094_v4 = vsub.f32 1.0, %v5093_v41  ;;  %6972 = vpow2.f32 %v6706_v23  ;;  %v4775_v57 = vmax.f32 %v4737_v20, 0.0  ;;  %v5118_v62 = vand.u32 2147483648, %v10397_v10 }
 0x6cf   : > { %v4854_v46 = vpop.xlane.xlu2 %4853  ;;  %v4776_v61 = vmax.f32 %v4641_v9, 0.0  ;;  %vm5112_vm15 = vweird.f32 %v10397_v10  ;;  %vm5117_vm1 = vcmp.eq.f32.partialorder %v5116_v25, 8.507059e+37 }
 0x6d0   : > { %v5095_v39 = vmul.f32 %v6969_v12, %v5094_v4  ;;  %v4911_v13 = vmul.f32 %v10262_v47, %v4775_v57  ;;  %v4891_v44 = vadd.f32 %v10352_v42, %v4854_v46  ;;  %v5119_v34 = vor.u32 1.1754944e-38, %v5118_v62 }
 0x6d1   : > { %v4689_v3 = vpop.f32.mrf.mxu2  ;;  %v4738_v6 = vpop.f32.mrf.mxu3  ;;  %v4912_v58 = vmul.f32 %v10259_v21, %v4776_v61 }
 0x6d2   : > { %v5096_v52 = vadd.f32 %v6969_v12, %v5095_v39  ;;  %v6707_v24 = vmul.f32 -1.442695, %v4891_v44  ;;  %v4690_v5 = vadd.f32 %v4689_v3, %v10251_v53  ;;  %v4594_v60 = vpop.f32.mrf.mxu0  ;;  %v4946_v43 = vadd.f32 %v4911_v13, %v4910_v15 }
 0x6d3   : > { %v4643_v55 = vpop.f32.mrf.mxu1  ;;  %v6971_v17 = vpop.eup %6970  ;;  %v4595_v16 = vadd.f32 %v4594_v60, %v10241_v7 }
 0x6d4   : > { %v6973_v38 = vpop.eup %6972  ;;  %v5100_v31 = vsel %vm5099_vm12, %v6969_v12, %v5096_v52  ;;  %v5108_v22 = vmul.f32 %v6971_v17, %v10397_v10  ;;  %6974 = vpow2.f32 %v6707_v24  ;;  %4947 = vadd.xlane.f32.xlu2 %v4946_v43  ;;  %v4739_v29 = vadd.f32 %v4738_v6, %v4690_v5 }
 0x6d5   : > { %v5105_v32 = vsel %vm5102_vm13, %v5104_v27, %v5100_v31  ;;  %v10415_v45 = vadd.f32 1.0, %v6973_v38  ;;  %vm5113_vm14 = vweird.f32 %v6971_v17  ;;  %v4644_v23 = vadd.f32 %v4643_v55, %v4595_v16 }
 0x6d6   : > { %5305 = vst.msk [vmem:[%s10381_s15 + $0x10] sm:$0xff] %vm5302_vm2, %v5105_v32  ;;  %v5109_v48 = vsub.f32 1.0, %v5108_v22  ;;  %v4777_v19 = vmax.f32 %v4739_v29, 0.0  ;;  %vm5114_vm0 = vmor %vm5112_vm15, %vm5113_vm14 }
 0x6d7   : > { %6976 = vrcp.f32 %v10415_v45  ;;  %v4857_v30 = vpop.xlane.xlu0 %4856  ;;  %v5131_v18 = vand.u32 2147483647, %v10415_v45  ;;  %v5133_v57 = vand.u32 2147483648, %v10415_v45  ;;  %v4778_v35 = vmax.f32 %v4644_v23, 0.0 }
 0x6d8   : > { %v5110_v28 = vmul.f32 %v6971_v17, %v5109_v48  ;;  %v4892_v36 = vadd.f32 %v10352_v42, %v4857_v30  ;;  %v4913_v59 = vmul.f32 %v10262_v47, %v4777_v19  ;;  %vm5127_vm4 = vweird.f32 %v10415_v45 }
 0x6d9   : > { %v4692_v50 = vpop.f32.mrf.mxu2  ;;  %v4741_v11 = vpop.f32.mrf.mxu3  ;;  %vm5132_vm5 = vcmp.eq.f32.partialorder %v5131_v18, 8.507059e+37  ;;  %v5134_v55 = vor.u32 1.1754944e-38, %v5133_v57  ;;  %v4914_v43 = vmul.f32 %v10259_v21, %v4778_v35 }
 0x6da   : > { %v6975_v0 = vpop.eup %6974  ;;  %v5111_v1 = vadd.f32 %v6971_v17, %v5110_v28  ;;  %v6708_v8 = vmul.f32 -1.442695, %v4892_v36  ;;  %v4596_v63 = vpop.f32.mrf.mxu0  ;;  %v4693_v2 = vadd.f32 %v4692_v50, %v10251_v53  ;;  %v4949_v10 = vadd.f32 %v4913_v59, %v4912_v58 }
 0x6db   : > { %v4645_v33 = vpop.f32.mrf.mxu1  ;;  %v10427_v49 = vadd.f32 1.0, %v6975_v0  ;;  %v4597_v54 = vadd.f32 %v4596_v63, %v10241_v7 }
 0x6dc   : > { %v5115_v12 = vsel %vm5114_vm0, %v6971_v17, %v5111_v1  ;;  %6978 = vpow2.f32 %v6708_v8  ;;  %v4742_v41 = vadd.f32 %v4741_v11, %v4693_v2  ;;  %4950 = vadd.xlane.f32.xlu0 %v4949_v10 }
 0x6dd   : > { %v6977_v56 = vpop.eup %6976  ;;  %v5120_v26 = vsel %vm5117_vm1, %v5119_v34, %v5115_v12  ;;  %6980 = vrcp.f32 %v10427_v49  ;;  %v4646_v17 = vadd.f32 %v4645_v33, %v4597_v54  ;;  %v5148_v31 = vand.u32 2147483648, %v10427_v49 }
 0x6de   : > { %5306 = vst.msk [vmem:[%s10381_s15 + $0x18] sm:$0xff] %vm5302_vm2, %v5120_v26  ;;  %v5123_v37 = vmul.f32 %v6977_v56, %v10415_v45  ;;  %v4779_v51 = vmax.f32 %v4742_v41, 0.0  ;;  %vm5128_vm3 = vweird.f32 %v6977_v56  ;;  %v5146_v45 = vand.u32 2147483647, %v10427_v49 }
 0x6df   : > { %v4860_v20 = vpop.xlane.xlu1 %4859  ;;  %vm5129_vm6 = vmor %vm5127_vm4, %vm5128_vm3  ;;  %v4780_v30 = vmax.f32 %v4646_v17, 0.0  ;;  %vm5142_vm8 = vweird.f32 %v10427_v49  ;;  %v5149_v11 = vor.u32 1.1754944e-38, %v5148_v31 }
 0x6e0   : > { %v5124_v40 = vsub.f32 1.0, %v5123_v37  ;;  %v4893_v4 = vadd.f32 %v10352_v42, %v4860_v20  ;;  %v4915_v24 = vmul.f32 %v10262_v47, %v4779_v51  ;;  %vm5147_vm10 = vcmp.eq.f32.partialorder %v5146_v45, 8.507059e+37 }
 0x6e1   : > { %v4694_v15 = vpop.f32.mrf.mxu2  ;;  %v4743_v14 = vpop.f32.mrf.mxu3  ;;  %v4916_v10 = vmul.f32 %v10259_v21, %v4780_v30 }
 0x6e2   : > { %v6979_v46 = vpop.eup %6978  ;;  %v5125_v39 = vmul.f32 %v6977_v56, %v5124_v40  ;;  %v6709_v13 = vmul.f32 -1.442695, %v4893_v4  ;;  %v4695_v44 = vadd.f32 %v4694_v15, %v10251_v53  ;;  %v4599_v9 = vpop.f32.mrf.mxu0  ;;  %v4952_v29 = vadd.f32 %v4915_v24, %v4914_v43 }
 0x6e3   : > { %v4648_v3 = vpop.f32.mrf.mxu1  ;;  %v6981_v6 = vpop.eup %6980  ;;  %v10440_v52 = vadd.f32 1.0, %v6979_v46  ;;  %v4600_v28 = vadd.f32 %v4599_v9, %v10241_v7 }
 0x6e4   : > { %v5126_v5 = vadd.f32 %v6977_v56, %v5125_v39  ;;  %v5138_v60 = vmul.f32 %v6981_v6, %v10427_v49  ;;  %6982 = vpow2.f32 %v6709_v13  ;;  %v4744_v22 = vadd.f32 %v4743_v14, %v4695_v44  ;;  %4953 = vadd.xlane.f32.xlu1 %v4952_v29 }
 0x6e5   : > { %6984 = vrcp.f32 %v10440_v52  ;;  %vm5143_vm7 = vweird.f32 %v6981_v6  ;;  %v5163_v23 = vand.u32 2147483648, %v10440_v52  ;;  %v5161_v51 = vand.u32 2147483647, %v10440_v52 }
 0x6e6   : > { %v5130_v27 = vsel %vm5129_vm6, %v6977_v56, %v5126_v5  ;;  %v5139_v38 = vsub.f32 1.0, %v5138_v60  ;;  %v4781_v25 = vmax.f32 %v4744_v22, 0.0  ;;  %vm5144_vm9 = vmor %vm5142_vm8, %vm5143_vm7  ;;  %v4649_v56 = vadd.f32 %v4648_v3, %v4600_v28 }
 0x6e7   : > { %v5135_v32 = vsel %vm5132_vm5, %v5134_v55, %v5130_v27  ;;  %v4863_v48 = vpop.xlane.xlu2 %4862  ;;  %vm5157_vm12 = vweird.f32 %v10440_v52  ;;  %v5164_v39 = vor.u32 1.1754944e-38, %v5163_v23  ;;  %vm5162_vm14 = vcmp.eq.f32.partialorder %v5161_v51, 8.507059e+37 }
 0x6e8   : > { %5307 = vst.msk [vmem:[%s10381_s15 + $0x20] sm:$0xff] %vm5302_vm2, %v5135_v32  ;;  %v5140_v61 = vmul.f32 %v6981_v6, %v5139_v38  ;;  %v4894_v62 = vadd.f32 %v10352_v42, %v4863_v48  ;;  %v4917_v63 = vmul.f32 %v10262_v47, %v4781_v25  ;;  %v4782_v57 = vmax.f32 %v4649_v56, 0.0 }
 0x6e9   : > { %v4697_v19 = vpop.f32.mrf.mxu2  ;;  %v4746_v36 = vpop.f32.mrf.mxu3 }
 0x6ea   : > { %v6983_v16 = vpop.eup %6982  ;;  %v5141_v50 = vadd.f32 %v6981_v6, %v5140_v61  ;;  %v6710_v0 = vmul.f32 -1.442695, %v4894_v62  ;;  %v4601_v1 = vpop.f32.mrf.mxu0  ;;  %v4698_v33 = vadd.f32 %v4697_v19, %v10251_v53  ;;  %v4955_v20 = vadd.f32 %v4917_v63, %v4916_v10 }
 0x6eb   : > { %v4650_v58 = vpop.f32.mrf.mxu1  ;;  %v6985_v59 = vpop.eup %6984  ;;  %v10454_v8 = vadd.f32 1.0, %v6983_v16  ;;  %v4602_v34 = vadd.f32 %v4601_v1, %v10241_v7  ;;  %v4918_v27 = vmul.f32 %v10259_v21, %v4782_v57 }
 0x6ec   : > { %v5145_v2 = vsel %vm5144_vm9, %v6981_v6, %v5141_v50  ;;  %v5153_v49 = vmul.f32 %v6985_v59, %v10440_v52  ;;  %6986 = vpow2.f32 %v6710_v0  ;;  %v4747_v37 = vadd.f32 %v4746_v36, %v4698_v33  ;;  %4956 = vadd.xlane.f32.xlu2 %v4955_v20 }
 0x6ed   : > { %v5150_v12 = vsel %vm5147_vm10, %v5149_v11, %v5145_v2  ;;  %6988 = vrcp.f32 %v10454_v8  ;;  %v4651_v41 = vadd.f32 %v4650_v58, %v4602_v34  ;;  %vm5158_vm11 = vweird.f32 %v6985_v59 }
 0x6ee   : > { %5308 = vst.msk [vmem:[%s10381_s15 + $0x28] sm:$0xff] %vm5302_vm2, %v5150_v12  ;;  %v5154_v26 = vsub.f32 1.0, %v5153_v49  ;;  %v4783_v4 = vmax.f32 %v4747_v37, 0.0  ;;  %vm5159_vm13 = vmor %vm5157_vm12, %vm5158_vm11  ;;  %v5176_v32 = vand.u32 2147483647, %v10454_v8  ;;  %v5178_v45 = vand.u32 2147483648, %v10454_v8 }
 0x6ef   : > { %v4866_v40 = vpop.xlane.xlu0 %4865  ;;  %v4784_v5 = vmax.f32 %v4651_v41, 0.0  ;;  %vm5172_vm0 = vweird.f32 %v10454_v8 }
 0x6f0   : > { %v5155_v18 = vmul.f32 %v6985_v59, %v5154_v26  ;;  %v4895_v35 = vadd.f32 %v10352_v42, %v4866_v40  ;;  %v4919_v24 = vmul.f32 %v10262_v47, %v4783_v4  ;;  %v5179_v63 = vor.u32 1.1754944e-38, %v5178_v45 }
 0x6f1   : > { %v4699_v54 = vpop.f32.mrf.mxu2  ;;  %v4748_v15 = vpop.f32.mrf.mxu3  ;;  %v4920_v29 = vmul.f32 %v10259_v21, %v4784_v5  ;;  %vm5177_vm3 = vcmp.eq.f32.partialorder %v5176_v32, 8.507059e+37 }
 0x6f2   : > { %v6987_v14 = vpop.eup %6986  ;;  %v5156_v46 = vadd.f32 %v6985_v59, %v5155_v18  ;;  %v4700_v13 = vadd.f32 %v4699_v54, %v10251_v53  ;;  %v4604_v44 = vpop.f32.mrf.mxu0  ;;  %v6711_v60 = vmul.f32 -1.442695, %v4895_v35  ;;  %v4958_v48 = vadd.f32 %v4919_v24, %v4918_v27 }
 0x6f3   : > { %v4653_v9 = vpop.f32.mrf.mxu1  ;;  %v6989_v3 = vpop.eup %6988  ;;  %v10470_v6 = vadd.f32 1.0, %v6987_v14  ;;  %v4605_v38 = vadd.f32 %v4604_v44, %v10241_v7 }
 0x6f4   : > { %v5160_v55 = vsel %vm5159_vm13, %v6985_v59, %v5156_v46  ;;  %v5168_v43 = vmul.f32 %v6989_v3, %v10454_v8  ;;  %v4749_v52 = vadd.f32 %v4748_v15, %v4700_v13  ;;  %vm5173_vm15 = vweird.f32 %v6989_v3  ;;  %4959 = vadd.xlane.f32.xlu0 %v4958_v48 }
 0x6f5   : > { %v5165_v17 = vsel %vm5162_vm14, %v5164_v39, %v5160_v55  ;;  %6990 = vrcp.f32 %v10470_v6  ;;  %v4654_v28 = vadd.f32 %v4653_v9, %v4605_v38  ;;  %vm5174_vm1 = vmor %vm5172_vm0, %vm5173_vm15  ;;  %v5191_v26 = vand.u32 2147483647, %v10470_v6 }
 0x6f6   : > { %5309 = vst.msk [vmem:[%s10381_s15 + $0x30] sm:$0xff] %vm5302_vm2, %v5165_v17  ;;  %v5169_v31 = vsub.f32 1.0, %v5168_v43  ;;  %6992 = vpow2.f32 %v6711_v60  ;;  %v4785_v22 = vmax.f32 %v4749_v52, 0.0  ;;  %v5193_v23 = vand.u32 2147483648, %v10470_v6 }
 0x6f7   : > { %v4869_v61 = vpop.xlane.xlu1 %4868  ;;  %v4786_v56 = vmax.f32 %v4654_v28, 0.0  ;;  %vm5187_vm5 = vweird.f32 %v10470_v6  ;;  %vm5192_vm7 = vcmp.eq.f32.partialorder %v5191_v26, 8.507059e+37 }
 0x6f8   : > { %v5170_v25 = vmul.f32 %v6989_v3, %v5169_v31  ;;  %v4921_v62 = vmul.f32 %v10262_v47, %v4785_v22  ;;  %v4896_v30 = vadd.f32 %v10352_v42, %v4869_v61  ;;  %v5194_v13 = vor.u32 1.1754944e-38, %v5193_v23 }
 0x6f9   : > { %v4702_v19 = vpop.f32.mrf.mxu2  ;;  %v4751_v36 = vpop.f32.mrf.mxu3  ;;  %v4922_v54 = vmul.f32 %v10259_v21, %v4786_v56 }
 0x6fa   : > { %v5171_v16 = vadd.f32 %v6989_v3, %v5170_v25  ;;  %v6712_v50 = vmul.f32 -1.442695, %v4896_v30  ;;  %v4703_v11 = vadd.f32 %v4702_v19, %v10251_v53  ;;  %v4606_v0 = vpop.f32.mrf.mxu0  ;;  %v4961_v58 = vadd.f32 %v4921_v62, %v4920_v29 }
 0x6fb   : > { %v4655_v1 = vpop.f32.mrf.mxu1  ;;  %v6991_v59 = vpop.eup %6990  ;;  %v4607_v18 = vadd.f32 %v4606_v0, %v10241_v7 }
 0x6fc   : > { %v6993_v33 = vpop.eup %6992  ;;  %v5175_v34 = vsel %vm5174_vm1, %v6989_v3, %v5171_v16  ;;  %v5183_v8 = vmul.f32 %v6991_v59, %v10470_v6  ;;  %6994 = vpow2.f32 %v6712_v50  ;;  %4962 = vadd.xlane.f32.xlu1 %v4961_v58  ;;  %v4752_v12 = vadd.f32 %v4751_v36, %v4703_v11 }
 0x6fd   : > { %v5180_v2 = vsel %vm5177_vm3, %v5179_v63, %v5175_v34  ;;  %v10488_v49 = vadd.f32 1.0, %v6993_v33  ;;  %vm5188_vm4 = vweird.f32 %v6991_v59  ;;  %v4656_v60 = vadd.f32 %v4655_v1, %v4607_v18 }
 0x6fe   : > { %5310 = vst.msk [vmem:[%s10381_s15 + $0x38] sm:$0xff] %vm5302_vm2, %v5180_v2  ;;  %v5184_v10 = vsub.f32 1.0, %v5183_v8  ;;  %v4787_v20 = vmax.f32 %v4752_v12, 0.0  ;;  %vm5189_vm6 = vmor %vm5187_vm5, %vm5188_vm4 }
 0x6ff   : > { %6996 = vrcp.f32 %v10488_v49  ;;  %v4872_v37 = vpop.xlane.xlu2 %4871  ;;  %v5206_v27 = vand.u32 2147483647, %v10488_v49  ;;  %v5208_v22 = vand.u32 2147483648, %v10488_v49  ;;  %v4788_v32 = vmax.f32 %v4656_v60, 0.0 }
 0x700   : > { %v5185_v41 = vmul.f32 %v6991_v59, %v5184_v10  ;;  %v4897_v40 = vadd.f32 %v10352_v42, %v4872_v37  ;;  %v4923_v15 = vmul.f32 %v10262_v47, %v4787_v20  ;;  %vm5202_vm9 = vweird.f32 %v10488_v49 }
 0x701   : > { %v4704_v51 = vpop.f32.mrf.mxu2  ;;  %v4753_v4 = vpop.f32.mrf.mxu3  ;;  %vm5207_vm10 = vcmp.eq.f32.partialorder %v5206_v27, 8.507059e+37  ;;  %v5209_v1 = vor.u32 1.1754944e-38, %v5208_v22  ;;  %v4924_v58 = vmul.f32 %v10259_v21, %v4788_v32 }
 0x702   : > { %v6995_v57 = vpop.eup %6994  ;;  %v5186_v35 = vadd.f32 %v6991_v59, %v5185_v41  ;;  %v6713_v14 = vmul.f32 -1.442695, %v4897_v40  ;;  %v4609_v46 = vpop.f32.mrf.mxu0  ;;  %v4705_v9 = vadd.f32 %v4704_v51, %v10251_v53  ;;  %v4964_v6 = vadd.f32 %v4923_v15, %v4922_v54 }
 0x703   : > { %v4658_v39 = vpop.f32.mrf.mxu1  ;;  %v10500_v44 = vadd.f32 1.0, %v6995_v57  ;;  %v4610_v45 = vadd.f32 %v4609_v46, %v10241_v7 }
 0x704   : > { %v5190_v3 = vsel %vm5189_vm6, %v6991_v59, %v5186_v35  ;;  %6998 = vpow2.f32 %v6713_v14  ;;  %v4754_v43 = vadd.f32 %v4753_v4, %v4705_v9  ;;  %4965 = vadd.xlane.f32.xlu2 %v4964_v6 }
 0x705   : > { %v6997_v24 = vpop.eup %6996  ;;  %v5195_v5 = vsel %vm5192_vm7, %v5194_v13, %v5190_v3  ;;  %7000 = vrcp.f32 %v10500_v44  ;;  %v4659_v59 = vadd.f32 %v4658_v39, %v4610_v45  ;;  %v5223_v34 = vand.u32 2147483648, %v10500_v44 }
 0x706   : > { %5311 = vst.msk [vmem:[%s10381_s15 + $0x40] sm:$0xff] %vm5302_vm2, %v5195_v5  ;;  %v5198_v55 = vmul.f32 %v6997_v24, %v10488_v49  ;;  %v4789_v38 = vmax.f32 %v4754_v43, 0.0  ;;  %vm5203_vm8 = vweird.f32 %v6997_v24  ;;  %v5221_v49 = vand.u32 2147483647, %v10500_v44 }
 0x707   : > { %v4875_v52 = vpop.xlane.xlu0 %4874  ;;  %vm5204_vm11 = vmor %vm5202_vm9, %vm5203_vm8  ;;  %v4790_v37 = vmax.f32 %v4659_v59, 0.0  ;;  %vm5217_vm13 = vweird.f32 %v10500_v44  ;;  %v5224_v4 = vor.u32 1.1754944e-38, %v5223_v34 }
 0x708   : > { %v5199_v17 = vsub.f32 1.0, %v5198_v55  ;;  %v4898_v31 = vadd.f32 %v10352_v42, %v4875_v52  ;;  %v4925_v16 = vmul.f32 %v10262_v47, %v4789_v38  ;;  %vm5222_vm15 = vcmp.eq.f32.partialorder %v5221_v49, 8.507059e+37 }
 0x709   : > { %v4707_v29 = vpop.f32.mrf.mxu2  ;;  %v4756_v48 = vpop.f32.mrf.mxu3  ;;  %v4926_v3 = vmul.f32 %v10259_v21, %v4790_v37 }
 0x70a   : > { %v6999_v61 = vpop.eup %6998  ;;  %v5200_v25 = vmul.f32 %v6997_v24, %v5199_v17  ;;  %v6714_v62 = vmul.f32 -1.442695, %v4898_v31  ;;  %v4708_v30 = vadd.f32 %v4707_v29, %v10251_v53  ;;  %v4611_v28 = vpop.f32.mrf.mxu0  ;;  %v4967_v12 = vadd.f32 %v4925_v16, %v4924_v58 }
 0x70b   : > { %v7001_v19 = vpop.eup %7000  ;;  %v10513_v36 = vadd.f32 1.0, %v6999_v61  ;;  %v4660_v0 = vpop.f32.mrf.mxu1  ;;  %v4612_v41 = vadd.f32 %v4611_v28, %v10241_v7 }
 0x70c   : > { %v5201_v50 = vadd.f32 %v6997_v24, %v5200_v25  ;;  %v5213_v11 = vmul.f32 %v7001_v19, %v10500_v44  ;;  %7002 = vpow2.f32 %v6714_v62  ;;  %v4757_v8 = vadd.f32 %v4756_v48, %v4708_v30  ;;  %4968 = vadd.xlane.f32.xlu0 %v4967_v12 }
 0x70d   : > { %7004 = vrcp.f32 %v10513_v36  ;;  %vm5218_vm12 = vweird.f32 %v7001_v19  ;;  %v4661_v6 = vadd.f32 %v4660_v0, %v4612_v41  ;;  %v5238_v5 = vand.u32 2147483648, %v10513_v36 }
 0x70e   : > { %v5205_v63 = vsel %vm5204_vm11, %v6997_v24, %v5201_v50  ;;  %v5214_v33 = vsub.f32 1.0, %v5213_v11  ;;  %v4791_v26 = vmax.f32 %v4757_v8, 0.0  ;;  %vm5219_vm14 = vmor %vm5217_vm13, %vm5218_vm12  ;;  %v5236_v38 = vand.u32 2147483647, %v10513_v36 }
 0x70f   : > { %v5210_v2 = vsel %vm5207_vm10, %v5209_v1, %v5205_v63  ;;  %v4878_v10 = vpop.xlane.xlu1 %4877  ;;  %v4792_v22 = vmax.f32 %v4661_v6, 0.0  ;;  %vm5232_vm1 = vweird.f32 %v10513_v36  ;;  %v5239_v61 = vor.u32 1.1754944e-38, %v5238_v5 }
 0x710   : > { %5312 = vst.msk [vmem:[%s10381_s15 + $0x48] sm:$0xff] %vm5302_vm2, %v5210_v2  ;;  %v5215_v56 = vmul.f32 %v7001_v19, %v5214_v33  ;;  %v4899_v23 = vadd.f32 %v10352_v42, %v4878_v10  ;;  %v4927_v14 = vmul.f32 %v10262_v47, %v4791_v26  ;;  %vm5237_vm4 = vcmp.eq.f32.partialorder %v5236_v38, 8.507059e+37 }
 0x711   : > { %v4709_v20 = vpop.f32.mrf.mxu2  ;;  %v4758_v40 = vpop.f32.mrf.mxu3  ;;  %v4928_v59 = vmul.f32 %v10259_v21, %v4792_v22 }
 0x712   : > { %v7003_v18 = vpop.eup %7002  ;;  %v5216_v51 = vadd.f32 %v7001_v19, %v5215_v56  ;;  %v6715_v57 = vmul.f32 -1.442695, %v4899_v23  ;;  %v4614_v35 = vpop.f32.mrf.mxu0  ;;  %v4710_v46 = vadd.f32 %v4709_v20, %v10251_v53  ;;  %v4970_v52 = vadd.f32 %v4927_v14, %v4926_v3 }
 0x713   : > { %v7005_v54 = vpop.eup %7004  ;;  %v10527_v15 = vadd.f32 1.0, %v7003_v18  ;;  %v4615_v39 = vadd.f32 %v4614_v35, %v10241_v7  ;;  %v4663_v55 = vpop.f32.mrf.mxu1 }
 0x714   : > { %v5220_v13 = vsel %vm5219_vm14, %v7001_v19, %v5216_v51  ;;  %v5228_v9 = vmul.f32 %v7005_v54, %v10513_v36  ;;  %7006 = vpow2.f32 %v6715_v57  ;;  %v4759_v60 = vadd.f32 %v4758_v40, %v4710_v46  ;;  %4971 = vadd.xlane.f32.xlu1 %v4970_v52 }
 0x715   : > { %v5225_v44 = vsel %vm5222_vm15, %v5224_v4, %v5220_v13  ;;  %7008 = vrcp.f32 %v10527_v15  ;;  %v4664_v43 = vadd.f32 %v4663_v55, %v4615_v39  ;;  %vm5233_vm0 = vweird.f32 %v7005_v54 }
 0x716   : > { %5313 = vst.msk [vmem:[%s10381_s15 + $0x50] sm:$0xff] %vm5302_vm2, %v5225_v44  ;;  %v5229_v24 = vsub.f32 1.0, %v5228_v9  ;;  %v4793_v31 = vmax.f32 %v4759_v60, 0.0  ;;  %vm5234_vm3 = vmor %vm5232_vm1, %vm5233_vm0  ;;  %v5251_v8 = vand.u32 2147483647, %v10527_v15  ;;  %v5253_v2 = vand.u32 2147483648, %v10527_v15 }
 0x717   : > { %v4881_v17 = vpop.xlane.xlu2 %4880  ;;  %v4794_v50 = vmax.f32 %v4664_v43, 0.0  ;;  %vm5247_vm6 = vweird.f32 %v10527_v15 }
 0x718   : > { %v5230_v27 = vmul.f32 %v7005_v54, %v5229_v24  ;;  %v4900_v32 = vadd.f32 %v10352_v42, %v4881_v17  ;;  %v4929_v16 = vmul.f32 %v10262_v47, %v4793_v31  ;;  %v5254_v57 = vor.u32 1.1754944e-38, %v5253_v2 }
 0x719   : > { %v4712_v45 = vpop.f32.mrf.mxu2  ;;  %v4761_v62 = vpop.f32.mrf.mxu3  ;;  %v4930_v49 = vmul.f32 %v10259_v21, %v4794_v50  ;;  %vm5252_vm8 = vcmp.eq.f32.partialorder %v5251_v8, 8.507059e+37 }
 0x71a   : > { %v7007_v29 = vpop.eup %7006  ;;  %v5231_v48 = vadd.f32 %v7005_v54, %v5230_v27  ;;  %v4713_v25 = vadd.f32 %v4712_v45, %v10251_v53  ;;  %v4616_v30 = vpop.f32.mrf.mxu0  ;;  %v6716_v11 = vmul.f32 -1.442695, %v4900_v32  ;;  %v4973_v12 = vadd.f32 %v4929_v16, %v4928_v59 }
 0x71b   : > { %v7009_v28 = vpop.eup %7008  ;;  %v10543_v19 = vadd.f32 1.0, %v7007_v29  ;;  %v4617_v63 = vadd.f32 %v4616_v30, %v10241_v7  ;;  %v4665_v23 = vpop.f32.mrf.mxu1 }
 0x71c   : > { %v5235_v0 = vsel %vm5234_vm3, %v7005_v54, %v5231_v48  ;;  %v5243_v1 = vmul.f32 %v7009_v28, %v10527_v15  ;;  %v4762_v36 = vadd.f32 %v4761_v62, %v4713_v25  ;;  %vm5248_vm5 = vweird.f32 %v7009_v28  ;;  %4974 = vadd.xlane.f32.xlu2 %v4973_v12 }
 0x71d   : > { %v5240_v58 = vsel %vm5237_vm4, %v5239_v61, %v5235_v0  ;;  %7010 = vrcp.f32 %v10543_v19  ;;  %v4666_v37 = vadd.f32 %v4665_v23, %v4617_v63  ;;  %vm5249_vm7 = vmor %vm5247_vm6, %vm5248_vm5  ;;  %v5268_v3 = vand.u32 2147483648, %v10543_v19 }
 0x71e   : > { %5314 = vst.msk [vmem:[%s10381_s15 + $0x58] sm:$0xff] %vm5302_vm2, %v5240_v58  ;;  %v5244_v33 = vsub.f32 1.0, %v5243_v1  ;;  %7012 = vpow2.f32 %v6716_v11  ;;  %v4795_v34 = vmax.f32 %v4762_v36, 0.0  ;;  %vm5262_vm10 = vweird.f32 %v10543_v19 }
 0x71f   : > { %v4884_v10 = vpop.xlane.xlu0 %4883  ;;  %v4796_v44 = vmax.f32 %v4666_v37, 0.0  ;;  %v5269_v38 = vor.u32 1.1754944e-38, %v5268_v3 }
 0x720   : > { %v5245_v56 = vmul.f32 %v7009_v28, %v5244_v33  ;;  %v4931_v26 = vmul.f32 %v10262_v47, %v4795_v34  ;;  %v4901_v7 = vadd.f32 %v10352_v42, %v4884_v10 }
 0x721   : > { %v4714_v41 = vpop.f32.mrf.mxu2  ;;  %v4763_v46 = vpop.f32.mrf.mxu3  ;;  %v4932_v52 = vmul.f32 %v10259_v21, %v4796_v44 }
 0x722   : > { %v5246_v20 = vadd.f32 %v7009_v28, %v5245_v56  ;;  %v6717_v40 = vmul.f32 -1.442695, %v4901_v7  ;;  %v4715_v18 = vadd.f32 %v4714_v41, %v10251_v53  ;;  %v4976_v51 = vadd.f32 %v4931_v26, %v4930_v49 }
 0x723   : > { %v7011_v4 = vpop.eup %7010  ;;  %v5266_v53 = vand.u32 2147483647, %v10543_v19 }
 0x724   : > { %v7013_v35 = vpop.eup %7012  ;;  %v5250_v54 = vsel %vm5249_vm7, %v7009_v28, %v5246_v20  ;;  %v5258_v14 = vmul.f32 %v7011_v4, %v10543_v19  ;;  %7014 = vpow2.f32 %v6717_v40  ;;  %4977 = vadd.xlane.f32.xlu0 %v4976_v51  ;;  %v4764_v13 = vadd.f32 %v4763_v46, %v4715_v18 }
 0x725   : > { %v5255_v15 = vsel %vm5252_vm8, %v5254_v57, %v5250_v54  ;;  %v5060_v39 = vadd.f32 1.0, %v7013_v35  ;;  %vm5263_vm9 = vweird.f32 %v7011_v4  ;;  %vm5267_vm12 = vcmp.eq.f32.partialorder %v5266_v53, 8.507059e+37 }
 0x726   : > { %5315 = vst.msk [vmem:[%s10381_s15 + $0x60] sm:$0xff] %vm5302_vm2, %v5255_v15  ;;  %v5259_v9 = vsub.f32 1.0, %v5258_v14  ;;  %v4797_v5 = vmax.f32 %v4764_v13, 0.0  ;;  %vm5264_vm11 = vmor %vm5262_vm10, %vm5263_vm9 }
 0x727   : > { %7016 = vrcp.f32 %v5060_v39  ;;  %v4936_v6 = vpop.xlane.xlu1 %4935  ;;  %v5281_v28 = vand.u32 2147483647, %v5060_v39  ;;  %vm5277_vm14 = vweird.f32 %v5060_v39 }
 0x728   : > { %v5260_v24 = vmul.f32 %v7011_v4, %v5259_v9  ;;  %v4982_v60 = vadd.f32 %v4936_v6, %v10352_v42  ;;  %v4933_v17 = vmul.f32 %v10262_v47, %v4797_v5  ;;  %v5283_v47 = vand.u32 2147483648, %v5060_v39 }
 0x729   : > { %vm5282_vm0 = vcmp.eq.f32.partialorder %v5281_v28, 8.507059e+37 }
 0x72a   : > { %v7015_v55 = vpop.eup %7014  ;;  %v5261_v43 = vadd.f32 %v7011_v4, %v5260_v24  ;;  %v6718_v27 = vmul.f32 -1.442695, %v4982_v60  ;;  %v4979_v32 = vadd.f32 %v4933_v17, %v4932_v52  ;;  %v5284_v1 = vor.u32 1.1754944e-38, %v5283_v47 }
 0x72b   : > { %v5061_v31 = vadd.f32 1.0, %v7015_v55 }
 0x72c   : > { %v5265_v22 = vsel %vm5264_vm11, %v7011_v4, %v5261_v43  ;;  %7018 = vpow2.f32 %v6718_v27  ;;  %4980 = vadd.xlane.f32.xlu1 %v4979_v32 }
 0x72d   : > { %v7017_v45 = vpop.eup %7016  ;;  %v5270_v29 = vsel %vm5267_vm12, %v5269_v38, %v5265_v22  ;;  %7020 = vrcp.f32 %v5061_v31  ;;  %v5298_v63 = vand.u32 2147483648, %v5061_v31  ;;  %v5296_v34 = vand.u32 2147483647, %v5061_v31 }
 0x72e   : > { %5316 = vst.msk [vmem:[%s10381_s15 + $0x68] sm:$0xff] %vm5302_vm2, %v5270_v29  ;;  %v5273_v48 = vmul.f32 %v7017_v45, %v5060_v39  ;;  %vm5278_vm13 = vweird.f32 %v7017_v45  ;;  %vm5292_vm3 = vweird.f32 %v5061_v31 }
 0x72f   : > { %v4939_v61 = vpop.xlane.xlu2 %4938  ;;  %vm5279_vm15 = vmor %vm5277_vm14, %vm5278_vm13  ;;  %v5299_v56 = vor.u32 1.1754944e-38, %v5298_v63  ;;  %vm5297_vm5 = vcmp.eq.f32.partialorder %v5296_v34, 8.507059e+37 }
 0x730   : > { %v5274_v25 = vsub.f32 1.0, %v5273_v48  ;;  %v4983_v21 = vadd.f32 %v4939_v61, %v10352_v42 }
 0x732   : > { %v7019_v62 = vpop.eup %7018  ;;  %v5275_v30 = vmul.f32 %v7017_v45, %v5274_v25  ;;  %v6719_v19 = vmul.f32 -1.442695, %v4983_v21 }
 0x733   : > { %v7021_v16 = vpop.eup %7020  ;;  %v5367_v50 = vadd.f32 1.0, %v7019_v62 }
 0x734   : > { %v5276_v11 = vadd.f32 %v7017_v45, %v5275_v30  ;;  %v5288_v0 = vmul.f32 %v7021_v16, %v5061_v31  ;;  %7022 = vpow2.f32 %v6719_v19  ;;  %vm5293_vm1 = vweird.f32 %v7021_v16 }
 0x735   : > { %7024 = vrcp.f32 %v5367_v50  ;;  %vm5294_vm4 = vmor %vm5292_vm3, %vm5293_vm1  ;;  %v5394_v40 = vand.u32 2147483648, %v5367_v50  ;;  %v5392_v51 = vand.u32 2147483647, %v5367_v50  ;;  %vm5388_vm7 = vweird.f32 %v5367_v50 }
 0x736   : > { %v5280_v36 = vsel %vm5279_vm15, %v7017_v45, %v5276_v11  ;;  %v5289_v58 = vsub.f32 1.0, %v5288_v0 }
 0x737   : > { %v5285_v59 = vsel %vm5282_vm0, %v5284_v1, %v5280_v36  ;;  %v4942_v8 = vpop.xlane.xlu0 %4941  ;;  %v5395_v35 = vor.u32 1.1754944e-38, %v5394_v40  ;;  %vm5393_vm9 = vcmp.eq.f32.partialorder %v5392_v51, 8.507059e+37 }
 0x738   : > { %5317 = vst.msk [vmem:[%s10381_s15 + $0x70] sm:$0xff] %vm5302_vm2, %v5285_v59  ;;  %v5290_v33 = vmul.f32 %v7021_v16, %v5289_v58  ;;  %v4984_v2 = vadd.f32 %v4942_v8, %v10352_v42 }
 0x73a   : > { %v7023_v49 = vpop.eup %7022  ;;  %v5291_v12 = vadd.f32 %v7021_v16, %v5290_v33  ;;  %v6720_v23 = vmul.f32 -1.442695, %v4984_v2 }
 0x73b   : > { %v7025_v10 = vpop.eup %7024  ;;  %v5368_v26 = vadd.f32 1.0, %v7023_v49 }
 0x73c   : > { %v5295_v7 = vsel %vm5294_vm4, %v7021_v16, %v5291_v12  ;;  %v5384_v37 = vmul.f32 %v7025_v10, %v5367_v50  ;;  %vm5389_vm6 = vweird.f32 %v7025_v10 }
 0x73d   : > { %v5300_v41 = vsel %vm5297_vm5, %v5299_v56, %v5295_v7  ;;  %7026 = vrcp.f32 %v5368_v26  ;;  %vm5390_vm8 = vmor %vm5388_vm7, %vm5389_vm6  ;;  %v5407_v53 = vand.u32 2147483647, %v5368_v26  ;;  %v5409_v3 = vand.u32 2147483648, %v5368_v26 }
 0x73e   : > { %5318 = vst.msk [vmem:[%s10381_s15 + $0x78] sm:$0xff] %vm5302_vm2, %v5300_v41  ;;  %v5385_v20 = vsub.f32 1.0, %v5384_v37  ;;  %7028 = vpow2.f32 %v6720_v23  ;;  %vm5403_vm11 = vweird.f32 %v5368_v26 }
 0x73f   : > { %v4945_v15 = vpop.xlane.xlu1 %4944  ;;  %v5410_v52 = vor.u32 1.1754944e-38, %v5409_v3  ;;  %vm5408_vm13 = vcmp.eq.f32.partialorder %v5407_v53, 8.507059e+37 }
 0x740   : > { %v5386_v18 = vmul.f32 %v7025_v10, %v5385_v20  ;;  %v4985_v9 = vadd.f32 %v4945_v15, %v10352_v42 }
 0x742   : > { %v5387_v4 = vadd.f32 %v7025_v10, %v5386_v18  ;;  %v6721_v5 = vmul.f32 -1.442695, %v4985_v9 }
 0x743   : > { %v7027_v57 = vpop.eup %7026 }
 0x744   : > { %v7029_v54 = vpop.eup %7028  ;;  %v5391_v14 = vsel %vm5390_vm8, %v7025_v10, %v5387_v4  ;;  %v5399_v46 = vmul.f32 %v7027_v57, %v5368_v26  ;;  %vm5404_vm10 = vweird.f32 %v7027_v57 }
 0x745   : > { %v5396_v39 = vsel %vm5393_vm9, %v5395_v35, %v5391_v14  ;;  %v5369_v13 = vadd.f32 1.0, %v7029_v54  ;;  %vm5405_vm12 = vmor %vm5403_vm11, %vm5404_vm10 }
 0x746   : > { %6734 = vst.msk [vmem:[%s10381_s15 + $0x80] sm:$0xff] %vm5302_vm2, %v5396_v39  ;;  %v5400_v44 = vsub.f32 1.0, %v5399_v46 }
 0x747   : > { %7030 = vrcp.f32 %v5369_v13  ;;  %v4948_v6 = vpop.xlane.xlu2 %4947  ;;  %v5424_v45 = vand.u32 2147483648, %v5369_v13  ;;  %v5422_v21 = vand.u32 2147483647, %v5369_v13  ;;  %vm5418_vm15 = vweird.f32 %v5369_v13 }
 0x748   : > { %v5401_v24 = vmul.f32 %v7027_v57, %v5400_v44  ;;  %v4986_v60 = vadd.f32 %v4948_v6, %v10352_v42  ;;  %7032 = vpow2.f32 %v6721_v5 }
 0x749   : > { %v5425_v19 = vor.u32 1.1754944e-38, %v5424_v45  ;;  %vm5423_vm1 = vcmp.eq.f32.partialorder %v5422_v21, 8.507059e+37 }
 0x74a   : > { %v5402_v55 = vadd.f32 %v7027_v57, %v5401_v24  ;;  %v6722_v43 = vmul.f32 -1.442695, %v4986_v60 }
 0x74c   : > { %v5406_v17 = vsel %vm5405_vm12, %v7027_v57, %v5402_v55  ;;  %7034 = vpow2.f32 %v6722_v43 }
 0x74d   : > { %v7031_v27 = vpop.eup %7030  ;;  %v5411_v38 = vsel %vm5408_vm13, %v5410_v52, %v5406_v17 }
 0x74e   : > { %6735 = vst.msk [vmem:[%s10381_s15 + $0x88] sm:$0xff] %vm5302_vm2, %v5411_v38  ;;  %v5414_v31 = vmul.f32 %v7031_v27, %v5369_v13  ;;  %v7033_v22 = vpop.eup %7032  ;;  %vm5419_vm14 = vweird.f32 %v7031_v27 }
 0x74f   : > { %v5370_v29 = vadd.f32 1.0, %v7033_v22  ;;  %v4951_v48 = vpop.xlane.xlu0 %4950  ;;  %vm5420_vm0 = vmor %vm5418_vm15, %vm5419_vm14 }
 0x750   : > { %v5415_v32 = vsub.f32 1.0, %v5414_v31  ;;  %v4987_v47 = vadd.f32 %v4951_v48, %v10352_v42 }
 0x751   : > { %7036 = vrcp.f32 %v5370_v29  ;;  %v5439_v58 = vand.u32 2147483648, %v5370_v29  ;;  %v5437_v2 = vand.u32 2147483647, %v5370_v29  ;;  %vm5433_vm4 = vweird.f32 %v5370_v29 }
 0x752   : > { %v7035_v61 = vpop.eup %7034  ;;  %v5416_v25 = vmul.f32 %v7031_v27, %v5415_v32  ;;  %v6723_v28 = vmul.f32 -1.442695, %v4987_v47 }
 0x753   : > { %v5371_v30 = vadd.f32 1.0, %v7035_v61  ;;  %v5440_v26 = vor.u32 1.1754944e-38, %v5439_v58  ;;  %vm5438_vm7 = vcmp.eq.f32.partialorder %v5437_v2, 8.507059e+37 }
 0x754   : > { %v5417_v62 = vadd.f32 %v7031_v27, %v5416_v25 }
 0x755   : > { %7038 = vrcp.f32 %v5371_v30  ;;  %v5454_v23 = vand.u32 2147483648, %v5371_v30  ;;  %v5452_v37 = vand.u32 2147483647, %v5371_v30  ;;  %vm5448_vm8 = vweird.f32 %v5371_v30 }
 0x756   : > { %v5421_v16 = vsel %vm5420_vm0, %v7031_v27, %v5417_v62  ;;  %7040 = vpow2.f32 %v6723_v28 }
 0x757   : > { %v5426_v50 = vsel %vm5423_vm1, %v5425_v19, %v5421_v16  ;;  %v7037_v11 = vpop.eup %7036  ;;  %v4954_v59 = vpop.xlane.xlu1 %4953  ;;  %v5455_v18 = vor.u32 1.1754944e-38, %v5454_v23  ;;  %vm5453_vm10 = vcmp.eq.f32.partialorder %v5452_v37, 8.507059e+37 }
 0x758   : > { %6736 = vst.msk [vmem:[%s10381_s15 + $0x90] sm:$0xff] %vm5302_vm2, %v5426_v50  ;;  %v5429_v0 = vmul.f32 %v7037_v11, %v5370_v29  ;;  %v4988_v34 = vadd.f32 %v4954_v59, %v10352_v42  ;;  %vm5434_vm3 = vweird.f32 %v7037_v11 }
 0x759   : > { %vm5435_vm5 = vmor %vm5433_vm4, %vm5434_vm3 }
 0x75a   : > { %v5430_v36 = vsub.f32 1.0, %v5429_v0  ;;  %v6724_v10 = vmul.f32 -1.442695, %v4988_v34 }
 0x75b   : > { %v7039_v1 = vpop.eup %7038 }
 0x75c   : > { %v7041_v63 = vpop.eup %7040  ;;  %v5444_v33 = vmul.f32 %v7039_v1, %v5371_v30  ;;  %v5431_v8 = vmul.f32 %v7037_v11, %v5430_v36  ;;  %vm5449_vm6 = vweird.f32 %v7039_v1 }
 0x75d   : > { %v5372_v49 = vadd.f32 1.0, %v7041_v63  ;;  %vm5450_vm9 = vmor %vm5448_vm8, %vm5449_vm6 }
 0x75e   : > { %v5445_v12 = vsub.f32 1.0, %v5444_v33  ;;  %v5432_v56 = vadd.f32 %v7037_v11, %v5431_v8 }
 0x75f   : > { %7042 = vrcp.f32 %v5372_v49  ;;  %v4957_v51 = vpop.xlane.xlu2 %4956  ;;  %v5469_v9 = vand.u32 2147483648, %v5372_v49  ;;  %v5467_v53 = vand.u32 2147483647, %v5372_v49  ;;  %vm5463_vm12 = vweird.f32 %v5372_v49 }
 0x760   : > { %v5446_v7 = vmul.f32 %v7039_v1, %v5445_v12  ;;  %7044 = vpow2.f32 %v6724_v10  ;;  %v5436_v41 = vsel %vm5435_vm5, %v7037_v11, %v5432_v56  ;;  %v4989_v57 = vadd.f32 %v4957_v51, %v10352_v42 }
 0x761   : > { %v5441_v20 = vsel %vm5438_vm7, %v5440_v26, %v5436_v41  ;;  %v5470_v5 = vor.u32 1.1754944e-38, %v5469_v9  ;;  %vm5468_vm14 = vcmp.eq.f32.partialorder %v5467_v53, 8.507059e+37 }
 0x762   : > { %v5447_v40 = vadd.f32 %v7039_v1, %v5446_v7  ;;  %6737 = vst.msk [vmem:[%s10381_s15 + $0x98] sm:$0xff] %vm5302_vm2, %v5441_v20  ;;  %v6725_v15 = vmul.f32 -1.442695, %v4989_v57 }
 0x764   : > { %v5451_v4 = vsel %vm5450_vm9, %v7039_v1, %v5447_v40  ;;  %7046 = vpow2.f32 %v6725_v15 }
 0x765   : > { %v7043_v35 = vpop.eup %7042  ;;  %v5456_v54 = vsel %vm5453_vm10, %v5455_v18, %v5451_v4 }
 0x766   : > { %v7045_v14 = vpop.eup %7044  ;;  %6738 = vst.msk [vmem:[%s10381_s15 + $0xa0] sm:$0xff] %vm5302_vm2, %v5456_v54  ;;  %v5459_v46 = vmul.f32 %v7043_v35, %v5372_v49  ;;  %vm5464_vm11 = vweird.f32 %v7043_v35 }
 0x767   : > { %v5373_v39 = vadd.f32 1.0, %v7045_v14  ;;  %v4960_v3 = vpop.xlane.xlu0 %4959  ;;  %vm5465_vm13 = vmor %vm5463_vm12, %vm5464_vm11 }
 0x768   : > { %v5460_v13 = vsub.f32 1.0, %v5459_v46  ;;  %v4990_v24 = vadd.f32 %v4960_v3, %v10352_v42 }
 0x769   : > { %7048 = vrcp.f32 %v5373_v39  ;;  %v5484_v29 = vand.u32 2147483648, %v5373_v39  ;;  %v5482_v61 = vand.u32 2147483647, %v5373_v39  ;;  %vm5478_vm0 = vweird.f32 %v5373_v39 }
 0x76a   : > { %v5461_v44 = vmul.f32 %v7043_v35, %v5460_v13  ;;  %v7047_v60 = vpop.eup %7046  ;;  %v6726_v43 = vmul.f32 -1.442695, %v4990_v24 }
 0x76b   : > { %v5374_v38 = vadd.f32 1.0, %v7047_v60  ;;  %v5485_v62 = vor.u32 1.1754944e-38, %v5484_v29  ;;  %vm5483_vm3 = vcmp.eq.f32.partialorder %v5482_v61, 8.507059e+37 }
 0x76c   : > { %v5462_v6 = vadd.f32 %v7043_v35, %v5461_v44  ;;  %7050 = vpow2.f32 %v6726_v43 }
 0x76d   : > { %7052 = vrcp.f32 %v5374_v38  ;;  %v5499_v36 = vand.u32 2147483648, %v5374_v38  ;;  %v5497_v63 = vand.u32 2147483647, %v5374_v38  ;;  %vm5493_vm5 = vweird.f32 %v5374_v38 }
 0x76e   : > { %v5466_v55 = vsel %vm5465_vm13, %v7043_v35, %v5462_v6 }
 0x76f   : > { %v4963_v52 = vpop.xlane.xlu1 %4962  ;;  %v7049_v17 = vpop.eup %7048  ;;  %v5471_v27 = vsel %vm5468_vm14, %v5470_v5, %v5466_v55  ;;  %v5500_v2 = vor.u32 1.1754944e-38, %v5499_v36  ;;  %vm5498_vm7 = vcmp.eq.f32.partialorder %v5497_v63, 8.507059e+37 }
 0x770   : > { %v4991_v31 = vadd.f32 %v4963_v52, %v10352_v42  ;;  %6739 = vst.msk [vmem:[%s10381_s15 + $0xa8] sm:$0xff] %vm5302_vm2, %v5471_v27  ;;  %v5474_v22 = vmul.f32 %v7049_v17, %v5373_v39  ;;  %vm5479_vm15 = vweird.f32 %v7049_v17 }
 0x771   : > { %vm5480_vm1 = vmor %vm5478_vm0, %vm5479_vm15 }
 0x772   : > { %v5475_v32 = vsub.f32 1.0, %v5474_v22  ;;  %v6727_v45 = vmul.f32 -1.442695, %v4991_v31  ;;  %v7051_v25 = vpop.eup %7050 }
 0x773   : > { %v7053_v47 = vpop.eup %7052  ;;  %v5375_v30 = vadd.f32 1.0, %v7051_v25 }
 0x774   : > { %v5476_v48 = vmul.f32 %v7049_v17, %v5475_v32  ;;  %7054 = vpow2.f32 %v6727_v45  ;;  %v5489_v19 = vmul.f32 %v7053_v47, %v5374_v38  ;;  %vm5494_vm4 = vweird.f32 %v7053_v47 }
 0x775   : > { %7056 = vrcp.f32 %v5375_v30  ;;  %vm5495_vm6 = vmor %vm5493_vm5, %vm5494_vm4  ;;  %v5512_v26 = vand.u32 2147483647, %v5375_v30  ;;  %v5514_v7 = vand.u32 2147483648, %v5375_v30  ;;  %vm5508_vm9 = vweird.f32 %v5375_v30 }
 0x776   : > { %v5477_v21 = vadd.f32 %v7049_v17, %v5476_v48  ;;  %v5490_v0 = vsub.f32 1.0, %v5489_v19 }
 0x777   : > { %v4966_v16 = vpop.xlane.xlu2 %4965  ;;  %vm5513_vm10 = vcmp.eq.f32.partialorder %v5512_v26, 8.507059e+37  ;;  %v5515_v54 = vor.u32 1.1754944e-38, %v5514_v7 }
 0x778   : > { %v5481_v28 = vsel %vm5480_vm1, %v7049_v17, %v5477_v21  ;;  %v4992_v1 = vadd.f32 %v4966_v16, %v10352_v42  ;;  %v5491_v59 = vmul.f32 %v7053_v47, %v5490_v0 }
 0x779   : > { %v5486_v50 = vsel %vm5483_vm3, %v5485_v62, %v5481_v28 }
 0x77a   : > { %v7055_v11 = vpop.eup %7054  ;;  %6740 = vst.msk [vmem:[%s10381_s15 + $0xb0] sm:$0xff] %vm5302_vm2, %v5486_v50  ;;  %v6728_v33 = vmul.f32 -1.442695, %v4992_v1  ;;  %v5492_v34 = vadd.f32 %v7053_v47, %v5491_v59 }
 0x77b   : > { %v5376_v58 = vadd.f32 1.0, %v7055_v11  ;;  %v7057_v8 = vpop.eup %7056 }
 0x77c   : > { %v5496_v49 = vsel %vm5495_vm6, %v7053_v47, %v5492_v34  ;;  %v5504_v12 = vmul.f32 %v7057_v8, %v5375_v30  ;;  %vm5509_vm8 = vweird.f32 %v7057_v8 }
 0x77d   : > { %7058 = vrcp.f32 %v5376_v58  ;;  %v5501_v10 = vsel %vm5498_vm7, %v5500_v2, %v5496_v49  ;;  %vm5510_vm11 = vmor %vm5508_vm9, %vm5509_vm8  ;;  %v5527_v14 = vand.u32 2147483647, %v5376_v58  ;;  %v5529_v46 = vand.u32 2147483648, %v5376_v58 }
 0x77e   : > { %7060 = vpow2.f32 %v6728_v33  ;;  %6741 = vst.msk [vmem:[%s10381_s15 + $0xb8] sm:$0xff] %vm5302_vm2, %v5501_v10  ;;  %v5505_v56 = vsub.f32 1.0, %v5504_v12  ;;  %vm5523_vm13 = vweird.f32 %v5376_v58 }
 0x77f   : > { %v4969_v37 = vpop.xlane.xlu0 %4968  ;;  %v5530_v44 = vor.u32 1.1754944e-38, %v5529_v46  ;;  %vm5528_vm15 = vcmp.eq.f32.partialorder %v5527_v14, 8.507059e+37 }
 0x780   : > { %v5506_v20 = vmul.f32 %v7057_v8, %v5505_v56  ;;  %v4993_v18 = vadd.f32 %v4969_v37, %v10352_v42 }
 0x782   : > { %v5507_v4 = vadd.f32 %v7057_v8, %v5506_v20  ;;  %v6729_v35 = vmul.f32 -1.442695, %v4993_v18 }
 0x783   : > { %v7059_v23 = vpop.eup %7058 }
 0x784   : > { %v7061_v41 = vpop.eup %7060  ;;  %v5519_v40 = vmul.f32 %v7059_v23, %v5376_v58  ;;  %v5511_v15 = vsel %vm5510_vm11, %v7057_v8, %v5507_v4  ;;  %vm5524_vm12 = vweird.f32 %v7059_v23 }
 0x785   : > { %v5377_v51 = vadd.f32 1.0, %v7061_v41  ;;  %v5516_v13 = vsel %vm5513_vm10, %v5515_v54, %v5511_v15  ;;  %vm5525_vm14 = vmor %vm5523_vm13, %vm5524_vm12 }
 0x786   : > { %v5520_v57 = vsub.f32 1.0, %v5519_v40  ;;  %6742 = vst.msk [vmem:[%s10381_s15 + $0xc0] sm:$0xff] %vm5302_vm2, %v5516_v13 }
 0x787   : > { %7062 = vrcp.f32 %v5377_v51  ;;  %v4972_v53 = vpop.xlane.xlu1 %4971  ;;  %v5544_v27 = vand.u32 2147483648, %v5377_v51  ;;  %v5542_v31 = vand.u32 2147483647, %v5377_v51  ;;  %vm5538_vm1 = vweird.f32 %v5377_v51 }
 0x788   : > { %v5521_v39 = vmul.f32 %v7059_v23, %v5520_v57  ;;  %7064 = vpow2.f32 %v6729_v35  ;;  %v4994_v6 = vadd.f32 %v4972_v53, %v10352_v42 }
 0x789   : > { %v5545_v29 = vor.u32 1.1754944e-38, %v5544_v27  ;;  %vm5543_vm4 = vcmp.eq.f32.partialorder %v5542_v31, 8.507059e+37 }
 0x78a   : > { %v5522_v9 = vadd.f32 %v7059_v23, %v5521_v39  ;;  %v6730_v43 = vmul.f32 -1.442695, %v4994_v6 }
 0x78c   : > { %v5526_v3 = vsel %vm5525_vm14, %v7059_v23, %v5522_v9  ;;  %7066 = vpow2.f32 %v6730_v43 }
 0x78d   : > { %v7063_v24 = vpop.eup %7062  ;;  %v5531_v5 = vsel %vm5528_vm15, %v5530_v44, %v5526_v3 }
 0x78e   : > { %v7065_v60 = vpop.eup %7064  ;;  %6743 = vst.msk [vmem:[%s10381_s15 + $0xc8] sm:$0xff] %vm5302_vm2, %v5531_v5  ;;  %v5534_v55 = vmul.f32 %v7063_v24, %v5377_v51  ;;  %vm5539_vm0 = vweird.f32 %v7063_v24 }
 0x78f   : > { %v5378_v52 = vadd.f32 1.0, %v7065_v60  ;;  %v4975_v22 = vpop.xlane.xlu2 %4974  ;;  %vm5540_vm3 = vmor %vm5538_vm1, %vm5539_vm0 }
 0x790   : > { %v5535_v17 = vsub.f32 1.0, %v5534_v55  ;;  %v4995_v45 = vadd.f32 %v4975_v22, %v10352_v42 }
 0x791   : > { %7068 = vrcp.f32 %v5378_v52  ;;  %v5559_v11 = vand.u32 2147483648, %v5378_v52  ;;  %v5557_v1 = vand.u32 2147483647, %v5378_v52  ;;  %vm5553_vm6 = vweird.f32 %v5378_v52 }
 0x792   : > { %v5536_v38 = vmul.f32 %v7063_v24, %v5535_v17  ;;  %v7067_v48 = vpop.eup %7066  ;;  %v6731_v25 = vmul.f32 -1.442695, %v4995_v45 }
 0x793   : > { %v5379_v30 = vadd.f32 1.0, %v7067_v48  ;;  %v5560_v63 = vor.u32 1.1754944e-38, %v5559_v11  ;;  %vm5558_vm8 = vcmp.eq.f32.partialorder %v5557_v1, 8.507059e+37 }
 0x794   : > { %v5537_v32 = vadd.f32 %v7063_v24, %v5536_v38  ;;  %7070 = vpow2.f32 %v6731_v25 }
 0x795   : > { %7072 = vrcp.f32 %v5379_v30  ;;  %v5574_v26 = vand.u32 2147483648, %v5379_v30  ;;  %v5572_v37 = vand.u32 2147483647, %v5379_v30  ;;  %vm5568_vm10 = vweird.f32 %v5379_v30 }
 0x796   : > { %v5541_v61 = vsel %vm5540_vm3, %v7063_v24, %v5537_v32 }
 0x797   : > { %v4978_v21 = vpop.xlane.xlu0 %4977  ;;  %v7069_v47 = vpop.eup %7068  ;;  %v5546_v62 = vsel %vm5543_vm4, %v5545_v29, %v5541_v61  ;;  %v5575_v18 = vor.u32 1.1754944e-38, %v5574_v26  ;;  %vm5573_vm12 = vcmp.eq.f32.partialorder %v5572_v37, 8.507059e+37 }
 0x798   : > { %v4996_v28 = vadd.f32 %v4978_v21, %v10352_v42  ;;  %6744 = vst.msk [vmem:[%s10381_s15 + $0xd0] sm:$0xff] %vm5302_vm2, %v5546_v62  ;;  %v5549_v19 = vmul.f32 %v7069_v47, %v5378_v52  ;;  %vm5554_vm5 = vweird.f32 %v7069_v47 }
 0x799   : > { %vm5555_vm7 = vmor %vm5553_vm6, %vm5554_vm5 }
 0x79a   : > { %v5550_v16 = vsub.f32 1.0, %v5549_v19  ;;  %v6732_v50 = vmul.f32 -1.442695, %v4996_v28  ;;  %v7071_v36 = vpop.eup %7070 }
 0x79b   : > { %v7073_v59 = vpop.eup %7072  ;;  %v5380_v33 = vadd.f32 1.0, %v7071_v36 }
 0x79c   : > { %v5551_v0 = vmul.f32 %v7069_v47, %v5550_v16  ;;  %7074 = vpow2.f32 %v6732_v50  ;;  %v5564_v8 = vmul.f32 %v7073_v59, %v5379_v30  ;;  %vm5569_vm9 = vweird.f32 %v7073_v59 }
 0x79d   : > { %7076 = vrcp.f32 %v5380_v33  ;;  %vm5570_vm11 = vmor %vm5568_vm10, %vm5569_vm9  ;;  %v5587_v54 = vand.u32 2147483647, %v5380_v33  ;;  %v5589_v14 = vand.u32 2147483648, %v5380_v33  ;;  %vm5583_vm14 = vweird.f32 %v5380_v33 }
 0x79e   : > { %v5552_v58 = vadd.f32 %v7069_v47, %v5551_v0  ;;  %v5565_v10 = vsub.f32 1.0, %v5564_v8 }
 0x79f   : > { %v4981_v2 = vpop.xlane.xlu1 %4980  ;;  %vm5588_vm0 = vcmp.eq.f32.partialorder %v5587_v54, 8.507059e+37  ;;  %v5590_v53 = vor.u32 1.1754944e-38, %v5589_v14 }
 0x7a0   : > { %v5556_v34 = vsel %vm5555_vm7, %v7069_v47, %v5552_v58  ;;  %v4997_v56 = vadd.f32 %v4981_v2, %v10352_v42  ;;  %v5566_v7 = vmul.f32 %v7073_v59, %v5565_v10 }
 0x7a1   : > { %v5561_v49 = vsel %vm5558_vm8, %v5560_v63, %v5556_v34 }
 0x7a2   : > { %v7075_v12 = vpop.eup %7074  ;;  %6745 = vst.msk [vmem:[%s10381_s15 + $0xd8] sm:$0xff] %vm5302_vm2, %v5561_v49  ;;  %v6733_v41 = vmul.f32 -1.442695, %v4997_v56  ;;  %v5567_v20 = vadd.f32 %v7073_v59, %v5566_v7 }
 0x7a3   : > { %v5381_v23 = vadd.f32 1.0, %v7075_v12  ;;  %v7077_v40 = vpop.eup %7076 }
 0x7a4   : > { %v5571_v51 = vsel %vm5570_vm11, %v7073_v59, %v5567_v20  ;;  %v5579_v4 = vmul.f32 %v7077_v40, %v5380_v33  ;;  %vm5584_vm13 = vweird.f32 %v7077_v40 }
 0x7a5   : > { %7078 = vrcp.f32 %v5381_v23  ;;  %v5576_v57 = vsel %vm5573_vm12, %v5575_v18, %v5571_v51  ;;  %vm5585_vm15 = vmor %vm5583_vm14, %vm5584_vm13  ;;  %v5604_v3 = vand.u32 2147483648, %v5381_v23  ;;  %v5602_v5 = vand.u32 2147483647, %v5381_v23 }
 0x7a6   : > { %7080 = vpow2.f32 %v6733_v41  ;;  %6746 = vst.msk [vmem:[%s10381_s15 + $0xe0] sm:$0xff] %vm5302_vm2, %v5576_v57  ;;  %v5580_v42 = vsub.f32 1.0, %v5579_v4  ;;  %vm5598_vm3 = vweird.f32 %v5381_v23 }
 0x7a7   : > { %v5605_v43 = vor.u32 1.1754944e-38, %v5604_v3  ;;  %vm5603_vm5 = vcmp.eq.f32.partialorder %v5602_v5, 8.507059e+37 }
 0x7a8   : > { %v5581_v15 = vmul.f32 %v7077_v40, %v5580_v42 }
 0x7aa   : > { %v5582_v9 = vadd.f32 %v7077_v40, %v5581_v15 }
 0x7ab   : > { %v7079_v35 = vpop.eup %7078 }
 0x7ac   : > { %v7081_v46 = vpop.eup %7080  ;;  %v5594_v39 = vmul.f32 %v7079_v35, %v5381_v23  ;;  %v5586_v6 = vsel %vm5585_vm15, %v7077_v40, %v5582_v9  ;;  %vm5599_vm1 = vweird.f32 %v7079_v35 }
 0x7ad   : > { %v5382_v13 = vadd.f32 1.0, %v7081_v46  ;;  %v5591_v60 = vsel %vm5588_vm0, %v5590_v53, %v5586_v6  ;;  %vm5600_vm4 = vmor %vm5598_vm3, %vm5599_vm1 }
 0x7ae   : > { %v5595_v44 = vsub.f32 1.0, %v5594_v39  ;;  %6747 = vst.msk [vmem:[%s10381_s15 + $0xe8] sm:$0xff] %vm5302_vm2, %v5591_v60 }
 0x7af   : > { %7082 = vrcp.f32 %v5382_v13  ;;  %v5619_v22 = vand.u32 2147483648, %v5382_v13  ;;  %v5617_v45 = vand.u32 2147483647, %v5382_v13  ;;  %vm5613_vm7 = vweird.f32 %v5382_v13 }
 0x7b0   : > { %v5596_v24 = vmul.f32 %v7079_v35, %v5595_v44 }
 0x7b1   : > { %v5620_v48 = vor.u32 1.1754944e-38, %v5619_v22  ;;  %vm5618_vm9 = vcmp.eq.f32.partialorder %v5617_v45, 8.507059e+37 }
 0x7b2   : > { %v5597_v55 = vadd.f32 %v7079_v35, %v5596_v24 }
 0x7b4   : > { %v5601_v52 = vsel %vm5600_vm4, %v7079_v35, %v5597_v55 }
 0x7b5   : > { %v7083_v17 = vpop.eup %7082  ;;  %v5606_v27 = vsel %vm5603_vm5, %v5605_v43, %v5601_v52 }
 0x7b6   : > { %6748 = vst.msk [vmem:[%s10381_s15 + $0xf0] sm:$0xff] %vm5302_vm2, %v5606_v27  ;;  %v5609_v38 = vmul.f32 %v7083_v17, %v5382_v13  ;;  %vm5614_vm6 = vweird.f32 %v7083_v17 }
 0x7b7   : > { %vm5615_vm8 = vmor %vm5613_vm7, %vm5614_vm6 }
 0x7b8   : > { %v5610_v31 = vsub.f32 1.0, %v5609_v38 }
 0x7ba   : > { %v5611_v32 = vmul.f32 %v7083_v17, %v5610_v31 }
 0x7bc   : > { %v5612_v29 = vadd.f32 %v7083_v17, %v5611_v32 }
 0x7be   : > { %v5616_v61 = vsel %vm5615_vm8, %v7083_v17, %v5612_v29 }
 0x7bf   : > { %v5621_v25 = vsel %vm5618_vm9, %v5620_v48, %v5616_v61 }
 0x7c0   : > { %6749 = vst.msk [vmem:[%s10381_s15 + $0xf8] sm:$0xff] %vm5302_vm2, %v5621_v25 }
 0x7c1 PF: > { %s18_s26 = sadd.s32 1, %s7090_s26  }
 0x7c2   : > { %p15_p4 = scmp.ge.s32.totalorder %s18_s26, 4  }
 0x7c4   :  { %17 = sbr.rel (!%p15_p4) target bundleno = 2 (0x2), region = 90 }

</bundles_post_ra>
